<compile_context>
chip_gen: v7x
topology: tpu7x:2x2x1
jax: 0.10.0
libtpu: 0.0.40
codegen_flags: <defaults>
</compile_context>

<pallas_src>
import functools
import math

import jax
import jax.numpy as jnp
from jax import lax
from jax.experimental import pallas as pl
from jax.experimental.pallas import tpu as pltpu

BN_EPS = 1e-5  # PyTorch nn.BatchNorm2d default eps


# ------------------------------- Pallas kernel ------------------------------

def _aspp_kernel(x_ref, xp_ref, w0_ref, w3_ref, wpool_ref, wproj_ref,
                 bscale_ref, bshift_ref, pscale_ref, pshift_ref, o_ref,
                 *, rates, max_d, H, W):
    Cin = x_ref.shape[-1]
    Cout = o_ref.shape[-1]
    HW = H * W
    R = len(rates)

    x = x_ref[0].reshape(HW, Cin)          # f32: used by 1x1 branch + pooling
    xp = xp_ref[0]                         # (Hp, Wp, Cin) bf16 padded copy

    def bn_relu_proj(z, b):
        # Folded BatchNorm (eval) + ReLU, then contract with this branch's
        # slice of the 1x1 projection weight (the concat is never built).
        z = jnp.maximum(z * bscale_ref[b] + bshift_ref[b], 0.0)
        return jnp.dot(z.astype(jnp.bfloat16), wproj_ref[b],
                       preferred_element_type=jnp.float32)

    # Branch 0: 1x1 conv.
    z0 = jnp.dot(x.astype(jnp.bfloat16), w0_ref[...],
                 preferred_element_type=jnp.float32)
    acc = bn_relu_proj(z0, 0)

    # Dilated 3x3 branches: 9 shifted-tap GEMMs each, accumulated in f32.
    for r, d in enumerate(rates):
        z = jnp.zeros((HW, Cout), jnp.float32)
        for t in range(9):
            ky, kx = t // 3, t % 3
            oh = max_d + (ky - 1) * d
            ow = max_d + (kx - 1) * d
            tap = xp[oh:oh + H, ow:ow + W, :].reshape(HW, Cin)
            z = z + jnp.dot(tap, w3_ref[r, t],
                            preferred_element_type=jnp.float32)
        acc = acc + bn_relu_proj(z, r + 1)

    # Pooling branch: global average pool -> 1x1 conv -> BN -> ReLU.
    # Bilinear upsampling of a 1x1 map (align_corners=False) is a broadcast,
    # so its projection contribution is a (1, Cout) row broadcast to all pixels.
    pooled = jnp.mean(x, axis=0, keepdims=True)                 # (1, Cin) f32
    zp = jnp.dot(pooled.astype(jnp.bfloat16), wpool_ref[...],
                 preferred_element_type=jnp.float32)
    acc = acc + bn_relu_proj(zp, R + 1)

    # Projection BN + ReLU.  Dropout(0.5) is identity in eval mode.
    out = jnp.maximum(acc * pscale_ref[...] + pshift_ref[...], 0.0)
    o_ref[0] = out.reshape(H, W, Cout)


# ------------------------------- wrapper -------------------------------------

def _full_spec(shape):
    nd = len(shape)
    return pl.BlockSpec(shape, lambda i, _nd=nd: (0,) * _nd)


def _fold_bn(bn, eps=BN_EPS):
    scale = bn["gamma"] / jnp.sqrt(bn["var"] + eps)
    shift = bn["beta"] - bn["mean"] * scale
    return scale, shift


def aspp_forward(x_nchw, params, rates):
    B, Cin, H, W = x_nchw.shape
    Cout = params["conv0_w"].shape[0]
    R = len(rates)
    max_d = max(rates)
    Hp, Wp = H + 2 * max_d, W + 2 * max_d
    HW = H * W

    # NHWC activations; padded copy for the dilated branches (bf16 on the wire).
    x = jnp.transpose(x_nchw, (0, 2, 3, 1)).astype(jnp.float32)
    xp = jnp.pad(x, ((0, 0), (max_d, max_d), (max_d, max_d), (0, 0))
                 ).astype(jnp.bfloat16)

    # Matmul-layout weights: (Cin on sublanes, Cout on lanes), bf16 for the MXU.
    w0 = jnp.transpose(params["conv0_w"][:, :, 0, 0], (1, 0)).astype(jnp.bfloat16)
    w3 = jnp.stack([
        jnp.transpose(params[f"conv_d{i}_w"], (2, 3, 1, 0)).reshape(9, Cin, Cout)
        for i in range(R)
    ]).astype(jnp.bfloat16)                                   # (R, 9, Cin, Cout)
    wpool = jnp.transpose(params["pool_w"][:, :, 0, 0], (1, 0)).astype(jnp.bfloat16)
    wproj = jnp.transpose(params["proj_w"][:, :, 0, 0], (1, 0)) \
        .reshape(R + 2, Cout, Cout).astype(jnp.bfloat16)      # (5, Cout, Cout)

    # Folded BatchNorm (eval) scale/shift.  Branch order: 1x1, dilated..., pool.
    branch_bns = ([params["bn0"]] + [params[f"bn_d{i}"] for i in range(R)]
                  + [params["bn_pool"]])
    bscale = jnp.stack([_fold_bn(b)[0] for b in branch_bns])[:, None, :]
    bshift = jnp.stack([_fold_bn(b)[1] for b in branch_bns])[:, None, :]
    pscale, pshift = _fold_bn(params["bn_proj"])
    pscale, pshift = pscale[None, :], pshift[None, :]

    weights = (w0, w3, wpool, wproj, bscale, bshift, pscale, pshift)

    kernel = functools.partial(_aspp_kernel, rates=tuple(rates),
                               max_d=max_d, H=H, W=W)

    flops = (2 * B * HW * Cin * Cout * (1 + 9 * R)          # branch convs
             + 2 * B * (HW * (R + 1) + 1) * Cout * Cout     # projection
             + 2 * B * Cin * Cout)                          # pooled 1x1 conv
    bytes_accessed = (x.size * 4 + xp.size * 2 + B * HW * Cout * 4
                      + (w0.size + w3.size + wpool.size + wproj.size) * 2
                      + (bscale.size + bshift.size + pscale.size + pshift.size) * 4)

    out_nhwc = pl.pallas_call(
        kernel,
        out_shape=jax.ShapeDtypeStruct((B, H, W, Cout), jnp.float32),
        grid=(B,),
        in_specs=[
            pl.BlockSpec((1, H, W, Cin), lambda i: (i, 0, 0, 0)),
            pl.BlockSpec((1, Hp, Wp, Cin), lambda i: (i, 0, 0, 0)),
        ] + [_full_spec(w.shape) for w in weights],
        out_specs=pl.BlockSpec((1, H, W, Cout), lambda i: (i, 0, 0, 0)),
        compiler_params=pltpu.CompilerParams(
            dimension_semantics=("parallel",)),
        cost_estimate=pl.CostEstimate(flops=int(flops), transcendentals=0,
                                      bytes_accessed=int(bytes_accessed)),
    )(x, xp, *weights)

    return jnp.transpose(out_nhwc, (0, 3, 1, 2))              # back to NCHW


# ------------------------------ parameter init -------------------------------

def init_params(key, in_channels, out_channels, rates):
    R = len(rates)
    keys = iter(jax.random.split(key, 4 * (R + 3)))

    def conv_w(k, cout, cin, ksz):
        fan_in = cin * ksz * ksz
        bound = 1.0 / math.sqrt(fan_in)
        return jax.random.uniform(k, (cout, cin, ksz, ksz), jnp.float32,
                                  minval=-bound, maxval=bound)

    def bn_params(k, c):
        k1, k2 = jax.random.split(k)
        return {
            "gamma": jnp.ones((c,), jnp.float32),
            "beta": jnp.zeros((c,), jnp.float32),
            "mean": 0.1 * jax.random.normal(k1, (c,), jnp.float32),
            "var": jax.random.uniform(k2, (c,), jnp.float32,
                                      minval=0.5, maxval=1.5),
        }

    p = {
        "conv0_w": conv_w(next(keys), out_channels, in_channels, 1),
        "bn0": bn_params(next(keys), out_channels),
        "pool_w": conv_w(next(keys), out_channels, in_channels, 1),
        "bn_pool": bn_params(next(keys), out_channels),
        "proj_w": conv_w(next(keys), out_channels, (R + 2) * out_channels, 1),
        "bn_proj": bn_params(next(keys), out_channels),
    }
    for i in range(R):
        p[f"conv_d{i}_w"] = conv_w(next(keys), out_channels, in_channels, 3)
        p[f"bn_d{i}"] = bn_params(next(keys), out_channels)
    return p


# ------------------------------ pure-JAX reference ---------------------------

def aspp_reference(x, params, rates):
    def bn(z, b):
        scale = b["gamma"] / jnp.sqrt(b["var"] + BN_EPS)
        shift = b["beta"] - b["mean"] * scale
        return z * scale[None, :, None, None] + shift[None, :, None, None]

    def conv(inp, w, d=1, pad=0):
        return lax.conv_general_dilated(
            inp, w, (1, 1), [(pad, pad), (pad, pad)], rhs_dilation=(d, d),
            dimension_numbers=("NCHW", "OIHW", "NCHW"))

    res = [jax.nn.relu(bn(conv(x, params["conv0_w"]), params["bn0"]))]
    for i, d in enumerate(rates):
        res.append(jax.nn.relu(bn(conv(x, params[f"conv_d{i}_w"], d=d, pad=d),
                                  params[f"bn_d{i}"])))
    pooled = jnp.mean(x, axis=(2, 3), keepdims=True)
    pool_feat = jax.nn.relu(bn(conv(pooled, params["pool_w"]), params["bn_pool"]))
    res.append(jnp.broadcast_to(pool_feat, res[0].shape))
    cat = jnp.concatenate(res, axis=1)
    return jax.nn.relu(bn(conv(cat, params["proj_w"]), params["bn_proj"]))


# ---------------------------------- main --------------------------------------

if __name__ == "__main__":
    B, Cin, H, W = 2, 32, 16, 16
    Cout = 64
    rates = (1, 2, 3)      # 3 atrous rates -> 5 branches, matches 5*out_channels

    key = jax.random.PRNGKey(0)
    k_param, k_x = jax.random.split(key)
    params = init_params(k_param, Cin, Cout, rates)
    x = jax.random.normal(k_x, (B, Cin, H, W), jnp.float32)

    out = aspp_forward(x, params, rates)
    out = jax.block_until_ready(out)

    assert out.shape == (B, Cout, H, W), out.shape
    assert bool(jnp.all(jnp.isfinite(out)))

    ref = aspp_reference(x, params, rates)
    max_err = float(jnp.max(jnp.abs(out - ref)))
    assert max_err < 1e-1, f"max abs err vs reference: {max_err}"

    print("KERNEL_OK")
</pallas_src>

<mosaic_0001>
module attributes {stable_mosaic.version = 11 : i64} {
  func.func @_aspp_kernel(%arg0: i32, %arg1: memref<1x16x16x32xf32, #tpu.memory_space<vmem>>, %arg2: memref<1x22x22x32xbf16, #tpu.memory_space<vmem>>, %arg3: memref<32x64xbf16, #tpu.memory_space<vmem>>, %arg4: memref<3x9x32x64xbf16, #tpu.memory_space<vmem>>, %arg5: memref<32x64xbf16, #tpu.memory_space<vmem>>, %arg6: memref<5x64x64xbf16, #tpu.memory_space<vmem>>, %arg7: memref<5x1x64xf32, #tpu.memory_space<vmem>>, %arg8: memref<5x1x64xf32, #tpu.memory_space<vmem>>, %arg9: memref<1x64xf32, #tpu.memory_space<vmem>>, %arg10: memref<1x64xf32, #tpu.memory_space<vmem>>, %arg11: memref<1x16x16x64xf32, #tpu.memory_space<vmem>>) attributes {dimension_semantics = [#tpu.dimension_semantics<parallel>], iteration_bounds = array<i64: 2>, scalar_prefetch = 0 : i64, scratch_operands = 0 : i64, tpu.core_type = #tpu.core_type<tc>, window_params = [{transform_indices = @transform_0, window_bounds = array<i64: 1, 16, 16, 32>}, {transform_indices = @transform_1, window_bounds = array<i64: 1, 22, 22, 32>}, {pipeline_mode = #tpu.pipeline_mode<synchronous>, transform_indices = @transform_2, window_bounds = array<i64: 32, 64>}, {pipeline_mode = #tpu.pipeline_mode<synchronous>, transform_indices = @transform_3, window_bounds = array<i64: 3, 9, 32, 64>}, {pipeline_mode = #tpu.pipeline_mode<synchronous>, transform_indices = @transform_4, window_bounds = array<i64: 32, 64>}, {pipeline_mode = #tpu.pipeline_mode<synchronous>, transform_indices = @transform_5, window_bounds = array<i64: 5, 64, 64>}, {pipeline_mode = #tpu.pipeline_mode<synchronous>, transform_indices = @transform_6, window_bounds = array<i64: 5, 1, 64>}, {pipeline_mode = #tpu.pipeline_mode<synchronous>, transform_indices = @transform_7, window_bounds = array<i64: 5, 1, 64>}, {pipeline_mode = #tpu.pipeline_mode<synchronous>, transform_indices = @transform_8, window_bounds = array<i64: 1, 64>}, {pipeline_mode = #tpu.pipeline_mode<synchronous>, transform_indices = @transform_9, window_bounds = array<i64: 1, 64>}, {transform_indices = @transform_10, window_bounds = array<i64: 1, 16, 16, 64>}]} {
    %c0 = arith.constant 0 : index
    %c0_0 = arith.constant 0 : index
    %c0_1 = arith.constant 0 : index
    %c0_2 = arith.constant 0 : index
    %0 = vector.load %arg1[%c0, %c0_0, %c0_1, %c0_2] : memref<1x16x16x32xf32, #tpu.memory_space<vmem>>, vector<1x16x16x32xf32>
    %1 = vector.shape_cast %0 : vector<1x16x16x32xf32> to vector<16x16x32xf32>
    %2 = vector.shape_cast %1 : vector<16x16x32xf32> to vector<256x32xf32>
    %c0_3 = arith.constant 0 : index
    %c0_4 = arith.constant 0 : index
    %c0_5 = arith.constant 0 : index
    %c0_6 = arith.constant 0 : index
    %3 = vector.load %arg2[%c0_3, %c0_4, %c0_5, %c0_6] : memref<1x22x22x32xbf16, #tpu.memory_space<vmem>>, vector<1x22x22x32xbf16>
    %4 = vector.shape_cast %3 : vector<1x22x22x32xbf16> to vector<22x22x32xbf16>
    %5 = arith.truncf %2 : vector<256x32xf32> to vector<256x32xbf16>
    %c0_7 = arith.constant 0 : index
    %c0_8 = arith.constant 0 : index
    %6 = vector.load %arg3[%c0_7, %c0_8] : memref<32x64xbf16, #tpu.memory_space<vmem>>, vector<32x64xbf16>
    %cst = arith.constant dense<0.000000e+00> : vector<256x64xf32>
    %7 = tpu.matmul %5, %6, %cst {dimension_numbers = #tpu.dot_dimension_numbers<[1], [0], [0], [1], [0, 0, 1, 1], [], []>} : vector<256x32xbf16>, vector<32x64xbf16>, vector<256x64xf32> -> vector<256x64xf32>
    %c0_9 = arith.constant 0 : index
    %c0_10 = arith.constant 0 : index
    %c0_11 = arith.constant 0 : index
    %8 = vector.load %arg7[%c0_9, %c0_10, %c0_11] : memref<5x1x64xf32, #tpu.memory_space<vmem>>, vector<1x1x64xf32>
    %9 = vector.shape_cast %8 : vector<1x1x64xf32> to vector<1x64xf32>
    %10 = vector.broadcast %9 : vector<1x64xf32> to vector<256x64xf32>
    %11 = arith.mulf %7, %10 : vector<256x64xf32>
    %c0_12 = arith.constant 0 : index
    %c0_13 = arith.constant 0 : index
    %c0_14 = arith.constant 0 : index
    %12 = vector.load %arg8[%c0_12, %c0_13, %c0_14] : memref<5x1x64xf32, #tpu.memory_space<vmem>>, vector<1x1x64xf32>
    %13 = vector.shape_cast %12 : vector<1x1x64xf32> to vector<1x64xf32>
    %14 = vector.broadcast %13 : vector<1x64xf32> to vector<256x64xf32>
    %15 = arith.addf %11, %14 : vector<256x64xf32>
    %cst_15 = arith.constant 0.000000e+00 : f32
    %16 = vector.broadcast %cst_15 : f32 to vector<256x64xf32>
    %17 = arith.maximumf %15, %16 : vector<256x64xf32>
    %18 = arith.truncf %17 : vector<256x64xf32> to vector<256x64xbf16>
    %c0_16 = arith.constant 0 : index
    %c0_17 = arith.constant 0 : index
    %c0_18 = arith.constant 0 : index
    %19 = vector.load %arg6[%c0_16, %c0_17, %c0_18] : memref<5x64x64xbf16, #tpu.memory_space<vmem>>, vector<1x64x64xbf16>
    %20 = vector.shape_cast %19 : vector<1x64x64xbf16> to vector<64x64xbf16>
    %cst_19 = arith.constant dense<0.000000e+00> : vector<256x64xf32>
    %21 = tpu.matmul %18, %20, %cst_19 {dimension_numbers = #tpu.dot_dimension_numbers<[1], [0], [0], [1], [0, 0, 1, 1], [], []>} : vector<256x64xbf16>, vector<64x64xbf16>, vector<256x64xf32> -> vector<256x64xf32>
    %cst_20 = arith.constant 0.000000e+00 : f32
    %22 = vector.broadcast %cst_20 : f32 to vector<256x64xf32>
    %23 = vector.extract_strided_slice %4 {offsets = [2, 2, 0], sizes = [16, 16, 32], strides = [1, 1, 1]} : vector<22x22x32xbf16> to vector<16x16x32xbf16>
    %24 = vector.shape_cast %23 : vector<16x16x32xbf16> to vector<256x32xbf16>
    %c0_21 = arith.constant 0 : index
    %c0_22 = arith.constant 0 : index
    %c0_23 = arith.constant 0 : index
    %c0_24 = arith.constant 0 : index
    %25 = vector.load %arg4[%c0_21, %c0_22, %c0_23, %c0_24] : memref<3x9x32x64xbf16, #tpu.memory_space<vmem>>, vector<1x1x32x64xbf16>
    %26 = vector.shape_cast %25 : vector<1x1x32x64xbf16> to vector<32x64xbf16>
    %cst_25 = arith.constant dense<0.000000e+00> : vector<256x64xf32>
    %27 = tpu.matmul %24, %26, %cst_25 {dimension_numbers = #tpu.dot_dimension_numbers<[1], [0], [0], [1], [0, 0, 1, 1], [], []>} : vector<256x32xbf16>, vector<32x64xbf16>, vector<256x64xf32> -> vector<256x64xf32>
    %28 = arith.addf %22, %27 : vector<256x64xf32>
    %29 = vector.extract_strided_slice %4 {offsets = [2, 3, 0], sizes = [16, 16, 32], strides = [1, 1, 1]} : vector<22x22x32xbf16> to vector<16x16x32xbf16>
    %30 = vector.shape_cast %29 : vector<16x16x32xbf16> to vector<256x32xbf16>
    %c0_26 = arith.constant 0 : index
    %c1 = arith.constant 1 : index
    %c0_27 = arith.constant 0 : index
    %c0_28 = arith.constant 0 : index
    %31 = vector.load %arg4[%c0_26, %c1, %c0_27, %c0_28] : memref<3x9x32x64xbf16, #tpu.memory_space<vmem>>, vector<1x1x32x64xbf16>
    %32 = vector.shape_cast %31 : vector<1x1x32x64xbf16> to vector<32x64xbf16>
    %cst_29 = arith.constant dense<0.000000e+00> : vector<256x64xf32>
    %33 = tpu.matmul %30, %32, %cst_29 {dimension_numbers = #tpu.dot_dimension_numbers<[1], [0], [0], [1], [0, 0, 1, 1], [], []>} : vector<256x32xbf16>, vector<32x64xbf16>, vector<256x64xf32> -> vector<256x64xf32>
    %34 = arith.addf %28, %33 : vector<256x64xf32>
    %35 = vector.extract_strided_slice %4 {offsets = [2, 4, 0], sizes = [16, 16, 32], strides = [1, 1, 1]} : vector<22x22x32xbf16> to vector<16x16x32xbf16>
    %36 = vector.shape_cast %35 : vector<16x16x32xbf16> to vector<256x32xbf16>
    %c0_30 = arith.constant 0 : index
    %c2 = arith.constant 2 : index
    %c0_31 = arith.constant 0 : index
    %c0_32 = arith.constant 0 : index
    %37 = vector.load %arg4[%c0_30, %c2, %c0_31, %c0_32] : memref<3x9x32x64xbf16, #tpu.memory_space<vmem>>, vector<1x1x32x64xbf16>
    %38 = vector.shape_cast %37 : vector<1x1x32x64xbf16> to vector<32x64xbf16>
    %cst_33 = arith.constant dense<0.000000e+00> : vector<256x64xf32>
    %39 = tpu.matmul %36, %38, %cst_33 {dimension_numbers = #tpu.dot_dimension_numbers<[1], [0], [0], [1], [0, 0, 1, 1], [], []>} : vector<256x32xbf16>, vector<32x64xbf16>, vector<256x64xf32> -> vector<256x64xf32>
    %40 = arith.addf %34, %39 : vector<256x64xf32>
    %41 = vector.extract_strided_slice %4 {offsets = [3, 2, 0], sizes = [16, 16, 32], strides = [1, 1, 1]} : vector<22x22x32xbf16> to vector<16x16x32xbf16>
    %42 = vector.shape_cast %41 : vector<16x16x32xbf16> to vector<256x32xbf16>
    %c0_34 = arith.constant 0 : index
    %c3 = arith.constant 3 : index
    %c0_35 = arith.constant 0 : index
    %c0_36 = arith.constant 0 : index
    %43 = vector.load %arg4[%c0_34, %c3, %c0_35, %c0_36] : memref<3x9x32x64xbf16, #tpu.memory_space<vmem>>, vector<1x1x32x64xbf16>
    %44 = vector.shape_cast %43 : vector<1x1x32x64xbf16> to vector<32x64xbf16>
    %cst_37 = arith.constant dense<0.000000e+00> : vector<256x64xf32>
    %45 = tpu.matmul %42, %44, %cst_37 {dimension_numbers = #tpu.dot_dimension_numbers<[1], [0], [0], [1], [0, 0, 1, 1], [], []>} : vector<256x32xbf16>, vector<32x64xbf16>, vector<256x64xf32> -> vector<256x64xf32>
    %46 = arith.addf %40, %45 : vector<256x64xf32>
    %47 = vector.extract_strided_slice %4 {offsets = [3, 3, 0], sizes = [16, 16, 32], strides = [1, 1, 1]} : vector<22x22x32xbf16> to vector<16x16x32xbf16>
    %48 = vector.shape_cast %47 : vector<16x16x32xbf16> to vector<256x32xbf16>
    %c0_38 = arith.constant 0 : index
    %c4 = arith.constant 4 : index
    %c0_39 = arith.constant 0 : index
    %c0_40 = arith.constant 0 : index
    %49 = vector.load %arg4[%c0_38, %c4, %c0_39, %c0_40] : memref<3x9x32x64xbf16, #tpu.memory_space<vmem>>, vector<1x1x32x64xbf16>
    %50 = vector.shape_cast %49 : vector<1x1x32x64xbf16> to vector<32x64xbf16>
    %cst_41 = arith.constant dense<0.000000e+00> : vector<256x64xf32>
    %51 = tpu.matmul %48, %50, %cst_41 {dimension_numbers = #tpu.dot_dimension_numbers<[1], [0], [0], [1], [0, 0, 1, 1], [], []>} : vector<256x32xbf16>, vector<32x64xbf16>, vector<256x64xf32> -> vector<256x64xf32>
    %52 = arith.addf %46, %51 : vector<256x64xf32>
    %53 = vector.extract_strided_slice %4 {offsets = [3, 4, 0], sizes = [16, 16, 32], strides = [1, 1, 1]} : vector<22x22x32xbf16> to vector<16x16x32xbf16>
    %54 = vector.shape_cast %53 : vector<16x16x32xbf16> to vector<256x32xbf16>
    %c0_42 = arith.constant 0 : index
    %c5 = arith.constant 5 : index
    %c0_43 = arith.constant 0 : index
    %c0_44 = arith.constant 0 : index
    %55 = vector.load %arg4[%c0_42, %c5, %c0_43, %c0_44] : memref<3x9x32x64xbf16, #tpu.memory_space<vmem>>, vector<1x1x32x64xbf16>
    %56 = vector.shape_cast %55 : vector<1x1x32x64xbf16> to vector<32x64xbf16>
    %cst_45 = arith.constant dense<0.000000e+00> : vector<256x64xf32>
    %57 = tpu.matmul %54, %56, %cst_45 {dimension_numbers = #tpu.dot_dimension_numbers<[1], [0], [0], [1], [0, 0, 1, 1], [], []>} : vector<256x32xbf16>, vector<32x64xbf16>, vector<256x64xf32> -> vector<256x64xf32>
    %58 = arith.addf %52, %57 : vector<256x64xf32>
    %59 = vector.extract_strided_slice %4 {offsets = [4, 2, 0], sizes = [16, 16, 32], strides = [1, 1, 1]} : vector<22x22x32xbf16> to vector<16x16x32xbf16>
    %60 = vector.shape_cast %59 : vector<16x16x32xbf16> to vector<256x32xbf16>
    %c0_46 = arith.constant 0 : index
    %c6 = arith.constant 6 : index
    %c0_47 = arith.constant 0 : index
    %c0_48 = arith.constant 0 : index
    %61 = vector.load %arg4[%c0_46, %c6, %c0_47, %c0_48] : memref<3x9x32x64xbf16, #tpu.memory_space<vmem>>, vector<1x1x32x64xbf16>
    %62 = vector.shape_cast %61 : vector<1x1x32x64xbf16> to vector<32x64xbf16>
    %cst_49 = arith.constant dense<0.000000e+00> : vector<256x64xf32>
    %63 = tpu.matmul %60, %62, %cst_49 {dimension_numbers = #tpu.dot_dimension_numbers<[1], [0], [0], [1], [0, 0, 1, 1], [], []>} : vector<256x32xbf16>, vector<32x64xbf16>, vector<256x64xf32> -> vector<256x64xf32>
    %64 = arith.addf %58, %63 : vector<256x64xf32>
    %65 = vector.extract_strided_slice %4 {offsets = [4, 3, 0], sizes = [16, 16, 32], strides = [1, 1, 1]} : vector<22x22x32xbf16> to vector<16x16x32xbf16>
    %66 = vector.shape_cast %65 : vector<16x16x32xbf16> to vector<256x32xbf16>
    %c0_50 = arith.constant 0 : index
    %c7 = arith.constant 7 : index
    %c0_51 = arith.constant 0 : index
    %c0_52 = arith.constant 0 : index
    %67 = vector.load %arg4[%c0_50, %c7, %c0_51, %c0_52] : memref<3x9x32x64xbf16, #tpu.memory_space<vmem>>, vector<1x1x32x64xbf16>
    %68 = vector.shape_cast %67 : vector<1x1x32x64xbf16> to vector<32x64xbf16>
    %cst_53 = arith.constant dense<0.000000e+00> : vector<256x64xf32>
    %69 = tpu.matmul %66, %68, %cst_53 {dimension_numbers = #tpu.dot_dimension_numbers<[1], [0], [0], [1], [0, 0, 1, 1], [], []>} : vector<256x32xbf16>, vector<32x64xbf16>, vector<256x64xf32> -> vector<256x64xf32>
    %70 = arith.addf %64, %69 : vector<256x64xf32>
    %71 = vector.extract_strided_slice %4 {offsets = [4, 4, 0], sizes = [16, 16, 32], strides = [1, 1, 1]} : vector<22x22x32xbf16> to vector<16x16x32xbf16>
    %72 = vector.shape_cast %71 : vector<16x16x32xbf16> to vector<256x32xbf16>
    %c0_54 = arith.constant 0 : index
    %c8 = arith.constant 8 : index
    %c0_55 = arith.constant 0 : index
    %c0_56 = arith.constant 0 : index
    %73 = vector.load %arg4[%c0_54, %c8, %c0_55, %c0_56] : memref<3x9x32x64xbf16, #tpu.memory_space<vmem>>, vector<1x1x32x64xbf16>
    %74 = vector.shape_cast %73 : vector<1x1x32x64xbf16> to vector<32x64xbf16>
    %cst_57 = arith.constant dense<0.000000e+00> : vector<256x64xf32>
    %75 = tpu.matmul %72, %74, %cst_57 {dimension_numbers = #tpu.dot_dimension_numbers<[1], [0], [0], [1], [0, 0, 1, 1], [], []>} : vector<256x32xbf16>, vector<32x64xbf16>, vector<256x64xf32> -> vector<256x64xf32>
    %76 = arith.addf %70, %75 : vector<256x64xf32>
    %c1_58 = arith.constant 1 : index
    %c0_59 = arith.constant 0 : index
    %c0_60 = arith.constant 0 : index
    %77 = vector.load %arg7[%c1_58, %c0_59, %c0_60] : memref<5x1x64xf32, #tpu.memory_space<vmem>>, vector<1x1x64xf32>
    %78 = vector.shape_cast %77 : vector<1x1x64xf32> to vector<1x64xf32>
    %79 = vector.broadcast %78 : vector<1x64xf32> to vector<256x64xf32>
    %80 = arith.mulf %76, %79 : vector<256x64xf32>
    %c1_61 = arith.constant 1 : index
    %c0_62 = arith.constant 0 : index
    %c0_63 = arith.constant 0 : index
    %81 = vector.load %arg8[%c1_61, %c0_62, %c0_63] : memref<5x1x64xf32, #tpu.memory_space<vmem>>, vector<1x1x64xf32>
    %82 = vector.shape_cast %81 : vector<1x1x64xf32> to vector<1x64xf32>
    %83 = vector.broadcast %82 : vector<1x64xf32> to vector<256x64xf32>
    %84 = arith.addf %80, %83 : vector<256x64xf32>
    %cst_64 = arith.constant 0.000000e+00 : f32
    %85 = vector.broadcast %cst_64 : f32 to vector<256x64xf32>
    %86 = arith.maximumf %84, %85 : vector<256x64xf32>
    %87 = arith.truncf %86 : vector<256x64xf32> to vector<256x64xbf16>
    %c1_65 = arith.constant 1 : index
    %c0_66 = arith.constant 0 : index
    %c0_67 = arith.constant 0 : index
    %88 = vector.load %arg6[%c1_65, %c0_66, %c0_67] : memref<5x64x64xbf16, #tpu.memory_space<vmem>>, vector<1x64x64xbf16>
    %89 = vector.shape_cast %88 : vector<1x64x64xbf16> to vector<64x64xbf16>
    %cst_68 = arith.constant dense<0.000000e+00> : vector<256x64xf32>
    %90 = tpu.matmul %87, %89, %cst_68 {dimension_numbers = #tpu.dot_dimension_numbers<[1], [0], [0], [1], [0, 0, 1, 1], [], []>} : vector<256x64xbf16>, vector<64x64xbf16>, vector<256x64xf32> -> vector<256x64xf32>
    %91 = arith.addf %21, %90 : vector<256x64xf32>
    %cst_69 = arith.constant 0.000000e+00 : f32
    %92 = vector.broadcast %cst_69 : f32 to vector<256x64xf32>
    %93 = vector.extract_strided_slice %4 {offsets = [1, 1, 0], sizes = [16, 16, 32], strides = [1, 1, 1]} : vector<22x22x32xbf16> to vector<16x16x32xbf16>
    %94 = vector.shape_cast %93 : vector<16x16x32xbf16> to vector<256x32xbf16>
    %c1_70 = arith.constant 1 : index
    %c0_71 = arith.constant 0 : index
    %c0_72 = arith.constant 0 : index
    %c0_73 = arith.constant 0 : index
    %95 = vector.load %arg4[%c1_70, %c0_71, %c0_72, %c0_73] : memref<3x9x32x64xbf16, #tpu.memory_space<vmem>>, vector<1x1x32x64xbf16>
    %96 = vector.shape_cast %95 : vector<1x1x32x64xbf16> to vector<32x64xbf16>
    %cst_74 = arith.constant dense<0.000000e+00> : vector<256x64xf32>
    %97 = tpu.matmul %94, %96, %cst_74 {dimension_numbers = #tpu.dot_dimension_numbers<[1], [0], [0], [1], [0, 0, 1, 1], [], []>} : vector<256x32xbf16>, vector<32x64xbf16>, vector<256x64xf32> -> vector<256x64xf32>
    %98 = arith.addf %92, %97 : vector<256x64xf32>
    %99 = vector.extract_strided_slice %4 {offsets = [1, 3, 0], sizes = [16, 16, 32], strides = [1, 1, 1]} : vector<22x22x32xbf16> to vector<16x16x32xbf16>
    %100 = vector.shape_cast %99 : vector<16x16x32xbf16> to vector<256x32xbf16>
    %c1_75 = arith.constant 1 : index
    %c1_76 = arith.constant 1 : index
    %c0_77 = arith.constant 0 : index
    %c0_78 = arith.constant 0 : index
    %101 = vector.load %arg4[%c1_75, %c1_76, %c0_77, %c0_78] : memref<3x9x32x64xbf16, #tpu.memory_space<vmem>>, vector<1x1x32x64xbf16>
    %102 = vector.shape_cast %101 : vector<1x1x32x64xbf16> to vector<32x64xbf16>
    %cst_79 = arith.constant dense<0.000000e+00> : vector<256x64xf32>
    %103 = tpu.matmul %100, %102, %cst_79 {dimension_numbers = #tpu.dot_dimension_numbers<[1], [0], [0], [1], [0, 0, 1, 1], [], []>} : vector<256x32xbf16>, vector<32x64xbf16>, vector<256x64xf32> -> vector<256x64xf32>
    %104 = arith.addf %98, %103 : vector<256x64xf32>
    %105 = vector.extract_strided_slice %4 {offsets = [1, 5, 0], sizes = [16, 16, 32], strides = [1, 1, 1]} : vector<22x22x32xbf16> to vector<16x16x32xbf16>
    %106 = vector.shape_cast %105 : vector<16x16x32xbf16> to vector<256x32xbf16>
    %c1_80 = arith.constant 1 : index
    %c2_81 = arith.constant 2 : index
    %c0_82 = arith.constant 0 : index
    %c0_83 = arith.constant 0 : index
    %107 = vector.load %arg4[%c1_80, %c2_81, %c0_82, %c0_83] : memref<3x9x32x64xbf16, #tpu.memory_space<vmem>>, vector<1x1x32x64xbf16>
    %108 = vector.shape_cast %107 : vector<1x1x32x64xbf16> to vector<32x64xbf16>
    %cst_84 = arith.constant dense<0.000000e+00> : vector<256x64xf32>
    %109 = tpu.matmul %106, %108, %cst_84 {dimension_numbers = #tpu.dot_dimension_numbers<[1], [0], [0], [1], [0, 0, 1, 1], [], []>} : vector<256x32xbf16>, vector<32x64xbf16>, vector<256x64xf32> -> vector<256x64xf32>
    %110 = arith.addf %104, %109 : vector<256x64xf32>
    %111 = vector.extract_strided_slice %4 {offsets = [3, 1, 0], sizes = [16, 16, 32], strides = [1, 1, 1]} : vector<22x22x32xbf16> to vector<16x16x32xbf16>
    %112 = vector.shape_cast %111 : vector<16x16x32xbf16> to vector<256x32xbf16>
    %c1_85 = arith.constant 1 : index
    %c3_86 = arith.constant 3 : index
    %c0_87 = arith.constant 0 : index
    %c0_88 = arith.constant 0 : index
    %113 = vector.load %arg4[%c1_85, %c3_86, %c0_87, %c0_88] : memref<3x9x32x64xbf16, #tpu.memory_space<vmem>>, vector<1x1x32x64xbf16>
    %114 = vector.shape_cast %113 : vector<1x1x32x64xbf16> to vector<32x64xbf16>
    %cst_89 = arith.constant dense<0.000000e+00> : vector<256x64xf32>
    %115 = tpu.matmul %112, %114, %cst_89 {dimension_numbers = #tpu.dot_dimension_numbers<[1], [0], [0], [1], [0, 0, 1, 1], [], []>} : vector<256x32xbf16>, vector<32x64xbf16>, vector<256x64xf32> -> vector<256x64xf32>
    %116 = arith.addf %110, %115 : vector<256x64xf32>
    %117 = vector.extract_strided_slice %4 {offsets = [3, 3, 0], sizes = [16, 16, 32], strides = [1, 1, 1]} : vector<22x22x32xbf16> to vector<16x16x32xbf16>
    %118 = vector.shape_cast %117 : vector<16x16x32xbf16> to vector<256x32xbf16>
    %c1_90 = arith.constant 1 : index
    %c4_91 = arith.constant 4 : index
    %c0_92 = arith.constant 0 : index
    %c0_93 = arith.constant 0 : index
    %119 = vector.load %arg4[%c1_90, %c4_91, %c0_92, %c0_93] : memref<3x9x32x64xbf16, #tpu.memory_space<vmem>>, vector<1x1x32x64xbf16>
    %120 = vector.shape_cast %119 : vector<1x1x32x64xbf16> to vector<32x64xbf16>
    %cst_94 = arith.constant dense<0.000000e+00> : vector<256x64xf32>
    %121 = tpu.matmul %118, %120, %cst_94 {dimension_numbers = #tpu.dot_dimension_numbers<[1], [0], [0], [1], [0, 0, 1, 1], [], []>} : vector<256x32xbf16>, vector<32x64xbf16>, vector<256x64xf32> -> vector<256x64xf32>
    %122 = arith.addf %116, %121 : vector<256x64xf32>
    %123 = vector.extract_strided_slice %4 {offsets = [3, 5, 0], sizes = [16, 16, 32], strides = [1, 1, 1]} : vector<22x22x32xbf16> to vector<16x16x32xbf16>
    %124 = vector.shape_cast %123 : vector<16x16x32xbf16> to vector<256x32xbf16>
    %c1_95 = arith.constant 1 : index
    %c5_96 = arith.constant 5 : index
    %c0_97 = arith.constant 0 : index
    %c0_98 = arith.constant 0 : index
    %125 = vector.load %arg4[%c1_95, %c5_96, %c0_97, %c0_98] : memref<3x9x32x64xbf16, #tpu.memory_space<vmem>>, vector<1x1x32x64xbf16>
    %126 = vector.shape_cast %125 : vector<1x1x32x64xbf16> to vector<32x64xbf16>
    %cst_99 = arith.constant dense<0.000000e+00> : vector<256x64xf32>
    %127 = tpu.matmul %124, %126, %cst_99 {dimension_numbers = #tpu.dot_dimension_numbers<[1], [0], [0], [1], [0, 0, 1, 1], [], []>} : vector<256x32xbf16>, vector<32x64xbf16>, vector<256x64xf32> -> vector<256x64xf32>
    %128 = arith.addf %122, %127 : vector<256x64xf32>
    %129 = vector.extract_strided_slice %4 {offsets = [5, 1, 0], sizes = [16, 16, 32], strides = [1, 1, 1]} : vector<22x22x32xbf16> to vector<16x16x32xbf16>
    %130 = vector.shape_cast %129 : vector<16x16x32xbf16> to vector<256x32xbf16>
    %c1_100 = arith.constant 1 : index
    %c6_101 = arith.constant 6 : index
    %c0_102 = arith.constant 0 : index
    %c0_103 = arith.constant 0 : index
    %131 = vector.load %arg4[%c1_100, %c6_101, %c0_102, %c0_103] : memref<3x9x32x64xbf16, #tpu.memory_space<vmem>>, vector<1x1x32x64xbf16>
    %132 = vector.shape_cast %131 : vector<1x1x32x64xbf16> to vector<32x64xbf16>
    %cst_104 = arith.constant dense<0.000000e+00> : vector<256x64xf32>
    %133 = tpu.matmul %130, %132, %cst_104 {dimension_numbers = #tpu.dot_dimension_numbers<[1], [0], [0], [1], [0, 0, 1, 1], [], []>} : vector<256x32xbf16>, vector<32x64xbf16>, vector<256x64xf32> -> vector<256x64xf32>
    %134 = arith.addf %128, %133 : vector<256x64xf32>
    %135 = vector.extract_strided_slice %4 {offsets = [5, 3, 0], sizes = [16, 16, 32], strides = [1, 1, 1]} : vector<22x22x32xbf16> to vector<16x16x32xbf16>
    %136 = vector.shape_cast %135 : vector<16x16x32xbf16> to vector<256x32xbf16>
    %c1_105 = arith.constant 1 : index
    %c7_106 = arith.constant 7 : index
    %c0_107 = arith.constant 0 : index
    %c0_108 = arith.constant 0 : index
    %137 = vector.load %arg4[%c1_105, %c7_106, %c0_107, %c0_108] : memref<3x9x32x64xbf16, #tpu.memory_space<vmem>>, vector<1x1x32x64xbf16>
    %138 = vector.shape_cast %137 : vector<1x1x32x64xbf16> to vector<32x64xbf16>
    %cst_109 = arith.constant dense<0.000000e+00> : vector<256x64xf32>
    %139 = tpu.matmul %136, %138, %cst_109 {dimension_numbers = #tpu.dot_dimension_numbers<[1], [0], [0], [1], [0, 0, 1, 1], [], []>} : vector<256x32xbf16>, vector<32x64xbf16>, vector<256x64xf32> -> vector<256x64xf32>
    %140 = arith.addf %134, %139 : vector<256x64xf32>
    %141 = vector.extract_strided_slice %4 {offsets = [5, 5, 0], sizes = [16, 16, 32], strides = [1, 1, 1]} : vector<22x22x32xbf16> to vector<16x16x32xbf16>
    %142 = vector.shape_cast %141 : vector<16x16x32xbf16> to vector<256x32xbf16>
    %c1_110 = arith.constant 1 : index
    %c8_111 = arith.constant 8 : index
    %c0_112 = arith.constant 0 : index
    %c0_113 = arith.constant 0 : index
    %143 = vector.load %arg4[%c1_110, %c8_111, %c0_112, %c0_113] : memref<3x9x32x64xbf16, #tpu.memory_space<vmem>>, vector<1x1x32x64xbf16>
    %144 = vector.shape_cast %143 : vector<1x1x32x64xbf16> to vector<32x64xbf16>
    %cst_114 = arith.constant dense<0.000000e+00> : vector<256x64xf32>
    %145 = tpu.matmul %142, %144, %cst_114 {dimension_numbers = #tpu.dot_dimension_numbers<[1], [0], [0], [1], [0, 0, 1, 1], [], []>} : vector<256x32xbf16>, vector<32x64xbf16>, vector<256x64xf32> -> vector<256x64xf32>
    %146 = arith.addf %140, %145 : vector<256x64xf32>
    %c2_115 = arith.constant 2 : index
    %c0_116 = arith.constant 0 : index
    %c0_117 = arith.constant 0 : index
    %147 = vector.load %arg7[%c2_115, %c0_116, %c0_117] : memref<5x1x64xf32, #tpu.memory_space<vmem>>, vector<1x1x64xf32>
    %148 = vector.shape_cast %147 : vector<1x1x64xf32> to vector<1x64xf32>
    %149 = vector.broadcast %148 : vector<1x64xf32> to vector<256x64xf32>
    %150 = arith.mulf %146, %149 : vector<256x64xf32>
    %c2_118 = arith.constant 2 : index
    %c0_119 = arith.constant 0 : index
    %c0_120 = arith.constant 0 : index
    %151 = vector.load %arg8[%c2_118, %c0_119, %c0_120] : memref<5x1x64xf32, #tpu.memory_space<vmem>>, vector<1x1x64xf32>
    %152 = vector.shape_cast %151 : vector<1x1x64xf32> to vector<1x64xf32>
    %153 = vector.broadcast %152 : vector<1x64xf32> to vector<256x64xf32>
    %154 = arith.addf %150, %153 : vector<256x64xf32>
    %cst_121 = arith.constant 0.000000e+00 : f32
    %155 = vector.broadcast %cst_121 : f32 to vector<256x64xf32>
    %156 = arith.maximumf %154, %155 : vector<256x64xf32>
    %157 = arith.truncf %156 : vector<256x64xf32> to vector<256x64xbf16>
    %c2_122 = arith.constant 2 : index
    %c0_123 = arith.constant 0 : index
    %c0_124 = arith.constant 0 : index
    %158 = vector.load %arg6[%c2_122, %c0_123, %c0_124] : memref<5x64x64xbf16, #tpu.memory_space<vmem>>, vector<1x64x64xbf16>
    %159 = vector.shape_cast %158 : vector<1x64x64xbf16> to vector<64x64xbf16>
    %cst_125 = arith.constant dense<0.000000e+00> : vector<256x64xf32>
    %160 = tpu.matmul %157, %159, %cst_125 {dimension_numbers = #tpu.dot_dimension_numbers<[1], [0], [0], [1], [0, 0, 1, 1], [], []>} : vector<256x64xbf16>, vector<64x64xbf16>, vector<256x64xf32> -> vector<256x64xf32>
    %161 = arith.addf %91, %160 : vector<256x64xf32>
    %cst_126 = arith.constant 0.000000e+00 : f32
    %162 = vector.broadcast %cst_126 : f32 to vector<256x64xf32>
    %163 = vector.extract_strided_slice %4 {offsets = [0, 0, 0], sizes = [16, 16, 32], strides = [1, 1, 1]} : vector<22x22x32xbf16> to vector<16x16x32xbf16>
    %164 = vector.shape_cast %163 : vector<16x16x32xbf16> to vector<256x32xbf16>
    %c2_127 = arith.constant 2 : index
    %c0_128 = arith.constant 0 : index
    %c0_129 = arith.constant 0 : index
    %c0_130 = arith.constant 0 : index
    %165 = vector.load %arg4[%c2_127, %c0_128, %c0_129, %c0_130] : memref<3x9x32x64xbf16, #tpu.memory_space<vmem>>, vector<1x1x32x64xbf16>
    %166 = vector.shape_cast %165 : vector<1x1x32x64xbf16> to vector<32x64xbf16>
    %cst_131 = arith.constant dense<0.000000e+00> : vector<256x64xf32>
    %167 = tpu.matmul %164, %166, %cst_131 {dimension_numbers = #tpu.dot_dimension_numbers<[1], [0], [0], [1], [0, 0, 1, 1], [], []>} : vector<256x32xbf16>, vector<32x64xbf16>, vector<256x64xf32> -> vector<256x64xf32>
    %168 = arith.addf %162, %167 : vector<256x64xf32>
    %169 = vector.extract_strided_slice %4 {offsets = [0, 3, 0], sizes = [16, 16, 32], strides = [1, 1, 1]} : vector<22x22x32xbf16> to vector<16x16x32xbf16>
    %170 = vector.shape_cast %169 : vector<16x16x32xbf16> to vector<256x32xbf16>
    %c2_132 = arith.constant 2 : index
    %c1_133 = arith.constant 1 : index
    %c0_134 = arith.constant 0 : index
    %c0_135 = arith.constant 0 : index
    %171 = vector.load %arg4[%c2_132, %c1_133, %c0_134, %c0_135] : memref<3x9x32x64xbf16, #tpu.memory_space<vmem>>, vector<1x1x32x64xbf16>
    %172 = vector.shape_cast %171 : vector<1x1x32x64xbf16> to vector<32x64xbf16>
    %cst_136 = arith.constant dense<0.000000e+00> : vector<256x64xf32>
    %173 = tpu.matmul %170, %172, %cst_136 {dimension_numbers = #tpu.dot_dimension_numbers<[1], [0], [0], [1], [0, 0, 1, 1], [], []>} : vector<256x32xbf16>, vector<32x64xbf16>, vector<256x64xf32> -> vector<256x64xf32>
    %174 = arith.addf %168, %173 : vector<256x64xf32>
    %175 = vector.extract_strided_slice %4 {offsets = [0, 6, 0], sizes = [16, 16, 32], strides = [1, 1, 1]} : vector<22x22x32xbf16> to vector<16x16x32xbf16>
    %176 = vector.shape_cast %175 : vector<16x16x32xbf16> to vector<256x32xbf16>
    %c2_137 = arith.constant 2 : index
    %c2_138 = arith.constant 2 : index
    %c0_139 = arith.constant 0 : index
    %c0_140 = arith.constant 0 : index
    %177 = vector.load %arg4[%c2_137, %c2_138, %c0_139, %c0_140] : memref<3x9x32x64xbf16, #tpu.memory_space<vmem>>, vector<1x1x32x64xbf16>
    %178 = vector.shape_cast %177 : vector<1x1x32x64xbf16> to vector<32x64xbf16>
    %cst_141 = arith.constant dense<0.000000e+00> : vector<256x64xf32>
    %179 = tpu.matmul %176, %178, %cst_141 {dimension_numbers = #tpu.dot_dimension_numbers<[1], [0], [0], [1], [0, 0, 1, 1], [], []>} : vector<256x32xbf16>, vector<32x64xbf16>, vector<256x64xf32> -> vector<256x64xf32>
    %180 = arith.addf %174, %179 : vector<256x64xf32>
    %181 = vector.extract_strided_slice %4 {offsets = [3, 0, 0], sizes = [16, 16, 32], strides = [1, 1, 1]} : vector<22x22x32xbf16> to vector<16x16x32xbf16>
    %182 = vector.shape_cast %181 : vector<16x16x32xbf16> to vector<256x32xbf16>
    %c2_142 = arith.constant 2 : index
    %c3_143 = arith.constant 3 : index
    %c0_144 = arith.constant 0 : index
    %c0_145 = arith.constant 0 : index
    %183 = vector.load %arg4[%c2_142, %c3_143, %c0_144, %c0_145] : memref<3x9x32x64xbf16, #tpu.memory_space<vmem>>, vector<1x1x32x64xbf16>
    %184 = vector.shape_cast %183 : vector<1x1x32x64xbf16> to vector<32x64xbf16>
    %cst_146 = arith.constant dense<0.000000e+00> : vector<256x64xf32>
    %185 = tpu.matmul %182, %184, %cst_146 {dimension_numbers = #tpu.dot_dimension_numbers<[1], [0], [0], [1], [0, 0, 1, 1], [], []>} : vector<256x32xbf16>, vector<32x64xbf16>, vector<256x64xf32> -> vector<256x64xf32>
    %186 = arith.addf %180, %185 : vector<256x64xf32>
    %187 = vector.extract_strided_slice %4 {offsets = [3, 3, 0], sizes = [16, 16, 32], strides = [1, 1, 1]} : vector<22x22x32xbf16> to vector<16x16x32xbf16>
    %188 = vector.shape_cast %187 : vector<16x16x32xbf16> to vector<256x32xbf16>
    %c2_147 = arith.constant 2 : index
    %c4_148 = arith.constant 4 : index
    %c0_149 = arith.constant 0 : index
    %c0_150 = arith.constant 0 : index
    %189 = vector.load %arg4[%c2_147, %c4_148, %c0_149, %c0_150] : memref<3x9x32x64xbf16, #tpu.memory_space<vmem>>, vector<1x1x32x64xbf16>
    %190 = vector.shape_cast %189 : vector<1x1x32x64xbf16> to vector<32x64xbf16>
    %cst_151 = arith.constant dense<0.000000e+00> : vector<256x64xf32>
    %191 = tpu.matmul %188, %190, %cst_151 {dimension_numbers = #tpu.dot_dimension_numbers<[1], [0], [0], [1], [0, 0, 1, 1], [], []>} : vector<256x32xbf16>, vector<32x64xbf16>, vector<256x64xf32> -> vector<256x64xf32>
    %192 = arith.addf %186, %191 : vector<256x64xf32>
    %193 = vector.extract_strided_slice %4 {offsets = [3, 6, 0], sizes = [16, 16, 32], strides = [1, 1, 1]} : vector<22x22x32xbf16> to vector<16x16x32xbf16>
    %194 = vector.shape_cast %193 : vector<16x16x32xbf16> to vector<256x32xbf16>
    %c2_152 = arith.constant 2 : index
    %c5_153 = arith.constant 5 : index
    %c0_154 = arith.constant 0 : index
    %c0_155 = arith.constant 0 : index
    %195 = vector.load %arg4[%c2_152, %c5_153, %c0_154, %c0_155] : memref<3x9x32x64xbf16, #tpu.memory_space<vmem>>, vector<1x1x32x64xbf16>
    %196 = vector.shape_cast %195 : vector<1x1x32x64xbf16> to vector<32x64xbf16>
    %cst_156 = arith.constant dense<0.000000e+00> : vector<256x64xf32>
    %197 = tpu.matmul %194, %196, %cst_156 {dimension_numbers = #tpu.dot_dimension_numbers<[1], [0], [0], [1], [0, 0, 1, 1], [], []>} : vector<256x32xbf16>, vector<32x64xbf16>, vector<256x64xf32> -> vector<256x64xf32>
    %198 = arith.addf %192, %197 : vector<256x64xf32>
    %199 = vector.extract_strided_slice %4 {offsets = [6, 0, 0], sizes = [16, 16, 32], strides = [1, 1, 1]} : vector<22x22x32xbf16> to vector<16x16x32xbf16>
    %200 = vector.shape_cast %199 : vector<16x16x32xbf16> to vector<256x32xbf16>
    %c2_157 = arith.constant 2 : index
    %c6_158 = arith.constant 6 : index
    %c0_159 = arith.constant 0 : index
    %c0_160 = arith.constant 0 : index
    %201 = vector.load %arg4[%c2_157, %c6_158, %c0_159, %c0_160] : memref<3x9x32x64xbf16, #tpu.memory_space<vmem>>, vector<1x1x32x64xbf16>
    %202 = vector.shape_cast %201 : vector<1x1x32x64xbf16> to vector<32x64xbf16>
    %cst_161 = arith.constant dense<0.000000e+00> : vector<256x64xf32>
    %203 = tpu.matmul %200, %202, %cst_161 {dimension_numbers = #tpu.dot_dimension_numbers<[1], [0], [0], [1], [0, 0, 1, 1], [], []>} : vector<256x32xbf16>, vector<32x64xbf16>, vector<256x64xf32> -> vector<256x64xf32>
    %204 = arith.addf %198, %203 : vector<256x64xf32>
    %205 = vector.extract_strided_slice %4 {offsets = [6, 3, 0], sizes = [16, 16, 32], strides = [1, 1, 1]} : vector<22x22x32xbf16> to vector<16x16x32xbf16>
    %206 = vector.shape_cast %205 : vector<16x16x32xbf16> to vector<256x32xbf16>
    %c2_162 = arith.constant 2 : index
    %c7_163 = arith.constant 7 : index
    %c0_164 = arith.constant 0 : index
    %c0_165 = arith.constant 0 : index
    %207 = vector.load %arg4[%c2_162, %c7_163, %c0_164, %c0_165] : memref<3x9x32x64xbf16, #tpu.memory_space<vmem>>, vector<1x1x32x64xbf16>
    %208 = vector.shape_cast %207 : vector<1x1x32x64xbf16> to vector<32x64xbf16>
    %cst_166 = arith.constant dense<0.000000e+00> : vector<256x64xf32>
    %209 = tpu.matmul %206, %208, %cst_166 {dimension_numbers = #tpu.dot_dimension_numbers<[1], [0], [0], [1], [0, 0, 1, 1], [], []>} : vector<256x32xbf16>, vector<32x64xbf16>, vector<256x64xf32> -> vector<256x64xf32>
    %210 = arith.addf %204, %209 : vector<256x64xf32>
    %211 = vector.extract_strided_slice %4 {offsets = [6, 6, 0], sizes = [16, 16, 32], strides = [1, 1, 1]} : vector<22x22x32xbf16> to vector<16x16x32xbf16>
    %212 = vector.shape_cast %211 : vector<16x16x32xbf16> to vector<256x32xbf16>
    %c2_167 = arith.constant 2 : index
    %c8_168 = arith.constant 8 : index
    %c0_169 = arith.constant 0 : index
    %c0_170 = arith.constant 0 : index
    %213 = vector.load %arg4[%c2_167, %c8_168, %c0_169, %c0_170] : memref<3x9x32x64xbf16, #tpu.memory_space<vmem>>, vector<1x1x32x64xbf16>
    %214 = vector.shape_cast %213 : vector<1x1x32x64xbf16> to vector<32x64xbf16>
    %cst_171 = arith.constant dense<0.000000e+00> : vector<256x64xf32>
    %215 = tpu.matmul %212, %214, %cst_171 {dimension_numbers = #tpu.dot_dimension_numbers<[1], [0], [0], [1], [0, 0, 1, 1], [], []>} : vector<256x32xbf16>, vector<32x64xbf16>, vector<256x64xf32> -> vector<256x64xf32>
    %216 = arith.addf %210, %215 : vector<256x64xf32>
    %c3_172 = arith.constant 3 : index
    %c0_173 = arith.constant 0 : index
    %c0_174 = arith.constant 0 : index
    %217 = vector.load %arg7[%c3_172, %c0_173, %c0_174] : memref<5x1x64xf32, #tpu.memory_space<vmem>>, vector<1x1x64xf32>
    %218 = vector.shape_cast %217 : vector<1x1x64xf32> to vector<1x64xf32>
    %219 = vector.broadcast %218 : vector<1x64xf32> to vector<256x64xf32>
    %220 = arith.mulf %216, %219 : vector<256x64xf32>
    %c3_175 = arith.constant 3 : index
    %c0_176 = arith.constant 0 : index
    %c0_177 = arith.constant 0 : index
    %221 = vector.load %arg8[%c3_175, %c0_176, %c0_177] : memref<5x1x64xf32, #tpu.memory_space<vmem>>, vector<1x1x64xf32>
    %222 = vector.shape_cast %221 : vector<1x1x64xf32> to vector<1x64xf32>
    %223 = vector.broadcast %222 : vector<1x64xf32> to vector<256x64xf32>
    %224 = arith.addf %220, %223 : vector<256x64xf32>
    %cst_178 = arith.constant 0.000000e+00 : f32
    %225 = vector.broadcast %cst_178 : f32 to vector<256x64xf32>
    %226 = arith.maximumf %224, %225 : vector<256x64xf32>
    %227 = arith.truncf %226 : vector<256x64xf32> to vector<256x64xbf16>
    %c3_179 = arith.constant 3 : index
    %c0_180 = arith.constant 0 : index
    %c0_181 = arith.constant 0 : index
    %228 = vector.load %arg6[%c3_179, %c0_180, %c0_181] : memref<5x64x64xbf16, #tpu.memory_space<vmem>>, vector<1x64x64xbf16>
    %229 = vector.shape_cast %228 : vector<1x64x64xbf16> to vector<64x64xbf16>
    %cst_182 = arith.constant dense<0.000000e+00> : vector<256x64xf32>
    %230 = tpu.matmul %227, %229, %cst_182 {dimension_numbers = #tpu.dot_dimension_numbers<[1], [0], [0], [1], [0, 0, 1, 1], [], []>} : vector<256x64xbf16>, vector<64x64xbf16>, vector<256x64xf32> -> vector<256x64xf32>
    %231 = arith.addf %161, %230 : vector<256x64xf32>
    %cst_183 = arith.constant dense<0.000000e+00> : vector<32xf32>
    %232 = vector.multi_reduction <add>, %2, %cst_183 [0] : vector<256x32xf32> to vector<32xf32>
    %233 = vector.shape_cast %232 : vector<32xf32> to vector<1x32xf32>
    %cst_184 = arith.constant 2.560000e+02 : f32
    %234 = vector.broadcast %cst_184 : f32 to vector<1x32xf32>
    %235 = arith.divf %233, %234 : vector<1x32xf32>
    %236 = arith.truncf %235 : vector<1x32xf32> to vector<1x32xbf16>
    %c0_185 = arith.constant 0 : index
    %c0_186 = arith.constant 0 : index
    %237 = vector.load %arg5[%c0_185, %c0_186] : memref<32x64xbf16, #tpu.memory_space<vmem>>, vector<32x64xbf16>
    %cst_187 = arith.constant dense<0.000000e+00> : vector<1x64xf32>
    %238 = tpu.matmul %236, %237, %cst_187 {dimension_numbers = #tpu.dot_dimension_numbers<[1], [0], [0], [1], [0, 0, 1, 1], [], []>} : vector<1x32xbf16>, vector<32x64xbf16>, vector<1x64xf32> -> vector<1x64xf32>
    %c4_188 = arith.constant 4 : index
    %c0_189 = arith.constant 0 : index
    %c0_190 = arith.constant 0 : index
    %239 = vector.load %arg7[%c4_188, %c0_189, %c0_190] : memref<5x1x64xf32, #tpu.memory_space<vmem>>, vector<1x1x64xf32>
    %240 = vector.shape_cast %239 : vector<1x1x64xf32> to vector<1x64xf32>
    %241 = arith.mulf %238, %240 : vector<1x64xf32>
    %c4_191 = arith.constant 4 : index
    %c0_192 = arith.constant 0 : index
    %c0_193 = arith.constant 0 : index
    %242 = vector.load %arg8[%c4_191, %c0_192, %c0_193] : memref<5x1x64xf32, #tpu.memory_space<vmem>>, vector<1x1x64xf32>
    %243 = vector.shape_cast %242 : vector<1x1x64xf32> to vector<1x64xf32>
    %244 = arith.addf %241, %243 : vector<1x64xf32>
    %cst_194 = arith.constant 0.000000e+00 : f32
    %245 = vector.broadcast %cst_194 : f32 to vector<1x64xf32>
    %246 = arith.maximumf %244, %245 : vector<1x64xf32>
    %247 = arith.truncf %246 : vector<1x64xf32> to vector<1x64xbf16>
    %c4_195 = arith.constant 4 : index
    %c0_196 = arith.constant 0 : index
    %c0_197 = arith.constant 0 : index
    %248 = vector.load %arg6[%c4_195, %c0_196, %c0_197] : memref<5x64x64xbf16, #tpu.memory_space<vmem>>, vector<1x64x64xbf16>
    %249 = vector.shape_cast %248 : vector<1x64x64xbf16> to vector<64x64xbf16>
    %cst_198 = arith.constant dense<0.000000e+00> : vector<1x64xf32>
    %250 = tpu.matmul %247, %249, %cst_198 {dimension_numbers = #tpu.dot_dimension_numbers<[1], [0], [0], [1], [0, 0, 1, 1], [], []>} : vector<1x64xbf16>, vector<64x64xbf16>, vector<1x64xf32> -> vector<1x64xf32>
    %251 = vector.broadcast %250 : vector<1x64xf32> to vector<256x64xf32>
    %252 = arith.addf %231, %251 : vector<256x64xf32>
    %c0_199 = arith.constant 0 : index
    %c0_200 = arith.constant 0 : index
    %253 = vector.load %arg9[%c0_199, %c0_200] : memref<1x64xf32, #tpu.memory_space<vmem>>, vector<1x64xf32>
    %254 = vector.broadcast %253 : vector<1x64xf32> to vector<256x64xf32>
    %255 = arith.mulf %252, %254 : vector<256x64xf32>
    %c0_201 = arith.constant 0 : index
    %c0_202 = arith.constant 0 : index
    %256 = vector.load %arg10[%c0_201, %c0_202] : memref<1x64xf32, #tpu.memory_space<vmem>>, vector<1x64xf32>
    %257 = vector.broadcast %256 : vector<1x64xf32> to vector<256x64xf32>
    %258 = arith.addf %255, %257 : vector<256x64xf32>
    %cst_203 = arith.constant 0.000000e+00 : f32
    %259 = vector.broadcast %cst_203 : f32 to vector<256x64xf32>
    %260 = arith.maximumf %258, %259 : vector<256x64xf32>
    %261 = vector.shape_cast %260 : vector<256x64xf32> to vector<16x16x64xf32>
    %c0_204 = arith.constant 0 : index
    %c0_205 = arith.constant 0 : index
    %c0_206 = arith.constant 0 : index
    %c0_207 = arith.constant 0 : index
    %262 = vector.load %arg11[%c0_204, %c0_205, %c0_206, %c0_207] : memref<1x16x16x64xf32, #tpu.memory_space<vmem>>, vector<1x16x16x64xf32>
    %263 = vector.shape_cast %262 : vector<1x16x16x64xf32> to vector<16x16x64xf32>
    %264 = vector.shape_cast %261 : vector<16x16x64xf32> to vector<1x16x16x64xf32>
    tpu.vector_store %arg11[%c0_204, %c0_205, %c0_206, %c0_207], %264 {strides = array<i32>} : memref<1x16x16x64xf32, #tpu.memory_space<vmem>>, vector<1x16x16x64xf32>,
    return
  }
  func.func @transform_0(%arg0: i32) -> (i32, i32, i32, i32) {
    %c0_i32 = arith.constant 0 : i32
    %c0_i32_0 = arith.constant 0 : i32
    %c0_i32_1 = arith.constant 0 : i32
    %c0_i32_2 = arith.constant 0 : i32
    return %arg0, %c0_i32, %c0_i32_0, %c0_i32_1 : i32, i32, i32, i32
  }
  func.func @transform_1(%arg0: i32) -> (i32, i32, i32, i32) {
    %c0_i32 = arith.constant 0 : i32
    %c0_i32_0 = arith.constant 0 : i32
    %c0_i32_1 = arith.constant 0 : i32
    %c0_i32_2 = arith.constant 0 : i32
    return %arg0, %c0_i32, %c0_i32_0, %c0_i32_1 : i32, i32, i32, i32
  }
  func.func @transform_2(%arg0: i32) -> (i32, i32) {
    %c0_i32 = arith.constant 0 : i32
    %c0_i32_0 = arith.constant 0 : i32
    %c0_i32_1 = arith.constant 0 : i32
    return %c0_i32, %c0_i32_0 : i32, i32
  }
  func.func @transform_3(%arg0: i32) -> (i32, i32, i32, i32) {
    %c0_i32 = arith.constant 0 : i32
    %c0_i32_0 = arith.constant 0 : i32
    %c0_i32_1 = arith.constant 0 : i32
    %c0_i32_2 = arith.constant 0 : i32
    %c0_i32_3 = arith.constant 0 : i32
    return %c0_i32, %c0_i32_0, %c0_i32_1, %c0_i32_2 : i32, i32, i32, i32
  }
  func.func @transform_4(%arg0: i32) -> (i32, i32) {
    %c0_i32 = arith.constant 0 : i32
    %c0_i32_0 = arith.constant 0 : i32
    %c0_i32_1 = arith.constant 0 : i32
    return %c0_i32, %c0_i32_0 : i32, i32
  }
  func.func @transform_5(%arg0: i32) -> (i32, i32, i32) {
    %c0_i32 = arith.constant 0 : i32
    %c0_i32_0 = arith.constant 0 : i32
    %c0_i32_1 = arith.constant 0 : i32
    %c0_i32_2 = arith.constant 0 : i32
    return %c0_i32, %c0_i32_0, %c0_i32_1 : i32, i32, i32
  }
  func.func @transform_6(%arg0: i32) -> (i32, i32, i32) {
    %c0_i32 = arith.constant 0 : i32
    %c0_i32_0 = arith.constant 0 : i32
    %c0_i32_1 = arith.constant 0 : i32
    %c0_i32_2 = arith.constant 0 : i32
    return %c0_i32, %c0_i32_0, %c0_i32_1 : i32, i32, i32
  }
  func.func @transform_7(%arg0: i32) -> (i32, i32, i32) {
    %c0_i32 = arith.constant 0 : i32
    %c0_i32_0 = arith.constant 0 : i32
    %c0_i32_1 = arith.constant 0 : i32
    %c0_i32_2 = arith.constant 0 : i32
    return %c0_i32, %c0_i32_0, %c0_i32_1 : i32, i32, i32
  }
  func.func @transform_8(%arg0: i32) -> (i32, i32) {
    %c0_i32 = arith.constant 0 : i32
    %c0_i32_0 = arith.constant 0 : i32
    %c0_i32_1 = arith.constant 0 : i32
    return %c0_i32, %c0_i32_0 : i32, i32
  }
  func.func @transform_9(%arg0: i32) -> (i32, i32) {
    %c0_i32 = arith.constant 0 : i32
    %c0_i32_0 = arith.constant 0 : i32
    %c0_i32_1 = arith.constant 0 : i32
    return %c0_i32, %c0_i32_0 : i32, i32
  }
  func.func @transform_10(%arg0: i32) -> (i32, i32, i32, i32) {
    %c0_i32 = arith.constant 0 : i32
    %c0_i32_0 = arith.constant 0 : i32
    %c0_i32_1 = arith.constant 0 : i32
    %c0_i32_2 = arith.constant 0 : i32
    return %arg0, %c0_i32, %c0_i32_0, %c0_i32_1 : i32, i32, i32, i32
  }
}

</mosaic_0001>

<bundles_post_ra>
// kernel: tpu_custom_call.1
= control target key start
LH: loop header
LB: loop body
LE: loop exit
PB: predicated region body
PF: predicated region fallthrough
CT: control target
= control target key end

     0   :  { %15 = vsyncpa [#allocation3], 0  ;;  %s18815_s0 = inlined_call_operand.vmem [shape: f32[2,16,16,32], index: 0, kind: input, shape index: {}]   ;;  %s18816_s1 = inlined_call_operand.vmem [shape: bf16[2,22,22,32], index: 1, kind: input, shape index: {}]   ;;  %s18817_s2 = inlined_call_operand.vmem [shape: bf16[32,64], index: 2, kind: input, shape index: {}]   ;;  %s18818_s3 = inlined_call_operand.vmem [shape: bf16[3,9,32,64], index: 3, kind: input, shape index: {}]   ;;  %s18819_s4 = inlined_call_operand.vmem [shape: bf16[32,64], index: 4, kind: input, shape index: {}]   ;;  %s18820_s5 = inlined_call_operand.hbm [shape: bf16[5,64,64], index: 5, kind: input, shape index: {}]   ;;  %s18821_s6 = inlined_call_operand.vmem [shape: f32[5,1,64], index: 6, kind: input, shape index: {}]   ;;  %s18822_s7 = inlined_call_operand.vmem [shape: f32[5,1,64], index: 7, kind: input, shape index: {}]   ;;  %s18823_s8 = inlined_call_operand.vmem [shape: f32[1,64], index: 8, kind: input, shape index: {}]   ;;  %s18824_s9 = inlined_call_operand.vmem [shape: f32[1,64], index: 9, kind: input, shape index: {}]   ;;  %s18825_s10 = inlined_call_operand.hbm [shape: f32[2,16,16,64], index: 10, kind: output, shape index: {}]  }
   0x1   :  { %16 = vsyncpa [#allocation4], 0 }
   0x2   :  { %18 = vsyncpa [#allocation4 + $0x1], 0  ;;  %s14658_s13 = smov 0   ;;  %s14660_s14 = smov 0  }
   0x3   :  { %s14662_s15 = smov 0   ;;  %s14664_s16 = smov 0  }
   0x4 LB: > { %s14679_s17 = sadd.s32 4294967295, %s14593_s16   ;;  %s10684_s18 = sadd.s32 4294967294, %s14593_s16   ;;  %s14593_s16 = sphi %s14664_s16, %s19895_s16   ;;  %s14589_s15 = sphi %s14662_s15, %s19894_s15   ;;  %s14585_s14 = sphi %s14660_s14, %s19893_s14   ;;  %s14581_s13 = sphi %s14658_s13, %s19892_s13  }
   0x5   : > { %s14683_s19 = sadd.s32 1, %s14593_s16   ;;  %s251_s20 = sadd.s32 1, %s14589_s15 }
   0x6   : > { %s248_s21 = ssub.s32 %s14593_s16, %s14683_s19  ;;  %p261_p0 = scmp.ne.s32.totalorder %s14589_s15, %s14585_s14 }
   0x7   : > { %p249_p1 = scmp.eq.s32.totalorder %s248_s21, 0  ;;  %p262_p2 = scmp.eq.s32.totalorder %s14679_s17, 1 }
   0x8   : > { %p267_p3 = scmp.ne.s32.totalorder %s14585_s14, %s14581_s13  ;;  %p268_p4 = scmp.eq.s32.totalorder %s10684_s18, 1 }
   0x9   : > { %s14694_s22 = scalar_select %p249_p1, %s14589_s15, %s251_s20  }
   0xa   : > { %p14696_p5 = por %p262_p2, %p261_p0  ;;  %p14700_p6 = por %p268_p4, %p267_p3 }
   0xb   : > { %p10685_p7 = scmp.ge.s32.totalorder %s14593_s16, 1  ;;  %p275_p8 = scmp.lt.s32.totalorder %s14593_s16, 3 }
   0xc   : > { %s19226_s23 = scalar_select %p14696_p5, 1, 0 }
   0xd   : > { %s19227_s24 = scalar_select %p14700_p6, 1, 0 }
   0xe   : > { %p18826_p9 = scmp.eq.s32.totalorder %s14679_s17, 0  ;;  %p14707_p10 = pnand %p10685_p7, %p275_p8 }
   0xf   : > { %s14595_s26 = smov [#allocation2]   ;;  %s14499_s11 = scalar_lea.hbm %s18820_s5, 2560 }
  0x10   : > { %s19228_s25 = scalar_select %p14707_p10, 1, 0 }
  0x11   : > { %s296_s27 = sshll.u32 %s14595_s26, 4  ;;  %p14270_p11 = pneg %p14707_p10  ;;  %s297_s27 = int_to_ptr.vmem [resolvable:$true] %s296_s27 }
  0x12   : > { %p14500_p13 = scmp.ne.s32.totalorder %s18820_s5, %s14499_s11  ;;  %p14506_p3 = scmp.lt.u32.totalorder %s14499_s11, %s18820_s5 }
  0x13   : > { %p14715_p12 = pnand %p18826_p9, %p14270_p11 }
  0x15   : > { %p14501_p0 = pneg %p14715_p12 }
  0x17   : > { %p14502_p1 = pnand %p14501_p0, %p14500_p13 }
  0x19   : > { %p14503_p2 = pneg %p14502_p1 }
  0x1b   : > { %p14508_p4 = pnand %p14506_p3, %p14503_p2 }
  0x1d   : > { %14511 = shalt.err (!%p14508_p4)
}
  0x1e   : > { %s14512_s26 = scalar_lea.vmem %s297_s27, 2560  ;;  %p14520_p9 = scmp.lt.s32.totalorder %s297_s27, %s297_s27 }
  0x1f   : > { %p14513_p7 = scmp.ne.s32.totalorder %s297_s27, %s14512_s26  ;;  %p14521_p6 = scmp.lt.s32.totalorder %s14512_s26, %s14512_s26 }
  0x21   : > { %p14515_p8 = pnand %p14513_p7, %p14501_p0  ;;  %p14522_p5 = por %p14521_p6, %p14520_p9 }
  0x23   : > { %p14516_p11 = pneg %p14515_p8 }
  0x25   : > { %p14523_p10 = pnand %p14522_p5, %p14516_p11 }
  0x27   : > { %14526 = shalt.err (!%p14523_p10)
}
  0x28   : > { %s14596_s29 = smov 64   ;;  %s14597_s30 = smov 4  }
  0x29   : > { %14273 = dma.hbm_to_vmem [thread:$0]  (!%p14715_p12), %s18820_s5, 2560, %s297_s27, [#allocation3], %s14596_s29, %s14596_s29, %s14597_s30  }
  0x2a   : > { %p19230_p13 = scmp.ne.s32.totalorder %s19228_s25, 0 }
  0x2c   : > { %340 = sbr.rel (%p19230_p13) target bundleno = 2171 (0x87b), region = 60 }
  0x33   : > { %p19231_p1 = scmp.eq.s32.totalorder %s14679_s17, 0 }
  0x35   : > { %14572 = dma.done.wait (%p19231_p1), [#allocation3], 2560   ;;  %p19232_p0 = pmov %p19231_p1 }
  0x36   : > { %p383_p5 = scmp.lt.s32.totalorder %s14679_s17, 1  ;;  %vm916_vm0 = vcmask 1042432   ;;  %vm917_vm1 = vcmask 1046532   ;;  %v14320_v1 = vld [vmem:[%s18818_s3] sm:$0xff]   ;;  %v14321_v2 = vld [vmem:[%s18818_s3 + $0x8] sm:$0xff]   ;;  %vm524_vm3 = vcmask 261120  }
  0x37   : > { %14574 = vsyncadd (%p19232_p0), [#allocation3], 4294964736  ;;  %13395 = vmatprep.subr.bf16.mxu1 %v14320_v1  ;;  %v14322_v14 = vld [vmem:[%s18818_s3 + $0x20] sm:$0xff]   ;;  %vm2029_vm4 = vcmask 1041408   ;;  %vm2030_vm5 = vcmask 1045508   ;;  %v14323_v26 = vld [vmem:[%s18818_s3 + $0x28] sm:$0xff]  }
  0x38   : > { %s14743_s11 = scalar_select %p383_p5, %s14679_s17, 1  ;;  %vm14751_vm2 = vmor %vm916_vm0, %vm917_vm1  ;;  %13397 = vmatpush3.bf16.msra.mxu1 %v14320_v1  ;;  %v19237_v27 = vmov 0  ;;  %v14324_v44 = vld [vmem:[%s18818_s3 + $0x30] sm:$0xff]   ;;  %v14325_v55 = vld [vmem:[%s18818_s3 + $0x38] sm:$0xff]   ;;  %vm1035_vm7 = vsmask.f32 2304 }
  0x39   : > { %13396 = vmatprep.subr.bf16.mxu1 %v14321_v2  ;;  %vm14806_vm6 = vmor %vm2029_vm4, %vm2030_vm5  ;;  %v14878_v1 = vld [vmem:[%s18818_s3 + $0x40] sm:$0xff]   ;;  %vm1036_vm8 = vsmask.f32 6416  ;;  %v16270_v0 = vld [vmem:[%s18818_s3 + $0x130] sm:$0xff]   ;;  %vm7954_vm10 = vcmask 1040384   ;;  %vm7955_vm11 = vcmask 1044484  }
  0x3a   : > { %s14263_s28 = smul.u32 264, %s14743_s11  ;;  %v19238_v27 = vsel %vm14806_vm6, 4294967295, %v19237_v27  ;;  %vm15407_vm9 = vmor %vm1035_vm7, %vm1036_vm8  ;;  %s11613_s12 = sshll.u32 %s14743_s11, 8  ;;  %vm3997_vm13 = vcmask 523264   ;;  %vm4440_vm14 = vsmask.f32 3328 }
  0x3b   : > { %19239 = vst [vmem:[#allocation10_spill] sm:$0xff] %v19238_v27  ;;  %vm16811_vm12 = vmor %vm7954_vm10, %vm7955_vm11  ;;  %vm4441_vm15 = vsmask.f32 7440  ;;  %vm5105_vm1 = vsmask.f32 1280  ;;  %vm14599_vm5 = vmmov 0  }
  0x3c   : > { %s14749_s25 = scalar_lea.vmem %s18816_s1, %s14263_s28  ;;  %13398 = vmatpush3.bf16.msra.mxu1 %v14321_v2  ;;  %s15460_s28 = scalar_lea.vmem %s18815_s0, %s11613_s12  ;;  %vm17168_vm0 = vmor %vm4440_vm14, %vm4441_vm15 }
  0x3d   : > { %v14762_v3 = vld [vmem:[%s14749_s25 + $0xc0] sm:$0xf]  ;;  %v14765_v4 = vld [vmem:[%s14749_s25 + $0xc4] sm:$0xf]  ;;  %v14768_v5 = vld [vmem:[%s14749_s25 + $0xc8] sm:$0x7]  ;;  %12315 = vmatprep.subr.bf16.mxu1 %v14322_v14 }
  0x3e   : > { %19235 = vst [vmem:[#allocation8_spill] sm:$0xff] %v14768_v5  ;;  %v10728_v6 = vrot.slane %v14762_v3, 9  ;;  %v1019_v7 = vrot.slane %v14765_v4, 5  ;;  %v1022_v8 = vrot.slane %v14768_v5, 5  ;;  %v14774_v9 = vld [vmem:[%s14749_s25 + $0xcc] sm:$0xf] }
  0x3f   : > { %v14777_v10 = vld [vmem:[%s14749_s25 + $0xd0] sm:$0xf]  ;;  %v14782_v13 = vld [vmem:[%s14749_s25 + $0xd4] sm:$0x7]  ;;  %v10729_v16 = vrot.slane %v14774_v9, 9  ;;  %s380_s20 = sand.u32 1, %s14585_s14  }
  0x40   : > { %v1020_v11 = vsel %vm14751_vm2, %v10728_v6, %v1019_v7  ;;  %v1021_v12 = vrot.slane %v1019_v7, 4  ;;  %v1026_v17 = vrot.slane %v14777_v10, 5  ;;  %v1029_v19 = vrot.slane %v14782_v13, 5  ;;  %v432_v22 = vld [vmem:[%s14749_s25 + $0x18] sm:$0xf]  ;;  %s18774_s30 = scalar_lea.sflag [#allocation4], %s380_s20 }
  0x41   : > { %v433_v23 = vld [vmem:[%s14749_s25 + $0x1c] sm:$0xf]  ;;  %v434_v24 = vld [vmem:[%s14749_s25 + $0x20] sm:$0x7]  ;;  %v14811_v28 = vld [vmem:[%s14749_s25 + $0x24] sm:$0xf] }
  0x42   : > { %v1023_v15 = vsel %vm14751_vm2, %v1021_v12, %v1022_v8  ;;  %v1027_v20 = vsel %vm14751_vm2, %v10729_v16, %v1026_v17  ;;  %v1028_v21 = vrot.slane %v1026_v17, 4  ;;  %v10802_v30 = vrot.slane %v432_v22, 10  ;;  %v14816_v32 = vld [vmem:[%s14749_s25 + $0x28] sm:$0xf]  ;;  %v14819_v33 = vld [vmem:[%s14749_s25 + $0x2c] sm:$0x7] }
  0x43   : > { %v14791_v18 = vcombine.low %v1020_v11, %v1023_v15  ;;  %v2034_v31 = vrot.slane %v433_v23, 6  ;;  %v2037_v34 = vrot.slane %v434_v24, 6  ;;  %v10803_v35 = vrot.slane %v14811_v28, 10  ;;  %v14829_v40 = vld [vmem:[%s14749_s25 + $0x30] sm:$0xf]  ;;  %p19890_p9 = scmp.ne.s32.totalorder %s19226_s23, 0 }
  0x44   : > { %v1030_v25 = vsel %vm14751_vm2, %v1028_v21, %v1029_v19  ;;  %v2041_v38 = vrot.slane %v14816_v32, 6  ;;  %v2044_v39 = vrot.slane %v14819_v33, 6  ;;  %v14839_v45 = vld [vmem:[%s14749_s25 + $0x34] sm:$0xf]  ;;  %v14842_v46 = vld [vmem:[%s14749_s25 + $0x38] sm:$0x7] }
  0x45   : > { %19236 = vst [vmem:[#allocation9_spill] sm:$0xff] %v14791_v18  ;;  %12311 = vmatprep.mubr.msk.bf16.mxu1 %vm524_vm3, %v14791_v18  ;;  %v14813_v29 = vcombine.low %v1027_v20, %v1030_v25  ;;  %v2035_v36 = vsel %vm14806_vm6, %v10802_v30, %v2034_v31  ;;  %v2036_v37 = vrot.slane %v2034_v31, 4  ;;  %19241 = vst [vmem:[#allocation12_spill] sm:$0xff] %v14842_v46  ;;  %v10804_v49 = vrot.slane %v14829_v40, 10  ;;  %v14853_v53 = vld [vmem:[%s14749_s25 + $0x3c] sm:$0xf] }
  0x46   : > { %v2042_v42 = vsel %vm14806_vm6, %v10803_v35, %v2041_v38  ;;  %v2043_v43 = vrot.slane %v2041_v38, 4  ;;  %v2048_v51 = vrot.slane %v14839_v45, 6  ;;  %v2051_v52 = vrot.slane %v14842_v46, 6  ;;  %v14856_v54 = vld [vmem:[%s14749_s25 + $0x40] sm:$0xf]  ;;  %s14600_s11 = smov [#allocation5]  }
  0x47   : > { %19240 = vst [vmem:[#allocation11_spill] sm:$0xff] %v14813_v29  ;;  %12312 = vmatmul.mubr.msk.bf16.vlgmr.msra.gmra.mrb[0].mxu1 %vm524_vm3, %v14813_v29  ;;  %v2038_v41 = vsel %vm14806_vm6, %v2036_v37, %v2037_v34  ;;  %v14864_v58 = vld [vmem:[%s14749_s25 + $0x44] sm:$0x7]  ;;  %v10805_v60 = vrot.slane %v14853_v53, 10  ;;  %v2055_v61 = vrot.slane %v14856_v54, 6  ;;  %s14531_s18 = sshll.u32 %s14600_s11, 4  ;;  %s14532_s18 = int_to_ptr.vmem [resolvable:$false] %s14531_s18 }
  0x48   : > { %12316 = vmatpush3.bf16.msra.mxu1 %v14322_v14  ;;  %v10822_v47 = vcombine.low %v2035_v36, %v2038_v41  ;;  %v2045_v48 = vsel %vm14806_vm6, %v2043_v43, %v2044_v39  ;;  %v2049_v56 = vsel %vm14806_vm6, %v10804_v49, %v2048_v51  ;;  %v2050_v57 = vrot.slane %v2048_v51, 4  ;;  %19243 = vst [vmem:[#allocation14_spill] sm:$0xff] %v14864_v58  ;;  %v14885_v7 = vld [vmem:[%s14749_s25 + $0x48] sm:$0xf]  ;;  %v14888_v8 = vld [vmem:[%s14749_s25 + $0x4c] sm:$0xf] }
  0x49   : > { %12317 = vmatprep.subr.bf16.mxu1 %v14323_v26  ;;  %v14848_v50 = vcombine.low %v2042_v42, %v2045_v48  ;;  %v2058_v63 = vrot.slane %v14864_v58, 6  ;;  %v2056_v2 = vsel %vm14806_vm6, %v10805_v60, %v2055_v61  ;;  %v2057_v6 = vrot.slane %v2055_v61, 4  ;;  %v14893_v12 = vld [vmem:[%s14749_s25 + $0x50] sm:$0x7]  ;;  %v14908_v22 = vld [vmem:[%s14749_s25 + $0x54] sm:$0xf] }
  0x4a   : > { %12319 = vmatprep.mubr.msk.bf16.mxu1 %vm524_vm3, %v10822_v47  ;;  %v2052_v59 = vsel %vm14806_vm6, %v2050_v57, %v2051_v52  ;;  %19245 = vst [vmem:[#allocation16_spill] sm:$0xff] %v14893_v12  ;;  %v10806_v15 = vrot.slane %v14885_v7, 10  ;;  %v2062_v16 = vrot.slane %v14888_v8, 6  ;;  %v2065_v17 = vrot.slane %v14893_v12, 6  ;;  %v14911_v23 = vld [vmem:[%s14749_s25 + $0x58] sm:$0xf] }
  0x4b   : > { %19242 = vst [vmem:[#allocation13_spill] sm:$0xff] %v14848_v50  ;;  %v14872_v62 = vcombine.low %v2049_v56, %v2052_v59  ;;  %v2059_v11 = vsel %vm14806_vm6, %v2057_v6, %v2058_v63  ;;  %v14914_v24 = vld [vmem:[%s14749_s25 + $0x5c] sm:$0x7]  ;;  %v2069_v30 = vrot.slane %v14911_v23, 6  ;;  %v14926_v36 = vld [vmem:[%s14749_s25 + $0x60] sm:$0xf] }
  0x4c   : > { %12318 = vmatpush3.bf16.msra.mxu1 %v14323_v26  ;;  %v14895_v14 = vcombine.low %v2056_v2, %v2059_v11  ;;  %v2063_v19 = vsel %vm14806_vm6, %v10806_v15, %v2062_v16  ;;  %v2064_v20 = vrot.slane %v2062_v16, 4  ;;  %19247 = vst [vmem:[#allocation18_spill] sm:$0xff] %v14914_v24  ;;  %v10807_v26 = vrot.slane %v14908_v22, 10  ;;  %v14931_v38 = vld [vmem:[%s14749_s25 + $0x64] sm:$0xf] }
  0x4d   : > { %12351 = vmatprep.subr.bf16.mxu1 %v14324_v44  ;;  %19244 = vst [vmem:[#allocation15_spill] sm:$0xff] %v14872_v62  ;;  %v2072_v31 = vrot.slane %v14914_v24, 6  ;;  %v2071_v35 = vrot.slane %v2069_v30, 4  ;;  %v14934_v39 = vld [vmem:[%s14749_s25 + $0x68] sm:$0x7]  ;;  %v10808_v42 = vrot.slane %v14926_v36, 10 }
  0x4e   : > { %19246 = vst [vmem:[#allocation17_spill] sm:$0xff] %v14895_v14  ;;  %v2066_v21 = vsel %vm14806_vm6, %v2064_v20, %v2065_v17  ;;  %v2070_v34 = vsel %vm14806_vm6, %v10807_v26, %v2069_v30  ;;  %19249 = vst [vmem:[#allocation20_spill] sm:$0xff] %v14934_v39  ;;  %v2076_v43 = vrot.slane %v14931_v38, 6  ;;  %v14946_v49 = vld [vmem:[%s14749_s25 + $0x6c] sm:$0xf] }
  0x4f   : > { %12320 = vmatmul.mubr.msk.bf16.vlgmr.msra.gmra.mrb[4].mxu1 %vm524_vm3, %v14848_v50  ;;  %v14916_v25 = vcombine.low %v2063_v19, %v2066_v21  ;;  %v2073_v37 = vsel %vm14806_vm6, %v2071_v35, %v2072_v31  ;;  %v14949_v51 = vld [vmem:[%s14749_s25 + $0x70] sm:$0xf]  ;;  %v10809_v57 = vrot.slane %v14946_v49, 10  ;;  %v14966_v2 = vld [vmem:[%s14749_s25 + $0x78] sm:$0xf]  ;;  %v15091_v50 = vshll.u32 %v14864_v58, 16 }
  0x50   : > { %12352 = vmatpush3.bf16.msra.mxu1 %v14324_v44  ;;  %12323 = vmatprep.mubr.msk.bf16.mxu1 %vm524_vm3, %v14872_v62  ;;  %v14936_v41 = vcombine.low %v2070_v34, %v2073_v37  ;;  %v2079_v44 = vrot.slane %v14934_v39, 6  ;;  %v2077_v47 = vsel %vm14806_vm6, %v10808_v42, %v2076_v43  ;;  %v2078_v48 = vrot.slane %v2076_v43, 4  ;;  %v14971_v11 = vld [vmem:[%s14749_s25 + $0x7c] sm:$0xf]  ;;  %v14976_v16 = vld [vmem:[%s14749_s25 + $0x80] sm:$0x7] }
  0x51   : > { %12353 = vmatprep.subr.bf16.mxu1 %v14325_v55  ;;  %19248 = vst [vmem:[#allocation19_spill] sm:$0xff] %v14916_v25  ;;  %v2083_v59 = vrot.slane %v14949_v51, 6  ;;  %19254 = vst [vmem:[#allocation25_spill] sm:$0xff] %v14976_v16  ;;  %v10810_v17 = vrot.slane %v14966_v2, 10  ;;  %v2090_v19 = vrot.slane %v14971_v11, 6  ;;  %v2093_v20 = vrot.slane %v14976_v16, 6 }
  0x52   : > { %19250 = vst [vmem:[#allocation21_spill] sm:$0xff] %v14936_v41  ;;  %v2080_v52 = vsel %vm14806_vm6, %v2078_v48, %v2079_v44  ;;  %v14986_v30 = vld [vmem:[%s14749_s25 + $0x84] sm:$0xf]  ;;  %v14991_v34 = vld [vmem:[%s14749_s25 + $0x88] sm:$0xf]  ;;  %19273 = vst [vmem:[#allocation43_spill] sm:$0xff] %v15091_v50 }
  0x53   : > { %v14956_v56 = vcombine.low %v2077_v47, %v2080_v52  ;;  %v2084_v61 = vsel %vm14806_vm6, %v10809_v57, %v2083_v59  ;;  %v2085_v63 = vrot.slane %v2083_v59, 4  ;;  %v2091_v21 = vsel %vm14806_vm6, %v10810_v17, %v2090_v19  ;;  %v14994_v35 = vld [vmem:[%s14749_s25 + $0x8c] sm:$0x7]  ;;  %v15009_v57 = vld [vmem:[%s14749_s25 + $0x90] sm:$0xf] }
  0x54   : > { %12354 = vmatpush3.bf16.msra.mxu1 %v14325_v55  ;;  %v14954_v55 = vld [vmem:[%s14749_s25 + $0x74] sm:$0x7]  ;;  %v2092_v26 = vrot.slane %v2090_v19, 4  ;;  %v10811_v42 = vrot.slane %v14986_v30, 10  ;;  %v2097_v43 = vrot.slane %v14991_v34, 6  ;;  %v2100_v44 = vrot.slane %v14994_v35, 6 }
  0x55   : > { %12387 = vmatprep.subr.bf16.mxu1 %v14878_v1  ;;  %19251 = vst [vmem:[#allocation22_spill] sm:$0xff] %v14954_v55  ;;  %19252 = vst [vmem:[#allocation23_spill] sm:$0xff] %v14956_v56  ;;  %v2086_v60 = vrot.slane %v14954_v55, 6  ;;  %v15006_v52 = vshrl.u32 %v14762_v3, 16  ;;  %v15023_v17 = vshll.u32 %v14762_v3, 16  ;;  %v15121_v62 = vshrl.u32 %v14885_v7, 16 }
  0x56   : > { %v2094_v31 = vsel %vm14806_vm6, %v2092_v26, %v2093_v20  ;;  %v2098_v47 = vsel %vm14806_vm6, %v10811_v42, %v2097_v43  ;;  %v2099_v48 = vrot.slane %v2097_v43, 4  ;;  %v15031_v26 = vshrl.u32 %v14765_v4, 16  ;;  %v15055_v42 = vld [vmem:[%s14749_s25 + $0xa4] sm:$0x7]  ;;  %v15106_v18 = vld [vmem:[%s14749_s25 + $0xb0] sm:$0x7] }
  0x57   : > { %12324 = vmatmul.mubr.msk.bf16.gmra.mrb[8].mxu1 %vm524_vm3, %v14895_v14  ;;  %v2087_v6 = vsel %vm14806_vm6, %v2085_v63, %v2086_v60  ;;  %v14996_v37 = vcombine.low %v2091_v21, %v2094_v31  ;;  %19256 = vst [vmem:[#allocation27_spill] sm:$0xff] %v15006_v52  ;;  %v15014_v60 = vld [vmem:[%s14749_s25 + $0x94] sm:$0xf]  ;;  %19258 = vst [vmem:[#allocation29_spill] sm:$0xff] %v15023_v17  ;;  %v15034_v31 = vshll.u32 %v14765_v4, 16  ;;  %v15038_v43 = vshrl.u32 %v14829_v40, 16 }
  0x58   : > { %12327 = vmatprep.mubr.msk.bf16.mxu1 %vm524_vm3, %v14916_v25  ;;  %v14973_v15 = vcombine.low %v2084_v61, %v2087_v6  ;;  %v2101_v59 = vsel %vm14806_vm6, %v2099_v48, %v2100_v44  ;;  %v15017_v61 = vld [vmem:[%s14749_s25 + $0x98] sm:$0x7]  ;;  %v10812_v6 = vrot.slane %v15009_v57, 10  ;;  %v2104_v19 = vrot.slane %v15014_v60, 6  ;;  %19259 = vst [vmem:[#allocation30_spill] sm:$0xff] %v15031_v26  ;;  %19275 = vst [vmem:[#allocation45_spill] sm:$0xff] %v15106_v18 }
  0x59   : > { %19255 = vst [vmem:[#allocation26_spill] sm:$0xff] %v14996_v37  ;;  %v15019_v63 = vcombine.low %v2098_v47, %v2101_v59  ;;  %v2107_v20 = vrot.slane %v15017_v61, 6  ;;  %19260 = vst [vmem:[#allocation31_spill] sm:$0xff] %v15034_v31  ;;  %v15043_v48 = vshll.u32 %v14829_v40, 16  ;;  %v15047_v21 = vld [vmem:[%s14749_s25 + $0x9c] sm:$0xf] }
  0x5a   : > { %19253 = vst [vmem:[#allocation24_spill] sm:$0xff] %v14973_v15  ;;  %19261 = vst [vmem:[#allocation32_spill] sm:$0xff] %v15038_v43  ;;  %v2105_v44 = vsel %vm14806_vm6, %v10812_v6, %v2104_v19  ;;  %v2106_v47 = vrot.slane %v2104_v19, 4  ;;  %v15061_v6 = vshll.u32 %v14839_v45, 16  ;;  %v15066_v59 = vshll.u32 %v14842_v46, 16 }
  0x5b   : > { %19257 = vst [vmem:[#allocation28_spill] sm:$0xff] %v15019_v63  ;;  %19262 = vst [vmem:[#allocation33_spill] sm:$0xff] %v15043_v48  ;;  %v15081_v25 = vshll.u32 %v14853_v53, 16  ;;  %v15084_v14 = vshrl.u32 %v14856_v54, 16  ;;  %v15096_v31 = vld [vmem:[%s14749_s25 + $0xa8] sm:$0xf] }
  0x5c   : > { %19264 = vst [vmem:[#allocation35_spill] sm:$0xff] %v15061_v6  ;;  %19266 = vst [vmem:[#allocation37_spill] sm:$0xff] %v15066_v59  ;;  %v15099_v26 = vld [vmem:[%s14749_s25 + $0xac] sm:$0xf]  ;;  %v15138_v59 = vshrl.u32 %v14908_v22, 16  ;;  %v15157_v43 = vshll.u32 %v14908_v22, 16 }
  0x5d   : > { %19270 = vst [vmem:[#allocation40_spill] sm:$0xff] %v15081_v25  ;;  %19271 = vst [vmem:[#allocation41_spill] sm:$0xff] %v15084_v14  ;;  %v15146_v14 = vld [vmem:[%s14749_s25 + $0xb8] sm:$0xf]  ;;  %v15149_v25 = vld [vmem:[%s14749_s25 + $0xbc] sm:$0x7] }
  0x5e   : > { %19274 = vst [vmem:[#allocation44_spill] sm:$0xff] %v15096_v31  ;;  %19278 = vst [vmem:[#allocation47_spill] sm:$0xff] %v15121_v62 }
  0x5f   : > { %12328 = vmatmul.mubr.msk.bf16.gmra.mrb[12].mxu1 %vm524_vm3, %v14936_v41  ;;  %v15074_v41 = vshrl.u32 %v14853_v53, 16  ;;  %19282 = vst [vmem:[#allocation51_spill] sm:$0xff] %v15138_v59  ;;  %19284 = vst [vmem:[#allocation53_spill] sm:$0xff] %v15146_v14 }
  0x60   : > { %12331 = vmatprep.mubr.msk.bf16.mxu1 %vm524_vm3, %v14956_v56  ;;  %v10813_v56 = vrot.slane %v15047_v21, 10  ;;  %19285 = vst [vmem:[#allocation54_spill] sm:$0xff] %v15149_v25  ;;  %19287 = vst [vmem:[#allocation56_spill] sm:$0xff] %v15157_v43 }
  0x61   : > { %19269 = vst [vmem:[#allocation39_spill] sm:$0xff] %v15074_v41  ;;  %v1153_v41 = vrot.slane %v15121_v62, 5  ;;  %v2128_v62 = vrot.slane %v15149_v25, 6 }
  0x67   : > { %12332 = vmatmul.mubr.msk.bf16.gmra.mrb[16].mxu1 %vm524_vm3, %v14973_v15  ;;  %v15058_v15 = vshrl.u32 %v14839_v45, 16 }
  0x68   : > { %12335 = vmatprep.mubr.msk.bf16.mxu1 %vm524_vm3, %v14996_v37  ;;  %v15052_v37 = vld [vmem:[%s14749_s25 + $0xa0] sm:$0xf] }
  0x69   : > { %19263 = vst [vmem:[#allocation34_spill] sm:$0xff] %v15058_v15  ;;  %v19277_v15 = vshrl.u32 %v14864_v58, 16 }
  0x6b   : > { %v15115_v17 = vrot.slane %v19277_v15, 5  ;;  %v15130_v15 = vshrl.u32 %v14888_v8, 16 }
  0x6d   : > { %19280 = vst [vmem:[#allocation49_spill] sm:$0xff] %v15130_v15 }
  0x6f   : > { %12336 = vmatmul.mubr.msk.bf16.gmra.mrb[20].mxu1 %vm524_vm3, %v15019_v63  ;;  %v2108_v63 = vsel %vm14806_vm6, %v2106_v47, %v2107_v20  ;;  %v19267_v20 = vshrl.u32 %v14842_v46, 16 }
  0x70   : > { %v15063_v19 = vcombine.low %v2105_v44, %v2108_v63  ;;  %v2111_v63 = vrot.slane %v15052_v37, 6  ;;  %v2114_v44 = vrot.slane %v15055_v42, 6 }
  0x71   : > { %v15071_v47 = vrot.slane %v19267_v20, 5  ;;  %v15087_v20 = vshll.u32 %v14856_v54, 16 }
  0x72   : > { %19265 = vst [vmem:[#allocation36_spill] sm:$0xff] %v15063_v19  ;;  %12339 = vmatprep.mubr.msk.bf16.mxu1 %vm524_vm3, %v15063_v19  ;;  %v2112_v19 = vsel %vm14806_vm6, %v10813_v56, %v2111_v63  ;;  %v2113_v52 = vrot.slane %v2111_v63, 4 }
  0x73   : > { %19268 = vst [vmem:[#allocation38_spill] sm:$0xff] %v15071_v47  ;;  %19272 = vst [vmem:[#allocation42_spill] sm:$0xff] %v15087_v20  ;;  %v10814_v47 = vrot.slane %v15096_v31, 10  ;;  %v15141_v20 = vld [vmem:[%s14749_s25 + $0xb4] sm:$0xf] }
  0x74   : > { %v2115_v29 = vsel %vm14806_vm6, %v2113_v52, %v2114_v44  ;;  %v2118_v52 = vrot.slane %v15099_v26, 6  ;;  %v15135_v44 = vshll.u32 %v14888_v8, 16  ;;  %19283 = vst [vmem:[#allocation52_spill] sm:$0xff] %v15141_v20 }
  0x75   : > { %v15110_v56 = vcombine.low %v2112_v19, %v2115_v29  ;;  %v15124_v29 = vshll.u32 %v14885_v7, 16  ;;  %v2121_v19 = vrot.slane %v15106_v18, 6  ;;  %v1162_v18 = vrot.slane %v15130_v15, 5 }
  0x76   : > { %v2119_v63 = vsel %vm14806_vm6, %v10814_v47, %v2118_v52  ;;  %v2120_v6 = vrot.slane %v2118_v52, 4  ;;  %19281 = vst [vmem:[#allocation50_spill] sm:$0xff] %v15135_v44  ;;  %v1165_v47 = vrot.slane %v15135_v44, 6 }
  0x77   : > { %19276 = vst [vmem:[#allocation46_spill] sm:$0xff] %v15110_v56  ;;  %19279 = vst [vmem:[#allocation48_spill] sm:$0xff] %v15124_v29  ;;  %12340 = vmatmul.mubr.msk.bf16.gmra.mrb[24].mxu1 %vm524_vm3, %v15110_v56  ;;  %v1156_v48 = vrot.slane %v15124_v29, 6  ;;  %v2132_v29 = vrot.slane %v14765_v4, 6  ;;  %v2142_v4 = vrot.slane %v14782_v13, 6  ;;  %v928_v13 = vrot.slane %v14816_v32, 5 }
  0x78   : > { %v2122_v56 = vsel %vm14806_vm6, %v2120_v6, %v2121_v19  ;;  %v10815_v6 = vrot.slane %v15141_v20, 10  ;;  %v2125_v19 = vrot.slane %v15146_v14, 6  ;;  %v1184_v20 = vrot.slane %v15157_v43, 6 }
  0x79   : > { %v15153_v52 = vcombine.low %v2119_v63, %v2122_v56  ;;  %v1181_v56 = vrot.slane %v15138_v59, 5  ;;  %v10816_v63 = vrot.slane %v14762_v3, 10  ;;  %v2134_v25 = vrot.slane %v2132_v29, 4 }
  0x7a   : > { %v2126_v15 = vsel %vm14806_vm6, %v10815_v6, %v2125_v19  ;;  %v2127_v31 = vrot.slane %v2125_v19, 4  ;;  %v10817_v59 = vrot.slane %v14774_v9, 10  ;;  %v2139_v3 = vrot.slane %v14777_v10, 6 }
  0x7b   : > { %19286 = vst [vmem:[#allocation55_spill] sm:$0xff] %v15153_v52  ;;  %12343 = vmatprep.mubr.msk.bf16.mxu1 %vm524_vm3, %v15153_v52  ;;  %v2135_v52 = vrot.slane %v14768_v5, 6  ;;  %v2133_v14 = vsel %vm14806_vm6, %v10816_v63, %v2132_v29  ;;  %v15181_v6 = vshrl.u32 %v14911_v23, 16  ;;  %v10715_v63 = vrot.slane %v14811_v28, 9  ;;  %v14330_v28 = vld [vmem:[%s18817_s2] sm:$0xff]  }
  0x7c   : > { %v2129_v44 = vsel %vm14806_vm6, %v2127_v31, %v2128_v62  ;;  %v15189_v29 = vshll.u32 %v14911_v23, 16  ;;  %v2141_v9 = vrot.slane %v2139_v3, 4  ;;  %v15193_v31 = vor.u32 %v1156_v48, %v1153_v41  ;;  %12207 = vmatprep.subr.bf16.mxu0 %v14330_v28 }
  0x7d   : > { %19288 = vst [vmem:[#allocation57_spill] sm:$0xff] %v15181_v6  ;;  %v15183_v19 = vcombine.low %v2126_v15, %v2129_v44  ;;  %v2136_v43 = vsel %vm14806_vm6, %v2134_v25, %v2135_v52  ;;  %v15196_v10 = vshll.u32 %v14893_v12, 16  ;;  %v931_v25 = vrot.slane %v14819_v33, 5  ;;  %12208 = vmatpush3.bf16.msra.mxu0 %v14330_v28 }
  0x7e   : > { %19289 = vst [vmem:[#allocation58_spill] sm:$0xff] %v15189_v29  ;;  %v15191_v62 = vcombine.low %v2133_v14, %v2136_v43  ;;  %v2140_v41 = vsel %vm14806_vm6, %v10817_v59, %v2139_v3  ;;  %v2143_v43 = vsel %vm14806_vm6, %v2141_v9, %v2142_v4  ;;  %v935_v48 = vrot.slane %v14839_v45, 5 }
  0x7f   : > { %19290 = vst [vmem:[#allocation59_spill] sm:$0xff] %v15196_v10  ;;  %12344 = vmatmul.mubr.msk.bf16.gmra.mrb[28].mxu1 %vm524_vm3, %v15183_v19  ;;  %v15213_v32 = vor.u32 %v1165_v47, %v1162_v18  ;;  %v929_v33 = vsel %vm14751_vm2, %v10715_v63, %v928_v13  ;;  %v930_v44 = vrot.slane %v928_v13, 4  ;;  %v942_v15 = vrot.slane %v14856_v54, 5 }
  0x80   : > { %12347 = vmatprep.mubr.msk.bf16.mxu1 %vm524_vm3, %v15191_v62  ;;  %v15218_v52 = vor.u32 %v1184_v20, %v1181_v56  ;;  %v1190_v14 = vrot.slane %v15181_v6, 5  ;;  %v1193_v59 = vrot.slane %v15189_v29, 6  ;;  %v15223_v3 = vshll.u32 %v14914_v24, 16 }
  0x81   : > { %v15225_v45 = vcombine.low %v2140_v41, %v2143_v43  ;;  %v932_v18 = vsel %vm14751_vm2, %v930_v44, %v931_v25  ;;  %v10716_v47 = vrot.slane %v14829_v40, 9  ;;  %v938_v54 = vrot.slane %v14842_v46, 5  ;;  %v14331_v25 = vld [vmem:[%s18817_s2 + $0x8] sm:$0xff]  }
  0x82   : > { %19291 = vst [vmem:[#allocation60_spill] sm:$0xff] %v15223_v3  ;;  %v15231_v4 = vcombine.low %v929_v33, %v932_v18  ;;  %v937_v20 = vrot.slane %v935_v48, 4  ;;  %v10717_v56 = vrot.slane %v14853_v53, 9  ;;  %v944_v63 = vrot.slane %v942_v15, 4  ;;  %12209 = vmatprep.subr.bf16.mxu0 %v14331_v25 }
  0x83   : > { %19292 = vst [vmem:[#allocation61_spill] sm:$0xff] %v15225_v45  ;;  %v945_v9 = vrot.slane %v14864_v58, 5  ;;  %v19293_v13 = vshrl.u32 %v14893_v12, 16  ;;  %v15240_v43 = vor.u32 %v1193_v59, %v1190_v14  ;;  %v15243_v40 = vshrl.u32 %v14926_v36, 16  ;;  %12210 = vmatpush3.bf16.msra.mxu0 %v14331_v25 }
  0x84   : > { %v19295_v18 = vshrl.u32 %v14914_v24, 16  ;;  %v936_v59 = vsel %vm14751_vm2, %v10716_v47, %v935_v48  ;;  %v939_v33 = vsel %vm14751_vm2, %v937_v20, %v938_v54  ;;  %v949_v44 = vrot.slane %v14888_v8, 5 }
  0x85   : > { %v15237_v28 = vrot.slane %v19293_v13, 5  ;;  %19294 = vst [vmem:[#allocation62_spill] sm:$0xff] %v15243_v40  ;;  %v943_v53 = vsel %vm14751_vm2, %v10717_v56, %v942_v15  ;;  %v946_v14 = vsel %vm14751_vm2, %v944_v63, %v945_v9  ;;  %v956_v41 = vrot.slane %v14911_v23, 5  ;;  %v14327_v23 = vld [vmem:[%s18818_s3 + $0x48] sm:$0xff]  }
  0x86   : > { %v15253_v13 = vrot.slane %v19295_v18, 5  ;;  %v15266_v18 = vshll.u32 %v14926_v36, 16  ;;  %v1209_v47 = vrot.slane %v15243_v40, 5  ;;  %v15276_v54 = vshrl.u32 %v14931_v38, 16 }
  0x87   : > { %12348 = vmatmul.mubr.msk.bf16.gmra.mrb[0].mxu1 %vm524_vm3, %v15225_v45  ;;  %v15279_v8 = vshll.u32 %v14931_v38, 16  ;;  %v15282_v20 = vshrl.u32 %v14946_v49, 16  ;;  %v15284_v15 = vcombine.low %v936_v59, %v939_v33  ;;  %v10718_v56 = vrot.slane %v14885_v7, 9 }
  0x88   : > { %12355 = vmatprep.mubr.msk.bf16.mxu1 %vm524_vm3, %v15231_v4  ;;  %19296 = vst [vmem:[#allocation63_spill] sm:$0xff] %v15266_v18  ;;  %19297 = vst [vmem:[#allocation64_spill] sm:$0xff] %v15276_v54  ;;  %v15290_v63 = vcombine.low %v943_v53, %v946_v14  ;;  %v951_v9 = vrot.slane %v949_v44, 4  ;;  %v952_v25 = vrot.slane %v14893_v12, 5  ;;  %v15294_v48 = vshll.u32 %v14946_v49, 16 }
  0x89   : > { %19298 = vst [vmem:[#allocation65_spill] sm:$0xff] %v15279_v8  ;;  %19299 = vst [vmem:[#allocation66_spill] sm:$0xff] %v15282_v20  ;;  %v10719_v58 = vrot.slane %v14908_v22, 9  ;;  %v958_v46 = vrot.slane %v956_v41, 4  ;;  %v959_v33 = vrot.slane %v14914_v24, 5  ;;  %v1212_v59 = vrot.slane %v15266_v18, 6 }
  0x8a   : > { %19300 = vst [vmem:[#allocation67_spill] sm:$0xff] %v15294_v48  ;;  %v1218_v7 = vrot.slane %v15276_v54, 5  ;;  %v1221_v40 = vrot.slane %v15279_v8, 6  ;;  %v15303_v14 = vshll.u32 %v14934_v39, 16  ;;  %v15306_v12 = vshrl.u32 %v14949_v51, 16 }
  0x8b   : > { %v1237_v22 = vrot.slane %v15282_v20, 5  ;;  %v950_v24 = vsel %vm14751_vm2, %v10718_v56, %v949_v44  ;;  %v953_v53 = vsel %vm14751_vm2, %v951_v9, %v952_v25  ;;  %v963_v54 = vrot.slane %v14931_v38, 5  ;;  %v15328_v44 = vld [vmem:[%s18818_s3 + $0x50] sm:$0xff]  }
  0x8c   : > { %19301 = vst [vmem:[#allocation68_spill] sm:$0xff] %v15303_v14  ;;  %19302 = vst [vmem:[#allocation69_spill] sm:$0xff] %v15306_v12  ;;  %v1240_v8 = vrot.slane %v15294_v48, 6  ;;  %v957_v20 = vsel %vm14751_vm2, %v10719_v58, %v956_v41  ;;  %v970_v18 = vrot.slane %v14949_v51, 5  ;;  %v15330_v56 = vor.u32 %v1212_v59, %v1209_v47 }
  0x8d   : > { %v19303_v38 = vshrl.u32 %v14934_v39, 16  ;;  %v15337_v25 = vshll.u32 %v14949_v51, 16  ;;  %v15339_v58 = vor.u32 %v1221_v40, %v1218_v7  ;;  %v18911_v41 = vshrl.u32 %v14954_v55, 16 }
  0x8e   : > { %v10720_v47 = vrot.slane %v14926_v36, 9  ;;  %v965_v59 = vrot.slane %v963_v54, 4  ;;  %v966_v6 = vrot.slane %v14934_v39, 5  ;;  %v10721_v51 = vrot.slane %v14946_v49, 9 }
  0x8f   : > { %12356 = vmatmul.mubr.msk.bf16.vlgmr.msra.gmra.mrb[4].mxu1 %vm524_vm3, %v15284_v15  ;;  %v15334_v9 = vrot.slane %v19303_v38, 5  ;;  %19304 = vst [vmem:[#allocation70_spill] sm:$0xff] %v15337_v25  ;;  %v15349_v38 = vor.u32 %v1240_v8, %v1237_v22  ;;  %v972_v40 = vrot.slane %v970_v18, 4  ;;  %v973_v7 = vrot.slane %v14954_v55, 5 }
  0x90   : > { %12388 = vmatpush3.bf16.msra.mxu1 %v14878_v1  ;;  %12359 = vmatprep.mubr.msk.bf16.mxu1 %vm524_vm3, %v15290_v63  ;;  %v960_v1 = vsel %vm14751_vm2, %v958_v46, %v959_v33  ;;  %v1246_v46 = vrot.slane %v15306_v12, 5  ;;  %v15343_v33 = vcombine.low %v950_v24, %v953_v53  ;;  %v19305_v24 = vrot.slane %v15196_v10, 6  ;;  %v19333_v10 = vld [vmem:[#allocation54_spill] sm:$0xff] }
  0x91   : > { %12389 = vmatprep.subr.bf16.mxu1 %v14327_v23  ;;  %v15345_v48 = vcombine.low %v957_v20, %v960_v1  ;;  %v19306_v36 = vrot.slane %v15223_v3, 6  ;;  %v1249_v1 = vrot.slane %v15337_v25, 6  ;;  %v15362_v8 = vshrl.u32 %v14966_v2, 16 }
  0x92   : > { %v1176_v20 = vor.u32 %v19305_v24, %v15237_v28  ;;  %v1231_v22 = vrot.slane %v15303_v14, 6  ;;  %v15369_v39 = vrot.slane %v18911_v41, 5  ;;  %v15374_v28 = vshll.u32 %v14954_v55, 16 }
  0x93   : > { %v1204_v53 = vor.u32 %v19306_v36, %v15253_v13  ;;  %19307 = vst [vmem:[#allocation71_spill] sm:$0xff] %v15362_v8  ;;  %v964_v13 = vsel %vm14751_vm2, %v10720_v47, %v963_v54  ;;  %v967_v24 = vsel %vm14751_vm2, %v965_v59, %v966_v6  ;;  %v977_v36 = vrot.slane %v14971_v11, 5 }
  0x94   : > { %12390 = vmatpush3.bf16.msra.mxu1 %v14327_v23  ;;  %19308 = vst [vmem:[#allocation72_spill] sm:$0xff] %v15374_v28  ;;  %v971_v23 = vsel %vm14751_vm2, %v10721_v51, %v970_v18  ;;  %v974_v49 = vsel %vm14751_vm2, %v972_v40, %v973_v7  ;;  %v984_v55 = vrot.slane %v14991_v34, 5  ;;  %v15389_v14 = vor.u32 %v1249_v1, %v1246_v46 }
  0x95   : > { %12423 = vmatprep.subr.bf16.mxu1 %v15328_v44  ;;  %v1265_v3 = vrot.slane %v15362_v8, 5  ;;  %v15393_v54 = vshll.u32 %v14966_v2, 16  ;;  %v15396_v6 = vshrl.u32 %v14971_v11, 16  ;;  %v15399_v47 = vshll.u32 %v14971_v11, 16 }
  0x96   : > { %v15401_v18 = vcombine.low %v964_v13, %v967_v24  ;;  %v10722_v59 = vrot.slane %v14966_v2, 9  ;;  %v980_v51 = vrot.slane %v14976_v16, 5  ;;  %v19312_v46 = vmov 0 }
  0x97   : > { %12360 = vmatmul.mubr.msk.bf16.gmra.mrb[8].mxu1 %vm524_vm3, %v15343_v33  ;;  %19309 = vst [vmem:[#allocation73_spill] sm:$0xff] %v15393_v54  ;;  %19310 = vst [vmem:[#allocation74_spill] sm:$0xff] %v15396_v6  ;;  %v19313_v46 = vsel %vm15407_vm9, 4294967295, %v19312_v46  ;;  %v15411_v40 = vcombine.low %v971_v23, %v974_v49  ;;  %v979_v7 = vrot.slane %v977_v36, 4  ;;  %v10723_v1 = vrot.slane %v14986_v30, 9 }
  0x98   : > { %12363 = vmatprep.mubr.msk.bf16.mxu1 %vm524_vm3, %v15345_v48  ;;  %19311 = vst [vmem:[#allocation75_spill] sm:$0xff] %v15399_v47  ;;  %19314 = vst [vmem:[#allocation76_spill] sm:$0xff] %v19313_v46  ;;  %v19316_v11 = vrot.slane %v15193_v31, 4  ;;  %v986_v2 = vrot.slane %v984_v55, 4  ;;  %v987_v24 = vrot.slane %v14994_v35, 5  ;;  %v19317_v41 = vrot.slane %v15213_v32, 4 }
  0x99   : > { %19315 = vst [vmem:[#allocation77_spill] sm:$0xff] %v15411_v40  ;;  %v19318_v49 = vrot.slane %v15218_v52, 4  ;;  %v19319_v12 = vrot.slane %v15240_v43, 4  ;;  %v15442_v52 = vshll.u32 %v14976_v16, 16  ;;  %v1015_v29 = vrot.slane %v19333_v10, 5 }
  0x9a   : > { %v1167_v13 = vsel %vm15407_vm9, %v19316_v11, %v15213_v32  ;;  %v1177_v8 = vsel %vm15407_vm9, %v19317_v41, %v1176_v20  ;;  %v1268_v11 = vrot.slane %v15393_v54, 6  ;;  %v1259_v32 = vrot.slane %v15374_v28, 6 }
  0x9b   : > { %v1195_v23 = vsel %vm15407_vm9, %v19318_v49, %v15240_v43  ;;  %v1205_v31 = vsel %vm15407_vm9, %v19319_v12, %v1204_v53  ;;  %19320 = vst [vmem:[#allocation78_spill] sm:$0xff] %v15442_v52  ;;  %v978_v12 = vsel %vm14751_vm2, %v10722_v59, %v977_v36  ;;  %v981_v43 = vsel %vm14751_vm2, %v979_v7, %v980_v51 }
  0x9c   : > { %v991_v53 = vrot.slane %v15014_v60, 5  ;;  %v985_v41 = vsel %vm14751_vm2, %v10723_v1, %v984_v55  ;;  %v988_v35 = vsel %vm14751_vm2, %v986_v2, %v987_v24  ;;  %v998_v20 = vrot.slane %v15052_v37, 5 }
  0x9d   : > { %v15462_v36 = vor.u32 %v1268_v11, %v1265_v3  ;;  %v10724_v60 = vrot.slane %v15009_v57, 9  ;;  %v10725_v59 = vrot.slane %v15047_v21, 9  ;;  %v19321_v55 = vrot.slane %v15091_v50, 6  ;;  %v394_v21 = vld [vmem:[%s15460_s28] sm:$0xff]  ;;  %v395_v11 = vld [vmem:[%s15460_s28 + $0x8] sm:$0xff] }
  0x9e   : > { %v15471_v7 = vcombine.low %v1167_v13, %v1177_v8  ;;  %v15473_v37 = vcombine.low %v1195_v23, %v1205_v31  ;;  %v15475_v1 = vcombine.low %v978_v12, %v981_v43  ;;  %v1232_v2 = vor.u32 %v1231_v22, %v15334_v9  ;;  %v399_v22 = vld [vmem:[%s15460_s28 + $0x28] sm:$0xff] }
  0x9f   : > { %12364 = vmatmul.mubr.msk.bf16.gmra.mrb[12].mxu1 %vm524_vm3, %v15401_v18  ;;  %v15469_v51 = vor.u32 %v19321_v55, %v15115_v17  ;;  %v15478_v3 = vcombine.low %v985_v41, %v988_v35  ;;  %v993_v24 = vrot.slane %v991_v53, 4  ;;  %v994_v57 = vrot.slane %v15017_v61, 5  ;;  %v396_v41 = vld [vmem:[%s15460_s28 + $0x10] sm:$0xff]  ;;  %v19329_v13 = vld [vmem:[#allocation53_spill] sm:$0xff] }
  0xa0   : > { %12367 = vmatprep.mubr.msk.bf16.mxu1 %vm524_vm3, %v15411_v40  ;;  %19322 = vst [vmem:[#allocation79_spill] sm:$0xff] %v15471_v7  ;;  %19323 = vst [vmem:[#allocation80_spill] sm:$0xff] %v15473_v37  ;;  %v19326_v17 = vshrl.u32 %v14976_v16, 16  ;;  %v1000_v23 = vrot.slane %v998_v20, 4  ;;  %v1001_v31 = vrot.slane %v15055_v42, 5  ;;  %v1260_v9 = vor.u32 %v1259_v32, %v15369_v39  ;;  %v19328_v42 = vld [vmem:[#allocation44_spill] sm:$0xff] }
  0xa1   : > { %19324 = vst [vmem:[#allocation81_spill] sm:$0xff] %v15475_v1  ;;  %19325 = vst [vmem:[#allocation82_spill] sm:$0xff] %v15478_v3  ;;  %v15492_v61 = vshrl.u32 %v14986_v30, 16  ;;  %v1005_v35 = vrot.slane %v15099_v26, 5  ;;  %v992_v12 = vsel %vm14751_vm2, %v10724_v60, %v991_v53  ;;  %v999_v43 = vsel %vm14751_vm2, %v10725_v59, %v998_v20  ;;  %v397_v39 = vld [vmem:[%s15460_s28 + $0x18] sm:$0xff]  ;;  %v19330_v59 = vld [vmem:[#allocation45_spill] sm:$0xff] }
  0xa2   : > { %v15485_v8 = vrot.slane %v19326_v17, 5  ;;  %v10726_v55 = vrot.slane %v19328_v42, 9  ;;  %v492_v32 = vpack.c.bf16 %v395_v11, %v394_v21  ;;  %v398_v17 = vld [vmem:[%s15460_s28 + $0x20] sm:$0xff]  ;;  %v995_v26 = vsel %vm14751_vm2, %v993_v24, %v994_v57 }
  0xa3   : > { %19327 = vst [vmem:[#allocation83_spill] sm:$0xff] %v15492_v61  ;;  %v1012_v49 = vrot.slane %v19329_v13, 5  ;;  %v10191_v53 = vsel %vm524_vm3, %v394_v21, 0.0  ;;  %v10192_v20 = vsel %vm524_vm3, %v395_v11, 0.0  ;;  %v1002_v60 = vsel %vm14751_vm2, %v1000_v23, %v1001_v31  ;;  %v19332_v21 = vld [vmem:[#allocation52_spill] sm:$0xff]  ;;  %v400_v31 = vld [vmem:[%s15460_s28 + $0x30] sm:$0xff] }
  0xa4   : > { %v1008_v42 = vrot.slane %v19330_v59, 5  ;;  %12211 = vmatprep.mubr.msk.bf16.mxu0 %vm524_vm3, %v492_v32  ;;  %v10193_v16 = vadd.f32 %v10192_v20, %v10191_v53  ;;  %v10194_v28 = vsel %vm524_vm3, %v396_v41, 0.0  ;;  %v1007_v54 = vrot.slane %v1005_v35, 4  ;;  %v401_v59 = vld [vmem:[%s15460_s28 + $0x38] sm:$0xff] }
  0xa5   : > { %v10196_v24 = vsel %vm524_vm3, %v397_v39, 0.0  ;;  %v493_v57 = vpack.c.bf16 %v397_v39, %v396_v41  ;;  %v494_v13 = vpack.c.bf16 %v399_v22, %v398_v17  ;;  %v15519_v25 = vcombine.low %v992_v12, %v995_v26  ;;  %v402_v26 = vld [vmem:[%s15460_s28 + $0x40] sm:$0xff] }
  0xa6   : > { %v10727_v11 = vrot.slane %v19332_v21, 9  ;;  %v10195_v23 = vadd.f32 %v10194_v28, %v10193_v16  ;;  %v19334_v32 = vrot.slane %v15330_v56, 4  ;;  %v15530_v20 = vcombine.low %v999_v43, %v1002_v60  ;;  %v403_v60 = vld [vmem:[%s15460_s28 + $0x48] sm:$0xff] }
  0xa7   : > { %12368 = vmatmul.mubr.msk.bf16.gmra.mrb[16].mxu1 %vm524_vm3, %v15475_v1  ;;  %19331 = vst [vmem:[#allocation44_spill] sm:$0xff] %v15519_v25  ;;  %v1014_v41 = vrot.slane %v1012_v49, 4  ;;  %12212 = vmatmul.mubr.msk.bf16.vlgmr.msra.gmra.mrb[0].mxu0 %vm524_vm3, %v493_v57  ;;  %v10198_v12 = vsel %vm524_vm3, %v398_v17, 0.0  ;;  %v19336_v10 = vrot.slane %v15339_v58, 4  ;;  %v19337_v56 = vrot.slane %v15349_v38, 4 }
  0xa8   : > { %12371 = vmatprep.mubr.msk.bf16.mxu1 %vm524_vm3, %v15478_v3  ;;  %v1223_v53 = vsel %vm15407_vm9, %v19334_v32, %v15339_v58  ;;  %19335 = vst [vmem:[#allocation53_spill] sm:$0xff] %v15530_v20  ;;  %v15544_v43 = vshll.u32 %v14986_v30, 16  ;;  %v10197_v39 = vadd.f32 %v10196_v24, %v10195_v23  ;;  %12215 = vmatprep.mubr.msk.bf16.mxu0 %vm524_vm3, %v494_v13  ;;  %v19339_v17 = vrot.slane %v15389_v14, 4  ;;  %v15578_v21 = vld [vmem:[%s14749_s25 + $0x2c] sm:$0x7]  ;;  %v19372_v3 = vld [vmem:[#allocation42_spill] sm:$0xff] }
  0xa9   : > { %v1233_v16 = vsel %vm15407_vm9, %v19336_v10, %v1232_v2  ;;  %v1251_v28 = vsel %vm15407_vm9, %v19337_v56, %v15389_v14  ;;  %v1006_v2 = vsel %vm14751_vm2, %v10726_v55, %v1005_v35  ;;  %v1009_v38 = vsel %vm14751_vm2, %v1007_v54, %v1008_v42  ;;  %v14420_v14 = vld [vmem:[%s14749_s25 + $0x24] sm:$0xf]  ;;  %19344 = vst [vmem:[#allocation86_spill] sm:$0xff] %v15578_v21  ;;  %v15588_v56 = vld [vmem:[%s14749_s25 + $0xdc] sm:$0xf] }
  0xaa   : > { %19338 = vst [vmem:[#allocation45_spill] sm:$0xff] %v15544_v43  ;;  %v1261_v58 = vsel %vm15407_vm9, %v19339_v17, %v1260_v9  ;;  %v10200_v30 = vsel %vm524_vm3, %v399_v22, 0.0  ;;  %v1013_v24 = vsel %vm14751_vm2, %v10727_v11, %v1012_v49  ;;  %v15563_v57 = vshrl.u32 %v14420_v14, 16  ;;  %v14421_v22 = vld [vmem:[%s14749_s25 + $0x28] sm:$0xf] }
  0xab   : > { %v15565_v9 = vshll.u32 %v14420_v14, 16  ;;  %v10199_v35 = vadd.f32 %v10198_v12, %v10197_v39  ;;  %v1016_v54 = vsel %vm14751_vm2, %v1014_v41, %v1015_v29  ;;  %v15572_v55 = vshrl.u32 %v14421_v22, 16 }
  0xac   : > { %19340 = vst [vmem:[#allocation52_spill] sm:$0xff] %v15563_v57  ;;  %v495_v42 = vpack.c.bf16 %v401_v59, %v400_v31  ;;  %v10202_v49 = vsel %vm524_vm3, %v400_v31, 0.0  ;;  %v15575_v13 = vshll.u32 %v14421_v22, 16  ;;  %v496_v32 = vpack.c.bf16 %v403_v60, %v402_v26 }
  0xad   : > { %19341 = vst [vmem:[#allocation54_spill] sm:$0xff] %v15565_v9  ;;  %19342 = vst [vmem:[#allocation84_spill] sm:$0xff] %v15572_v55  ;;  %v10201_v23 = vadd.f32 %v10200_v30, %v10199_v35  ;;  %v15581_v12 = vcombine.low %v1223_v53, %v1233_v16  ;;  %v19346_v29 = vrot.slane %v15396_v6, 5  ;;  %v19347_v41 = vrot.slane %v15399_v47, 6  ;;  %v404_v30 = vld [vmem:[%s15460_s28 + $0x50] sm:$0xff]  ;;  %v405_v35 = vld [vmem:[%s15460_s28 + $0x58] sm:$0xff] }
  0xae   : > { %19343 = vst [vmem:[#allocation85_spill] sm:$0xff] %v15575_v13  ;;  %v15591_v31 = vshll.u32 %v15578_v21, 16  ;;  %v10204_v39 = vsel %vm524_vm3, %v401_v59, 0.0  ;;  %v15594_v17 = vcombine.low %v1251_v28, %v1261_v58  ;;  %v15596_v14 = vcombine.low %v1006_v2, %v1009_v38  ;;  %v15616_v2 = vld [vmem:[%s14749_s25 + $0xd8] sm:$0xf] }
  0xaf   : > { %12372 = vmatmul.mubr.msk.bf16.gmra.mrb[20].mxu1 %vm524_vm3, %v15519_v25  ;;  %19345 = vst [vmem:[#allocation87_spill] sm:$0xff] %v15581_v12  ;;  %v1278_v10 = vor.u32 %v19347_v41, %v19346_v29  ;;  %v1069_v53 = vrot.slane %v15563_v57, 5  ;;  %v10203_v16 = vadd.f32 %v10202_v49, %v10201_v23  ;;  %v19351_v22 = vrot.slane %v15442_v52, 6  ;;  %12216 = vmatmul.mubr.msk.bf16.gmra.mrb[4].mxu0 %vm524_vm3, %v495_v42  ;;  %v406_v49 = vld [vmem:[%s15460_s28 + $0x60] sm:$0xff]  ;;  %v407_v23 = vld [vmem:[%s15460_s28 + $0x68] sm:$0xff]  ;;  %v19369_v25 = vld [vmem:[#allocation11_spill] sm:$0xff] }
  0xb0   : > { %12375 = vmatprep.mubr.msk.bf16.mxu1 %vm524_vm3, %v15530_v20  ;;  %19348 = vst [vmem:[#allocation88_spill] sm:$0xff] %v15591_v31  ;;  %19349 = vst [vmem:[#allocation89_spill] sm:$0xff] %v15594_v17  ;;  %v15604_v41 = vcombine.low %v1013_v24, %v1016_v54  ;;  %v1072_v11 = vrot.slane %v15565_v9, 6  ;;  %v10206_v59 = vsel %vm524_vm3, %v402_v26, 0.0  ;;  %v19353_v28 = vrot.slane %v15462_v36, 4  ;;  %12219 = vmatprep.mubr.msk.bf16.mxu0 %vm524_vm3, %v496_v32 }
  0xb1   : > { %19350 = vst [vmem:[#allocation90_spill] sm:$0xff] %v15596_v14  ;;  %v1288_v29 = vor.u32 %v19351_v22, %v15485_v8  ;;  %v1078_v8 = vrot.slane %v15572_v55, 5  ;;  %v1081_v38 = vrot.slane %v15575_v13, 6  ;;  %v10205_v24 = vadd.f32 %v10204_v39, %v10203_v16  ;;  %v15635_v32 = vld [vmem:[%s14749_s25 + $0xe0] sm:$0x7] }
  0xb2   : > { %19352 = vst [vmem:[#allocation91_spill] sm:$0xff] %v15604_v41  ;;  %v15613_v58 = vsel %vm15407_vm9, %v19353_v28, %v1278_v10  ;;  %v1280_v54 = vrot.slane %v1278_v10, 4  ;;  %v1293_v42 = vrot.slane %v15492_v61, 5  ;;  %v15623_v26 = vshrl.u32 %v14991_v34, 16  ;;  %19356 = vst [vmem:[#allocation94_spill] sm:$0xff] %v15635_v32 }
  0xb3   : > { %v10208_v36 = vsel %vm524_vm3, %v403_v60, 0.0  ;;  %v1296_v22 = vrot.slane %v15544_v43, 6  ;;  %v15630_v28 = vshll.u32 %v14991_v34, 16  ;;  %v2455_v10 = vrot.slane %v15588_v56, 5  ;;  %v15645_v55 = vld [vmem:[%s14749_s25 + $0x8c] sm:$0x7] }
  0xb4   : > { %19354 = vst [vmem:[#allocation92_spill] sm:$0xff] %v15623_v26  ;;  %v10207_v39 = vadd.f32 %v10206_v59, %v10205_v24  ;;  %v1073_v60 = vor.u32 %v1072_v11, %v1069_v53  ;;  %v19357_v16 = vshrl.u32 %v15578_v21, 16  ;;  %v497_v61 = vpack.c.bf16 %v405_v35, %v404_v30  ;;  %19358 = vst [vmem:[#allocation95_spill] sm:$0xff] %v15645_v55 }
  0xb5   : > { %19355 = vst [vmem:[#allocation93_spill] sm:$0xff] %v15630_v28  ;;  %v10210_v43 = vsel %vm524_vm3, %v404_v30, 0.0  ;;  %v1082_v34 = vor.u32 %v1081_v38, %v1078_v8  ;;  %v1091_v6 = vrot.slane %v15591_v31, 6  ;;  %v498_v50 = vpack.c.bf16 %v407_v23, %v406_v49  ;;  %v19360_v8 = vld [vmem:[#allocation33_spill] sm:$0xff]  ;;  %v19362_v31 = vld [vmem:[#allocation35_spill] sm:$0xff] }
  0xb6   : > { %v1088_v52 = vrot.slane %v19357_v16, 5  ;;  %v10209_v47 = vadd.f32 %v10208_v36, %v10207_v39  ;;  %v10856_v59 = vrot.slane %v15616_v2, 9  ;;  %v2458_v24 = vrot.slane %v15635_v32, 5  ;;  %v19359_v16 = vld [vmem:[#allocation32_spill] sm:$0xff]  ;;  %v19361_v39 = vld [vmem:[#allocation34_spill] sm:$0xff] }
  0xb7   : > { %12376 = vmatmul.mubr.msk.bf16.gmra.mrb[24].mxu1 %vm524_vm3, %v15596_v14  ;;  %v10212_v11 = vsel %vm524_vm3, %v405_v35, 0.0  ;;  %v2457_v53 = vrot.slane %v2455_v10, 4  ;;  %v1097_v30 = vrot.slane %v19359_v16, 5  ;;  %v1100_v38 = vrot.slane %v19360_v8, 6  ;;  %12220 = vmatmul.mubr.msk.bf16.gmra.mrb[8].mxu0 %vm524_vm3, %v497_v61 }
  0xb8   : > { %12379 = vmatprep.mubr.msk.bf16.mxu1 %vm524_vm3, %v15604_v41  ;;  %v10211_v21 = vadd.f32 %v10210_v43, %v10209_v47  ;;  %v15655_v36 = vsel %vm15407_vm9, %v1280_v54, %v1288_v29  ;;  %v1106_v13 = vrot.slane %v19361_v39, 5  ;;  %v1109_v9 = vrot.slane %v19362_v31, 6  ;;  %12223 = vmatprep.mubr.msk.bf16.mxu0 %vm524_vm3, %v498_v50  ;;  %v408_v47 = vld [vmem:[%s15460_s28 + $0x70] sm:$0xff]  ;;  %v409_v43 = vld [vmem:[%s15460_s28 + $0x78] sm:$0xff]  ;;  %v410_v31 = vld [vmem:[%s15460_s28 + $0x80] sm:$0xff] }
  0xb9   : > { %v10214_v35 = vsel %vm524_vm3, %v406_v49, 0.0  ;;  %v1074_v57 = vrot.slane %v1073_v60, 4  ;;  %v1084_v41 = vrot.slane %v1082_v34, 4  ;;  %v1092_v16 = vor.u32 %v1091_v6, %v1088_v52  ;;  %v411_v49 = vld [vmem:[%s15460_s28 + $0x88] sm:$0xff]  ;;  %v19365_v52 = vld [vmem:[#allocation39_spill] sm:$0xff] }
  0xba   : > { %v10213_v14 = vadd.f32 %v10212_v11, %v10211_v21  ;;  %v1302_v29 = vrot.slane %v15623_v26, 5  ;;  %v15666_v54 = vshll.u32 %v15645_v55, 16  ;;  %v2456_v39 = vsel %vm14751_vm2, %v10856_v59, %v2455_v10  ;;  %v19364_v60 = vld [vmem:[#allocation9_spill] sm:$0xff]  ;;  %v19367_v11 = vld [vmem:[#allocation40_spill] sm:$0xff] }
  0xbb   : > { %v10216_v61 = vsel %vm524_vm3, %v407_v23, 0.0  ;;  %v2459_v50 = vsel %vm14751_vm2, %v2457_v53, %v2458_v24  ;;  %v1101_v6 = vor.u32 %v1100_v38, %v1097_v30  ;;  %v19366_v21 = vrot.slane %v19365_v52, 5  ;;  %v19370_v10 = vld [vmem:[#allocation41_spill] sm:$0xff]  ;;  %v14334_v53 = vld [vmem:[%s18818_s3 + $0x10] sm:$0xff]  }
  0xbc   : > { %19363 = vst [vmem:[#allocation96_spill] sm:$0xff] %v15666_v54  ;;  %v19368_v26 = vrot.slane %v19367_v11, 6  ;;  %v10215_v20 = vadd.f32 %v10214_v35, %v10213_v14  ;;  %v1110_v23 = vor.u32 %v1109_v9, %v1106_v13  ;;  %v19371_v59 = vrot.slane %v19370_v10, 5  ;;  %v14424_v35 = vld [vmem:[%s14749_s25 + $0x90] sm:$0xf]  ;;  %12243 = vmatprep.subr.bf16.mxu0 %v14334_v53 }
  0xbd   : > { %v19373_v1 = vrot.slane %v19372_v3, 6  ;;  %v499_v40 = vpack.c.bf16 %v409_v43, %v408_v47  ;;  %v10218_v24 = vsel %vm524_vm3, %v408_v47, 0.0  ;;  %v1093_v14 = vsel %vm15407_vm9, %v1084_v41, %v1092_v16  ;;  %12244 = vmatpush3.bf16.msra.mxu0 %v14334_v53  ;;  %v413_v53 = vld [vmem:[%s15460_s28 + $0x98] sm:$0xff]  ;;  %v14432_v11 = vld [vmem:[%s14749_s25 + $0xa0] sm:$0xf] }
  0xbe   : > { %v1129_v8 = vor.u32 %v19368_v26, %v19366_v21  ;;  %v1083_v26 = vsel %vm15407_vm9, %v1074_v57, %v1082_v34  ;;  %v10217_v30 = vadd.f32 %v10216_v61, %v10215_v20  ;;  %v500_v9 = vpack.c.bf16 %v411_v49, %v410_v31  ;;  %v19377_v57 = vld [vmem:[#allocation38_spill] sm:$0xff]  ;;  %v19378_v34 = vld [vmem:[#allocation37_spill] sm:$0xff] }
  0xbf   : > { %12380 = vmatmul.mubr.msk.bf16.gmra.mrb[28].mxu1 %vm524_vm3, %v19364_v60  ;;  %v1138_v60 = vor.u32 %v19373_v1, %v19371_v59  ;;  %v1297_v13 = vor.u32 %v1296_v22, %v1293_v42  ;;  %v1305_v38 = vrot.slane %v15630_v28, 6  ;;  %v15697_v1 = vshrl.u32 %v14424_v35, 16  ;;  %12224 = vmatmul.mubr.msk.bf16.gmra.mrb[12].mxu0 %vm524_vm3, %v499_v40 }
  0xc0   : > { %12383 = vmatprep.mubr.msk.bf16.mxu1 %vm524_vm3, %v19369_v25  ;;  %v10220_v47 = vsel %vm524_vm3, %v409_v43, 0.0  ;;  %v15700_v21 = vshll.u32 %v14424_v35, 16  ;;  %v15702_v59 = vcombine.low %v2456_v39, %v2459_v50  ;;  %v19379_v41 = vrot.slane %v19378_v34, 6  ;;  %12227 = vmatprep.mubr.msk.bf16.mxu0 %vm524_vm3, %v500_v9  ;;  %v14425_v9 = vld [vmem:[%s14749_s25 + $0x94] sm:$0xf] }
  0xc1   : > { %19374 = vst [vmem:[#allocation97_spill] sm:$0xff] %v15697_v1  ;;  %v10219_v16 = vadd.f32 %v10218_v24, %v10217_v30  ;;  %v15707_v42 = vcombine.low %v1083_v26, %v1093_v14  ;;  %v1102_v22 = vrot.slane %v1101_v6, 4  ;;  %v1112_v61 = vrot.slane %v1110_v23, 4  ;;  %v412_v24 = vld [vmem:[%s15460_s28 + $0x90] sm:$0xff]  ;;  %v414_v30 = vld [vmem:[%s15460_s28 + $0xa0] sm:$0xff] }
  0xc2   : > { %19375 = vst [vmem:[#allocation98_spill] sm:$0xff] %v15700_v21  ;;  %19376 = vst [vmem:[#allocation99_spill] sm:$0xff] %v15702_v59  ;;  %v1120_v20 = vor.u32 %v19379_v41, %v19377_v57  ;;  %v10222_v43 = vsel %vm524_vm3, %v410_v31, 0.0  ;;  %v19381_v35 = vshrl.u32 %v15645_v55, 16  ;;  %v1130_v50 = vrot.slane %v1129_v8, 4  ;;  %v415_v31 = vld [vmem:[%s15460_s28 + $0xa8] sm:$0xff] }
  0xc3   : > { %19380 = vst [vmem:[#allocation38_spill] sm:$0xff] %v15707_v42  ;;  %v1140_v28 = vrot.slane %v1138_v60, 4  ;;  %v10221_v34 = vadd.f32 %v10220_v47, %v10219_v16  ;;  %v1298_v26 = vrot.slane %v1297_v13, 4  ;;  %v15716_v14 = vor.u32 %v1305_v38, %v1302_v29  ;;  %v14335_v57 = vld [vmem:[%s18818_s3 + $0x18] sm:$0xff]  }
  0xc4   : > { %v1312_v39 = vrot.slane %v19381_v35, 5  ;;  %v1315_v6 = vrot.slane %v15666_v54, 6  ;;  %v10224_v40 = vsel %vm524_vm3, %v411_v49, 0.0  ;;  %v1321_v8 = vrot.slane %v15697_v1, 5  ;;  %12245 = vmatprep.subr.bf16.mxu0 %v14335_v57 }
  0xc5   : > { %v1324_v47 = vrot.slane %v15700_v21, 6  ;;  %v15728_v41 = vshrl.u32 %v14425_v9, 16  ;;  %v10223_v29 = vadd.f32 %v10222_v43, %v10221_v34  ;;  %v1111_v49 = vsel %vm15407_vm9, %v1102_v22, %v1110_v23  ;;  %12246 = vmatpush3.bf16.msra.mxu0 %v14335_v57 }
  0xc6   : > { %v1121_v13 = vsel %vm15407_vm9, %v1112_v61, %v1120_v20  ;;  %v501_v38 = vpack.c.bf16 %v413_v53, %v412_v24  ;;  %v10226_v16 = vsel %vm524_vm3, %v412_v24, 0.0  ;;  %v1139_v35 = vsel %vm15407_vm9, %v1130_v50, %v1138_v60  ;;  %v15754_v60 = vld [vmem:[%s18818_s3] sm:$0xff]  }
  0xc7   : > { %19382 = vst [vmem:[#allocation100_spill] sm:$0xff] %v15728_v41  ;;  %12384 = vmatmul.mubr.msk.bf16.gmra.mrb[0].mxu1 %vm524_vm3, %v15702_v59  ;;  %v1149_v34 = vsel %vm15407_vm9, %v1140_v28, %v15469_v51  ;;  %v10225_v43 = vadd.f32 %v10224_v40, %v10223_v29  ;;  %v502_v55 = vpack.c.bf16 %v415_v31, %v414_v30  ;;  %v15748_v20 = vshll.u32 %v14425_v9, 16  ;;  %v15758_v51 = vld [vmem:[%s14749_s25 + $0x98] sm:$0x7]  ;;  %v416_v29 = vld [vmem:[%s15460_s28 + $0xb0] sm:$0xff] }
  0xc8   : > { %12391 = vmatprep.mubr.msk.bf16.mxu1 %vm524_vm3, %v15707_v42  ;;  %v15746_v23 = vcombine.low %v15613_v58, %v15655_v36  ;;  %v1316_v22 = vor.u32 %v1315_v6, %v1312_v39  ;;  %v10228_v61 = vsel %vm524_vm3, %v413_v53, 0.0  ;;  %12279 = vmatprep.subr.bf16.mxu0 %v15754_v60  ;;  %19385 = vst [vmem:[#allocation103_spill] sm:$0xff] %v15758_v51  ;;  %v18979_v28 = vshrl.u32 %v15758_v51, 16  ;;  %v14329_v9 = vld [vmem:[%s18818_s3 + $0x58] sm:$0xff]  }
  0xc9   : > { %19384 = vst [vmem:[#allocation102_spill] sm:$0xff] %v15748_v20  ;;  %v15762_v58 = vshll.u32 %v15758_v51, 16  ;;  %v15764_v36 = vcombine.low %v1111_v49, %v1121_v13  ;;  %v10227_v39 = vadd.f32 %v10226_v16, %v10225_v43  ;;  %v15769_v50 = vsel %vm15407_vm9, %v1298_v26, %v15716_v14  ;;  %12228 = vmatmul.mubr.msk.bf16.gmra.mrb[16].mxu0 %vm524_vm3, %v501_v38  ;;  %v15786_v49 = vld [vmem:[%s14749_s25 + $0x18] sm:$0xf]  ;;  %v15798_v16 = vld [vmem:[%s14749_s25 + $0x1c] sm:$0xf] }
  0xca   : > { %19383 = vst [vmem:[#allocation101_spill] sm:$0xff] %v15746_v23  ;;  %v1308_v24 = vrot.slane %v15716_v14, 4  ;;  %v15772_v53 = vcombine.low %v1139_v35, %v1149_v34  ;;  %v10230_v6 = vsel %vm524_vm3, %v414_v30, 0.0  ;;  %v15776_v40 = vor.u32 %v1324_v47, %v1321_v8  ;;  %12231 = vmatprep.mubr.msk.bf16.mxu0 %vm524_vm3, %v502_v55  ;;  %v417_v14 = vld [vmem:[%s15460_s28 + $0xb8] sm:$0xff]  ;;  %v418_v8 = vld [vmem:[%s15460_s28 + $0xc0] sm:$0xff]  ;;  %v419_v47 = vld [vmem:[%s15460_s28 + $0xc8] sm:$0xff] }
  0xcb   : > { %19386 = vst [vmem:[#allocation104_spill] sm:$0xff] %v15762_v58  ;;  %19387 = vst [vmem:[#allocation105_spill] sm:$0xff] %v15764_v36  ;;  %v1330_v57 = vrot.slane %v15728_v41, 5  ;;  %v10229_v26 = vadd.f32 %v10228_v61, %v10227_v39  ;;  %v15789_v13 = vshrl.u32 %v15786_v49, 16  ;;  %v10232_v30 = vsel %vm524_vm3, %v415_v31, 0.0 }
  0xcc   : > { %19388 = vst [vmem:[#allocation106_spill] sm:$0xff] %v15772_v53  ;;  %v15795_v38 = vshll.u32 %v15786_v49, 16  ;;  %v15801_v35 = vshrl.u32 %v15798_v16, 16  ;;  %v15804_v55 = vshll.u32 %v15798_v16, 16  ;;  %v1333_v34 = vrot.slane %v15748_v20, 6 }
  0xcd   : > { %19389 = vst [vmem:[#allocation107_spill] sm:$0xff] %v15789_v13  ;;  %v1340_v43 = vrot.slane %v18979_v28, 5  ;;  %v1343_v31 = vrot.slane %v15762_v58, 6  ;;  %v10231_v61 = vadd.f32 %v10230_v6, %v10229_v26  ;;  %v14430_v39 = vld [vmem:[%s14749_s25 + $0x9c] sm:$0xf]  ;;  %v503_v41 = vpack.c.bf16 %v417_v14, %v416_v29  ;;  %v15823_v58 = vld [vmem:[%s18818_s3 + $0x60] sm:$0xff]  }
  0xce   : > { %19390 = vst [vmem:[#allocation108_spill] sm:$0xff] %v15795_v38  ;;  %19391 = vst [vmem:[#allocation109_spill] sm:$0xff] %v15801_v35  ;;  %v15813_v54 = vshrl.u32 %v14430_v39, 16  ;;  %v10234_v51 = vsel %vm524_vm3, %v416_v29, 0.0  ;;  %v10236_v28 = vsel %vm524_vm3, %v417_v14, 0.0  ;;  %v504_v26 = vpack.c.bf16 %v419_v47, %v418_v8 }
  0xcf   : > { %19392 = vst [vmem:[#allocation110_spill] sm:$0xff] %v15804_v55  ;;  %12392 = vmatmul.mubr.msk.bf16.vlgmr.msra.gmra.mrb[4].mxu1 %vm524_vm3, %v15764_v36  ;;  %v10233_v6 = vadd.f32 %v10232_v30, %v10231_v61  ;;  %v1041_v20 = vrot.slane %v15789_v13, 5  ;;  %v1044_v1 = vrot.slane %v15795_v38, 6  ;;  %v1050_v29 = vrot.slane %v15801_v35, 5 }
  0xd0   : > { %19393 = vst [vmem:[#allocation111_spill] sm:$0xff] %v15813_v54  ;;  %12424 = vmatpush3.bf16.msra.mxu1 %v15328_v44  ;;  %12395 = vmatprep.mubr.msk.bf16.mxu1 %vm524_vm3, %v15772_v53  ;;  %v15827_v44 = vld [vmem:[%s14749_s25 + $0x20] sm:$0x7]  ;;  %v1053_v14 = vrot.slane %v15804_v55, 6  ;;  %v15836_v3 = vshll.u32 %v14430_v39, 16  ;;  %v15839_v30 = vshrl.u32 %v14432_v11, 16  ;;  %v15845_v52 = vsel %vm15407_vm9, %v1308_v24, %v1316_v22 }
  0xd1   : > { %12425 = vmatprep.subr.bf16.mxu1 %v14329_v9  ;;  %19394 = vst [vmem:[#allocation112_spill] sm:$0xff] %v15827_v44  ;;  %v15834_v10 = vshll.u32 %v15827_v44, 16  ;;  %v15841_v61 = vshll.u32 %v14432_v11, 16  ;;  %v10235_v21 = vadd.f32 %v10234_v51, %v10233_v6  ;;  %v15848_v35 = vor.u32 %v1333_v34, %v1330_v57  ;;  %12232 = vmatmul.mubr.msk.bf16.gmra.mrb[20].mxu0 %vm524_vm3, %v503_v41  ;;  %v420_v24 = vld [vmem:[%s15460_s28 + $0xd0] sm:$0xff]  ;;  %v421_v57 = vld [vmem:[%s15460_s28 + $0xd8] sm:$0xff]  ;;  %v422_v34 = vld [vmem:[%s15460_s28 + $0xe0] sm:$0xff] }
  0xd2   : > { %19396 = vst [vmem:[#allocation114_spill] sm:$0xff] %v15836_v3  ;;  %19397 = vst [vmem:[#allocation115_spill] sm:$0xff] %v15839_v30  ;;  %v10238_v39 = vsel %vm524_vm3, %v418_v8, 0.0  ;;  %v15852_v38 = vor.u32 %v1343_v31, %v1340_v43  ;;  %v1349_v11 = vrot.slane %v15813_v54, 5  ;;  %12235 = vmatprep.mubr.msk.bf16.mxu0 %vm524_vm3, %v504_v26  ;;  %v10240_v22 = vsel %vm524_vm3, %v419_v47, 0.0 }
  0xd3   : > { %19395 = vst [vmem:[#allocation113_spill] sm:$0xff] %v15834_v10  ;;  %19398 = vst [vmem:[#allocation116_spill] sm:$0xff] %v15841_v61  ;;  %v10237_v51 = vadd.f32 %v10236_v28, %v10235_v21  ;;  %v1045_v6 = vor.u32 %v1044_v1, %v1041_v20  ;;  %v1054_v41 = vor.u32 %v1053_v14, %v1050_v29  ;;  %v19399_v8 = vshrl.u32 %v15827_v44, 16  ;;  %v15871_v26 = vld [vmem:[%s14749_s25 + $0xa4] sm:$0x7] }
  0xd4   : > { %12426 = vmatpush3.bf16.msra.mxu1 %v14329_v9  ;;  %v423_v9 = vld [vmem:[%s15460_s28 + $0xe8] sm:$0xff]  ;;  %v1063_v31 = vrot.slane %v15834_v10, 6  ;;  %v1352_v55 = vrot.slane %v15836_v3, 6  ;;  %v1358_v21 = vrot.slane %v15839_v30, 5  ;;  %v1361_v28 = vrot.slane %v15841_v61, 6  ;;  %19400 = vst [vmem:[#allocation117_spill] sm:$0xff] %v15871_v26 }
  0xd5   : > { %12459 = vmatprep.subr.bf16.mxu1 %v15823_v58  ;;  %v1060_v43 = vrot.slane %v19399_v8, 5  ;;  %v10239_v47 = vadd.f32 %v10238_v39, %v10237_v51  ;;  %v15875_v20 = vshll.u32 %v15871_v26, 16  ;;  %v505_v29 = vpack.c.bf16 %v421_v57, %v420_v24  ;;  %v14434_v30 = vld [vmem:[%s14749_s25 + $0xa8] sm:$0xf] }
  0xd6   : > { %v10242_v14 = vsel %vm524_vm3, %v420_v24, 0.0  ;;  %v1336_v8 = vrot.slane %v15848_v35, 4  ;;  %v15882_v61 = vshrl.u32 %v14434_v30, 16  ;;  %v506_v51 = vpack.c.bf16 %v423_v9, %v422_v34 }
  0xd7   : > { %12396 = vmatmul.mubr.msk.bf16.gmra.mrb[8].mxu1 %vm524_vm3, %v15471_v7  ;;  %19401 = vst [vmem:[#allocation118_spill] sm:$0xff] %v15875_v20  ;;  %v10241_v39 = vadd.f32 %v10240_v22, %v10239_v47  ;;  %v10244_v3 = vsel %vm524_vm3, %v421_v57, 0.0  ;;  %v1046_v1 = vrot.slane %v1045_v6, 4  ;;  %v1056_v54 = vrot.slane %v1054_v41, 4  ;;  %v14435_v47 = vld [vmem:[%s14749_s25 + $0xac] sm:$0xf] }
  0xd8   : > { %12399 = vmatprep.mubr.msk.bf16.mxu1 %vm524_vm3, %v15473_v37  ;;  %19402 = vst [vmem:[#allocation119_spill] sm:$0xff] %v15882_v61  ;;  %v1064_v10 = vor.u32 %v1063_v31, %v1060_v43  ;;  %v15885_v13 = vor.u32 %v1352_v55, %v1349_v11  ;;  %v15887_v59 = vor.u32 %v1361_v28, %v1358_v21  ;;  %v15889_v24 = vshll.u32 %v14434_v30, 16  ;;  %v14436_v30 = vld [vmem:[%s14749_s25 + $0xb4] sm:$0xf]  ;;  %v425_v21 = vld [vmem:[%s15460_s28 + $0xf8] sm:$0xff] }
  0xd9   : > { %v10243_v25 = vadd.f32 %v10242_v14, %v10241_v39  ;;  %v19404_v27 = vshrl.u32 %v15871_v26, 16  ;;  %v1371_v22 = vrot.slane %v15875_v20, 6  ;;  %v15895_v57 = vshrl.u32 %v14435_v47, 16  ;;  %12236 = vmatmul.mubr.msk.bf16.gmra.mrb[24].mxu0 %vm524_vm3, %v505_v29 }
  0xda   : > { %19403 = vst [vmem:[#allocation120_spill] sm:$0xff] %v15889_v24  ;;  %v10246_v55 = vsel %vm524_vm3, %v422_v34, 0.0  ;;  %v1377_v11 = vrot.slane %v15882_v61, 5  ;;  %v15900_v6 = vshll.u32 %v14435_v47, 16  ;;  %v15903_v43 = vshrl.u32 %v14436_v30, 16  ;;  %12239 = vmatprep.mubr.msk.bf16.mxu0 %vm524_vm3, %v506_v51 }
  0xdb   : > { %v1368_v45 = vrot.slane %v19404_v27, 5  ;;  %19405 = vst [vmem:[#allocation121_spill] sm:$0xff] %v15895_v57  ;;  %v10245_v31 = vadd.f32 %v10244_v3, %v10243_v25  ;;  %v424_v27 = vld [vmem:[%s15460_s28 + $0xf0] sm:$0xff]  ;;  %v15908_v28 = vshll.u32 %v14436_v30, 16  ;;  %v10248_v14 = vsel %vm524_vm3, %v423_v9, 0.0  ;;  %s10690_s28 = sshll.u32 %s380_s20, 8 }
  0xdc   : > { %19406 = vst [vmem:[#allocation122_spill] sm:$0xff] %v15900_v6  ;;  %19407 = vst [vmem:[#allocation123_spill] sm:$0xff] %v15903_v43  ;;  %v1055_v34 = vsel %vm15407_vm9, %v1046_v1, %v1054_v41  ;;  %v1065_v29 = vsel %vm15407_vm9, %v1056_v54, %v1064_v10  ;;  %v1380_v39 = vrot.slane %v15889_v24, 6  ;;  %v14437_v47 = vld [vmem:[%s14749_s25 + $0xb8] sm:$0xf]  ;;  %v1386_v9 = vrot.slane %v15895_v57, 5 }
  0xdd   : > { %19408 = vst [vmem:[#allocation124_spill] sm:$0xff] %v15908_v28  ;;  %v15917_v26 = vshrl.u32 %v14437_v47, 16  ;;  %v15919_v25 = vshll.u32 %v14437_v47, 16  ;;  %v10247_v3 = vadd.f32 %v10246_v55, %v10245_v31  ;;  %v15925_v51 = vld [vmem:[%s14749_s25 + $0xb0] sm:$0x7]  ;;  %v507_v54 = vpack.c.bf16 %v425_v21, %v424_v27  ;;  %s18681_s27 = scalar_lea.vmem [#allocation5], %s10690_s28 }
  0xde   : > { %19411 = vst [vmem:[#allocation127_spill] sm:$0xff] %v15925_v51  ;;  %v10250_v10 = vsel %vm524_vm3, %v424_v27, 0.0  ;;  %v1389_v1 = vrot.slane %v15900_v6, 6  ;;  %v15933_v30 = vshll.u32 %v15925_v51, 16  ;;  %v15935_v55 = vcombine.low %v1055_v34, %v1065_v29  ;;  %v15940_v41 = vld [vmem:[%s14749_s25 + $0xbc] sm:$0x7] }
  0xdf   : > { %19409 = vst [vmem:[#allocation125_spill] sm:$0xff] %v15917_v26  ;;  %19410 = vst [vmem:[#allocation126_spill] sm:$0xff] %v15919_v25  ;;  %12400 = vmatmul.mubr.msk.bf16.gmra.mrb[12].mxu1 %vm524_vm3, %v15581_v12  ;;  %v10249_v47 = vadd.f32 %v10248_v14, %v10247_v3  ;;  %v1405_v31 = vrot.slane %v15903_v43, 5  ;;  %v1408_v20 = vrot.slane %v15908_v28, 6  ;;  %v10252_v24 = vsel %vm524_vm3, %v425_v21, 0.0  ;;  %s10598_s21 = sshll.u32 %s18681_s27, 4  ;;  %s18742_s21 = int_to_ptr.vmem [resolvable:$true] %s10598_s21 }
  0xe0   : > { %12403 = vmatprep.mubr.msk.bf16.mxu1 %vm524_vm3, %v15594_v17  ;;  %19412 = vst [vmem:[#allocation128_spill] sm:$0xff] %v15933_v30  ;;  %19413 = vst [vmem:[#allocation129_spill] sm:$0xff] %v15935_v55  ;;  %v1414_v27 = vrot.slane %v15917_v26, 5  ;;  %v1417_v6 = vrot.slane %v15919_v25, 6  ;;  %v15947_v61 = vshll.u32 %v15940_v41, 16  ;;  %v15954_v3 = vcombine.low %v15769_v50, %v15845_v52  ;;  %s14527_s12 = scalar_lea.vmem %s18742_s21, 4096  ;;  %p14534_p2 = scmp.lt.s32.totalorder %s18742_s21, %s14532_s18 }
  0xe1   : > { %19414 = vst [vmem:[#allocation130_spill] sm:$0xff] %v15940_v41  ;;  %v10251_v14 = vadd.f32 %v10250_v10, %v10249_v47  ;;  %v14440_v34 = vld [vmem:[%s14749_s25 + $0xc8] sm:$0x7]  ;;  %v19418_v57 = vrot.slane %v15776_v40, 4  ;;  %v1345_v26 = vsel %vm15407_vm9, %v1336_v8, %v15852_v38  ;;  %12240 = vmatmul.mubr.msk.bf16.gmra.mrb[28].mxu0 %vm524_vm3, %v507_v54  ;;  %v1354_v10 = vrot.slane %v15885_v13, 4  ;;  %p14528_p6 = scmp.ne.s32.totalorder %s18742_s21, %s14527_s12  ;;  %s14533_s28 = scalar_lea.vmem %s14532_s18, 8192 }
  0xe2   : > { %19415 = vst [vmem:[#allocation131_spill] sm:$0xff] %v15947_v61  ;;  %v15950_v29 = vshll.u32 %v14440_v34, 16  ;;  %19417 = vst [vmem:[#allocation133_spill] sm:$0xff] %v15954_v3  ;;  %v1364_v47 = vrot.slane %v15887_v59, 4  ;;  %v1372_v34 = vor.u32 %v1371_v22, %v1368_v45  ;;  %12247 = vmatprep.mubr.msk.bf16.mxu0 %vm524_vm3, %v15935_v55  ;;  %v1381_v50 = vor.u32 %v1380_v39, %v1377_v11  ;;  %v14441_v39 = vld [vmem:[%s14749_s25 + $0xcc] sm:$0xf]  ;;  %p14535_p3 = scmp.lt.s32.totalorder %s14533_s28, %s14527_s12 }
  0xe3   : > { %v1335_v21 = vsel %vm15407_vm9, %v19418_v57, %v15848_v35  ;;  %v15967_v52 = vadd.f32 %v10252_v24, %v10251_v14  ;;  %v1390_v40 = vor.u32 %v1389_v1, %v1386_v9  ;;  %v19420_v35 = vshrl.u32 %v15925_v51, 16  ;;  %v19422_v24 = vld [vmem:[#allocation29_spill] sm:$0xff]  ;;  %v19423_v14 = vld [vmem:[#allocation30_spill] sm:$0xff]  ;;  %p14529_p10 = pnand %p14528_p6, %p19890_p9 }
  0xe4   : > { %19416 = vst [vmem:[#allocation132_spill] sm:$0xff] %v15950_v29  ;;  %v1399_v38 = vrot.slane %v15933_v30, 6  ;;  %v1409_v8 = vor.u32 %v1408_v20, %v1405_v31  ;;  %v1418_v54 = vor.u32 %v1417_v6, %v1414_v27  ;;  %v19421_v13 = vshrl.u32 %v15940_v41, 16  ;;  %v14442_v20 = vld [vmem:[%s14749_s25 + $0xd0] sm:$0xf]  ;;  %p14536_p4 = por %p14535_p3, %p14534_p2 }
  0xe5   : > { %19419 = vst [vmem:[#allocation134_spill] sm:$0xff] %v15967_v52  ;;  %v1396_v57 = vrot.slane %v19420_v35, 5  ;;  %v1427_v45 = vrot.slane %v15947_v61, 6  ;;  %v1436_v22 = vrot.slane %v19422_v24, 6  ;;  %v1442_v11 = vrot.slane %v19423_v14, 5  ;;  %p14530_p12 = pneg %p14529_p10 }
  0xe6   : > { %v1424_v25 = vrot.slane %v19421_v13, 5  ;;  %v15982_v9 = vshrl.u32 %v14441_v39, 16  ;;  %v15984_v1 = vshll.u32 %v14441_v39, 16  ;;  %v15989_v6 = vshrl.u32 %v14442_v20, 16  ;;  %v19428_v13 = vld [vmem:[#allocation31_spill] sm:$0xff] }
  0xe7   : > { %12404 = vmatmul.mubr.msk.bf16.gmra.mrb[16].mxu1 %vm524_vm3, %v15746_v23  ;;  %v15991_v31 = vshll.u32 %v14442_v20, 16  ;;  %v1363_v27 = vsel %vm15407_vm9, %v1354_v10, %v15887_v59  ;;  %v1373_v35 = vsel %vm15407_vm9, %v1364_v47, %v1372_v34  ;;  %v1445_v52 = vrot.slane %v19428_v13, 6  ;;  %v16002_v28 = vld [vmem:[%s14749_s25 + $0xd4] sm:$0x7]  ;;  %v19433_v47 = vld [vmem:[#allocation27_spill] sm:$0xff]  ;;  %p14537_p7 = pnand %p14536_p4, %p14530_p12 }
  0xe8   : > { %19424 = vst [vmem:[#allocation135_spill] sm:$0xff] %v15982_v9  ;;  %19425 = vst [vmem:[#allocation136_spill] sm:$0xff] %v15984_v1  ;;  %12407 = vmatprep.mubr.msk.bf16.mxu1 %vm524_vm3, %v15954_v3  ;;  %v15999_v41 = vcombine.low %v1335_v21, %v1345_v26  ;;  %v1382_v39 = vrot.slane %v1381_v50, 4  ;;  %v1400_v51 = vor.u32 %v1399_v38, %v1396_v57  ;;  %v1392_v61 = vrot.slane %v1390_v40, 4 }
  0xe9   : > { %19426 = vst [vmem:[#allocation137_spill] sm:$0xff] %v15989_v6  ;;  %19427 = vst [vmem:[#allocation138_spill] sm:$0xff] %v15991_v31  ;;  %v1410_v30 = vrot.slane %v1409_v8, 4  ;;  %v1420_v14 = vrot.slane %v1418_v54, 4  ;;  %v1428_v24 = vor.u32 %v1427_v45, %v1424_v25  ;;  %v19046_v20 = vshrl.u32 %v16002_v28, 16  ;;  %12248 = vmatmul.mubr.msk.bf16.vlgmr.msra.gmra.mrb[32].mxu0 %vm524_vm3, %v15707_v42 }
  0xea   : > { %19429 = vst [vmem:[#allocation139_spill] sm:$0xff] %v15999_v41  ;;  %19430 = vst [vmem:[#allocation140_spill] sm:$0xff] %v16002_v28  ;;  %v16006_v43 = vshll.u32 %v16002_v28, 16  ;;  %v16008_v59 = vcombine.low %v1363_v27, %v1373_v35  ;;  %v1461_v26 = vrot.slane %v15982_v9, 5  ;;  %v1464_v21 = vrot.slane %v15984_v1, 6  ;;  %12251 = vmatprep.mubr.msk.bf16.mxu0 %vm524_vm3, %v15764_v36  ;;  %12280 = vmatpush3.bf16.msra.mxu0 %v15754_v60  ;;  %v14444_v27 = vld [vmem:[%s18818_s3 + $0x8] sm:$0xff]  }
  0xeb   : > { %v1470_v10 = vrot.slane %v15989_v6, 5  ;;  %v1473_v25 = vrot.slane %v15991_v31, 6  ;;  %v19434_v34 = vrot.slane %v19433_v47, 5  ;;  %v1446_v57 = vor.u32 %v1445_v52, %v1442_v11  ;;  %12281 = vmatprep.subr.bf16.mxu0 %v14444_v27 }
  0xec   : > { %19431 = vst [vmem:[#allocation141_spill] sm:$0xff] %v16006_v43  ;;  %19432 = vst [vmem:[#allocation142_spill] sm:$0xff] %v16008_v59  ;;  %v19435_v38 = vshrl.u32 %v14768_v5, 16  ;;  %v1455_v45 = vrot.slane %v15950_v29, 6  ;;  %v1391_v35 = vsel %vm15407_vm9, %v1382_v39, %v1390_v40  ;;  %v1401_v60 = vsel %vm15407_vm9, %v1392_v61, %v1400_v51 }
  0xed   : > { %v1437_v50 = vor.u32 %v1436_v22, %v19434_v34  ;;  %v1419_v22 = vsel %vm15407_vm9, %v1410_v30, %v1418_v54  ;;  %v1429_v52 = vsel %vm15407_vm9, %v1420_v14, %v1428_v24  ;;  %v16040_v11 = vshrl.u32 %v15616_v2, 16 }
  0xee   : > { %v1452_v8 = vrot.slane %v19435_v38, 5  ;;  %v16043_v40 = vshll.u32 %v15616_v2, 16  ;;  %v16046_v61 = vshrl.u32 %v15588_v56, 16  ;;  %v16049_v51 = vshll.u32 %v15588_v56, 16  ;;  %12282 = vmatpush3.bf16.msra.mxu0 %v14444_v27 }
  0xef   : > { %12408 = vmatmul.mubr.msk.bf16.gmra.mrb[20].mxu1 %vm524_vm3, %v15999_v41  ;;  %19436 = vst [vmem:[#allocation143_spill] sm:$0xff] %v16040_v11  ;;  %v1480_v30 = vrot.slane %v19046_v20, 5  ;;  %v1483_v54 = vrot.slane %v16006_v43, 6  ;;  %v1465_v24 = vor.u32 %v1464_v21, %v1461_v26  ;;  %v1474_v14 = vor.u32 %v1473_v25, %v1470_v10 }
  0xf0   : > { %12411 = vmatprep.mubr.msk.bf16.mxu1 %vm524_vm3, %v16008_v59  ;;  %19437 = vst [vmem:[#allocation144_spill] sm:$0xff] %v16043_v40  ;;  %19438 = vst [vmem:[#allocation145_spill] sm:$0xff] %v16046_v61  ;;  %v1438_v39 = vrot.slane %v1437_v50, 4  ;;  %v1448_v34 = vrot.slane %v1446_v57, 4  ;;  %v1456_v38 = vor.u32 %v1455_v45, %v1452_v8  ;;  %v16054_v6 = vcombine.low %v1391_v35, %v1401_v60 }
  0xf1   : > { %19439 = vst [vmem:[#allocation146_spill] sm:$0xff] %v16049_v51  ;;  %v16056_v31 = vcombine.low %v1419_v22, %v1429_v52  ;;  %v19047_v1 = vshrl.u32 %v15635_v32, 16  ;;  %v16060_v9 = vshll.u32 %v15635_v32, 16  ;;  %v2679_v28 = vrot.slane %v16040_v11, 5  ;;  %12252 = vmatmul.mubr.msk.bf16.gmra.mrb[36].mxu0 %vm524_vm3, %v15772_v53 }
  0xf2   : > { %19440 = vst [vmem:[#allocation147_spill] sm:$0xff] %v16054_v6  ;;  %v2682_v20 = vrot.slane %v16043_v40, 6  ;;  %v2688_v26 = vrot.slane %v16046_v61, 5  ;;  %v2691_v21 = vrot.slane %v16049_v51, 6  ;;  %v1466_v10 = vrot.slane %v1465_v24, 4  ;;  %12255 = vmatprep.mubr.msk.bf16.mxu0 %vm524_vm3, %v15471_v7 }
  0xf3   : > { %19441 = vst [vmem:[#allocation148_spill] sm:$0xff] %v16056_v31  ;;  %19442 = vst [vmem:[#allocation149_spill] sm:$0xff] %v16060_v9  ;;  %v1476_v25 = vrot.slane %v1474_v14, 4  ;;  %v1484_v50 = vor.u32 %v1483_v54, %v1480_v30  ;;  %v1457_v8 = vsel %vm15407_vm9, %v1448_v34, %v1456_v38  ;;  %v1447_v45 = vsel %vm15407_vm9, %v1438_v39, %v1446_v57  ;;  %v19446_v38 = vld [vmem:[#allocation13_spill] sm:$0xff] }
  0xf4   : > { %v2683_v27 = vor.u32 %v2682_v20, %v2679_v28  ;;  %v2692_v35 = vor.u32 %v2691_v21, %v2688_v26  ;;  %v2698_v60 = vrot.slane %v19047_v1, 5  ;;  %v2701_v22 = vrot.slane %v16060_v9, 6  ;;  %v14333_v26 = vld [vmem:[%s18818_s3 + $0x68] sm:$0xff]   ;;  %v19447_v21 = vld [vmem:[#allocation15_spill] sm:$0xff] }
  0xf5   : > { %v1475_v52 = vsel %vm15407_vm9, %v1466_v10, %v1474_v14  ;;  %v1485_v30 = vsel %vm15407_vm9, %v1476_v25, %v1484_v50  ;;  %v16085_v54 = vcombine.low %v1447_v45, %v1457_v8  ;;  %v19448_v10 = vld [vmem:[#allocation17_spill] sm:$0xff]  ;;  %v14336_v25 = vld [vmem:[%s18818_s3 + $0x70] sm:$0xff]   ;;  %v921_v50 = vrot.slane %v15798_v16, 5  ;;  %v19449_v8 = vld [vmem:[#allocation19_spill] sm:$0xff] }
  0xf6   : > { %v16087_v24 = vcombine.low %v1475_v52, %v1485_v30  ;;  %v2684_v57 = vrot.slane %v2683_v27, 4  ;;  %v2694_v39 = vrot.slane %v2692_v35, 4  ;;  %v2702_v34 = vor.u32 %v2701_v22, %v2698_v60  ;;  %v19451_v22 = vld [vmem:[#allocation23_spill] sm:$0xff]  ;;  %v19452_v52 = vld [vmem:[#allocation24_spill] sm:$0xff]  ;;  %v19453_v30 = vld [vmem:[#allocation26_spill] sm:$0xff] }
  0xf7   : > { %12412 = vmatmul.mubr.msk.bf16.gmra.mrb[24].mxu1 %vm524_vm3, %v16054_v6  ;;  %19443 = vst [vmem:[#allocation150_spill] sm:$0xff] %v16085_v54  ;;  %v10714_v45 = vrot.slane %v15786_v49, 9  ;;  %v923_v27 = vrot.slane %v921_v50, 4 }
  0xf8   : > { %12415 = vmatprep.mubr.msk.bf16.mxu1 %vm524_vm3, %v16056_v31  ;;  %19444 = vst [vmem:[#allocation151_spill] sm:$0xff] %v16087_v24  ;;  %v2693_v28 = vsel %vm15407_vm9, %v2684_v57, %v2692_v35  ;;  %v2703_v20 = vsel %vm15407_vm9, %v2694_v39, %v2702_v34  ;;  %v924_v35 = vrot.slane %v15827_v44, 5  ;;  %v19454_v57 = vld [vmem:[#allocation28_spill] sm:$0xff]  ;;  %v19456_v34 = vld [vmem:[#allocation46_spill] sm:$0xff] }
  0xf9   : > { %12256 = vmatmul.mubr.msk.bf16.gmra.mrb[40].mxu0 %vm524_vm3, %v15473_v37  ;;  %v16101_v14 = vcombine.low %v2693_v28, %v2703_v20  ;;  %v922_v16 = vsel %vm14751_vm2, %v10714_v45, %v921_v50  ;;  %v19455_v39 = vld [vmem:[#allocation36_spill] sm:$0xff]  ;;  %v19457_v28 = vld [vmem:[#allocation55_spill] sm:$0xff]  ;;  %v10903_v20 = vrot.slane %v15616_v2, 10  ;;  %v19458_v50 = vld [vmem:[#allocation61_spill] sm:$0xff] }
  0xfa   : > { %12259 = vmatprep.mubr.msk.bf16.mxu0 %vm524_vm3, %v15581_v12  ;;  %v925_v60 = vsel %vm14751_vm2, %v923_v27, %v924_v35  ;;  %v19460_v35 = vld [vmem:[#allocation77_spill] sm:$0xff] }
  0xfb   : > { %19445 = vst [vmem:[#allocation152_spill] sm:$0xff] %v16101_v14  ;;  %v10768_v49 = vcombine.low %v922_v16, %v925_v60  ;;  %v19461_v16 = vld [vmem:[#allocation81_spill] sm:$0xff]  ;;  %v19462_v60 = vld [vmem:[#allocation82_spill] sm:$0xff] }
  0xff   : > { %12416 = vmatmul.mubr.msk.bf16.gmra.mrb[28].mxu1 %vm524_vm3, %v16085_v54 }
 0x100   : > { %12419 = vmatprep.mubr.msk.bf16.mxu1 %vm524_vm3, %v16087_v24 }
 0x101   : > { %12260 = vmatmul.mubr.msk.bf16.gmra.mrb[44].mxu0 %vm524_vm3, %v15594_v17 }
 0x102   : > { %12263 = vmatprep.mubr.msk.bf16.mxu0 %vm524_vm3, %v15746_v23 }
 0x107   : > { %12420 = vmatmul.mubr.msk.bf16.gmra.mrb[0].mxu1 %vm524_vm3, %v16101_v14 }
 0x108   : > { %12427 = vmatprep.mubr.msk.bf16.mxu1 %vm524_vm3, %v19446_v38 }
 0x109   : > { %12264 = vmatmul.mubr.msk.bf16.gmra.mrb[48].mxu0 %vm524_vm3, %v15954_v3 }
 0x10a   : > { %12267 = vmatprep.mubr.msk.bf16.mxu0 %vm524_vm3, %v15999_v41 }
 0x10f   : > { %12428 = vmatmul.mubr.msk.bf16.vlgmr.msra.gmra.mrb[4].mxu1 %vm524_vm3, %v19447_v21 }
 0x110   : > { %12460 = vmatpush3.bf16.msra.mxu1 %v15823_v58  ;;  %12431 = vmatprep.mubr.msk.bf16.mxu1 %vm524_vm3, %v19448_v10  ;;  %v19450_v58 = vld [vmem:[#allocation21_spill] sm:$0xff] }
 0x111   : > { %12461 = vmatprep.subr.bf16.mxu1 %v14333_v26  ;;  %12268 = vmatmul.mubr.msk.bf16.gmra.mrb[52].mxu0 %vm524_vm3, %v16008_v59 }
 0x112   : > { %12271 = vmatprep.mubr.msk.bf16.mxu0 %vm524_vm3, %v16054_v6 }
 0x114   : > { %12462 = vmatpush3.bf16.msra.mxu1 %v14333_v26  ;;  %v2925_v26 = vrot.slane %v15635_v32, 6 }
 0x115   : > { %12495 = vmatprep.subr.bf16.mxu1 %v14336_v25 }
 0x117   : > { %12432 = vmatmul.mubr.msk.bf16.gmra.mrb[8].mxu1 %vm524_vm3, %v19449_v8 }
 0x118   : > { %12435 = vmatprep.mubr.msk.bf16.mxu1 %vm524_vm3, %v19450_v58 }
 0x119   : > { %12272 = vmatmul.mubr.msk.bf16.gmra.mrb[56].mxu0 %vm524_vm3, %v16056_v31 }
 0x11a   : > { %12275 = vmatprep.mubr.msk.bf16.mxu0 %vm524_vm3, %v16085_v54 }
 0x11f   : > { %12436 = vmatmul.mubr.msk.bf16.gmra.mrb[12].mxu1 %vm524_vm3, %v19451_v22 }
 0x120   : > { %12439 = vmatprep.mubr.msk.bf16.mxu1 %vm524_vm3, %v19452_v52 }
 0x121   : > { %12276 = vmatmul.mubr.msk.bf16.gmra.mrb[60].mxu0 %vm524_vm3, %v16087_v24 }
 0x122   : > { %12283 = vmatprep.mubr.msk.bf16.mxu0 %vm524_vm3, %v10768_v49  ;;  %v14337_v49 = vld [vmem:[%s18818_s3 + $0x78] sm:$0xff]  }
 0x127   : > { %12440 = vmatmul.mubr.msk.bf16.gmra.mrb[16].mxu1 %vm524_vm3, %v19453_v30 }
 0x128   : > { %12443 = vmatprep.mubr.msk.bf16.mxu1 %vm524_vm3, %v19454_v57 }
 0x129   : > { %12284 = vmatmul.mubr.msk.bf16.vlgmr.msra.gmra.mrb[32].mxu0 %vm524_vm3, %v15231_v4  ;;  %v2922_v4 = vrot.slane %v15588_v56, 6 }
 0x12a   : > { %12287 = vmatprep.mubr.msk.bf16.mxu0 %vm524_vm3, %v15284_v15 }
 0x12b   : > { %v2924_v38 = vrot.slane %v2922_v4, 4  ;;  %v2923_v56 = vsel %vm14806_vm6, %v10903_v20, %v2922_v4  ;;  %v19463_v4 = vld [vmem:[#allocation44_spill] sm:$0xff]  ;;  %v19464_v20 = vld [vmem:[#allocation53_spill] sm:$0xff] }
 0x12d   : > { %v2926_v2 = vsel %vm14806_vm6, %v2924_v38, %v2925_v26  ;;  %v19465_v38 = vld [vmem:[#allocation90_spill] sm:$0xff]  ;;  %v16245_v26 = vld [vmem:[%s14749_s25 + $0xec] sm:$0x7] }
 0x12e   : > { %v16187_v27 = vcombine.low %v2923_v56, %v2926_v2  ;;  %19468 = vst [vmem:[#allocation13_spill] sm:$0xff] %v16245_v26 }
 0x12f   : > { %12444 = vmatmul.mubr.msk.bf16.gmra.mrb[20].mxu1 %vm524_vm3, %v19455_v39 }
 0x130   : > { %12447 = vmatprep.mubr.msk.bf16.mxu1 %vm524_vm3, %v19456_v34 }
 0x131   : > { %12288 = vmatmul.mubr.msk.bf16.gmra.mrb[36].mxu0 %vm524_vm3, %v15290_v63 }
 0x132   : > { %12291 = vmatprep.mubr.msk.bf16.mxu0 %vm524_vm3, %v15343_v33 }
 0x137   : > { %12448 = vmatmul.mubr.msk.bf16.gmra.mrb[24].mxu1 %vm524_vm3, %v19457_v28 }
 0x138   : > { %12451 = vmatprep.mubr.msk.bf16.mxu1 %vm524_vm3, %v15183_v19 }
 0x139   : > { %12292 = vmatmul.mubr.msk.bf16.gmra.mrb[40].mxu0 %vm524_vm3, %v15345_v48 }
 0x13a   : > { %12295 = vmatprep.mubr.msk.bf16.mxu0 %vm524_vm3, %v15401_v18 }
 0x13f   : > { %12452 = vmatmul.mubr.msk.bf16.gmra.mrb[28].mxu1 %vm524_vm3, %v15191_v62 }
 0x140   : > { %12455 = vmatprep.mubr.msk.bf16.mxu1 %vm524_vm3, %v19458_v50 }
 0x141   : > { %12296 = vmatmul.mubr.msk.bf16.gmra.mrb[44].mxu0 %vm524_vm3, %v19460_v35 }
 0x142   : > { %12299 = vmatprep.mubr.msk.bf16.mxu0 %vm524_vm3, %v19461_v16 }
 0x147   : > { %12456 = vmatmul.mubr.msk.bf16.gmra.mrb[0].mxu1 %vm524_vm3, %v16187_v27 }
 0x148   : > { %12463 = vmatprep.mubr.msk.bf16.mxu1 %vm524_vm3, %v15284_v15  ;;  %v14338_v15 = vld [vmem:[%s18818_s3 + $0x80] sm:$0xff]  }
 0x149   : > { %12300 = vmatmul.mubr.msk.bf16.gmra.mrb[48].mxu0 %vm524_vm3, %v19462_v60 }
 0x14a   : > { %12303 = vmatprep.mubr.msk.bf16.mxu0 %vm524_vm3, %v19463_v4 }
 0x14f   : > { %12464 = vmatmul.mubr.msk.bf16.vlgmr.msra.gmra.mrb[4].mxu1 %vm524_vm3, %v15290_v63  ;;  %v19466_v63 = vld [vmem:[#allocation91_spill] sm:$0xff] }
 0x150   : > { %12496 = vmatpush3.bf16.msra.mxu1 %v14336_v25  ;;  %12467 = vmatprep.mubr.msk.bf16.mxu1 %vm524_vm3, %v15343_v33  ;;  %v19467_v33 = vld [vmem:[#allocation9_spill] sm:$0xff]  ;;  %v16242_v25 = vld [vmem:[%s14749_s25 + $0xe4] sm:$0xf] }
 0x151   : > { %12497 = vmatprep.subr.bf16.mxu1 %v14337_v49  ;;  %12304 = vmatmul.mubr.msk.bf16.gmra.mrb[52].mxu0 %vm524_vm3, %v19464_v20  ;;  %v10927_v56 = vrot.slane %v16242_v25, 9 }
 0x152   : > { %12307 = vmatprep.mubr.msk.bf16.mxu0 %vm524_vm3, %v19465_v38 }
 0x154   : > { %12498 = vmatpush3.bf16.msra.mxu1 %v14337_v49 }
 0x155   : > { %12531 = vmatprep.subr.bf16.mxu1 %v14338_v15 }
 0x157   : > { %12468 = vmatmul.mubr.msk.bf16.gmra.mrb[8].mxu1 %vm524_vm3, %v15345_v48  ;;  %v16234_v48 = vld [vmem:[%s14749_s25 + $0xe8] sm:$0xf] }
 0x158   : > { %12471 = vmatprep.mubr.msk.bf16.mxu1 %vm524_vm3, %v15401_v18  ;;  %v3148_v18 = vrot.slane %v16234_v48, 5 }
 0x159   : > { %12308 = vmatmul.mubr.msk.bf16.gmra.mrb[56].mxu0 %vm524_vm3, %v19466_v63 }
 0x15a   : > { %v3150_v2 = vrot.slane %v3148_v18, 4  ;;  %v3149_v49 = vsel %vm14751_vm2, %v10927_v56, %v3148_v18 }
 0x15f   : > { %12472 = vmatmul.mubr.msk.bf16.gmra.mrb[12].mxu1 %vm524_vm3, %v19460_v35  ;;  %v3151_v35 = vrot.slane %v16245_v26, 5 }
 0x160   : > { %12475 = vmatprep.mubr.msk.bf16.mxu1 %vm524_vm3, %v19461_v16  ;;  %v19469_v16 = vld [vmem:[#allocation11_spill] sm:$0xff] }
 0x167   : > { %12476 = vmatmul.mubr.msk.bf16.gmra.mrb[16].mxu1 %vm524_vm3, %v19462_v60  ;;  %v19470_v60 = vld [vmem:[#allocation99_spill] sm:$0xff] }
 0x168   : > { %12479 = vmatprep.mubr.msk.bf16.mxu1 %vm524_vm3, %v19463_v4  ;;  %v3152_v4 = vsel %vm14751_vm2, %v3150_v2, %v3151_v35  ;;  %vm5106_vm2 = vsmask.f32 5392 }
 0x169   : > { %vm17301_vm4 = vmor %vm5105_vm1, %vm5106_vm2 }
 0x16f   : > { %12480 = vmatmul.mubr.msk.bf16.gmra.mrb[20].mxu1 %vm524_vm3, %v19464_v20  ;;  %v10932_v20 = vcombine.low %v3149_v49, %v3152_v4 }
 0x170   : > { %12483 = vmatprep.mubr.msk.bf16.mxu1 %vm524_vm3, %v19465_v38  ;;  %v14339_v38 = vld [vmem:[%s18818_s3 + $0x88] sm:$0xff]  }
 0x177   : > { %12484 = vmatmul.mubr.msk.bf16.gmra.mrb[24].mxu1 %vm524_vm3, %v19466_v63  ;;  %v16282_v63 = vld [vmem:[%s18821_s6] ss:$0 sm:$0xff] }
 0x178   : > { %12487 = vmatprep.mubr.msk.bf16.mxu1 %vm524_vm3, %v19467_v33  ;;  %v16287_v33 = vld [vmem:[%s18822_s7] ss:$0 sm:$0xff] }
 0x17f   : > { %12488 = vmatmul.mubr.msk.bf16.gmra.mrb[28].mxu1 %vm524_vm3, %v19469_v16 }
 0x180   : > { %12491 = vmatprep.mubr.msk.bf16.mxu1 %vm524_vm3, %v19470_v60 }
 0x187   : > { %12492 = vmatmul.mubr.msk.bf16.gmra.mrb[0].mxu1 %vm524_vm3, %v10932_v20 }
 0x188   : > { %12499 = vmatprep.mubr.msk.bf16.mxu1 %vm524_vm3, %v15764_v36 }
 0x18f   : > { %12500 = vmatmul.mubr.msk.bf16.vlgmr.msra.gmra.mrb[4].mxu1 %vm524_vm3, %v15772_v53 }
 0x190   : > { %12532 = vmatpush3.bf16.msra.mxu1 %v14338_v15  ;;  %12503 = vmatprep.mubr.msk.bf16.mxu1 %vm524_vm3, %v15471_v7  ;;  %v12213_v15 = vpop.f32.mrb[0].mxu0 }
 0x191   : > { %12533 = vmatprep.subr.bf16.mxu1 %v14339_v38  ;;  %v743_v18 = vmul.f32 %v12213_v15, %v16282_v63  ;;  %v607_v56 = vpop.f32.mrb[1].mxu0 }
 0x192   : > { %v741_v2 = vmul.f32 %v16282_v63, %v607_v56  ;;  %v12214_v35 = vpop.f32.mrb[2].mxu0 }
 0x193   : > { %v782_v16 = vadd.f32 %v16287_v33, %v743_v18  ;;  %v744_v60 = vmul.f32 %v12214_v35, %v16282_v63  ;;  %v610_v49 = vpop.f32.mrb[3].mxu0 }
 0x194   : > { %12534 = vmatpush3.bf16.msra.mxu1 %v14339_v38  ;;  %v780_v4 = vadd.f32 %v16287_v33, %v741_v2  ;;  %v742_v20 = vmul.f32 %v16282_v63, %v610_v49  ;;  %v12217_v43 = vpop.f32.mrb[4].mxu0 }
 0x195   : > { %13011 = vmatprep.subr.bf16.mxu1 %v16270_v0  ;;  %v814_v38 = vmax.f32 %v782_v16, 0.0  ;;  %v783_v1 = vadd.f32 %v16287_v33, %v744_v60  ;;  %v747_v2 = vmul.f32 %v12217_v43, %v16282_v63  ;;  %v623_v35 = vpop.f32.mrb[5].mxu0 }
 0x196   : > { %v812_v32 = vmax.f32 %v780_v4, 0.0  ;;  %v781_v9 = vadd.f32 %v16287_v33, %v742_v20  ;;  %v745_v60 = vmul.f32 %v16282_v63, %v623_v35  ;;  %v12218_v49 = vpop.f32.mrb[6].mxu0  ;;  %v16324_v35 = vshrl.u32 %v16234_v48, 16 }
 0x197   : > { %12504 = vmatmul.mubr.msk.bf16.gmra.mrb[8].mxu1 %vm524_vm3, %v15473_v37  ;;  %v815_v15 = vmax.f32 %v783_v1, 0.0  ;;  %v786_v1 = vadd.f32 %v16287_v33, %v747_v2  ;;  %v748_v4 = vmul.f32 %v12218_v49, %v16282_v63  ;;  %v626_v20 = vpop.f32.mrb[7].mxu0 }
 0x198   : > { %12507 = vmatprep.mubr.msk.bf16.mxu1 %vm524_vm3, %v15581_v12  ;;  %v813_v56 = vmax.f32 %v781_v9, 0.0  ;;  %v784_v9 = vadd.f32 %v16287_v33, %v745_v60  ;;  %v746_v61 = vmul.f32 %v16282_v63, %v626_v20  ;;  %19475 = vst [vmem:[#allocation23_spill] sm:$0xff] %v16324_v35  ;;  %v16327_v60 = vshll.u32 %v16234_v48, 16 }
 0x199   : > { %v16303_v18 = vpack.c.bf16 %v815_v15, %v814_v38  ;;  %v818_v51 = vmax.f32 %v786_v1, 0.0  ;;  %v787_v38 = vadd.f32 %v16287_v33, %v748_v4  ;;  %v12221_v1 = vpop.f32.mrb[8].mxu0 }
 0x19a   : > { %v16306_v16 = vpack.c.bf16 %v813_v56, %v812_v32  ;;  %v816_v15 = vmax.f32 %v784_v9, 0.0  ;;  %v785_v43 = vadd.f32 %v16287_v33, %v746_v61  ;;  %v16316_v32 = vshrl.u32 %v16242_v25, 16  ;;  %19476 = vst [vmem:[#allocation24_spill] sm:$0xff] %v16327_v60  ;;  %v639_v20 = vpop.f32.mrb[9].mxu0 }
 0x19b   : > { %19471 = vst [vmem:[#allocation15_spill] sm:$0xff] %v16303_v18  ;;  %v16319_v56 = vshll.u32 %v16242_v25, 16  ;;  %v819_v2 = vmax.f32 %v787_v38, 0.0  ;;  %v751_v4 = vmul.f32 %v12221_v1, %v16282_v63  ;;  %v749_v38 = vmul.f32 %v16282_v63, %v639_v20  ;;  %v12222_v40 = vpop.f32.mrb[10].mxu0 }
 0x19c   : > { %19472 = vst [vmem:[#allocation17_spill] sm:$0xff] %v16306_v16  ;;  %19473 = vst [vmem:[#allocation19_spill] sm:$0xff] %v16316_v32  ;;  %v817_v49 = vmax.f32 %v785_v43, 0.0  ;;  %v3372_v11 = vrot.slane %v16316_v32, 5  ;;  %v752_v29 = vmul.f32 %v12222_v40, %v16282_v63  ;;  %v642_v13 = vpop.f32.mrb[11].mxu0  ;;  %v16347_v20 = vshll.u32 %v16245_v26, 16 }
 0x19d   : > { %19474 = vst [vmem:[#allocation21_spill] sm:$0xff] %v16319_v56  ;;  %v16331_v61 = vpack.c.bf16 %v819_v2, %v818_v51  ;;  %v3375_v5 = vrot.slane %v16319_v56, 6  ;;  %v790_v43 = vadd.f32 %v16287_v33, %v751_v4  ;;  %v3381_v51 = vrot.slane %v16324_v35, 5  ;;  %v12225_v44 = vpop.f32.mrb[12].mxu0  ;;  %v16751_v16 = vld [vmem:[%s14749_s25 + $0x78] sm:$0xf] }
 0x19e   : > { %v16334_v9 = vpack.c.bf16 %v817_v49, %v816_v15  ;;  %v3384_v2 = vrot.slane %v16327_v60, 6  ;;  %v788_v1 = vadd.f32 %v16287_v33, %v749_v38  ;;  %v750_v15 = vmul.f32 %v16282_v63, %v642_v13  ;;  %19479 = vst [vmem:[#allocation36_spill] sm:$0xff] %v16347_v20 }
 0x19f   : > { %12508 = vmatmul.mubr.msk.bf16.gmra.mrb[12].mxu1 %vm524_vm3, %v15594_v17  ;;  %19477 = vst [vmem:[#allocation26_spill] sm:$0xff] %v16331_v61  ;;  %v19075_v49 = vshrl.u32 %v16245_v26, 16  ;;  %v822_v32 = vmax.f32 %v790_v43, 0.0  ;;  %v791_v56 = vadd.f32 %v16287_v33, %v752_v29  ;;  %v3376_v35 = vor.u32 %v3375_v5, %v3372_v11  ;;  %v16741_v61 = vld [vmem:[%s14749_s25 + $0x6c] sm:$0xf] }
 0x1a0   : > { %12511 = vmatprep.mubr.msk.bf16.mxu1 %vm524_vm3, %v15746_v23  ;;  %19478 = vst [vmem:[#allocation28_spill] sm:$0xff] %v16334_v9  ;;  %v820_v4 = vmax.f32 %v788_v1, 0.0  ;;  %v789_v40 = vadd.f32 %v16287_v33, %v750_v15  ;;  %v3385_v60 = vor.u32 %v3384_v2, %v3381_v51  ;;  %v3394_v43 = vrot.slane %v16347_v20, 6  ;;  %v16744_v9 = vld [vmem:[%s14749_s25 + $0x70] sm:$0xf] }
 0x1a1   : > { %v823_v47 = vmax.f32 %v791_v56, 0.0  ;;  %v3391_v13 = vrot.slane %v19075_v49, 5  ;;  %v755_v1 = vmul.f32 %v12225_v44, %v16282_v63  ;;  %v655_v56 = vpop.f32.mrb[13].mxu0  ;;  %v16748_v18 = vcombine.low %v16741_v61, %v16744_v9 }
 0x1a2   : > { %v821_v38 = vmax.f32 %v789_v40, 0.0  ;;  %v753_v5 = vmul.f32 %v16282_v63, %v655_v56  ;;  %v12226_v11 = vpop.f32.mrb[14].mxu0 }
 0x1a3   : > { %v16358_v29 = vpack.c.bf16 %v823_v47, %v822_v32  ;;  %v794_v51 = vadd.f32 %v16287_v33, %v755_v1  ;;  %v756_v2 = vmul.f32 %v12226_v11, %v16282_v63  ;;  %v658_v40 = vpop.f32.mrb[15].mxu0  ;;  %v3387_v47 = vrot.slane %v3385_v60, 4  ;;  %19522 = vst [vmem:[#allocation181_spill] sm:$0xff] %v16748_v18 }
 0x1a4   : > { %v16361_v15 = vpack.c.bf16 %v821_v38, %v820_v4  ;;  %v792_v49 = vadd.f32 %v16287_v33, %v753_v5  ;;  %v754_v20 = vmul.f32 %v16282_v63, %v658_v40  ;;  %v3395_v32 = vor.u32 %v3394_v43, %v3391_v13  ;;  %v12229_v11 = vpop.f32.mrb[16].mxu0 }
 0x1a5   : > { %19480 = vst [vmem:[#allocation46_spill] sm:$0xff] %v16358_v29  ;;  %v826_v29 = vmax.f32 %v794_v51, 0.0  ;;  %v795_v44 = vadd.f32 %v16287_v33, %v756_v2 }
 0x1a6   : > { %19481 = vst [vmem:[#allocation55_spill] sm:$0xff] %v16361_v15  ;;  %v824_v4 = vmax.f32 %v792_v49, 0.0  ;;  %v793_v38 = vadd.f32 %v16287_v33, %v754_v20  ;;  %v3396_v13 = vsel %vm15407_vm9, %v3387_v47, %v3395_v32  ;;  %v759_v49 = vmul.f32 %v12229_v11, %v16282_v63  ;;  %v671_v20 = vpop.f32.mrb[17].mxu0 }
 0x1a7   : > { %12512 = vmatmul.mubr.msk.bf16.gmra.mrb[16].mxu1 %vm524_vm3, %v15954_v3  ;;  %v827_v56 = vmax.f32 %v795_v44, 0.0  ;;  %v757_v51 = vmul.f32 %v16282_v63, %v671_v20  ;;  %v12230_v2 = vpop.f32.mrb[18].mxu0 }
 0x1a8   : > { %12515 = vmatprep.mubr.msk.bf16.mxu1 %vm524_vm3, %v15999_v41  ;;  %v825_v1 = vmax.f32 %v793_v38, 0.0  ;;  %v798_v40 = vadd.f32 %v16287_v33, %v759_v49  ;;  %v760_v44 = vmul.f32 %v12230_v2, %v16282_v63  ;;  %v674_v38 = vpop.f32.mrb[19].mxu0 }
 0x1a9   : > { %v16378_v43 = vpack.c.bf16 %v827_v56, %v826_v29  ;;  %v12233_v11 = vpop.f32.mrb[20].mxu0 }
 0x1aa   : > { %v16381_v5 = vpack.c.bf16 %v825_v1, %v824_v4  ;;  %v830_v29 = vmax.f32 %v798_v40, 0.0  ;;  %v799_v47 = vadd.f32 %v16287_v33, %v760_v44  ;;  %v687_v49 = vpop.f32.mrb[21].mxu0 }
 0x1ab   : > { %19482 = vst [vmem:[#allocation61_spill] sm:$0xff] %v16378_v43  ;;  %v12234_v2 = vpop.f32.mrb[22].mxu0 }
 0x1ac   : > { %19483 = vst [vmem:[#allocation10_spill] sm:$0xff] %v16381_v5  ;;  %v831_v56 = vmax.f32 %v799_v47, 0.0  ;;  %v764_v44 = vmul.f32 %v12234_v2, %v16282_v63  ;;  %v14341_v47 = vld [vmem:[%s18818_s3 + $0x138] sm:$0xff]   ;;  %v16422_v2 = vld [vmem:[%s18818_s3 + $0x120] sm:$0xff]  }
 0x1ad   : > { %v16730_v5 = vld [vmem:[%s14749_s25 + $0x64] sm:$0xf] }
 0x1af   : > { %12516 = vmatmul.mubr.msk.bf16.gmra.mrb[20].mxu1 %vm524_vm3, %v16008_v59 }
 0x1b0   : > { %12519 = vmatprep.mubr.msk.bf16.mxu1 %vm524_vm3, %v16054_v6 }
 0x1b7   : > { %12520 = vmatmul.mubr.msk.bf16.gmra.mrb[24].mxu1 %vm524_vm3, %v16056_v31 }
 0x1b8   : > { %12523 = vmatprep.mubr.msk.bf16.mxu1 %vm524_vm3, %v16085_v54  ;;  %v3377_v54 = vrot.slane %v3376_v35, 4 }
 0x1ba   : > { %v3386_v35 = vsel %vm15407_vm9, %v3377_v54, %v3385_v60  ;;  %v796_v54 = vadd.f32 %v16287_v33, %v757_v51  ;;  %v758_v60 = vmul.f32 %v16282_v63, %v674_v38  ;;  %v761_v51 = vmul.f32 %v16282_v63, %v687_v49  ;;  %v690_v38 = vpop.f32.mrb[23].mxu0 }
 0x1bc   : > { %v828_v32 = vmax.f32 %v796_v54, 0.0  ;;  %v797_v4 = vadd.f32 %v16287_v33, %v758_v60  ;;  %v800_v54 = vadd.f32 %v16287_v33, %v761_v51  ;;  %v762_v60 = vmul.f32 %v16282_v63, %v690_v38 }
 0x1be   : > { %v829_v1 = vmax.f32 %v797_v4, 0.0  ;;  %v801_v4 = vadd.f32 %v16287_v33, %v762_v60 }
 0x1bf   : > { %12524 = vmatmul.mubr.msk.bf16.gmra.mrb[28].mxu1 %vm524_vm3, %v16087_v24 }
 0x1c0   : > { %12527 = vmatprep.mubr.msk.bf16.mxu1 %vm524_vm3, %v16101_v14  ;;  %v16386_v14 = vcombine.low %v3386_v35, %v3396_v13  ;;  %v16396_v35 = vpack.c.bf16 %v831_v56, %v830_v29  ;;  %v763_v13 = vmul.f32 %v12233_v11, %v16282_v63  ;;  %v16399_v20 = vpack.c.bf16 %v829_v1, %v828_v32  ;;  %v12237_v11 = vpop.f32.mrb[24].mxu0 }
 0x1c1   : > { %v803_v29 = vadd.f32 %v16287_v33, %v764_v44  ;;  %v832_v32 = vmax.f32 %v800_v54, 0.0  ;;  %v833_v1 = vmax.f32 %v801_v4, 0.0  ;;  %v767_v49 = vmul.f32 %v12237_v11, %v16282_v63  ;;  %v703_v51 = vpop.f32.mrb[25].mxu0 }
 0x1c2   : > { %19484 = vst [vmem:[#allocation77_spill] sm:$0xff] %v16386_v14  ;;  %19485 = vst [vmem:[#allocation81_spill] sm:$0xff] %v16396_v35  ;;  %v802_v40 = vadd.f32 %v16287_v33, %v763_v13  ;;  %v12238_v44 = vpop.f32.mrb[26].mxu0  ;;  %v16706_v35 = vld [vmem:[%s14749_s25 + $0x4c] sm:$0xf] }
 0x1c3   : > { %19486 = vst [vmem:[#allocation82_spill] sm:$0xff] %v16399_v20  ;;  %v835_v56 = vmax.f32 %v803_v29, 0.0  ;;  %v706_v38 = vpop.f32.mrb[27].mxu0  ;;  %v16720_v20 = vld [vmem:[%s14749_s25 + $0x58] sm:$0xf] }
 0x1c4   : > { %v766_v60 = vmul.f32 %v16282_v63, %v706_v38  ;;  %v12241_v11 = vpop.f32.mrb[28].mxu0 }
 0x1c6   : > { %v805_v4 = vadd.f32 %v16287_v33, %v766_v60 }
 0x1c7   : > { %12528 = vmatmul.mubr.msk.bf16.gmra.mrb[0].mxu1 %vm524_vm3, %v16386_v14 }
 0x1c8   : > { %12535 = vmatprep.mubr.msk.bf16.mxu1 %vm524_vm3, %v19447_v21  ;;  %v834_v21 = vmax.f32 %v802_v40, 0.0  ;;  %v16424_v40 = vpack.c.bf16 %v833_v1, %v832_v32  ;;  %v837_v1 = vmax.f32 %v805_v4, 0.0 }
 0x1ca   : > { %v16416_v13 = vpack.c.bf16 %v835_v56, %v834_v21  ;;  %19488 = vst [vmem:[#allocation53_spill] sm:$0xff] %v16424_v40 }
 0x1cc   : > { %19487 = vst [vmem:[#allocation44_spill] sm:$0xff] %v16416_v13 }
 0x1cf   : > { %12536 = vmatmul.mubr.msk.bf16.vlgmr.msra.gmra.mrb[4].mxu1 %vm524_vm3, %v19448_v10  ;;  %v765_v10 = vmul.f32 %v16282_v63, %v703_v51  ;;  %v719_v51 = vpop.f32.mrb[29].mxu0 }
 0x1d0   : > { %12539 = vmatprep.mubr.msk.bf16.mxu1 %vm524_vm3, %v19449_v8  ;;  %13012 = vmatpush3.bf16.msra.mxu1 %v16270_v0  ;;  %v806_v8 = vadd.f32 %v16287_v33, %v767_v49  ;;  %v768_v0 = vmul.f32 %v12238_v44, %v16282_v63  ;;  %v769_v44 = vmul.f32 %v16282_v63, %v719_v51 }
 0x1d1   : > { %13013 = vmatprep.subr.bf16.mxu1 %v14341_v47  ;;  %v804_v54 = vadd.f32 %v16287_v33, %v765_v10 }
 0x1d2   : > { %v838_v21 = vmax.f32 %v806_v8, 0.0  ;;  %v807_v29 = vadd.f32 %v16287_v33, %v768_v0  ;;  %v12242_v8 = vpop.f32.mrb[30].mxu0 }
 0x1d3   : > { %v836_v32 = vmax.f32 %v804_v54, 0.0  ;;  %v772_v38 = vmul.f32 %v12242_v8, %v16282_v63  ;;  %v808_v54 = vadd.f32 %v16287_v33, %v769_v44  ;;  %v16480_v8 = vld [vmem:[%s14749_s25 + $0xc] sm:$0xf] }
 0x1d4   : > { %13014 = vmatpush3.bf16.msra.mxu1 %v14341_v47  ;;  %v839_v56 = vmax.f32 %v807_v29, 0.0  ;;  %v771_v47 = vmul.f32 %v12241_v11, %v16282_v63 }
 0x1d5   : > { %13047 = vmatprep.subr.bf16.mxu1 %v16422_v2  ;;  %v16441_v10 = vpack.c.bf16 %v837_v1, %v836_v32  ;;  %v840_v29 = vmax.f32 %v808_v54, 0.0  ;;  %v3615_v54 = vrot.slane %v16234_v48, 6 }
 0x1d6   : > { %v16438_v49 = vpack.c.bf16 %v839_v56, %v838_v21  ;;  %v810_v0 = vadd.f32 %v16287_v33, %v771_v47  ;;  %v811_v21 = vadd.f32 %v16287_v33, %v772_v38 }
 0x1d7   : > { %12540 = vmatmul.mubr.msk.bf16.gmra.mrb[8].mxu1 %vm524_vm3, %v19450_v58  ;;  %19490 = vst [vmem:[#allocation91_spill] sm:$0xff] %v16441_v10  ;;  %v722_v58 = vpop.f32.mrb[31].mxu0  ;;  %v3617_v24 = vrot.slane %v3615_v54, 4  ;;  %v16631_v10 = vld [vmem:[#allocation2] sm:$0xff]  }
 0x1d8   : > { %12543 = vmatprep.mubr.msk.bf16.mxu1 %vm524_vm3, %v19451_v22  ;;  %19489 = vst [vmem:[#allocation90_spill] sm:$0xff] %v16438_v49  ;;  %v770_v22 = vmul.f32 %v16282_v63, %v722_v58  ;;  %v842_v60 = vmax.f32 %v810_v0, 0.0  ;;  %v843_v4 = vmax.f32 %v811_v21, 0.0  ;;  %v16463_v63 = vld [vmem:[%s14749_s25] sm:$0xf] }
 0x1d9   : > { %v16485_v58 = vld [vmem:[%s14749_s25 + $0x10] sm:$0xf]  ;;  %v14356_v21 = vld [vmem:[#allocation2 + $0x20] sm:$0xff]  }
 0x1da   : > { %v809_v32 = vadd.f32 %v16287_v33, %v770_v22  ;;  %v16454_v1 = vpack.c.bf16 %v843_v4, %v842_v60  ;;  %v16466_v33 = vld [vmem:[%s14749_s25 + $0x4] sm:$0xf]  ;;  %v16491_v22 = vshrl.u32 %v16480_v8, 16  ;;  %v16504_v4 = vshll.u32 %v16485_v58, 16  ;;  %12567 = vmatprep.subr.bf16.mxu0 %v14356_v21 }
 0x1db   : > { %v7480_v47 = vshll.u32 %v16466_v33, 16  ;;  %12568 = vmatpush3.bf16.msra.mxu0 %v14356_v21 }
 0x1dc   : > { %v841_v56 = vmax.f32 %v809_v32, 0.0  ;;  %19491 = vst [vmem:[#allocation9_spill] sm:$0xff] %v16454_v1  ;;  %19493 = vst [vmem:[#allocation99_spill] sm:$0xff] %v16491_v22  ;;  %v16501_v32 = vshll.u32 %v16480_v8, 16  ;;  %v3618_v1 = vrot.slane %v16245_v26, 6  ;;  %v4637_v49 = vrot.slane %v16491_v22, 5 }
 0x1dd   : > { %19497 = vst [vmem:[#allocation156_spill] sm:$0xff] %v16504_v4 }
 0x1de   : > { %v16456_v11 = vpack.c.bf16 %v841_v56, %v840_v29  ;;  %v16498_v29 = vld [vmem:[%s14749_s25 + $0x14] sm:$0x7]  ;;  %19496 = vst [vmem:[#allocation155_spill] sm:$0xff] %v16501_v32  ;;  %v3619_v26 = vsel %vm14806_vm6, %v3617_v24, %v3618_v1 }
 0x1df   : > { %12544 = vmatmul.mubr.msk.bf16.gmra.mrb[12].mxu1 %vm524_vm3, %v19452_v52  ;;  %v7468_v52 = vshrl.u32 %v16463_v63, 16  ;;  %19495 = vst [vmem:[#allocation154_spill] sm:$0xff] %v16498_v29 }
 0x1e0   : > { %12547 = vmatprep.mubr.msk.bf16.mxu1 %vm524_vm3, %v19453_v30  ;;  %19492 = vst [vmem:[#allocation11_spill] sm:$0xff] %v16456_v11  ;;  %v7471_v30 = vshll.u32 %v16463_v63, 16  ;;  %v16518_v11 = vshll.u32 %v16498_v29, 16 }
 0x1e1   : > { %v7470_v51 = vrot.slane %v7468_v52, 5 }
 0x1e2   : > { %v7473_v44 = vrot.slane %v7471_v30, 6  ;;  %19502 = vst [vmem:[#allocation161_spill] sm:$0xff] %v16518_v11 }
 0x1e4   : > { %v7474_v56 = vor.u32 %v7473_v44, %v7470_v51  ;;  %v4638_v51 = vrot.slane %v16501_v32, 6 }
 0x1e7   : > { %12548 = vmatmul.mubr.msk.bf16.gmra.mrb[16].mxu1 %vm524_vm3, %v19454_v57  ;;  %v7477_v57 = vshrl.u32 %v16466_v33, 16 }
 0x1e8   : > { %12551 = vmatprep.mubr.msk.bf16.mxu1 %vm524_vm3, %v19455_v39  ;;  %v16477_v39 = vld [vmem:[%s14749_s25 + $0x8] sm:$0x7] }
 0x1e9   : > { %v7479_v0 = vrot.slane %v7477_v57, 5  ;;  %v7487_v38 = vshrl.u32 %v16477_v39, 16 }
 0x1eb   : > { %v7489_v30 = vrot.slane %v7487_v38, 5 }
 0x1ef   : > { %12552 = vmatmul.mubr.msk.bf16.gmra.mrb[20].mxu1 %vm524_vm3, %v19456_v34  ;;  %v7482_v34 = vrot.slane %v7480_v47, 6 }
 0x1f0   : > { %12555 = vmatprep.mubr.msk.bf16.mxu1 %vm524_vm3, %v19457_v28  ;;  %v7490_v28 = vshll.u32 %v16477_v39, 16 }
 0x1f1   : > { %v7483_v52 = vor.u32 %v7482_v34, %v7479_v0  ;;  %v4642_v0 = vrot.slane %v16504_v4, 6  ;;  %v19091_v34 = vshrl.u32 %v16498_v29, 16 }
 0x1f2   : > { %v7492_v57 = vrot.slane %v7490_v28, 6 }
 0x1f3   : > { %v7485_v38 = vrot.slane %v7483_v52, 4 }
 0x1f4   : > { %v16493_v60 = vpop.f32.mrb[60].mxu0  ;;  %v7493_v28 = vor.u32 %v7492_v57, %v7489_v30  ;;  %v4649_v30 = vrot.slane %v16518_v11, 6  ;;  %v14365_v11 = vld [vmem:[#allocation2 + $0x38] sm:$0xff]  }
 0x1f5   : > { %19494 = vst [vmem:[#allocation153_spill] sm:$0xff] %v16493_v60  ;;  %v16509_v48 = vpop.f32.mrb[61].mxu0 }
 0x1f6   : > { %19499 = vst [vmem:[#allocation158_spill] sm:$0xff] %v16509_v48  ;;  %v16511_v47 = vpop.f32.mrb[62].mxu0  ;;  %v7494_v24 = vsel %vm15407_vm9, %v7485_v38, %v7493_v28  ;;  %v16768_v48 = vld [vmem:[%s14749_s25 + $0x88] sm:$0xf] }
 0x1f7   : > { %12556 = vmatmul.mubr.msk.bf16.gmra.mrb[24].mxu1 %vm524_vm3, %v15183_v19  ;;  %v16507_v19 = vshrl.u32 %v16485_v58, 16  ;;  %19500 = vst [vmem:[#allocation159_spill] sm:$0xff] %v16511_v47  ;;  %v16514_v14 = vpop.f32.mrb[63].mxu0 }
 0x1f8   : > { %12559 = vmatprep.mubr.msk.bf16.mxu1 %vm524_vm3, %v15191_v62  ;;  %v10974_v62 = vrot.slane %v16242_v25, 10  ;;  %19501 = vst [vmem:[#allocation160_spill] sm:$0xff] %v16514_v14  ;;  %v7475_v25 = vrot.slane %v7474_v56, 4  ;;  %v4648_v56 = vrot.slane %v19091_v34, 5  ;;  %v16754_v14 = vld [vmem:[%s14749_s25 + $0x7c] sm:$0xf] }
 0x1f9   : > { %19498 = vst [vmem:[#allocation157_spill] sm:$0xff] %v16507_v19  ;;  %v4641_v44 = vrot.slane %v16507_v19, 5  ;;  %v4639_v19 = vor.u32 %v4638_v51, %v4637_v49  ;;  %v16758_v47 = vcombine.low %v16751_v16, %v16754_v14 }
 0x1fa   : > { %v3616_v21 = vsel %vm14806_vm6, %v10974_v62, %v3615_v54  ;;  %v7484_v54 = vsel %vm15407_vm9, %v7475_v25, %v7483_v52 }
 0x1fb   : > { %v4643_v4 = vor.u32 %v4642_v0, %v4641_v44  ;;  %v11314_v49 = vcombine.low %v7484_v54, %v7494_v24  ;;  %v4640_v62 = vrot.slane %v4639_v19, 4  ;;  %v4650_v44 = vor.u32 %v4649_v30, %v4648_v56  ;;  %v14362_v54 = vld [vmem:[%s18818_s3 + $0x140] sm:$0xff]   ;;  %19523 = vst [vmem:[#allocation182_spill] sm:$0xff] %v16758_v47 }
 0x1fc   : > { %v16531_v22 = vpop.f32.mrb[32].mxu0 }
 0x1fd   : > { %v16538_v57 = vpop.f32.mrb[33].mxu0  ;;  %v4645_v51 = vrot.slane %v4643_v4, 4  ;;  %v4644_v52 = vsel %vm15407_vm9, %v4640_v62, %v4643_v4  ;;  %v14364_v4 = vld [vmem:[#allocation2 + $0x30] sm:$0xff]  }
 0x1fe   : > { %v16544_v45 = vpop.f32.mrb[34].mxu0 }
 0x1ff   : > { %12560 = vmatmul.mubr.msk.bf16.gmra.mrb[28].mxu1 %vm524_vm3, %v19458_v50  ;;  %v14360_v50 = vld [vmem:[#allocation2 + $0x28] sm:$0xff]   ;;  %v16546_v1 = vpop.f32.mrb[35].mxu0  ;;  %v4651_v25 = vsel %vm15407_vm9, %v4645_v51, %v4650_v44 }
 0x200   : > { %12563 = vmatprep.mubr.msk.bf16.mxu1 %vm524_vm3, %v16187_v27  ;;  %12569 = vmatprep.subr.bf16.mxu0 %v14360_v50  ;;  %v10979_v27 = vcombine.low %v3616_v21, %v3619_v26  ;;  %v16562_v19 = vcombine.low %v4644_v52, %v4651_v25  ;;  %v14343_v21 = vld [vmem:[%s18818_s3 + $0x128] sm:$0xff]  }
 0x201   : > { %12570 = vmatpush3.bf16.msra.mxu0 %v14360_v50 }
 0x202   : > { %19503 = vst [vmem:[#allocation162_spill] sm:$0xff] %v16562_v19  ;;  %12571 = vmatprep.subr.bf16.mxu0 %v14364_v4 }
 0x204   : > { %v16549_v0 = vpop.f32.mrb[36].mxu0 }
 0x205   : > { %v16556_v38 = vpop.f32.mrb[37].mxu0  ;;  %12572 = vmatpush3.bf16.msra.mxu0 %v14364_v4 }
 0x206   : > { %v16558_v26 = vpop.f32.mrb[38].mxu0  ;;  %12573 = vmatprep.subr.bf16.mxu0 %v14365_v11 }
 0x207   : > { %12564 = vmatmul.mubr.msk.bf16.gmra.mrb[0].mxu1 %vm524_vm3, %v10979_v27  ;;  %v16560_v28 = vpop.f32.mrb[39].mxu0 }
 0x208   : > { %13015 = vmatprep.mubr.msk.bf16.mxu1 %vm524_vm3, %v11314_v49 }
 0x209   : > { %12574 = vmatpush3.bf16.msra.mxu0 %v14365_v11  ;;  %v11333_v11 = vcombine.low %v16463_v63, %v16466_v33 }
 0x20a   : > { %12607 = vmatprep.subr.bf16.mxu0 %v16631_v10 }
 0x20c   : > { %v16569_v56 = vpop.f32.mrb[40].mxu0 }
 0x20d   : > { %v16574_v30 = vpop.f32.mrb[41].mxu0 }
 0x20e   : > { %v16576_v50 = vpop.f32.mrb[42].mxu0 }
 0x20f   : > { %13016 = vmatmul.mubr.msk.bf16.vlgmr.msra.gmra.mrb[32].mxu1 %vm524_vm3, %v16562_v19  ;;  %v16581_v24 = vpop.f32.mrb[43].mxu0 }
 0x210   : > { %13019 = vmatprep.mubr.msk.bf16.mxu1 %vm524_vm3, %v15935_v55  ;;  %13048 = vmatpush3.bf16.msra.mxu1 %v16422_v2 }
 0x211   : > { %13049 = vmatprep.subr.bf16.mxu1 %v14343_v21 }
 0x214   : > { %13050 = vmatpush3.bf16.msra.mxu1 %v14343_v21  ;;  %v16585_v27 = vpop.f32.mrb[44].mxu0 }
 0x215   : > { %13083 = vmatprep.subr.bf16.mxu1 %v14362_v54  ;;  %v16589_v2 = vpop.f32.mrb[45].mxu0 }
 0x216   : > { %v16591_v49 = vpop.f32.mrb[46].mxu0 }
 0x217   : > { %13020 = vmatmul.mubr.msk.bf16.gmra.mrb[36].mxu1 %vm524_vm3, %v15707_v42  ;;  %v16593_v62 = vpop.f32.mrb[47].mxu0  ;;  %v16727_v42 = vld [vmem:[%s14749_s25 + $0x60] sm:$0xf] }
 0x218   : > { %13023 = vmatprep.mubr.msk.bf16.mxu1 %vm524_vm3, %v15764_v36  ;;  %v16717_v36 = vld [vmem:[%s14749_s25 + $0x54] sm:$0xf]  ;;  %v16734_v15 = vcombine.low %v16727_v42, %v16730_v5 }
 0x219   : > { %v16724_v43 = vcombine.low %v16717_v36, %v16720_v20 }
 0x21a   : > { %19521 = vst [vmem:[#allocation180_spill] sm:$0xff] %v16734_v15 }
 0x21b   : > { %19520 = vst [vmem:[#allocation179_spill] sm:$0xff] %v16724_v43 }
 0x21c   : > { %v16597_v51 = vpop.f32.mrb[48].mxu0 }
 0x21d   : > { %19504 = vst [vmem:[#allocation163_spill] sm:$0xff] %v16597_v51  ;;  %v16601_v44 = vpop.f32.mrb[49].mxu0  ;;  %v14474_v51 = vld [vmem:[%s14749_s25 + $0x2c] sm:$0x7] }
 0x21e   : > { %19505 = vst [vmem:[#allocation164_spill] sm:$0xff] %v16601_v44  ;;  %v16603_v52 = vpop.f32.mrb[50].mxu0 }
 0x21f   : > { %13024 = vmatmul.mubr.msk.bf16.gmra.mrb[40].mxu1 %vm524_vm3, %v15772_v53  ;;  %19506 = vst [vmem:[#allocation165_spill] sm:$0xff] %v16603_v52  ;;  %v16605_v25 = vpop.f32.mrb[51].mxu0  ;;  %v7969_v52 = vrot.slane %v16498_v29, 7 }
 0x220   : > { %13027 = vmatprep.mubr.msk.bf16.mxu1 %vm524_vm3, %v15471_v7  ;;  %19507 = vst [vmem:[#allocation166_spill] sm:$0xff] %v16605_v25  ;;  %v16696_v7 = vld [vmem:[%s14749_s25 + $0x40] sm:$0xf] }
 0x224   : > { %v16609_v21 = vpop.f32.mrb[52].mxu0 }
 0x225   : > { %19508 = vst [vmem:[#allocation167_spill] sm:$0xff] %v16609_v21  ;;  %v16613_v4 = vpop.f32.mrb[53].mxu0  ;;  %v16826_v21 = vld [vmem:[%s14749_s25 + $0xb4] sm:$0xf] }
 0x226   : > { %19509 = vst [vmem:[#allocation168_spill] sm:$0xff] %v16613_v4  ;;  %v16615_v34 = vpop.f32.mrb[54].mxu0 }
 0x227   : > { %13028 = vmatmul.mubr.msk.bf16.gmra.mrb[44].mxu1 %vm524_vm3, %v15473_v37  ;;  %19510 = vst [vmem:[#allocation169_spill] sm:$0xff] %v16615_v34  ;;  %v16617_v46 = vpop.f32.mrb[55].mxu0  ;;  %v16693_v37 = vld [vmem:[%s14749_s25 + $0x3c] sm:$0xf]  ;;  %v7966_v34 = vrot.slane %v16485_v58, 7 }
 0x228   : > { %13031 = vmatprep.mubr.msk.bf16.mxu1 %vm524_vm3, %v15581_v12  ;;  %19511 = vst [vmem:[#allocation170_spill] sm:$0xff] %v16617_v46  ;;  %v16700_v40 = vcombine.low %v16693_v37, %v16696_v7  ;;  %v19528_v46 = vmov 0 }
 0x229   : > { %v19529_v46 = vsel %vm16811_vm12, 4294967295, %v19528_v46 }
 0x22a   : > { %19518 = vst [vmem:[#allocation177_spill] sm:$0xff] %v16700_v40  ;;  %19530 = vst [vmem:[#allocation187_spill] sm:$0xff] %v19529_v46  ;;  %v19682_v46 = vld [vmem:[#allocation98_spill] sm:$0xff] }
 0x22c   : > { %v16621_v32 = vpop.f32.mrb[56].mxu0 }
 0x22d   : > { %19512 = vst [vmem:[#allocation171_spill] sm:$0xff] %v16621_v32  ;;  %v16625_v55 = vpop.f32.mrb[57].mxu0  ;;  %v16800_v32 = vld [vmem:[%s14749_s25 + $0xa8] sm:$0xf] }
 0x22e   : > { %19513 = vst [vmem:[#allocation172_spill] sm:$0xff] %v16625_v55  ;;  %v16627_v19 = vpop.f32.mrb[58].mxu0 }
 0x22f   : > { %13032 = vmatmul.mubr.msk.bf16.gmra.mrb[48].mxu1 %vm524_vm3, %v15594_v17  ;;  %19514 = vst [vmem:[#allocation173_spill] sm:$0xff] %v16627_v19  ;;  %v16629_v12 = vpop.f32.mrb[59].mxu0  ;;  %v16671_v17 = vld [vmem:[%s14749_s25 + $0x28] sm:$0xf]  ;;  %v16793_v19 = vld [vmem:[%s14749_s25 + $0xa0] sm:$0xf] }
 0x230   : > { %13035 = vmatprep.mubr.msk.bf16.mxu1 %vm524_vm3, %v15746_v23  ;;  %19515 = vst [vmem:[#allocation174_spill] sm:$0xff] %v16629_v12  ;;  %v14363_v23 = vld [vmem:[%s18818_s3 + $0x148] sm:$0xff]   ;;  %v16790_v12 = vld [vmem:[%s14749_s25 + $0x9c] sm:$0xf] }
 0x231   : > { %v16797_v55 = vcombine.low %v16790_v12, %v16793_v19 }
 0x233   : > { %19526 = vst [vmem:[#allocation185_spill] sm:$0xff] %v16797_v55 }
 0x237   : > { %13036 = vmatmul.mubr.msk.bf16.gmra.mrb[52].mxu1 %vm524_vm3, %v15954_v3  ;;  %v16650_v3 = vld [vmem:[%s14749_s25 + $0x18] sm:$0xf] }
 0x238   : > { %13039 = vmatprep.mubr.msk.bf16.mxu1 %vm524_vm3, %v15999_v41  ;;  %v11334_v41 = vcombine.low %v16480_v8, %v16485_v58  ;;  %v7968_v58 = vrot.slane %v7966_v34, 4 }
 0x23f   : > { %13040 = vmatmul.mubr.msk.bf16.gmra.mrb[56].mxu1 %vm524_vm3, %v16008_v59  ;;  %v16653_v59 = vld [vmem:[%s14749_s25 + $0x1c] sm:$0xf] }
 0x240   : > { %13043 = vmatprep.mubr.msk.bf16.mxu1 %vm524_vm3, %v16054_v6  ;;  %v11335_v6 = vcombine.low %v16650_v3, %v16653_v59 }
 0x247   : > { %13044 = vmatmul.mubr.msk.bf16.gmra.mrb[60].mxu1 %vm524_vm3, %v16056_v31  ;;  %v16668_v31 = vld [vmem:[%s14749_s25 + $0x24] sm:$0xf] }
 0x248   : > { %13051 = vmatprep.mubr.msk.bf16.mxu1 %vm524_vm3, %v11333_v11  ;;  %v16665_v11 = vld [vmem:[%s18818_s3 + $0x150] sm:$0xff]   ;;  %v16675_v13 = vcombine.low %v16668_v31, %v16671_v17 }
 0x24a   : > { %19516 = vst [vmem:[#allocation175_spill] sm:$0xff] %v16675_v13 }
 0x24f   : > { %13052 = vmatmul.mubr.msk.bf16.vlgmr.msra.gmra.mrb[32].mxu1 %vm524_vm3, %v11334_v41  ;;  %v16678_v41 = vld [vmem:[%s14749_s25 + $0x30] sm:$0xf] }
 0x250   : > { %13055 = vmatprep.mubr.msk.bf16.mxu1 %vm524_vm3, %v11335_v6  ;;  %13084 = vmatpush3.bf16.msra.mxu1 %v14362_v54  ;;  %v16681_v6 = vld [vmem:[%s14749_s25 + $0x34] sm:$0xf] }
 0x251   : > { %13085 = vmatprep.subr.bf16.mxu1 %v14363_v23  ;;  %v16685_v54 = vcombine.low %v16678_v41, %v16681_v6 }
 0x253   : > { %19517 = vst [vmem:[#allocation176_spill] sm:$0xff] %v16685_v54 }
 0x254   : > { %13086 = vmatpush3.bf16.msra.mxu1 %v14363_v23  ;;  %v16703_v23 = vld [vmem:[%s14749_s25 + $0x48] sm:$0xf] }
 0x255   : > { %13119 = vmatprep.subr.bf16.mxu1 %v16665_v11  ;;  %v16710_v53 = vcombine.low %v16703_v23, %v16706_v35 }
 0x257   : > { %13056 = vmatmul.mubr.msk.bf16.gmra.mrb[36].mxu1 %vm524_vm3, %v16675_v13  ;;  %19519 = vst [vmem:[#allocation178_spill] sm:$0xff] %v16710_v53  ;;  %v16829_v13 = vld [vmem:[%s14749_s25 + $0xb8] sm:$0xf] }
 0x258   : > { %13059 = vmatprep.mubr.msk.bf16.mxu1 %vm524_vm3, %v16685_v54  ;;  %v7962_v54 = vrot.slane %v16477_v39, 7  ;;  %v7973_v39 = vrot.slane %v16653_v59, 7 }
 0x25f   : > { %13060 = vmatmul.mubr.msk.bf16.gmra.mrb[40].mxu1 %vm524_vm3, %v16700_v40 }
 0x260   : > { %13063 = vmatprep.mubr.msk.bf16.mxu1 %vm524_vm3, %v16710_v53  ;;  %v16778_v53 = vld [vmem:[%s14749_s25 + $0x94] sm:$0xf] }
 0x267   : > { %13064 = vmatmul.mubr.msk.bf16.gmra.mrb[44].mxu1 %vm524_vm3, %v16724_v43  ;;  %v16775_v43 = vld [vmem:[%s14749_s25 + $0x90] sm:$0xf] }
 0x268   : > { %13067 = vmatprep.mubr.msk.bf16.mxu1 %vm524_vm3, %v16734_v15  ;;  %v16765_v15 = vld [vmem:[%s14749_s25 + $0x84] sm:$0xf] }
 0x269   : > { %v16772_v60 = vcombine.low %v16765_v15, %v16768_v48 }
 0x26b   : > { %19524 = vst [vmem:[#allocation183_spill] sm:$0xff] %v16772_v60 }
 0x26f   : > { %13068 = vmatmul.mubr.msk.bf16.gmra.mrb[48].mxu1 %vm524_vm3, %v16748_v18  ;;  %v16782_v18 = vcombine.low %v16775_v43, %v16778_v53 }
 0x270   : > { %13071 = vmatprep.mubr.msk.bf16.mxu1 %vm524_vm3, %v16758_v47  ;;  %v7959_v47 = vrot.slane %v16466_v33, 7  ;;  %v11367_v33 = vrot.slane %v16463_v63, 11 }
 0x271   : > { %19525 = vst [vmem:[#allocation184_spill] sm:$0xff] %v16782_v18 }
 0x272   : > { %v7961_v40 = vrot.slane %v7959_v47, 4  ;;  %v7960_v4 = vsel %vm16811_vm12, %v11367_v33, %v7959_v47  ;;  %v11369_v47 = vrot.slane %v16650_v3, 11  ;;  %v7980_v33 = vrot.slane %v16671_v17, 7 }
 0x274   : > { %v7963_v63 = vsel %vm16811_vm12, %v7961_v40, %v7962_v54  ;;  %v7975_v40 = vrot.slane %v7973_v39, 4  ;;  %v14473_v54 = vld [vmem:[%s14749_s25 + $0x20] sm:$0x7]  ;;  %v7974_v3 = vsel %vm16811_vm12, %v11369_v47, %v7973_v39  ;;  %v7982_v44 = vrot.slane %v7980_v33, 4  ;;  %v14369_v39 = vld [vmem:[%s18818_s3 + $0x158] sm:$0xff]  }
 0x275   : > { %v11387_v25 = vcombine.low %v7960_v4, %v7963_v63  ;;  %v7976_v59 = vrot.slane %v14473_v54, 7  ;;  %v7987_v54 = vrot.slane %v16681_v6, 7  ;;  %v7994_v6 = vrot.slane %v16696_v7, 7  ;;  %v16875_v7 = vld [vmem:[%s18818_s3 + $0x160] sm:$0xff]  }
 0x277   : > { %13072 = vmatmul.mubr.msk.bf16.gmra.mrb[52].mxu1 %vm524_vm3, %v16772_v60  ;;  %v16803_v60 = vld [vmem:[%s14749_s25 + $0xac] sm:$0xf]  ;;  %v7977_v63 = vsel %vm16811_vm12, %v7975_v40, %v7976_v59  ;;  %v7996_v40 = vrot.slane %v7994_v6, 4 }
 0x278   : > { %13075 = vmatprep.mubr.msk.bf16.mxu1 %vm524_vm3, %v16782_v18  ;;  %v16807_v18 = vcombine.low %v16800_v32, %v16803_v60 }
 0x27a   : > { %19527 = vst [vmem:[#allocation186_spill] sm:$0xff] %v16807_v18 }
 0x27f   : > { %13076 = vmatmul.mubr.msk.bf16.gmra.mrb[56].mxu1 %vm524_vm3, %v16797_v55  ;;  %v16833_v55 = vcombine.low %v16826_v21, %v16829_v13 }
 0x280   : > { %13079 = vmatprep.mubr.msk.bf16.mxu1 %vm524_vm3, %v16807_v18  ;;  %v11368_v18 = vrot.slane %v16480_v8, 11  ;;  %v7970_v8 = vsel %vm16811_vm12, %v7968_v58, %v7969_v52  ;;  %v7989_v52 = vrot.slane %v7987_v54, 4  ;;  %v14475_v58 = vld [vmem:[%s14749_s25 + $0x38] sm:$0x7] }
 0x281   : > { %19531 = vst [vmem:[#allocation188_spill] sm:$0xff] %v16833_v55  ;;  %v7990_v17 = vrot.slane %v14475_v58, 7  ;;  %v11374_v58 = vrot.slane %v16717_v36, 11 }
 0x282   : > { %v7967_v4 = vsel %vm16811_vm12, %v11368_v18, %v7966_v34  ;;  %v7983_v18 = vrot.slane %v14474_v51, 7  ;;  %v11371_v34 = vrot.slane %v16678_v41, 11  ;;  %v8001_v41 = vrot.slane %v16706_v35, 7  ;;  %v14476_v35 = vld [vmem:[%s14749_s25 + $0x44] sm:$0x7] }
 0x283   : > { %v11388_v29 = vcombine.low %v7967_v4, %v7970_v8  ;;  %v7997_v59 = vrot.slane %v14476_v35, 7  ;;  %v11373_v4 = vrot.slane %v16703_v23, 11 }
 0x284   : > { %v7984_v51 = vsel %vm16811_vm12, %v7982_v44, %v7983_v18  ;;  %v7988_v47 = vsel %vm16811_vm12, %v11371_v34, %v7987_v54  ;;  %v11372_v44 = vrot.slane %v16693_v37, 11  ;;  %v8003_v8 = vrot.slane %v8001_v41, 4 }
 0x285   : > { %v8008_v54 = vrot.slane %v16720_v20, 7  ;;  %v8002_v23 = vsel %vm16811_vm12, %v11373_v4, %v8001_v41  ;;  %v8015_v18 = vrot.slane %v16730_v5, 7  ;;  %v8029_v5 = vrot.slane %v16754_v14, 7 }
 0x286   : > { %v7995_v37 = vsel %vm16811_vm12, %v11372_v44, %v7994_v6  ;;  %v11375_v6 = vrot.slane %v16727_v42, 11  ;;  %v11376_v44 = vrot.slane %v16741_v61, 11 }
 0x287   : > { %13080 = vmatmul.mubr.msk.bf16.gmra.mrb[60].mxu1 %vm524_vm3, %v16833_v55  ;;  %v11389_v55 = vcombine.low %v7974_v3, %v7977_v63  ;;  %v7998_v63 = vsel %vm16811_vm12, %v7996_v40, %v7997_v59  ;;  %v8009_v36 = vsel %vm16811_vm12, %v11374_v58, %v8008_v54  ;;  %v14480_v40 = vld [vmem:[%s14749_s25 + $0x74] sm:$0x7]  ;;  %v11377_v59 = vrot.slane %v16751_v16, 11  ;;  %v16939_v16 = vld [vmem:[%s18822_s7 + $0x1] ss:$0 sm:$0xff] }
 0x288   : > { %13087 = vmatprep.mubr.msk.bf16.mxu1 %vm524_vm3, %v11387_v25  ;;  %v11370_v25 = vrot.slane %v16668_v31, 11  ;;  %v16900_v34 = vcombine.low %v7995_v37, %v7998_v63  ;;  %v8016_v42 = vsel %vm16811_vm12, %v11375_v6, %v8015_v18  ;;  %v8025_v35 = vrot.slane %v14480_v40, 7 }
 0x289   : > { %v8031_v61 = vrot.slane %v8029_v5, 4 }
 0x28a   : > { %v7981_v31 = vsel %vm16811_vm12, %v11370_v25, %v7980_v33  ;;  %v14477_v33 = vld [vmem:[%s14749_s25 + $0x50] sm:$0x7] }
 0x28b   : > { %v8004_v3 = vrot.slane %v14477_v33, 7  ;;  %v14481_v33 = vld [vmem:[%s14749_s25 + $0x80] sm:$0x7] }
 0x28d   : > { %v8005_v25 = vsel %vm16811_vm12, %v8003_v8, %v8004_v3  ;;  %v16928_v8 = vld [vmem:[%s18821_s6 + $0x1] ss:$0 sm:$0xff]  ;;  %v8032_v3 = vrot.slane %v14481_v33, 7 }
 0x28f   : > { %13088 = vmatmul.mubr.msk.bf16.vlgmr.msra.gmra.mrb[32].mxu1 %vm524_vm3, %v11388_v29  ;;  %v7991_v29 = vsel %vm16811_vm12, %v7989_v52, %v7990_v17  ;;  %v16902_v52 = vcombine.low %v8002_v23, %v8005_v25  ;;  %v8010_v17 = vrot.slane %v8008_v54, 4 }
 0x290   : > { %13091 = vmatprep.mubr.msk.bf16.mxu1 %vm524_vm3, %v11389_v55  ;;  %13120 = vmatpush3.bf16.msra.mxu1 %v16665_v11  ;;  %v16877_v55 = vcombine.low %v7981_v31, %v7984_v51  ;;  %v16881_v11 = vcombine.low %v7988_v47, %v7991_v29  ;;  %v8017_v31 = vrot.slane %v8015_v18, 4  ;;  %v14479_v51 = vld [vmem:[%s14749_s25 + $0x68] sm:$0x7]  ;;  %v8022_v47 = vrot.slane %v16744_v9, 7 }
 0x291   : > { %13121 = vmatprep.subr.bf16.mxu1 %v14369_v39  ;;  %19532 = vst [vmem:[#allocation189_spill] sm:$0xff] %v16902_v52  ;;  %v8018_v41 = vrot.slane %v14479_v51, 7 }
 0x292   : > { %v8024_v9 = vrot.slane %v8022_v47, 4  ;;  %v8023_v58 = vsel %vm16811_vm12, %v11376_v44, %v8022_v47  ;;  %v8033_v47 = vsel %vm16811_vm12, %v8031_v61, %v8032_v3 }
 0x293   : > { %v8019_v14 = vsel %vm16811_vm12, %v8017_v31, %v8018_v41  ;;  %v8030_v31 = vsel %vm16811_vm12, %v11377_v59, %v8029_v5  ;;  %v14482_v5 = vld [vmem:[%s14749_s25 + $0x8c] sm:$0x7]  ;;  %v11379_v59 = vrot.slane %v16775_v43, 11 }
 0x294   : > { %13122 = vmatpush3.bf16.msra.mxu1 %v14369_v39  ;;  %v14478_v39 = vld [vmem:[%s14749_s25 + $0x5c] sm:$0x7]  ;;  %v16934_v23 = vcombine.low %v8016_v42, %v8019_v14  ;;  %v8039_v44 = vrot.slane %v14482_v5, 7  ;;  %v16969_v14 = vcombine.low %v8030_v31, %v8033_v47  ;;  %v11380_v47 = vrot.slane %v16790_v12, 11 }
 0x295   : > { %13155 = vmatprep.subr.bf16.mxu1 %v16875_v7  ;;  %v8011_v20 = vrot.slane %v14478_v39, 7  ;;  %v8057_v12 = vrot.slane %v16803_v60, 7 }
 0x296   : > { %19534 = vst [vmem:[#allocation191_spill] sm:$0xff] %v16934_v23  ;;  %19536 = vst [vmem:[#allocation193_spill] sm:$0xff] %v16969_v14 }
 0x297   : > { %13092 = vmatmul.mubr.msk.bf16.gmra.mrb[36].mxu1 %vm524_vm3, %v16877_v55  ;;  %v8012_v29 = vsel %vm16811_vm12, %v8010_v17, %v8011_v20  ;;  %v8026_v17 = vsel %vm16811_vm12, %v8024_v9, %v8025_v35 }
 0x298   : > { %13095 = vmatprep.mubr.msk.bf16.mxu1 %vm524_vm3, %v16881_v11  ;;  %v16932_v54 = vcombine.low %v8009_v36, %v8012_v29  ;;  %v16967_v42 = vcombine.low %v8023_v58, %v8026_v17 }
 0x29a   : > { %19533 = vst [vmem:[#allocation190_spill] sm:$0xff] %v16932_v54  ;;  %19535 = vst [vmem:[#allocation192_spill] sm:$0xff] %v16967_v42 }
 0x29f   : > { %13096 = vmatmul.mubr.msk.bf16.gmra.mrb[40].mxu1 %vm524_vm3, %v16900_v34 }
 0x2a0   : > { %13099 = vmatprep.mubr.msk.bf16.mxu1 %vm524_vm3, %v16902_v52 }
 0x2a2   : > { %v12537_v4 = vpop.f32.mrb[4].mxu1 }
 0x2a3   : > { %v13399_v37 = vadd.f32 %v12537_v4, %v16531_v22  ;;  %v3677_v63 = vpop.f32.mrb[5].mxu1  ;;  %v8036_v22 = vrot.slane %v16768_v48, 7  ;;  %v8043_v48 = vrot.slane %v16778_v53, 7 }
 0x2a4   : > { %v13400_v25 = vadd.f32 %v3677_v63, %v16538_v57  ;;  %v12538_v18 = vpop.f32.mrb[6].mxu1  ;;  %v11378_v57 = vrot.slane %v16765_v15, 11  ;;  %v14483_v63 = vld [vmem:[%s14749_s25 + $0x98] sm:$0x7] }
 0x2a5   : > { %v3846_v39 = vmul.f32 %v13399_v37, %v16928_v8  ;;  %v13401_v20 = vadd.f32 %v12538_v18, %v16544_v45  ;;  %v3680_v6 = vpop.f32.mrb[7].mxu1  ;;  %v8045_v4 = vrot.slane %v8043_v48, 4 }
 0x2a6   : > { %v3844_v51 = vmul.f32 %v13400_v25, %v16928_v8  ;;  %v13402_v41 = vadd.f32 %v3680_v6, %v16546_v1  ;;  %v8038_v1 = vrot.slane %v8036_v22, 4  ;;  %v8037_v35 = vsel %vm16811_vm12, %v11378_v57, %v8036_v22 }
 0x2a7   : > { %v3886_v36 = vadd.f32 %v16939_v16, %v3846_v39  ;;  %v3847_v29 = vmul.f32 %v13401_v20, %v16928_v8  ;;  %13100 = vmatmul.mubr.msk.bf16.gmra.mrb[44].mxu1 %vm524_vm3, %v16932_v54  ;;  %v8046_v25 = vrot.slane %v14483_v63, 7  ;;  %v8050_v57 = vrot.slane %v16793_v19, 7 }
 0x2a8   : > { %v3884_v45 = vadd.f32 %v16939_v16, %v3844_v51  ;;  %v3845_v15 = vmul.f32 %v13402_v41, %v16928_v8  ;;  %13103 = vmatprep.mubr.msk.bf16.mxu1 %vm524_vm3, %v16934_v23  ;;  %v8040_v20 = vsel %vm16811_vm12, %v8038_v1, %v8039_v44 }
 0x2a9   : > { %v3887_v53 = vadd.f32 %v16939_v16, %v3847_v29  ;;  %v3918_v61 = vmax.f32 %v3886_v36, 0.0  ;;  %v8047_v19 = vsel %vm16811_vm12, %v8045_v4, %v8046_v25  ;;  %v14367_v29 = vld [vmem:[#allocation2 + $0x8] sm:$0xff]   ;;  %v8052_v1 = vrot.slane %v8050_v57, 4 }
 0x2aa   : > { %v3885_v9 = vadd.f32 %v16939_v16, %v3845_v15  ;;  %v12541_v40 = vpop.f32.mrb[8].mxu1  ;;  %v3916_v18 = vmax.f32 %v3884_v45, 0.0 }
 0x2ab   : > { %v3919_v33 = vmax.f32 %v3887_v53, 0.0  ;;  %v13403_v3 = vadd.f32 %v12541_v40, %v16549_v0  ;;  %v3693_v37 = vpop.f32.mrb[9].mxu1  ;;  %v14484_v40 = vld [vmem:[%s14749_s25 + $0xa4] sm:$0x7] }
 0x2ac   : > { %v3917_v58 = vmax.f32 %v3885_v9, 0.0  ;;  %v13404_v17 = vadd.f32 %v3693_v37, %v16556_v38  ;;  %v12542_v39 = vpop.f32.mrb[10].mxu1  ;;  %v8051_v9 = vsel %vm16811_vm12, %v11380_v47, %v8050_v57 }
 0x2ad   : > { %v3949_v6 = vpack.c.bf16 %v3919_v33, %v3918_v61  ;;  %v3850_v22 = vmul.f32 %v13403_v3, %v16928_v8  ;;  %v13405_v43 = vadd.f32 %v12542_v39, %v16558_v26  ;;  %v3696_v31 = vpop.f32.mrb[11].mxu1  ;;  %v8044_v26 = vsel %vm16811_vm12, %v11379_v59, %v8043_v48  ;;  %v14370_v3 = vld [vmem:[#allocation2 + $0x10] sm:$0xff]  }
 0x2ae   : > { %v3948_v0 = vpack.c.bf16 %v3917_v58, %v3916_v18  ;;  %v3848_v51 = vmul.f32 %v13404_v17, %v16928_v8  ;;  %v13406_v41 = vadd.f32 %v3696_v31, %v16560_v28  ;;  %v17002_v48 = vcombine.low %v8037_v35, %v8040_v20 }
 0x2af   : > { %v3890_v38 = vadd.f32 %v16939_v16, %v3850_v22  ;;  %v3851_v36 = vmul.f32 %v13405_v43, %v16928_v8  ;;  %13104 = vmatmul.mubr.msk.bf16.gmra.mrb[48].mxu1 %vm524_vm3, %v16967_v42  ;;  %v17006_v53 = vcombine.low %v8044_v26, %v8047_v19  ;;  %v8053_v59 = vrot.slane %v14484_v40, 7 }
 0x2b0   : > { %v3888_v45 = vadd.f32 %v16939_v16, %v3848_v51  ;;  %v3849_v28 = vmul.f32 %v13406_v41, %v16928_v8  ;;  %12575 = vmatprep.mubr.msk.bf16.mxu0 %vm3997_vm13, %v3948_v0  ;;  %13107 = vmatprep.mubr.msk.bf16.mxu1 %vm524_vm3, %v16969_v14  ;;  %19537 = vst [vmem:[#allocation194_spill] sm:$0xff] %v17002_v48  ;;  %v11381_v33 = vrot.slane %v16800_v32, 11  ;;  %v8059_v18 = vrot.slane %v8057_v12, 4  ;;  %v14371_v0 = vld [vmem:[#allocation2 + $0x18] sm:$0xff]  }
 0x2b1   : > { %v3891_v15 = vadd.f32 %v16939_v16, %v3851_v36  ;;  %12576 = vmatmul.mubr.msk.bf16.vlgmr.msra.gmra.mrb[64].mxu0 %vm3997_vm13, %v3949_v6  ;;  %19538 = vst [vmem:[#allocation195_spill] sm:$0xff] %v17006_v53  ;;  %v3922_v60 = vmax.f32 %v3890_v38, 0.0  ;;  %v14485_v6 = vld [vmem:[%s14749_s25 + $0xb0] sm:$0x7]  ;;  %v8064_v31 = vrot.slane %v16829_v13, 7  ;;  %v11382_v19 = vrot.slane %v16826_v21, 11 }
 0x2b2   : > { %v3889_v5 = vadd.f32 %v16939_v16, %v3849_v28  ;;  %v12545_v44 = vpop.f32.mrb[12].mxu1  ;;  %12608 = vmatpush3.bf16.msra.mxu0 %v16631_v10  ;;  %v3920_v37 = vmax.f32 %v3888_v45, 0.0  ;;  %v8060_v22 = vrot.slane %v14485_v6, 7  ;;  %v19541_v6 = vld [vmem:[#allocation163_spill] sm:$0xff] }
 0x2b3   : > { %v3923_v4 = vmax.f32 %v3891_v15, 0.0  ;;  %v13407_v61 = vadd.f32 %v12545_v44, %v16569_v56  ;;  %v3709_v35 = vpop.f32.mrb[13].mxu1  ;;  %12609 = vmatprep.subr.bf16.mxu0 %v14367_v29 }
 0x2b4   : > { %v3921_v63 = vmax.f32 %v3889_v5, 0.0  ;;  %v13408_v10 = vadd.f32 %v3709_v35, %v16574_v30  ;;  %v12546_v25 = vpop.f32.mrb[14].mxu1  ;;  %v8061_v47 = vsel %vm16811_vm12, %v8059_v18, %v8060_v22  ;;  %v14486_v5 = vld [vmem:[%s14749_s25 + $0xbc] sm:$0x7] }
 0x2b5   : > { %v3951_v58 = vpack.c.bf16 %v3923_v4, %v3922_v60  ;;  %v3854_v17 = vmul.f32 %v13407_v61, %v16928_v8  ;;  %v13409_v39 = vadd.f32 %v12546_v25, %v16576_v50  ;;  %v3712_v20 = vpop.f32.mrb[15].mxu1  ;;  %v8054_v50 = vsel %vm16811_vm12, %v8052_v1, %v8053_v59 }
 0x2b6   : > { %v3950_v56 = vpack.c.bf16 %v3921_v63, %v3920_v37  ;;  %v3852_v43 = vmul.f32 %v13408_v10, %v16928_v8  ;;  %v13410_v32 = vadd.f32 %v3712_v20, %v16581_v24  ;;  %12610 = vmatpush3.bf16.msra.mxu0 %v14367_v29  ;;  %v8058_v24 = vsel %vm16811_vm12, %v11381_v33, %v8057_v12  ;;  %v17046_v12 = vld [vmem:[%s18818_s3 + $0xa0] sm:$0xff]  }
 0x2b7   : > { %v3894_v30 = vadd.f32 %v16939_v16, %v3854_v17  ;;  %v3855_v57 = vmul.f32 %v13409_v39, %v16928_v8  ;;  %13108 = vmatmul.mubr.msk.bf16.gmra.mrb[52].mxu1 %vm524_vm3, %v17002_v48  ;;  %12611 = vmatprep.subr.bf16.mxu0 %v14370_v3  ;;  %v17038_v26 = vcombine.low %v8051_v9, %v8054_v50  ;;  %v8066_v29 = vrot.slane %v8064_v31, 4 }
 0x2b8   : > { %v3892_v51 = vadd.f32 %v16939_v16, %v3852_v43  ;;  %v3853_v41 = vmul.f32 %v13410_v32, %v16928_v8  ;;  %12579 = vmatprep.mubr.msk.bf16.mxu0 %vm3997_vm13, %v3950_v56  ;;  %13111 = vmatprep.mubr.msk.bf16.mxu1 %vm524_vm3, %v17006_v53  ;;  %v8067_v44 = vrot.slane %v14486_v5, 7  ;;  %v17049_v60 = vcombine.low %v8058_v24, %v8061_v47 }
 0x2b9   : > { %v3895_v13 = vadd.f32 %v16939_v16, %v3855_v57  ;;  %12580 = vmatmul.mubr.msk.bf16.gmra.mrb[68].mxu0 %vm3997_vm13, %v3951_v58  ;;  %19539 = vst [vmem:[#allocation196_spill] sm:$0xff] %v17038_v26  ;;  %v3926_v45 = vmax.f32 %v3894_v30, 0.0  ;;  %v19543_v30 = vld [vmem:[#allocation164_spill] sm:$0xff] }
 0x2ba   : > { %v3893_v38 = vadd.f32 %v16939_v16, %v3853_v41  ;;  %v12549_v36 = vpop.f32.mrb[16].mxu1  ;;  %12612 = vmatpush3.bf16.msra.mxu0 %v14370_v3  ;;  %v3924_v40 = vmax.f32 %v3892_v51, 0.0  ;;  %19540 = vst [vmem:[#allocation197_spill] sm:$0xff] %v17049_v60  ;;  %v19544_v41 = vld [vmem:[#allocation165_spill] sm:$0xff] }
 0x2bb   : > { %v3927_v28 = vmax.f32 %v3895_v13, 0.0  ;;  %v13411_v15 = vadd.f32 %v12549_v36, %v16585_v27  ;;  %v3725_v1 = vpop.f32.mrb[17].mxu1  ;;  %12613 = vmatprep.subr.bf16.mxu0 %v14371_v0  ;;  %v19545_v36 = vld [vmem:[#allocation166_spill] sm:$0xff] }
 0x2bc   : > { %v3925_v9 = vmax.f32 %v3893_v38, 0.0  ;;  %v13412_v59 = vadd.f32 %v3725_v1, %v16589_v2  ;;  %v12550_v21 = vpop.f32.mrb[18].mxu1  ;;  %v8065_v2 = vsel %vm16811_vm12, %v11382_v19, %v8064_v31  ;;  %v19546_v1 = vld [vmem:[#allocation175_spill] sm:$0xff] }
 0x2bd   : > { %v3953_v4 = vpack.c.bf16 %v3927_v28, %v3926_v45  ;;  %v3858_v61 = vmul.f32 %v13411_v15, %v16928_v8  ;;  %v13413_v27 = vadd.f32 %v12550_v21, %v16591_v49  ;;  %v3728_v35 = vpop.f32.mrb[19].mxu1  ;;  %v19547_v21 = vld [vmem:[#allocation167_spill] sm:$0xff] }
 0x2be   : > { %v3952_v33 = vpack.c.bf16 %v3925_v9, %v3924_v40  ;;  %v3856_v3 = vmul.f32 %v13412_v59, %v16928_v8  ;;  %v13414_v37 = vadd.f32 %v3728_v35, %v16593_v62  ;;  %12614 = vmatpush3.bf16.msra.mxu0 %v14371_v0  ;;  %v8068_v62 = vsel %vm16811_vm12, %v8066_v29, %v8067_v44 }
 0x2bf   : > { %v3898_v63 = vadd.f32 %v16939_v16, %v3858_v61  ;;  %v3859_v10 = vmul.f32 %v13413_v27, %v16928_v8  ;;  %13112 = vmatmul.mubr.msk.bf16.gmra.mrb[56].mxu1 %vm524_vm3, %v17038_v26  ;;  %12647 = vmatprep.subr.bf16.mxu0 %v17046_v12  ;;  %v17073_v43 = vcombine.low %v8065_v2, %v8068_v62  ;;  %v19549_v2 = vld [vmem:[#allocation169_spill] sm:$0xff] }
 0x2c0   : > { %v3896_v49 = vadd.f32 %v16939_v16, %v3856_v3  ;;  %v3857_v25 = vmul.f32 %v13414_v37, %v16928_v8  ;;  %12583 = vmatprep.mubr.msk.bf16.mxu0 %vm3997_vm13, %v3952_v33  ;;  %13115 = vmatprep.mubr.msk.bf16.mxu1 %vm524_vm3, %v17049_v60  ;;  %v19548_v33 = vld [vmem:[#allocation168_spill] sm:$0xff] }
 0x2c1   : > { %v3899_v18 = vadd.f32 %v16939_v16, %v3859_v10  ;;  %12584 = vmatmul.mubr.msk.bf16.gmra.mrb[72].mxu0 %vm3997_vm13, %v3953_v4  ;;  %v3930_v39 = vmax.f32 %v3898_v63, 0.0  ;;  %19542 = vst [vmem:[#allocation163_spill] sm:$0xff] %v17073_v43 }
 0x2c2   : > { %v3897_v58 = vadd.f32 %v16939_v16, %v3857_v25  ;;  %v12553_v17 = vpop.f32.mrb[20].mxu1  ;;  %v3928_v32 = vmax.f32 %v3896_v49, 0.0 }
 0x2c3   : > { %v3931_v20 = vmax.f32 %v3899_v18, 0.0  ;;  %v13415_v22 = vadd.f32 %v12553_v17, %v19541_v6  ;;  %v3741_v56 = vpop.f32.mrb[21].mxu1 }
 0x2c4   : > { %v3929_v31 = vmax.f32 %v3897_v58, 0.0  ;;  %v13416_v57 = vadd.f32 %v3741_v56, %v19543_v30  ;;  %v12554_v50 = vpop.f32.mrb[22].mxu1  ;;  %v19550_v58 = vld [vmem:[#allocation170_spill] sm:$0xff] }
 0x2c5   : > { %v3955_v0 = vpack.c.bf16 %v3931_v20, %v3930_v39  ;;  %v3862_v51 = vmul.f32 %v13415_v22, %v16928_v8  ;;  %v13417_v13 = vadd.f32 %v12554_v50, %v19544_v41  ;;  %v3744_v24 = vpop.f32.mrb[23].mxu1  ;;  %v14377_v39 = vld [vmem:[%s18818_s3 + $0x168] sm:$0xff]   ;;  %v19551_v22 = vld [vmem:[#allocation176_spill] sm:$0xff] }
 0x2c6   : > { %v3954_v47 = vpack.c.bf16 %v3929_v31, %v3928_v32  ;;  %v3860_v38 = vmul.f32 %v13416_v57, %v16928_v8  ;;  %v13418_v19 = vadd.f32 %v3744_v24, %v19545_v36  ;;  %v19552_v31 = vld [vmem:[#allocation177_spill] sm:$0xff] }
 0x2c7   : > { %v3902_v29 = vadd.f32 %v16939_v16, %v3862_v51  ;;  %v3863_v45 = vmul.f32 %v13417_v13, %v16928_v8  ;;  %13116 = vmatmul.mubr.msk.bf16.gmra.mrb[60].mxu1 %vm524_vm3, %v17073_v43  ;;  %v19553_v13 = vld [vmem:[#allocation171_spill] sm:$0xff] }
 0x2c8   : > { %v3900_v28 = vadd.f32 %v16939_v16, %v3860_v38  ;;  %v3861_v15 = vmul.f32 %v13418_v19, %v16928_v8  ;;  %12587 = vmatprep.mubr.msk.bf16.mxu0 %vm3997_vm13, %v3954_v47  ;;  %13123 = vmatprep.mubr.msk.bf16.mxu1 %vm524_vm3, %v19546_v1  ;;  %v19554_v19 = vld [vmem:[#allocation172_spill] sm:$0xff] }
 0x2c9   : > { %v3903_v5 = vadd.f32 %v16939_v16, %v3863_v45  ;;  %12588 = vmatmul.mubr.msk.bf16.gmra.mrb[76].mxu0 %vm3997_vm13, %v3955_v0  ;;  %v3934_v9 = vmax.f32 %v3902_v29, 0.0  ;;  %v17117_v0 = vld [vmem:[%s18818_s3 + $0x170] sm:$0xff]  }
 0x2ca   : > { %v3901_v44 = vadd.f32 %v16939_v16, %v3861_v15  ;;  %v12557_v40 = vpop.f32.mrb[24].mxu1  ;;  %v3932_v27 = vmax.f32 %v3900_v28, 0.0  ;;  %v19555_v15 = vld [vmem:[#allocation173_spill] sm:$0xff] }
 0x2cb   : > { %v3935_v59 = vmax.f32 %v3903_v5, 0.0  ;;  %v13419_v4 = vadd.f32 %v12557_v40, %v19547_v21  ;;  %v3757_v61 = vpop.f32.mrb[25].mxu1 }
 0x2cc   : > { %v3933_v35 = vmax.f32 %v3901_v44, 0.0  ;;  %v13420_v3 = vadd.f32 %v3757_v61, %v19548_v33  ;;  %v12558_v37 = vpop.f32.mrb[26].mxu1  ;;  %v19557_v61 = vld [vmem:[#allocation178_spill] sm:$0xff]  ;;  %v19558_v33 = vld [vmem:[#allocation179_spill] sm:$0xff] }
 0x2cd   : > { %v3957_v63 = vpack.c.bf16 %v3935_v59, %v3934_v9  ;;  %v3866_v10 = vmul.f32 %v13419_v4, %v16928_v8  ;;  %v13421_v49 = vadd.f32 %v12558_v37, %v19549_v2  ;;  %v3760_v25 = vpop.f32.mrb[27].mxu1  ;;  %v19556_v9 = vld [vmem:[#allocation174_spill] sm:$0xff] }
 0x2ce   : > { %v3956_v62 = vpack.c.bf16 %v3933_v35, %v3932_v27  ;;  %v3864_v18 = vmul.f32 %v13420_v3, %v16928_v8  ;;  %v13422_v17 = vadd.f32 %v3760_v25, %v19550_v58 }
 0x2cf   : > { %v3906_v20 = vadd.f32 %v16939_v16, %v3866_v10  ;;  %v3867_v6 = vmul.f32 %v13421_v49, %v16928_v8  ;;  %13124 = vmatmul.mubr.msk.bf16.vlgmr.msra.gmra.mrb[32].mxu1 %vm524_vm3, %v19551_v22  ;;  %v19559_v49 = vld [vmem:[#allocation153_spill] sm:$0xff] }
 0x2d0   : > { %v3904_v56 = vadd.f32 %v16939_v16, %v3864_v18  ;;  %v3865_v32 = vmul.f32 %v13422_v17, %v16928_v8  ;;  %12591 = vmatprep.mubr.msk.bf16.mxu0 %vm3997_vm13, %v3956_v62  ;;  %13127 = vmatprep.mubr.msk.bf16.mxu1 %vm524_vm3, %v19552_v31  ;;  %v19560_v17 = vld [vmem:[#allocation158_spill] sm:$0xff] }
 0x2d1   : > { %v3907_v30 = vadd.f32 %v16939_v16, %v3867_v6  ;;  %12592 = vmatmul.mubr.msk.bf16.gmra.mrb[80].mxu0 %vm3997_vm13, %v3957_v63  ;;  %13156 = vmatpush3.bf16.msra.mxu1 %v16875_v7  ;;  %v3938_v51 = vmax.f32 %v3906_v20, 0.0 }
 0x2d2   : > { %v3905_v57 = vadd.f32 %v16939_v16, %v3865_v32  ;;  %v12561_v50 = vpop.f32.mrb[28].mxu1  ;;  %13157 = vmatprep.subr.bf16.mxu1 %v14377_v39  ;;  %v3936_v38 = vmax.f32 %v3904_v56, 0.0  ;;  %v19561_v56 = vld [vmem:[#allocation159_spill] sm:$0xff] }
 0x2d3   : > { %v3939_v41 = vmax.f32 %v3907_v30, 0.0  ;;  %v13423_v24 = vadd.f32 %v12561_v50, %v19553_v13  ;;  %v3773_v47 = vpop.f32.mrb[29].mxu1  ;;  %v19562_v50 = vld [vmem:[#allocation160_spill] sm:$0xff] }
 0x2d4   : > { %v3937_v36 = vmax.f32 %v3905_v57, 0.0  ;;  %v13424_v29 = vadd.f32 %v3773_v47, %v19554_v19  ;;  %v12562_v45 = vpop.f32.mrb[30].mxu1 }
 0x2d5   : > { %v3959_v7 = vpack.c.bf16 %v3939_v41, %v3938_v51  ;;  %v3870_v28 = vmul.f32 %v13423_v24, %v16928_v8  ;;  %v13425_v1 = vadd.f32 %v12562_v45, %v19555_v15  ;;  %v3776_v5 = vpop.f32.mrb[31].mxu1  ;;  %13158 = vmatpush3.bf16.msra.mxu1 %v14377_v39  ;;  %v19563_v24 = vld [vmem:[#allocation180_spill] sm:$0xff] }
 0x2d6   : > { %v3958_v44 = vpack.c.bf16 %v3937_v36, %v3936_v38  ;;  %v3868_v40 = vmul.f32 %v13424_v29, %v16928_v8  ;;  %v13426_v59 = vadd.f32 %v3776_v5, %v19556_v9  ;;  %13191 = vmatprep.subr.bf16.mxu1 %v17117_v0  ;;  %v19564_v36 = vld [vmem:[#allocation181_spill] sm:$0xff]  ;;  %v19565_v5 = vld [vmem:[#allocation107_spill] sm:$0xff] }
 0x2d7   : > { %v3910_v21 = vadd.f32 %v16939_v16, %v3870_v28  ;;  %v3871_v4 = vmul.f32 %v13425_v1, %v16928_v8  ;;  %13128 = vmatmul.mubr.msk.bf16.gmra.mrb[36].mxu1 %vm524_vm3, %v19557_v61  ;;  %v19567_v9 = vld [vmem:[#allocation109_spill] sm:$0xff] }
 0x2d8   : > { %v3908_v27 = vadd.f32 %v16939_v16, %v3868_v40  ;;  %v3869_v35 = vmul.f32 %v13426_v59, %v16928_v8  ;;  %12595 = vmatprep.mubr.msk.bf16.mxu0 %vm3997_vm13, %v3958_v44  ;;  %13131 = vmatprep.mubr.msk.bf16.mxu1 %vm524_vm3, %v19558_v33  ;;  %v4467_v44 = vrot.slane %v19565_v5, 4  ;;  %v19566_v40 = vld [vmem:[#allocation108_spill] sm:$0xff]  ;;  %v4473_v59 = vrot.slane %v19567_v9, 4 }
 0x2d9   : > { %v3911_v3 = vadd.f32 %v16939_v16, %v3871_v4  ;;  %12596 = vmatmul.mubr.msk.bf16.gmra.mrb[84].mxu0 %vm3997_vm13, %v3959_v7  ;;  %v3942_v10 = vmax.f32 %v3910_v21, 0.0  ;;  %v19568_v4 = vld [vmem:[#allocation182_spill] sm:$0xff] }
 0x2da   : > { %v3909_v37 = vadd.f32 %v16939_v16, %v3869_v35  ;;  %v12565_v63 = vpop.f32.mrb[0].mxu1  ;;  %v3940_v18 = vmax.f32 %v3908_v27, 0.0  ;;  %v19569_v27 = vld [vmem:[#allocation183_spill] sm:$0xff] }
 0x2db   : > { %v3943_v2 = vmax.f32 %v3911_v3, 0.0  ;;  %v13427_v25 = vadd.f32 %v12565_v63, %v19559_v49  ;;  %v3789_v62 = vpop.f32.mrb[1].mxu1  ;;  %v19571_v3 = vld [vmem:[#allocation17_spill] sm:$0xff] }
 0x2dc   : > { %v3941_v58 = vmax.f32 %v3909_v37, 0.0  ;;  %v13428_v39 = vadd.f32 %v3789_v62, %v19560_v17  ;;  %v12566_v20 = vpop.f32.mrb[2].mxu1  ;;  %v19576_v17 = vld [vmem:[#allocation184_spill] sm:$0xff] }
 0x2dd   : > { %v3961_v6 = vpack.c.bf16 %v3943_v2, %v3942_v10  ;;  %v3874_v22 = vmul.f32 %v13427_v25, %v16928_v8  ;;  %v13429_v32 = vadd.f32 %v12566_v20, %v19561_v56  ;;  %v3792_v31 = vpop.f32.mrb[3].mxu1  ;;  %v19572_v10 = vmov 0  ;;  %v19575_v25 = vld [vmem:[#allocation113_spill] sm:$0xff]  ;;  %v19579_v56 = vld [vmem:[#allocation28_spill] sm:$0xff] }
 0x2de   : > { %v3960_v30 = vpack.c.bf16 %v3941_v58, %v3940_v18  ;;  %v3872_v57 = vmul.f32 %v13428_v39, %v16928_v8  ;;  %v13430_v51 = vadd.f32 %v3792_v31, %v19562_v50  ;;  %v19573_v10 = vsel %vm17168_vm0, 4294967295, %v19572_v10  ;;  %v14378_v39 = vld [vmem:[%s18818_s3 + $0xa8] sm:$0xff]   ;;  %v19580_v31 = vld [vmem:[#allocation186_spill] sm:$0xff]  ;;  %v17210_v50 = vld [vmem:[%s14749_s25 + $0xc0] sm:$0xf] }
 0x2df   : > { %v3914_v41 = vadd.f32 %v16939_v16, %v3874_v22  ;;  %v3875_v13 = vmul.f32 %v13429_v32, %v16928_v8  ;;  %13132 = vmatmul.mubr.msk.bf16.gmra.mrb[40].mxu1 %vm524_vm3, %v19563_v24  ;;  %19574 = vst [vmem:[#allocation164_spill] sm:$0xff] %v19573_v10  ;;  %v4476_v62 = vrot.slane %v19575_v25, 5  ;;  %v19578_v22 = vld [vmem:[#allocation15_spill] sm:$0xff]  ;;  %v17198_v32 = vld [vmem:[%s18818_s3 + $0x90] sm:$0xff]  }
 0x2e0   : > { %v3912_v47 = vadd.f32 %v16939_v16, %v3872_v57  ;;  %v3873_v38 = vmul.f32 %v13430_v51, %v16928_v8  ;;  %12599 = vmatprep.mubr.msk.bf16.mxu0 %vm3997_vm13, %v3960_v30  ;;  %13135 = vmatprep.mubr.msk.bf16.mxu1 %vm524_vm3, %v19564_v36  ;;  %v4468_v8 = vrot.slane %v19566_v40, 5  ;;  %v19581_v30 = vld [vmem:[#allocation188_spill] sm:$0xff]  ;;  %v19582_v57 = vld [vmem:[#allocation26_spill] sm:$0xff] }
 0x2e1   : > { %v3915_v19 = vadd.f32 %v16939_v16, %v3875_v13  ;;  %12600 = vmatmul.mubr.msk.bf16.gmra.mrb[88].mxu0 %vm3997_vm13, %v3961_v6  ;;  %v3946_v45 = vmax.f32 %v3914_v41, 0.0  ;;  %v19577_v6 = vld [vmem:[#allocation185_spill] sm:$0xff]  ;;  %v17213_v51 = vld [vmem:[%s14749_s25 + $0xc4] sm:$0xf]  ;;  %v19731_v10 = vld [vmem:[#allocation14_spill] sm:$0xff] }
 0x2e2   : > { %v3913_v29 = vadd.f32 %v16939_v16, %v3873_v38  ;;  %v3944_v28 = vmax.f32 %v3912_v47, 0.0  ;;  %v19570_v16 = vld [vmem:[#allocation110_spill] sm:$0xff]  ;;  %v4469_v37 = vor.u32 %v4468_v8, %v4467_v44  ;;  %v17217_v41 = vcombine.low %v17210_v50, %v17213_v51  ;;  %v17220_v13 = vld [vmem:[%s14749_s25 + $0xcc] sm:$0xf]  ;;  %v14381_v8 = vld [vmem:[%s18818_s3 + $0x178] sm:$0xff]  }
 0x2e3   : > { %v3947_v7 = vmax.f32 %v3915_v19, 0.0  ;;  %v4471_v35 = vrot.slane %v19570_v16, 5  ;;  %v17223_v47 = vld [vmem:[%s14749_s25 + $0xd0] sm:$0xf] }
 0x2e4   : > { %v3945_v15 = vmax.f32 %v3913_v29, 0.0  ;;  %v4470_v2 = vrot.slane %v4469_v37, 4  ;;  %19584 = vst [vmem:[#allocation165_spill] sm:$0xff] %v17217_v41  ;;  %v17227_v38 = vcombine.low %v17220_v13, %v17223_v47  ;;  %v19586_v19 = vld [vmem:[#allocation46_spill] sm:$0xff]  ;;  %v19595_v37 = vld [vmem:[#allocation53_spill] sm:$0xff] }
 0x2e5   : > { %v3963_v1 = vpack.c.bf16 %v3947_v7, %v3946_v45  ;;  %v4474_v63 = vor.u32 %v4473_v59, %v4471_v35  ;;  %v19587_v29 = vld [vmem:[#allocation10_spill] sm:$0xff]  ;;  %v17238_v45 = vld [vmem:[%s14749_s25 + $0xdc] sm:$0xf]  ;;  %v17241_v7 = vld [vmem:[%s14749_s25 + $0xd8] sm:$0xf] }
 0x2e6   : > { %v3962_v21 = vpack.c.bf16 %v3945_v15, %v3944_v28  ;;  %v17175_v18 = vsel %vm17168_vm0, %v4470_v2, %v4471_v35  ;;  %19585 = vst [vmem:[#allocation166_spill] sm:$0xff] %v17227_v38  ;;  %v17245_v28 = vcombine.low %v17241_v7, %v17238_v45  ;;  %v19589_v15 = vld [vmem:[#allocation38_spill] sm:$0xff]  ;;  %v19592_v59 = vld [vmem:[#allocation105_spill] sm:$0xff]  ;;  %v19597_v2 = vld [vmem:[#allocation80_spill] sm:$0xff] }
 0x2e7   : > { %13136 = vmatmul.mubr.msk.bf16.gmra.mrb[44].mxu1 %vm524_vm3, %v19568_v4  ;;  %v4475_v49 = vrot.slane %v4474_v63, 4  ;;  %v19591_v44 = vld [vmem:[#allocation82_spill] sm:$0xff]  ;;  %v19594_v35 = vld [vmem:[#allocation81_spill] sm:$0xff]  ;;  %v19596_v63 = vld [vmem:[#allocation79_spill] sm:$0xff] }
 0x2e8   : > { %12603 = vmatprep.mubr.msk.bf16.mxu0 %vm3997_vm13, %v3962_v21  ;;  %13139 = vmatprep.mubr.msk.bf16.mxu1 %vm524_vm3, %v19569_v27  ;;  %19588 = vst [vmem:[#allocation175_spill] sm:$0xff] %v17245_v28  ;;  %v19593_v21 = vld [vmem:[#allocation106_spill] sm:$0xff] }
 0x2e9   : > { %12604 = vmatmul.mubr.msk.bf16.gmra.mrb[92].mxu0 %vm3997_vm13, %v3963_v1  ;;  %v17179_v58 = vsel %vm17168_vm0, %v4475_v49, %v4476_v62  ;;  %v19590_v1 = vld [vmem:[#allocation61_spill] sm:$0xff]  ;;  %v19599_v49 = vld [vmem:[#allocation91_spill] sm:$0xff] }
 0x2ea   : > { %12615 = vmatprep.mubr.msk.bf16.mxu0 %vm3997_vm13, %v19571_v3  ;;  %v14384_v3 = vld [vmem:[%s18818_s3 + $0x180] sm:$0xff]   ;;  %v19600_v62 = vld [vmem:[#allocation87_spill] sm:$0xff] }
 0x2ef   : > { %13140 = vmatmul.mubr.msk.bf16.gmra.mrb[48].mxu1 %vm524_vm3, %v19576_v17 }
 0x2f0   : > { %13143 = vmatprep.mubr.msk.bf16.mxu1 %vm524_vm3, %v19577_v6 }
 0x2f1   : > { %12616 = vmatmul.mubr.msk.bf16.vlgmr.msra.gmra.mrb[64].mxu0 %vm3997_vm13, %v19578_v22  ;;  %v19602_v22 = vld [vmem:[#allocation90_spill] sm:$0xff] }
 0x2f2   : > { %12619 = vmatprep.mubr.msk.bf16.mxu0 %vm3997_vm13, %v19579_v56  ;;  %12648 = vmatpush3.bf16.msra.mxu0 %v17046_v12  ;;  %v19583_v12 = vld [vmem:[#allocation55_spill] sm:$0xff] }
 0x2f3   : > { %12649 = vmatprep.subr.bf16.mxu0 %v14378_v39  ;;  %v19603_v56 = vld [vmem:[#allocation11_spill] sm:$0xff] }
 0x2f6   : > { %12650 = vmatpush3.bf16.msra.mxu0 %v14378_v39  ;;  %v19601_v39 = vld [vmem:[#allocation89_spill] sm:$0xff] }
 0x2f7   : > { %13144 = vmatmul.mubr.msk.bf16.gmra.mrb[52].mxu1 %vm524_vm3, %v19580_v31  ;;  %12683 = vmatprep.subr.bf16.mxu0 %v17198_v32 }
 0x2f8   : > { %13147 = vmatprep.mubr.msk.bf16.mxu1 %vm524_vm3, %v19581_v30  ;;  %v19638_v30 = vld [vmem:[#allocation42_spill] sm:$0xff] }
 0x2f9   : > { %12620 = vmatmul.mubr.msk.bf16.gmra.mrb[68].mxu0 %vm3997_vm13, %v19582_v57  ;;  %v5121_v57 = vrot.slane %v19565_v5, 6 }
 0x2fa   : > { %12623 = vmatprep.mubr.msk.bf16.mxu0 %vm3997_vm13, %v19583_v12  ;;  %v5122_v12 = vrot.slane %v19566_v40, 7  ;;  %v19609_v40 = vld [vmem:[#allocation162_spill] sm:$0xff] }
 0x2ff   : > { %13148 = vmatmul.mubr.msk.bf16.gmra.mrb[56].mxu1 %vm524_vm3, %v17217_v41 }
 0x300   : > { %13151 = vmatprep.mubr.msk.bf16.mxu1 %vm524_vm3, %v17227_v38  ;;  %v19635_v38 = vld [vmem:[#allocation34_spill] sm:$0xff] }
 0x301   : > { %12624 = vmatmul.mubr.msk.bf16.gmra.mrb[72].mxu0 %vm3997_vm13, %v19586_v19  ;;  %v5125_v19 = vrot.slane %v19567_v9, 6  ;;  %v5123_v9 = vor.u32 %v5122_v12, %v5121_v57  ;;  %v14382_v57 = vld [vmem:[%s18818_s3 + $0x98] sm:$0xff]  }
 0x302   : > { %12627 = vmatprep.mubr.msk.bf16.mxu0 %vm3997_vm13, %v19587_v29  ;;  %v5126_v29 = vrot.slane %v19570_v16, 7 }
 0x304   : > { %v5127_v16 = vor.u32 %v5126_v29, %v5125_v19  ;;  %v19616_v19 = vld [vmem:[#allocation142_spill] sm:$0xff]  ;;  %v19617_v29 = vld [vmem:[#allocation129_spill] sm:$0xff] }
 0x307   : > { %13152 = vmatmul.mubr.msk.bf16.gmra.mrb[60].mxu1 %vm524_vm3, %v17245_v28 }
 0x308   : > { %13159 = vmatprep.mubr.msk.bf16.mxu1 %vm524_vm3, %v19589_v15 }
 0x309   : > { %12628 = vmatmul.mubr.msk.bf16.gmra.mrb[76].mxu0 %vm3997_vm13, %v19590_v1  ;;  %v19604_v1 = vld [vmem:[#allocation112_spill] sm:$0xff] }
 0x30a   : > { %12631 = vmatprep.mubr.msk.bf16.mxu0 %vm3997_vm13, %v19591_v44  ;;  %v19605_v44 = vshrl.u32 %v19604_v1, 16 }
 0x30f   : > { %13160 = vmatmul.mubr.msk.bf16.vlgmr.msra.gmra.mrb[32].mxu1 %vm524_vm3, %v19592_v59 }
 0x310   : > { %13163 = vmatprep.mubr.msk.bf16.mxu1 %vm524_vm3, %v19593_v21  ;;  %13192 = vmatpush3.bf16.msra.mxu1 %v17117_v0  ;;  %v19598_v0 = vld [vmem:[#allocation44_spill] sm:$0xff] }
 0x311   : > { %12632 = vmatmul.mubr.msk.bf16.gmra.mrb[80].mxu0 %vm3997_vm13, %v19594_v35  ;;  %13193 = vmatprep.subr.bf16.mxu1 %v14381_v8  ;;  %v5131_v35 = vrot.slane %v19575_v25, 7  ;;  %v5124_v25 = vrot.slane %v5123_v9, 4  ;;  %v19622_v9 = vld [vmem:[#allocation152_spill] sm:$0xff] }
 0x312   : > { %12635 = vmatprep.mubr.msk.bf16.mxu0 %vm3997_vm13, %v19595_v37  ;;  %v19606_v37 = vld [vmem:[#allocation101_spill] sm:$0xff] }
 0x313   : > { %v17307_v1 = vsel %vm17301_vm4, %v5124_v25, %v5127_v16 }
 0x314   : > { %13194 = vmatpush3.bf16.msra.mxu1 %v14381_v8  ;;  %v5130_v8 = vrot.slane %v19605_v44, 6  ;;  %19613 = vst [vmem:[#allocation168_spill] sm:$0xff] %v17307_v1  ;;  %v19637_v1 = vld [vmem:[#allocation40_spill] sm:$0xff] }
 0x315   : > { %13227 = vmatprep.subr.bf16.mxu1 %v14384_v3  ;;  %v4501_v41 = vrot.slane %v19637_v1, 5 }
 0x316   : > { %v5132_v5 = vor.u32 %v5131_v35, %v5130_v8  ;;  %v19615_v8 = vld [vmem:[#allocation139_spill] sm:$0xff]  ;;  %v17330_v35 = vld [vmem:[%s18818_s3 + $0xb0] sm:$0xff]  }
 0x317   : > { %13164 = vmatmul.mubr.msk.bf16.gmra.mrb[36].mxu1 %vm524_vm3, %v19596_v63 }
 0x318   : > { %13167 = vmatprep.mubr.msk.bf16.mxu1 %vm524_vm3, %v19597_v2 }
 0x319   : > { %12636 = vmatmul.mubr.msk.bf16.gmra.mrb[84].mxu0 %vm3997_vm13, %v19598_v0  ;;  %v19607_v0 = vld [vmem:[#allocation133_spill] sm:$0xff] }
 0x31a   : > { %12639 = vmatprep.mubr.msk.bf16.mxu0 %vm3997_vm13, %v19599_v49  ;;  %v19608_v49 = vld [vmem:[#allocation9_spill] sm:$0xff] }
 0x31f   : > { %13168 = vmatmul.mubr.msk.bf16.gmra.mrb[40].mxu1 %vm524_vm3, %v19600_v62 }
 0x320   : > { %13171 = vmatprep.mubr.msk.bf16.mxu1 %vm524_vm3, %v19601_v39 }
 0x321   : > { %12640 = vmatmul.mubr.msk.bf16.gmra.mrb[88].mxu0 %vm3997_vm13, %v19602_v22  ;;  %v19610_v22 = vmov 0 }
 0x322   : > { %12643 = vmatprep.mubr.msk.bf16.mxu0 %vm3997_vm13, %v19603_v56  ;;  %v19611_v22 = vsel %vm17301_vm4, 4294967295, %v19610_v22  ;;  %v5129_v56 = vrot.slane %v5127_v16, 4  ;;  %v14385_v16 = vld [vmem:[%s18818_s3 + $0x188] sm:$0xff]  }
 0x323   : > { %19612 = vst [vmem:[#allocation167_spill] sm:$0xff] %v19611_v22 }
 0x324   : > { %v17311_v44 = vsel %vm17301_vm4, %v5129_v56, %v5132_v5  ;;  %v19619_v5 = vld [vmem:[#allocation148_spill] sm:$0xff] }
 0x325   : > { %19614 = vst [vmem:[#allocation169_spill] sm:$0xff] %v17311_v44  ;;  %v19625_v56 = vld [vmem:[#allocation156_spill] sm:$0xff]  ;;  %v4495_v44 = vrot.slane %v19635_v38, 4 }
 0x327   : > { %13172 = vmatmul.mubr.msk.bf16.gmra.mrb[44].mxu1 %vm524_vm3, %v19606_v37 }
 0x328   : > { %13175 = vmatprep.mubr.msk.bf16.mxu1 %vm524_vm3, %v19607_v0 }
 0x329   : > { %12644 = vmatmul.mubr.msk.bf16.gmra.mrb[92].mxu0 %vm3997_vm13, %v19608_v49  ;;  %v19618_v49 = vld [vmem:[#allocation147_spill] sm:$0xff] }
 0x32a   : > { %12651 = vmatprep.mubr.msk.bf16.mxu0 %vm524_vm3, %v19609_v40  ;;  %v19621_v40 = vld [vmem:[#allocation151_spill] sm:$0xff] }
 0x32f   : > { %13176 = vmatmul.mubr.msk.bf16.gmra.mrb[48].mxu1 %vm524_vm3, %v19615_v8 }
 0x330   : > { %13179 = vmatprep.mubr.msk.bf16.mxu1 %vm524_vm3, %v19616_v19 }
 0x331   : > { %12652 = vmatmul.mubr.msk.bf16.vlgmr.msra.gmra.mrb[96].mxu0 %vm524_vm3, %v19617_v29  ;;  %v19626_v29 = vld [vmem:[#allocation157_spill] sm:$0xff] }
 0x332   : > { %12684 = vmatpush3.bf16.msra.mxu0 %v17198_v32  ;;  %12655 = vmatprep.mubr.msk.bf16.mxu0 %vm524_vm3, %v19589_v15  ;;  %v19620_v32 = vld [vmem:[#allocation150_spill] sm:$0xff]  ;;  %v4459_v12 = vrot.slane %v19626_v29, 4 }
 0x333   : > { %12685 = vmatprep.subr.bf16.mxu0 %v14382_v57  ;;  %v19628_v15 = vld [vmem:[#allocation54_spill] sm:$0xff] }
 0x336   : > { %12686 = vmatpush3.bf16.msra.mxu0 %v14382_v57  ;;  %v4455_v57 = vrot.slane %v19625_v56, 5 }
 0x337   : > { %13180 = vmatmul.mubr.msk.bf16.gmra.mrb[52].mxu1 %vm524_vm3, %v19618_v49  ;;  %12719 = vmatprep.subr.bf16.mxu0 %v17330_v35 }
 0x338   : > { %13183 = vmatprep.mubr.msk.bf16.mxu1 %vm524_vm3, %v19619_v5  ;;  %v4460_v20 = vor.u32 %v4459_v12, %v4455_v57 }
 0x339   : > { %12656 = vmatmul.mubr.msk.bf16.gmra.mrb[100].mxu0 %vm524_vm3, %v19592_v59 }
 0x33a   : > { %12659 = vmatprep.mubr.msk.bf16.mxu0 %vm524_vm3, %v19593_v21  ;;  %v19627_v21 = vld [vmem:[#allocation52_spill] sm:$0xff] }
 0x33b   : > { %v4478_v59 = vrot.slane %v19627_v21, 4 }
 0x33f   : > { %13184 = vmatmul.mubr.msk.bf16.gmra.mrb[56].mxu1 %vm524_vm3, %v19620_v32 }
 0x340   : > { %13187 = vmatprep.mubr.msk.bf16.mxu1 %vm524_vm3, %v19621_v40 }
 0x341   : > { %12660 = vmatmul.mubr.msk.bf16.gmra.mrb[104].mxu0 %vm524_vm3, %v19596_v63 }
 0x342   : > { %12663 = vmatprep.mubr.msk.bf16.mxu0 %vm524_vm3, %v19597_v2  ;;  %v19632_v2 = vld [vmem:[#allocation32_spill] sm:$0xff] }
 0x343   : > { %v4489_v63 = vrot.slane %v19632_v2, 4 }
 0x347   : > { %13188 = vmatmul.mubr.msk.bf16.gmra.mrb[60].mxu1 %vm524_vm3, %v19622_v9  ;;  %v19629_v9 = vld [vmem:[#allocation85_spill] sm:$0xff] }
 0x348   : > { %13195 = vmatprep.mubr.msk.bf16.mxu1 %vm524_vm3, %v16877_v55  ;;  %v17369_v55 = vld [vmem:[%s18818_s3 + $0x190] sm:$0xff]   ;;  %v4482_v40 = vrot.slane %v19629_v9, 5 }
 0x349   : > { %12664 = vmatmul.mubr.msk.bf16.gmra.mrb[108].mxu0 %vm524_vm3, %v19600_v62  ;;  %v19631_v62 = vld [vmem:[#allocation161_spill] sm:$0xff] }
 0x34a   : > { %12667 = vmatprep.mubr.msk.bf16.mxu0 %vm524_vm3, %v19601_v39  ;;  %v4461_v39 = vrot.slane %v4460_v20, 4 }
 0x34f   : > { %13196 = vmatmul.mubr.msk.bf16.vlgmr.msra.gmra.mrb[32].mxu1 %vm524_vm3, %v16881_v11  ;;  %v19623_v11 = vld [vmem:[#allocation99_spill] sm:$0xff] }
 0x350   : > { %13199 = vmatprep.mubr.msk.bf16.mxu1 %vm524_vm3, %v16900_v34  ;;  %13228 = vmatpush3.bf16.msra.mxu1 %v14384_v3  ;;  %v4446_v34 = vrot.slane %v19623_v11, 4  ;;  %v19624_v3 = vld [vmem:[#allocation155_spill] sm:$0xff] }
 0x351   : > { %12668 = vmatmul.mubr.msk.bf16.gmra.mrb[112].mxu0 %vm524_vm3, %v19606_v37  ;;  %13229 = vmatprep.subr.bf16.mxu1 %v14385_v16  ;;  %v4449_v25 = vrot.slane %v19624_v3, 5 }
 0x352   : > { %12671 = vmatprep.mubr.msk.bf16.mxu0 %vm524_vm3, %v19607_v0  ;;  %v19630_v0 = vld [vmem:[#allocation84_spill] sm:$0xff] }
 0x353   : > { %v4484_v37 = vrot.slane %v19630_v0, 4 }
 0x354   : > { %13230 = vmatpush3.bf16.msra.mxu1 %v14385_v16  ;;  %v4450_v16 = vor.u32 %v4449_v25, %v4446_v34  ;;  %v19633_v34 = vld [vmem:[#allocation33_spill] sm:$0xff] }
 0x355   : > { %13263 = vmatprep.subr.bf16.mxu1 %v17369_v55  ;;  %v4490_v25 = vrot.slane %v19633_v34, 5 }
 0x357   : > { %13200 = vmatmul.mubr.msk.bf16.gmra.mrb[36].mxu1 %vm524_vm3, %v16902_v52  ;;  %v4479_v52 = vrot.slane %v19628_v15, 5 }
 0x358   : > { %13203 = vmatprep.mubr.msk.bf16.mxu1 %vm524_vm3, %v16932_v54  ;;  %v4451_v54 = vrot.slane %v4450_v16, 4  ;;  %v19636_v16 = vld [vmem:[#allocation39_spill] sm:$0xff] }
 0x359   : > { %12672 = vmatmul.mubr.msk.bf16.gmra.mrb[116].mxu0 %vm524_vm3, %v19615_v8  ;;  %v4465_v8 = vrot.slane %v19631_v62, 5  ;;  %v4480_v12 = vor.u32 %v4479_v52, %v4478_v59  ;;  %v4500_v20 = vrot.slane %v19636_v16, 4  ;;  %v19639_v52 = vld [vmem:[#allocation41_spill] sm:$0xff]  ;;  %v19640_v16 = vld [vmem:[#allocation88_spill] sm:$0xff] }
 0x35a   : > { %12675 = vmatprep.mubr.msk.bf16.mxu0 %vm524_vm3, %v19616_v19  ;;  %v19634_v19 = vld [vmem:[#allocation35_spill] sm:$0xff]  ;;  %v4506_v59 = vrot.slane %v19639_v52, 4  ;;  %v4456_v31 = vsel %vm17168_vm0, %v4451_v54, %v4455_v57  ;;  %v4487_v22 = vrot.slane %v19640_v16, 5 }
 0x35b   : > { %v4493_v28 = vrot.slane %v19634_v19, 5  ;;  %v4466_v6 = vsel %vm17168_vm0, %v4461_v39, %v4465_v8  ;;  %v4481_v19 = vrot.slane %v4480_v12, 4  ;;  %v4502_v1 = vor.u32 %v4501_v41, %v4500_v20  ;;  %v19643_v39 = vld [vmem:[#allocation37_spill] sm:$0xff]  ;;  %v19644_v8 = vld [vmem:[#allocation50_spill] sm:$0xff] }
 0x35c   : > { %v11069_v34 = vcombine.low %v4456_v31, %v4466_v6  ;;  %v8815_v31 = vrot.slane %v17213_v51, 7  ;;  %v4515_v57 = vrot.slane %v19644_v8, 5  ;;  %v11468_v51 = vrot.slane %v17210_v50, 11 }
 0x35d   : > { %v4483_v54 = vsel %vm17168_vm0, %v4481_v19, %v4482_v40  ;;  %v4503_v41 = vrot.slane %v4502_v1, 4  ;;  %v19645_v19 = vld [vmem:[#allocation43_spill] sm:$0xff]  ;;  %v14493_v1 = vld [vmem:[%s14749_s25 + $0xc8] sm:$0x7] }
 0x35f   : > { %13204 = vmatmul.mubr.msk.bf16.gmra.mrb[40].mxu1 %vm524_vm3, %v16934_v23  ;;  %v4485_v23 = vor.u32 %v4484_v37, %v4482_v40  ;;  %v4496_v37 = vor.u32 %v4495_v44, %v4493_v28  ;;  %v4498_v44 = vrot.slane %v19643_v39, 5 }
 0x360   : > { %13207 = vmatprep.mubr.msk.bf16.mxu1 %vm524_vm3, %v16967_v42  ;;  %v4504_v42 = vrot.slane %v19638_v30, 5  ;;  %v19642_v30 = vld [vmem:[#allocation48_spill] sm:$0xff] }
 0x361   : > { %12676 = vmatmul.mubr.msk.bf16.gmra.mrb[120].mxu0 %vm524_vm3, %v19618_v49  ;;  %v4491_v49 = vor.u32 %v4490_v25, %v4489_v63  ;;  %v4486_v38 = vrot.slane %v4485_v23, 4  ;;  %v4512_v27 = vrot.slane %v19642_v30, 5  ;;  %v4497_v23 = vrot.slane %v4496_v37, 4  ;;  %v19646_v25 = vld [vmem:[#allocation49_spill] sm:$0xff] }
 0x362   : > { %12679 = vmatprep.mubr.msk.bf16.mxu0 %vm524_vm3, %v19619_v5  ;;  %v4507_v2 = vor.u32 %v4506_v59, %v4504_v42  ;;  %v19641_v5 = vld [vmem:[#allocation47_spill] sm:$0xff]  ;;  %v4517_v20 = vrot.slane %v19646_v25, 4 }
 0x363   : > { %v4511_v17 = vrot.slane %v19641_v5, 4  ;;  %v4492_v63 = vrot.slane %v4491_v49, 4  ;;  %v4488_v6 = vsel %vm17168_vm0, %v4486_v38, %v4487_v22  ;;  %v4509_v49 = vrot.slane %v19645_v19, 5 }
 0x364   : > { %v4508_v12 = vrot.slane %v4507_v2, 4  ;;  %v17430_v59 = vcombine.low %v4483_v54, %v4488_v6  ;;  %v4499_v38 = vsel %vm17168_vm0, %v4497_v23, %v4498_v44  ;;  %v8817_v22 = vrot.slane %v8815_v31, 4  ;;  %v19650_v44 = vld [vmem:[#allocation58_spill] sm:$0xff]  ;;  %v19651_v6 = vld [vmem:[#allocation57_spill] sm:$0xff] }
 0x365   : > { %v4513_v40 = vor.u32 %v4512_v27, %v4511_v17  ;;  %v4494_v37 = vsel %vm17168_vm0, %v4492_v63, %v4493_v28  ;;  %v4505_v2 = vsel %vm17168_vm0, %v4503_v41, %v4504_v42  ;;  %v19648_v28 = vld [vmem:[#allocation51_spill] sm:$0xff]  ;;  %v19649_v63 = vld [vmem:[#allocation56_spill] sm:$0xff]  ;;  %v4526_v50 = vrot.slane %v19650_v44, 5  ;;  %v19662_v44 = vld [vmem:[#allocation70_spill] sm:$0xff] }
 0x366   : > { %19647 = vst [vmem:[#allocation170_spill] sm:$0xff] %v17430_v59  ;;  %v4510_v27 = vsel %vm17168_vm0, %v4508_v12, %v4509_v49  ;;  %v4522_v54 = vrot.slane %v19648_v28, 4  ;;  %v4523_v23 = vrot.slane %v19649_v63, 5  ;;  %v14386_v42 = vld [vmem:[%s18818_s3 + $0xb8] sm:$0xff]   ;;  %v19652_v41 = vcombine.low %v17175_v18, %v17179_v58 }
 0x367   : > { %13208 = vmatmul.mubr.msk.bf16.gmra.mrb[44].mxu1 %vm524_vm3, %v16969_v14  ;;  %v4514_v17 = vrot.slane %v4513_v40, 4  ;;  %v4528_v14 = vrot.slane %v19651_v6, 4  ;;  %v17457_v12 = vcombine.low %v4494_v37, %v4499_v38  ;;  %v8822_v49 = vrot.slane %v17223_v47, 7  ;;  %v19655_v18 = vld [vmem:[#allocation59_spill] sm:$0xff] }
 0x368   : > { %13211 = vmatprep.mubr.msk.bf16.mxu1 %vm524_vm3, %v17002_v48  ;;  %v8818_v48 = vrot.slane %v14493_v1, 7  ;;  %v8816_v40 = vsel %vm16811_vm12, %v11468_v51, %v8815_v31  ;;  %v17467_v1 = vcombine.low %v4505_v2, %v4510_v27  ;;  %v4520_v58 = vrot.slane %v19655_v18, 5  ;;  %v19656_v31 = vld [vmem:[#allocation62_spill] sm:$0xff]  ;;  %v19659_v27 = vld [vmem:[#allocation64_spill] sm:$0xff] }
 0x369   : > { %12680 = vmatmul.mubr.msk.bf16.gmra.mrb[124].mxu0 %vm524_vm3, %v19620_v32  ;;  %19653 = vst [vmem:[#allocation176_spill] sm:$0xff] %v17457_v12  ;;  %v4516_v37 = vsel %vm17168_vm0, %v4514_v17, %v4515_v57  ;;  %v4524_v38 = vor.u32 %v4523_v23, %v4522_v54  ;;  %v4533_v51 = vrot.slane %v19656_v31, 4  ;;  %v11469_v32 = vrot.slane %v17220_v13, 11  ;;  %v14494_v17 = vld [vmem:[%s14749_s25 + $0xd4] sm:$0x7]  ;;  %v19663_v31 = vld [vmem:[#allocation69_spill] sm:$0xff] }
 0x36a   : > { %12687 = vmatprep.mubr.msk.bf16.mxu0 %vm524_vm3, %v11069_v34  ;;  %v4518_v34 = vor.u32 %v4517_v20, %v4515_v57  ;;  %v8819_v20 = vsel %vm16811_vm12, %v8817_v22, %v8818_v48  ;;  %19654 = vst [vmem:[#allocation177_spill] sm:$0xff] %v17467_v1  ;;  %v19658_v22 = vld [vmem:[#allocation65_spill] sm:$0xff]  ;;  %v8824_v57 = vrot.slane %v8822_v49, 4  ;;  %v19660_v54 = vld [vmem:[#allocation66_spill] sm:$0xff]  ;;  %v4548_v6 = vrot.slane %v19662_v44, 5 }
 0x36b   : > { %v4537_v2 = vrot.slane %v19658_v22, 5  ;;  %v4544_v23 = vrot.slane %v19660_v54, 4  ;;  %v4550_v63 = vrot.slane %v19663_v31, 4  ;;  %v4525_v22 = vrot.slane %v4524_v38, 4  ;;  %v19674_v54 = vld [vmem:[#allocation72_spill] sm:$0xff] }
 0x36c   : > { %v4519_v47 = vrot.slane %v4518_v34, 4  ;;  %v8825_v34 = vrot.slane %v14494_v17, 7  ;;  %v19664_v17 = vld [vmem:[#allocation60_spill] sm:$0xff] }
 0x36e   : > { %v4521_v13 = vsel %vm17168_vm0, %v4519_v47, %v4520_v58  ;;  %v8823_v58 = vsel %vm16811_vm12, %v11469_v32, %v8822_v49  ;;  %v8826_v47 = vsel %vm16811_vm12, %v8824_v57, %v8825_v34  ;;  %v19668_v34 = vld [vmem:[#allocation68_spill] sm:$0xff] }
 0x36f   : > { %13212 = vmatmul.mubr.msk.bf16.gmra.mrb[48].mxu1 %vm524_vm3, %v17006_v53  ;;  %v4539_v53 = vrot.slane %v19659_v27, 4  ;;  %v17506_v38 = vcombine.low %v4516_v37, %v4521_v13  ;;  %v17514_v49 = vcombine.low %v8823_v58, %v8826_v47  ;;  %v4542_v37 = vrot.slane %v19668_v34, 5  ;;  %v19669_v13 = vld [vmem:[#allocation71_spill] sm:$0xff]  ;;  %v19677_v47 = vld [vmem:[#allocation93_spill] sm:$0xff] }
 0x370   : > { %13215 = vmatprep.mubr.msk.bf16.mxu1 %vm524_vm3, %v17038_v26  ;;  %v19657_v26 = vld [vmem:[#allocation63_spill] sm:$0xff] }
 0x371   : > { %12688 = vmatmul.mubr.msk.bf16.vlgmr.msra.gmra.mrb[96].mxu0 %vm524_vm3, %v19652_v41  ;;  %v17475_v41 = vld [vmem:[%s18818_s3 + $0xc0] sm:$0xff]   ;;  %v4534_v48 = vrot.slane %v19657_v26, 5  ;;  %19666 = vst [vmem:[#allocation172_spill] sm:$0xff] %v17506_v38  ;;  %19667 = vst [vmem:[#allocation173_spill] sm:$0xff] %v17514_v49 }
 0x372   : > { %12720 = vmatpush3.bf16.msra.mxu0 %v17330_v35  ;;  %12691 = vmatprep.mubr.msk.bf16.mxu0 %vm524_vm3, %v17430_v59  ;;  %v4529_v35 = vor.u32 %v4528_v14, %v4526_v50  ;;  %v8829_v14 = vrot.slane %v17238_v45, 7  ;;  %v19661_v59 = vld [vmem:[#allocation67_spill] sm:$0xff]  ;;  %v4531_v45 = vrot.slane %v19664_v17, 5 }
 0x373   : > { %12721 = vmatprep.subr.bf16.mxu0 %v14386_v42  ;;  %v4545_v18 = vrot.slane %v19661_v59, 5  ;;  %v4535_v44 = vor.u32 %v4534_v48, %v4533_v51  ;;  %v4540_v59 = vor.u32 %v4539_v53, %v4537_v2  ;;  %v4551_v53 = vor.u32 %v4550_v63, %v4548_v6  ;;  %v19671_v63 = vld [vmem:[#allocation75_spill] sm:$0xff] }
 0x374   : > { %v4530_v27 = vrot.slane %v4529_v35, 4  ;;  %v11470_v35 = vrot.slane %v17241_v7, 11  ;;  %v8831_v48 = vrot.slane %v8829_v14, 4  ;;  %v19670_v7 = vld [vmem:[#allocation73_spill] sm:$0xff] }
 0x375   : > { %v4546_v51 = vor.u32 %v4545_v18, %v4544_v23  ;;  %v4541_v57 = vrot.slane %v4540_v59, 4  ;;  %v4556_v18 = vrot.slane %v19670_v7, 5  ;;  %v4559_v23 = vrot.slane %v19671_v63, 5  ;;  %v19675_v59 = vld [vmem:[#allocation83_spill] sm:$0xff]  ;;  %v19678_v7 = vld [vmem:[#allocation92_spill] sm:$0xff] }
 0x376   : > { %12722 = vmatpush3.bf16.msra.mxu0 %v14386_v42  ;;  %v17498_v42 = vcombine.low %v8816_v40, %v8819_v20  ;;  %v4527_v40 = vsel %vm17168_vm0, %v4525_v22, %v4526_v50  ;;  %v4532_v32 = vsel %vm17168_vm0, %v4530_v27, %v4531_v45  ;;  %v4536_v20 = vrot.slane %v4535_v44, 4  ;;  %v19676_v45 = vld [vmem:[#allocation45_spill] sm:$0xff] }
 0x377   : > { %13216 = vmatmul.mubr.msk.bf16.gmra.mrb[52].mxu1 %vm524_vm3, %v17049_v60  ;;  %12755 = vmatprep.subr.bf16.mxu0 %v17475_v41  ;;  %v17521_v31 = vcombine.low %v4527_v40, %v4532_v32  ;;  %v4547_v50 = vrot.slane %v4546_v51, 4  ;;  %v4552_v22 = vrot.slane %v4551_v53, 4  ;;  %v4553_v27 = vrot.slane %v19674_v54, 5 }
 0x378   : > { %13219 = vmatprep.mubr.msk.bf16.mxu1 %vm524_vm3, %v17073_v43  ;;  %19665 = vst [vmem:[#allocation171_spill] sm:$0xff] %v17498_v42  ;;  %v14495_v43 = vld [vmem:[%s14749_s25 + $0xe0] sm:$0x7]  ;;  %v4566_v44 = vrot.slane %v19675_v59, 4  ;;  %v4567_v58 = vrot.slane %v19676_v45, 5  ;;  %v4572_v34 = vrot.slane %v19678_v7, 4  ;;  %v8830_v51 = vsel %vm16811_vm12, %v11470_v35, %v8829_v14 }
 0x379   : > { %12692 = vmatmul.mubr.msk.bf16.gmra.mrb[100].mxu0 %vm524_vm3, %v17457_v12  ;;  %v8832_v60 = vrot.slane %v14495_v43, 7  ;;  %v19672_v12 = vld [vmem:[#allocation74_spill] sm:$0xff]  ;;  %19673 = vst [vmem:[#allocation174_spill] sm:$0xff] %v17521_v31  ;;  %v4538_v40 = vsel %vm17168_vm0, %v4536_v20, %v4537_v2  ;;  %v4543_v32 = vsel %vm17168_vm0, %v4541_v57, %v4542_v37  ;;  %v4549_v14 = vsel %vm17168_vm0, %v4547_v50, %v4548_v6  ;;  %v19681_v57 = vld [vmem:[#allocation97_spill] sm:$0xff] }
 0x37a   : > { %12695 = vmatprep.mubr.msk.bf16.mxu0 %vm524_vm3, %v17467_v1  ;;  %v4555_v1 = vrot.slane %v19669_v13, 4  ;;  %v4561_v43 = vrot.slane %v19672_v12, 4  ;;  %v4570_v13 = vrot.slane %v19677_v47, 5  ;;  %v17550_v2 = vcombine.low %v4538_v40, %v4543_v32  ;;  %v19686_v7 = vld [vmem:[#allocation78_spill] sm:$0xff] }
 0x37b   : > { %v8833_v53 = vsel %vm16811_vm12, %v8831_v48, %v8832_v60  ;;  %v4554_v60 = vsel %vm17168_vm0, %v4552_v22, %v4553_v27  ;;  %v4568_v48 = vor.u32 %v4567_v58, %v4566_v44  ;;  %v4577_v37 = vrot.slane %v19681_v57, 4  ;;  %v19687_v27 = vld [vmem:[#allocation111_spill] sm:$0xff]  ;;  %v19689_v44 = vld [vmem:[#allocation116_spill] sm:$0xff] }
 0x37c   : > { %v4562_v47 = vor.u32 %v4561_v43, %v4559_v23  ;;  %v17548_v35 = vcombine.low %v8830_v51, %v8833_v53  ;;  %19680 = vst [vmem:[#allocation179_spill] sm:$0xff] %v17550_v2  ;;  %v4573_v20 = vor.u32 %v4572_v34, %v4570_v13  ;;  %v4564_v22 = vrot.slane %v19686_v7, 5  ;;  %v19688_v53 = vld [vmem:[#allocation114_spill] sm:$0xff]  ;;  %v19690_v58 = vld [vmem:[#allocation115_spill] sm:$0xff] }
 0x37d   : > { %v4588_v51 = vrot.slane %v19687_v27, 4  ;;  %v4589_v40 = vrot.slane %v19688_v53, 5  ;;  %v4592_v34 = vrot.slane %v19689_v44, 5  ;;  %v4594_v32 = vrot.slane %v19690_v58, 4  ;;  %v19696_v53 = vld [vmem:[#allocation122_spill] sm:$0xff] }
 0x37e   : > { %19679 = vst [vmem:[#allocation178_spill] sm:$0xff] %v17548_v35  ;;  %v4563_v50 = vrot.slane %v4562_v47, 4 }
 0x37f   : > { %13220 = vmatmul.mubr.msk.bf16.gmra.mrb[56].mxu1 %vm524_vm3, %v17498_v42  ;;  %v4557_v42 = vor.u32 %v4556_v18, %v4555_v1  ;;  %v4578_v1 = vrot.slane %v19682_v46, 5  ;;  %v19683_v18 = vld [vmem:[#allocation102_spill] sm:$0xff]  ;;  %v4574_v46 = vrot.slane %v4573_v20, 4  ;;  %v4595_v20 = vor.u32 %v4594_v32, %v4592_v34 }
 0x380   : > { %13223 = vmatprep.mubr.msk.bf16.mxu1 %vm524_vm3, %v17514_v49  ;;  %v4581_v43 = vrot.slane %v19683_v18, 5  ;;  %v19684_v49 = vld [vmem:[#allocation100_spill] sm:$0xff]  ;;  %v4569_v18 = vrot.slane %v4568_v48, 4  ;;  %v4565_v44 = vsel %vm17168_vm0, %v4563_v50, %v4564_v22  ;;  %v4590_v48 = vor.u32 %v4589_v40, %v4588_v51  ;;  %v19697_v51 = vld [vmem:[#allocation121_spill] sm:$0xff]  ;;  %v19699_v32 = vld [vmem:[#allocation118_spill] sm:$0xff] }
 0x381   : > { %12696 = vmatmul.mubr.msk.bf16.gmra.mrb[104].mxu0 %vm524_vm3, %v17506_v38  ;;  %v17556_v38 = vcombine.low %v4549_v14, %v4554_v60  ;;  %v4558_v6 = vrot.slane %v4557_v42, 4  ;;  %v4579_v42 = vor.u32 %v4578_v1, %v4577_v37  ;;  %v19695_v50 = vld [vmem:[#allocation120_spill] sm:$0xff]  ;;  %v4605_v40 = vrot.slane %v19697_v51, 4  ;;  %v19703_v51 = vld [vmem:[#allocation125_spill] sm:$0xff] }
 0x382   : > { %12699 = vmatprep.mubr.msk.bf16.mxu0 %vm524_vm3, %v17521_v31  ;;  %v4583_v31 = vrot.slane %v19684_v49, 4  ;;  %v19691_v49 = vld [vmem:[#allocation96_spill] sm:$0xff]  ;;  %v4600_v22 = vrot.slane %v19695_v50, 5 }
 0x383   : > { %19685 = vst [vmem:[#allocation153_spill] sm:$0xff] %v17556_v38  ;;  %v4575_v14 = vrot.slane %v19691_v49, 5  ;;  %v4560_v60 = vsel %vm17168_vm0, %v4558_v6, %v4559_v23  ;;  %v4580_v37 = vrot.slane %v4579_v42, 4  ;;  %v19694_v6 = vld [vmem:[#allocation119_spill] sm:$0xff] }
 0x384   : > { %v4584_v47 = vor.u32 %v4583_v31, %v4581_v43  ;;  %v17580_v31 = vcombine.low %v4560_v60, %v4565_v44  ;;  %v4599_v58 = vrot.slane %v19694_v6, 4  ;;  %v4596_v44 = vrot.slane %v4595_v20, 4  ;;  %v19700_v42 = vld [vmem:[#allocation123_spill] sm:$0xff]  ;;  %v19701_v60 = vld [vmem:[#allocation124_spill] sm:$0xff] }
 0x385   : > { %v4611_v50 = vrot.slane %v19701_v60, 5 }
 0x386   : > { %19692 = vst [vmem:[#allocation158_spill] sm:$0xff] %v17580_v31  ;;  %v4585_v1 = vrot.slane %v4584_v47, 4  ;;  %v4610_v47 = vrot.slane %v19700_v42, 4 }
 0x387   : > { %13224 = vmatmul.mubr.msk.bf16.gmra.mrb[60].mxu1 %vm524_vm3, %v17548_v35  ;;  %v4571_v35 = vsel %vm17168_vm0, %v4569_v18, %v4570_v13  ;;  %v14392_v13 = vld [vmem:[%s18818_s3 + $0x198] sm:$0xff]  }
 0x388   : > { %13231 = vmatprep.mubr.msk.bf16.mxu1 %vm524_vm3, %v19557_v61  ;;  %v4576_v61 = vsel %vm17168_vm0, %v4574_v46, %v4575_v14  ;;  %v4591_v46 = vrot.slane %v4590_v48, 4  ;;  %v4597_v14 = vrot.slane %v19699_v32, 5 }
 0x389   : > { %12700 = vmatmul.mubr.msk.bf16.gmra.mrb[108].mxu0 %vm524_vm3, %v17550_v2  ;;  %v19693_v2 = vld [vmem:[#allocation104_spill] sm:$0xff]  ;;  %v17590_v18 = vcombine.low %v4571_v35, %v4576_v61  ;;  %v4582_v35 = vsel %vm17168_vm0, %v4580_v37, %v4581_v43  ;;  %v4612_v37 = vor.u32 %v4611_v50, %v4610_v47  ;;  %v5108_v50 = vrot.slane %v19623_v11, 6 }
 0x38a   : > { %12703 = vmatprep.mubr.msk.bf16.mxu0 %vm524_vm3, %v17556_v38  ;;  %v4586_v23 = vrot.slane %v19693_v2, 5  ;;  %v4603_v38 = vrot.slane %v19696_v53, 5  ;;  %v19702_v53 = vld [vmem:[#allocation126_spill] sm:$0xff]  ;;  %v4616_v2 = vrot.slane %v19703_v51, 4  ;;  %v17611_v61 = vld [vmem:[%s18818_s3 + $0x1a0] sm:$0xff]  }
 0x38b   : > { %19698 = vst [vmem:[#allocation159_spill] sm:$0xff] %v17590_v18  ;;  %v4614_v6 = vrot.slane %v19702_v53, 5  ;;  %v19708_v51 = vld [vmem:[#allocation30_spill] sm:$0xff] }
 0x38c   : > { %v4587_v48 = vsel %vm17168_vm0, %v4585_v1, %v4586_v23  ;;  %v4606_v20 = vor.u32 %v4605_v40, %v4603_v38  ;;  %v19705_v1 = vld [vmem:[#allocation27_spill] sm:$0xff]  ;;  %v4627_v60 = vrot.slane %v19708_v51, 4 }
 0x38d   : > { %v17619_v43 = vcombine.low %v4582_v35, %v4587_v48  ;;  %v4621_v23 = vrot.slane %v19705_v1, 4  ;;  %v19711_v35 = vld [vmem:[#allocation131_spill] sm:$0xff] }
 0x38e   : > { %v4619_v48 = vrot.slane %v19711_v35, 5 }
 0x38f   : > { %13232 = vmatmul.mubr.msk.bf16.vlgmr.msra.gmra.mrb[32].mxu1 %vm524_vm3, %v19558_v33  ;;  %v4601_v33 = vor.u32 %v4600_v22, %v4599_v58  ;;  %19704 = vst [vmem:[#allocation160_spill] sm:$0xff] %v17619_v43  ;;  %v4617_v58 = vor.u32 %v4616_v2, %v4614_v6  ;;  %v19706_v22 = vld [vmem:[#allocation29_spill] sm:$0xff]  ;;  %v5109_v2 = vrot.slane %v19624_v3, 7 }
 0x390   : > { %13235 = vmatprep.mubr.msk.bf16.mxu1 %vm524_vm3, %v19563_v24  ;;  %13264 = vmatpush3.bf16.msra.mxu1 %v17369_v55  ;;  %v4593_v24 = vsel %vm17168_vm0, %v4591_v46, %v4592_v34  ;;  %v4598_v55 = vsel %vm17168_vm0, %v4596_v44, %v4597_v14  ;;  %v4622_v40 = vrot.slane %v19706_v22, 5  ;;  %v4607_v34 = vrot.slane %v4606_v20, 4  ;;  %v19710_v46 = vld [vmem:[#allocation128_spill] sm:$0xff] }
 0x391   : > { %12704 = vmatmul.mubr.msk.bf16.gmra.mrb[112].mxu0 %vm524_vm3, %v17580_v31  ;;  %13265 = vmatprep.subr.bf16.mxu1 %v14392_v13  ;;  %v19707_v31 = vld [vmem:[#allocation31_spill] sm:$0xff]  ;;  %v4602_v42 = vrot.slane %v4601_v33, 4  ;;  %v4608_v32 = vrot.slane %v19710_v46, 5  ;;  %v5112_v44 = vrot.slane %v19626_v29, 6  ;;  %v5113_v14 = vrot.slane %v19625_v56, 7  ;;  %v19712_v29 = vld [vmem:[#allocation154_spill] sm:$0xff] }
 0x392   : > { %12707 = vmatprep.mubr.msk.bf16.mxu0 %vm524_vm3, %v17590_v18  ;;  %v4625_v53 = vrot.slane %v19707_v31, 5  ;;  %v17625_v18 = vcombine.low %v4593_v24, %v4598_v55  ;;  %v4618_v47 = vrot.slane %v4617_v58, 4  ;;  %v4623_v33 = vor.u32 %v4622_v40, %v4621_v23  ;;  %v19715_v58 = vld [vmem:[#allocation132_spill] sm:$0xff] }
 0x393   : > { %v4604_v11 = vsel %vm17168_vm0, %v4602_v42, %v4603_v38  ;;  %v4609_v3 = vsel %vm17168_vm0, %v4607_v34, %v4608_v32  ;;  %v5114_v56 = vor.u32 %v5113_v14, %v5112_v44  ;;  %v19713_v24 = vshrl.u32 %v19712_v29, 16 }
 0x394   : > { %13266 = vmatpush3.bf16.msra.mxu1 %v14392_v13  ;;  %19709 = vst [vmem:[#allocation180_spill] sm:$0xff] %v17625_v18  ;;  %v4613_v13 = vrot.slane %v4612_v37, 4  ;;  %v4628_v20 = vor.u32 %v4627_v60, %v4625_v53  ;;  %v4620_v37 = vsel %vm17168_vm0, %v4618_v47, %v4619_v48  ;;  %v17653_v38 = vcombine.low %v4604_v11, %v4609_v3  ;;  %v19717_v47 = vld [vmem:[#allocation184_spill] sm:$0xff]  ;;  %v19720_v3 = vld [vmem:[#allocation86_spill] sm:$0xff] }
 0x395   : > { %13299 = vmatprep.subr.bf16.mxu1 %v17611_v61  ;;  %v5117_v55 = vrot.slane %v19713_v24, 6  ;;  %v4624_v42 = vrot.slane %v4623_v33, 4  ;;  %v4630_v23 = vrot.slane %v19715_v58, 5  ;;  %v5134_v40 = vrot.slane %v19627_v21, 6 }
 0x396   : > { %v4615_v60 = vsel %vm17168_vm0, %v4613_v13, %v4614_v6  ;;  %19714 = vst [vmem:[#allocation181_spill] sm:$0xff] %v17653_v38  ;;  %v4629_v32 = vrot.slane %v4628_v20, 4  ;;  %v5135_v34 = vrot.slane %v19628_v15, 7  ;;  %v5116_v44 = vrot.slane %v5114_v56, 4  ;;  %v19716_v13 = vld [vmem:[#allocation183_spill] sm:$0xff] }
 0x397   : > { %13236 = vmatmul.mubr.msk.bf16.gmra.mrb[36].mxu1 %vm524_vm3, %v19564_v36  ;;  %v5110_v36 = vor.u32 %v5109_v2, %v5108_v50  ;;  %v5138_v50 = vrot.slane %v19630_v0, 6  ;;  %v17660_v2 = vcombine.low %v4615_v60, %v4620_v37  ;;  %v4626_v21 = vsel %vm17168_vm0, %v4624_v42, %v4625_v53  ;;  %v19718_v0 = vld [vmem:[#allocation32_spill] sm:$0xff]  ;;  %v19723_v60 = vld [vmem:[#allocation34_spill] sm:$0xff]  ;;  %v19724_v42 = vld [vmem:[#allocation35_spill] sm:$0xff] }
 0x398   : > { %13239 = vmatprep.mubr.msk.bf16.mxu1 %vm524_vm3, %v19568_v4  ;;  %v5118_v4 = vrot.slane %v19631_v62, 7  ;;  %v5139_v62 = vrot.slane %v19629_v9, 7  ;;  %v4631_v15 = vsel %vm17168_vm0, %v4629_v32, %v4630_v23  ;;  %v5147_v48 = vrot.slane %v19718_v0, 6  ;;  %v19719_v9 = vld [vmem:[#allocation33_spill] sm:$0xff]  ;;  %v19725_v23 = vld [vmem:[#allocation39_spill] sm:$0xff] }
 0x399   : > { %12708 = vmatmul.mubr.msk.bf16.gmra.mrb[116].mxu0 %vm524_vm3, %v17619_v43  ;;  %v5111_v6 = vrot.slane %v5110_v36, 4  ;;  %v5148_v33 = vrot.slane %v19719_v9, 7  ;;  %v5136_v20 = vor.u32 %v5135_v34, %v5134_v40  ;;  %v19721_v36 = vshrl.u32 %v19720_v3, 16  ;;  %v19726_v34 = vld [vmem:[#allocation40_spill] sm:$0xff] }
 0x39a   : > { %12711 = vmatprep.mubr.msk.bf16.mxu0 %vm524_vm3, %v17625_v18  ;;  %v5119_v14 = vor.u32 %v5118_v4, %v5117_v55  ;;  %v5140_v11 = vor.u32 %v5139_v62, %v5138_v50  ;;  %v5144_v24 = vrot.slane %v19640_v16, 7  ;;  %v5151_v37 = vrot.slane %v19723_v60, 6  ;;  %v19727_v16 = vld [vmem:[#allocation42_spill] sm:$0xff]  ;;  %v19728_v9 = vld [vmem:[#allocation12_spill] sm:$0xff] }
 0x39b   : > { %v5143_v29 = vrot.slane %v19721_v36, 6  ;;  %v5115_v55 = vsel %vm17301_vm4, %v5111_v6, %v5114_v56  ;;  %v5152_v32 = vrot.slane %v19724_v42, 7  ;;  %v5160_v40 = vrot.slane %v19725_v23, 6  ;;  %v19730_v23 = vld [vmem:[#allocation185_spill] sm:$0xff] }
 0x39c   : > { %v5120_v4 = vsel %vm17301_vm4, %v5116_v44, %v5119_v14  ;;  %v5161_v50 = vrot.slane %v19726_v34, 7  ;;  %v5164_v62 = vrot.slane %v19639_v52, 6  ;;  %v5149_v0 = vor.u32 %v5148_v33, %v5147_v48  ;;  %v19733_v48 = vld [vmem:[#allocation186_spill] sm:$0xff] }
 0x39d   : > { %v19729_v56 = vshrl.u32 %v19728_v9, 16  ;;  %v5137_v3 = vrot.slane %v5136_v20, 4  ;;  %v5142_v44 = vrot.slane %v5140_v11, 4  ;;  %v5145_v14 = vor.u32 %v5144_v24, %v5143_v29  ;;  %v19736_v9 = vld [vmem:[#allocation58_spill] sm:$0xff] }
 0x39e   : > { %v5157_v36 = vrot.slane %v19643_v39, 7  ;;  %v11107_v60 = vcombine.low %v5115_v55, %v5120_v4  ;;  %v5153_v42 = vor.u32 %v5152_v32, %v5151_v37  ;;  %v5162_v34 = vor.u32 %v5161_v50, %v5160_v40  ;;  %v19734_v50 = vld [vmem:[#allocation56_spill] sm:$0xff] }
 0x39f   : > { %13240 = vmatmul.mubr.msk.bf16.gmra.mrb[40].mxu1 %vm524_vm3, %v19716_v13  ;;  %v5165_v13 = vrot.slane %v19727_v16, 7  ;;  %v5156_v6 = vrot.slane %v19729_v56, 6  ;;  %v19732_v16 = vshrl.u32 %v19731_v10, 16  ;;  %v5141_v39 = vsel %vm17301_vm4, %v5137_v3, %v5140_v11  ;;  %v19737_v3 = vld [vmem:[#allocation16_spill] sm:$0xff] }
 0x3a0   : > { %13243 = vmatprep.mubr.msk.bf16.mxu1 %vm524_vm3, %v19717_v47  ;;  %v17689_v47 = vcombine.low %v4626_v21, %v4631_v15  ;;  %v5170_v15 = vrot.slane %v19645_v19, 7  ;;  %v5146_v33 = vsel %vm17301_vm4, %v5142_v44, %v5145_v14  ;;  %v5150_v20 = vrot.slane %v5149_v0, 4  ;;  %v19739_v14 = vld [vmem:[#allocation188_spill] sm:$0xff] }
 0x3a1   : > { %12712 = vmatmul.mubr.msk.bf16.gmra.mrb[120].mxu0 %vm524_vm3, %v17653_v38  ;;  %v5166_v52 = vor.u32 %v5165_v13, %v5164_v62  ;;  %v5169_v21 = vrot.slane %v19732_v16, 6  ;;  %v5158_v29 = vor.u32 %v5157_v36, %v5156_v6  ;;  %v5155_v10 = vrot.slane %v5153_v42, 4  ;;  %v19735_v13 = vld [vmem:[#allocation57_spill] sm:$0xff] }
 0x3a2   : > { %12715 = vmatprep.mubr.msk.bf16.mxu0 %vm524_vm3, %v17660_v2  ;;  %v5173_v24 = vrot.slane %v19641_v5, 6  ;;  %v5174_v19 = vrot.slane %v19642_v30, 7  ;;  %v5177_v55 = vrot.slane %v19646_v25, 6  ;;  %v5163_v4 = vrot.slane %v5162_v34, 4  ;;  %v14393_v34 = vld [vmem:[%s18818_s3 + $0xc8] sm:$0xff]  }
 0x3a3   : > { %v5168_v37 = vrot.slane %v5166_v52, 4  ;;  %v5171_v32 = vor.u32 %v5170_v15, %v5169_v21  ;;  %v5178_v40 = vrot.slane %v19644_v8, 7  ;;  %v5186_v11 = vrot.slane %v19648_v28, 6  ;;  %v19741_v16 = vld [vmem:[#allocation165_spill] sm:$0xff] }
 0x3a4   : > { %v5187_v62 = vrot.slane %v19734_v50, 7  ;;  %v5190_v0 = vrot.slane %v19735_v13, 6  ;;  %v5191_v56 = vrot.slane %v19736_v9, 7  ;;  %v5154_v5 = vsel %vm17301_vm4, %v5150_v20, %v5153_v42  ;;  %v19740_v42 = vld [vmem:[#allocation59_spill] sm:$0xff]  ;;  %v19744_v20 = vld [vmem:[#allocation169_spill] sm:$0xff] }
 0x3a5   : > { %v17718_v6 = vcombine.low %v5141_v39, %v5146_v33  ;;  %v5159_v30 = vsel %vm17301_vm4, %v5155_v10, %v5158_v29  ;;  %v5175_v25 = vor.u32 %v5174_v19, %v5173_v24  ;;  %v19738_v44 = vshrl.u32 %v19737_v3, 16  ;;  %v19746_v10 = vld [vmem:[#allocation18_spill] sm:$0xff] }
 0x3a6   : > { %v5167_v28 = vsel %vm17301_vm4, %v5163_v4, %v5166_v52  ;;  %v5172_v36 = vsel %vm17301_vm4, %v5168_v37, %v5171_v32  ;;  %v5188_v21 = vor.u32 %v5187_v62, %v5186_v11  ;;  %v5192_v15 = vor.u32 %v5191_v56, %v5190_v0  ;;  %v19743_v52 = vld [vmem:[#allocation168_spill] sm:$0xff]  ;;  %v19749_v32 = vld [vmem:[#allocation65_spill] sm:$0xff] }
 0x3a7   : > { %13244 = vmatmul.mubr.msk.bf16.gmra.mrb[44].mxu1 %vm524_vm3, %v19730_v23  ;;  %v5182_v8 = vrot.slane %v19738_v44, 6  ;;  %v5183_v23 = vrot.slane %v19740_v42, 7  ;;  %v5200_v33 = vrot.slane %v19657_v26, 7  ;;  %v19745_v29 = vcombine.low %v19743_v52, %v19744_v20  ;;  %v19748_v4 = vld [vmem:[#allocation64_spill] sm:$0xff] }
 0x3a8   : > { %13247 = vmatprep.mubr.msk.bf16.mxu1 %vm524_vm3, %v19733_v48  ;;  %v19742_v48 = vld [vmem:[#allocation62_spill] sm:$0xff]  ;;  %v19747_v24 = vshrl.u32 %v19746_v10, 16  ;;  %v5203_v37 = vrot.slane %v19748_v4, 6  ;;  %v17750_v26 = vcombine.low %v5154_v5, %v5159_v30  ;;  %v17752_v11 = vcombine.low %v5167_v28, %v5172_v36  ;;  %v19750_v56 = vld [vmem:[#allocation20_spill] sm:$0xff]  ;;  %v19754_v36 = vld [vmem:[#allocation67_spill] sm:$0xff] }
 0x3a9   : > { %12716 = vmatmul.mubr.msk.bf16.gmra.mrb[124].mxu0 %vm524_vm3, %v17689_v47  ;;  %v5199_v39 = vrot.slane %v19742_v48, 6  ;;  %v5176_v50 = vrot.slane %v5175_v25, 4  ;;  %v5184_v62 = vor.u32 %v5183_v23, %v5182_v8  ;;  %v5189_v0 = vrot.slane %v5188_v21, 4  ;;  %v19753_v8 = vld [vmem:[#allocation66_spill] sm:$0xff]  ;;  %v19755_v23 = vld [vmem:[#allocation69_spill] sm:$0xff] }
 0x3aa   : > { %12723 = vmatprep.mubr.msk.bf16.mxu0 %vm524_vm3, %v11107_v60  ;;  %v5179_v60 = vor.u32 %v5178_v40, %v5177_v55  ;;  %v5195_v19 = vrot.slane %v19747_v24, 6  ;;  %v5196_v55 = vrot.slane %v19664_v17, 7  ;;  %v5204_v40 = vrot.slane %v19749_v32, 7  ;;  %v17757_v17 = vld [vmem:[%s18818_s3 + $0xd0] sm:$0xff]  }
 0x3ab   : > { %v5201_v9 = vor.u32 %v5200_v33, %v5199_v39  ;;  %v5194_v44 = vrot.slane %v5192_v15, 4  ;;  %v5212_v28 = vrot.slane %v19753_v8, 6  ;;  %v5213_v42 = vrot.slane %v19754_v36, 7  ;;  %v19756_v48 = vld [vmem:[#allocation70_spill] sm:$0xff]  ;;  %v19758_v39 = vld [vmem:[#allocation175_spill] sm:$0xff] }
 0x3ac   : > { %v5181_v13 = vrot.slane %v5179_v60, 4  ;;  %v5197_v5 = vor.u32 %v5196_v55, %v5195_v19  ;;  %v5205_v30 = vor.u32 %v5204_v40, %v5203_v37  ;;  %v5217_v52 = vrot.slane %v19756_v48, 7  ;;  %v19757_v21 = vld [vmem:[#allocation166_spill] sm:$0xff]  ;;  %v17819_v48 = vld [vmem:[%s14749_s25 + $0x100] sm:$0xf] }
 0x3ad   : > { %v5180_v33 = vsel %vm17301_vm4, %v5176_v50, %v5179_v60  ;;  %v17781_v10 = vld [vmem:[%s14749_s25 + $0xf4] sm:$0xf]  ;;  %v5193_v24 = vsel %vm17301_vm4, %v5189_v0, %v5192_v15  ;;  %v5214_v4 = vor.u32 %v5213_v42, %v5212_v28  ;;  %v5230_v8 = vrot.slane %v19671_v63, 7  ;;  %v17813_v28 = vld [vmem:[%s14749_s25 + $0xfc] sm:$0xf] }
 0x3ae   : > { %v5185_v20 = vsel %vm17301_vm4, %v5181_v13, %v5184_v62  ;;  %v5198_v19 = vsel %vm17301_vm4, %v5194_v44, %v5197_v5  ;;  %v5207_v55 = vrot.slane %v5205_v30, 4  ;;  %v19759_v32 = vld [vmem:[#allocation22_spill] sm:$0xff]  ;;  %v5222_v62 = vrot.slane %v19674_v54, 7  ;;  %v17793_v13 = vld [vmem:[%s14749_s25 + $0xe8] sm:$0xf]  ;;  %v19761_v44 = vld [vmem:[#allocation71_spill] sm:$0xff] }
 0x3af   : > { %13248 = vmatmul.mubr.msk.bf16.gmra.mrb[48].mxu1 %vm524_vm3, %v19739_v14  ;;  %v19752_v14 = vld [vmem:[#allocation68_spill] sm:$0xff]  ;;  %v19760_v40 = vshrl.u32 %v19759_v32, 16  ;;  %v17800_v0 = vcombine.low %v5180_v33, %v5185_v20  ;;  %v5225_v54 = vrot.slane %v19761_v44, 6  ;;  %v19762_v5 = vld [vmem:[#allocation73_spill] sm:$0xff]  ;;  %v5215_v42 = vrot.slane %v5214_v4, 4  ;;  %v19769_v44 = vld [vmem:[#allocation98_spill] sm:$0xff] }
 0x3b0   : > { %13251 = vmatprep.mubr.msk.bf16.mxu1 %vm524_vm3, %v19741_v16  ;;  %v5209_v25 = vrot.slane %v19752_v14, 7  ;;  %v5216_v16 = vrot.slane %v19755_v23, 6  ;;  %v5226_v14 = vrot.slane %v19762_v5, 7  ;;  %v19770_v5 = vld [vmem:[#allocation100_spill] sm:$0xff] }
 0x3b1   : > { %12724 = vmatmul.mubr.msk.bf16.vlgmr.msra.gmra.mrb[96].mxu0 %vm524_vm3, %v19745_v29  ;;  %v5202_v29 = vrot.slane %v5201_v9, 4  ;;  %v5221_v50 = vrot.slane %v19760_v40, 6  ;;  %v17796_v9 = vld [vmem:[%s14749_s25 + $0xe4] sm:$0xf] }
 0x3b2   : > { %12756 = vmatpush3.bf16.msra.mxu0 %v17475_v41  ;;  %12727 = vmatprep.mubr.msk.bf16.mxu0 %vm524_vm3, %v17718_v6  ;;  %v19751_v41 = vshrl.u32 %v19750_v56, 16  ;;  %v5218_v37 = vor.u32 %v5217_v52, %v5216_v16  ;;  %v11500_v15 = vcombine.low %v17796_v9, %v17793_v13  ;;  %v5239_v52 = vrot.slane %v19676_v45, 7 }
 0x3b3   : > { %12757 = vmatprep.subr.bf16.mxu0 %v14393_v34  ;;  %v5223_v16 = vor.u32 %v5222_v62, %v5221_v50  ;;  %v5227_v33 = vor.u32 %v5226_v14, %v5225_v54  ;;  %v19767_v50 = vld [vmem:[#allocation95_spill] sm:$0xff]  ;;  %v5252_v54 = vrot.slane %v19769_v44, 7  ;;  %v19771_v14 = vld [vmem:[#allocation102_spill] sm:$0xff] }
 0x3b4   : > { %v5208_v3 = vrot.slane %v19751_v41, 6  ;;  %v17804_v41 = vcombine.low %v5193_v24, %v5198_v19  ;;  %v5220_v23 = vrot.slane %v5218_v37, 4  ;;  %v19768_v62 = vshrl.u32 %v19767_v50, 16  ;;  %v19781_v44 = vld [vmem:[#allocation118_spill] sm:$0xff] }
 0x3b6   : > { %12758 = vmatpush3.bf16.msra.mxu0 %v14393_v34  ;;  %v17778_v34 = vld [vmem:[%s14749_s25 + $0xf0] sm:$0xf]  ;;  %v5210_v60 = vor.u32 %v5209_v25, %v5208_v3  ;;  %v5206_v3 = vsel %vm17301_vm4, %v5202_v29, %v5205_v30  ;;  %v5229_v25 = vrot.slane %v19672_v12, 6  ;;  %v5238_v30 = vrot.slane %v19675_v59, 6  ;;  %v19765_v29 = vld [vmem:[#allocation25_spill] sm:$0xff] }
 0x3b7   : > { %13252 = vmatmul.mubr.msk.bf16.gmra.mrb[52].mxu1 %vm524_vm3, %v19757_v21  ;;  %12791 = vmatprep.subr.bf16.mxu0 %v17757_v17  ;;  %v11501_v56 = vcombine.low %v17778_v34, %v17781_v10  ;;  %v19763_v21 = vld [vmem:[#allocation92_spill] sm:$0xff]  ;;  %v19766_v24 = vshrl.u32 %v19765_v29, 16  ;;  %v11502_v59 = vcombine.low %v17813_v28, %v17819_v48  ;;  %v5224_v4 = vsel %vm17301_vm4, %v5220_v23, %v5223_v16  ;;  %v19772_v16 = vld [vmem:[#allocation114_spill] sm:$0xff]  ;;  %v19775_v29 = vld [vmem:[#allocation79_spill] sm:$0xff] }
 0x3b8   : > { %13255 = vmatprep.mubr.msk.bf16.mxu1 %vm524_vm3, %v19758_v39  ;;  %v5211_v36 = vsel %vm17301_vm4, %v5207_v55, %v5210_v60  ;;  %v5242_v12 = vrot.slane %v19763_v21, 6  ;;  %v19764_v39 = vld [vmem:[#allocation93_spill] sm:$0xff]  ;;  %v5231_v20 = vor.u32 %v5230_v8, %v5229_v25  ;;  %v5235_v55 = vrot.slane %v19686_v7, 7 }
 0x3b9   : > { %12728 = vmatmul.mubr.msk.bf16.gmra.mrb[100].mxu0 %vm524_vm3, %v17750_v26  ;;  %v5243_v63 = vrot.slane %v19764_v39, 7  ;;  %v5234_v19 = vrot.slane %v19766_v24, 6  ;;  %v17835_v45 = vcombine.low %v5206_v3, %v5211_v36  ;;  %v5219_v60 = vsel %vm17301_vm4, %v5215_v42, %v5218_v37 }
 0x3ba   : > { %12731 = vmatprep.mubr.msk.bf16.mxu0 %vm524_vm3, %v17752_v11  ;;  %v5240_v32 = vor.u32 %v5239_v52, %v5238_v30  ;;  %v5248_v7 = vrot.slane %v19691_v49, 7  ;;  %v5255_v3 = vrot.slane %v19770_v5, 6  ;;  %v5256_v25 = vrot.slane %v19771_v14, 7  ;;  %v19773_v52 = vld [vmem:[#allocation115_spill] sm:$0xff]  ;;  %v19774_v49 = vld [vmem:[#allocation116_spill] sm:$0xff] }
 0x3bb   : > { %v5244_v40 = vor.u32 %v5243_v63, %v5242_v12  ;;  %v17848_v8 = vcombine.low %v5219_v60, %v5224_v4  ;;  %v5228_v37 = vrot.slane %v5227_v33, 4  ;;  %v5233_v36 = vrot.slane %v5231_v20, 4  ;;  %v19776_v60 = vld [vmem:[#allocation103_spill] sm:$0xff] }
 0x3bc   : > { %v5236_v42 = vor.u32 %v5235_v55, %v5234_v19  ;;  %v5264_v23 = vrot.slane %v19687_v27, 6  ;;  %v5265_v30 = vrot.slane %v19772_v16, 7  ;;  %v5268_v21 = vrot.slane %v19773_v52, 6  ;;  %v19778_v27 = vld [vmem:[#allocation104_spill] sm:$0xff] }
 0x3bd   : > { %v5269_v12 = vrot.slane %v19774_v49, 7  ;;  %v5246_v39 = vrot.slane %v5244_v40, 4  ;;  %v5257_v33 = vor.u32 %v5256_v25, %v5255_v3  ;;  %v19777_v19 = vshrl.u32 %v19776_v60, 16  ;;  %v19787_v60 = vld [vmem:[#allocation123_spill] sm:$0xff] }
 0x3be   : > { %v5261_v4 = vrot.slane %v19778_v27, 7  ;;  %v5232_v50 = vsel %vm17301_vm4, %v5228_v37, %v5231_v20 }
 0x3bf   : > { %13256 = vmatmul.mubr.msk.bf16.gmra.mrb[56].mxu1 %vm524_vm3, %v11500_v15  ;;  %v5247_v15 = vrot.slane %v19768_v62, 6  ;;  %v5260_v55 = vrot.slane %v19777_v19, 6  ;;  %v5270_v62 = vor.u32 %v5269_v12, %v5268_v21  ;;  %v5259_v25 = vrot.slane %v5257_v33, 4  ;;  %v19785_v21 = vld [vmem:[#allocation122_spill] sm:$0xff] }
 0x3c0   : > { %13259 = vmatprep.mubr.msk.bf16.mxu1 %vm524_vm3, %v11501_v56  ;;  %v5251_v56 = vrot.slane %v19681_v57, 6  ;;  %v5241_v57 = vrot.slane %v5240_v32, 4  ;;  %v5266_v32 = vor.u32 %v5265_v30, %v5264_v23  ;;  %v19783_v23 = vld [vmem:[#allocation120_spill] sm:$0xff]  ;;  %v19784_v30 = vld [vmem:[#allocation121_spill] sm:$0xff]  ;;  %v5282_v49 = vrot.slane %v19785_v21, 7 }
 0x3c1   : > { %12732 = vmatmul.mubr.msk.bf16.gmra.mrb[104].mxu0 %vm524_vm3, %v17800_v0  ;;  %v5249_v63 = vor.u32 %v5248_v7, %v5247_v15  ;;  %v19779_v15 = vld [vmem:[#allocation117_spill] sm:$0xff]  ;;  %v5262_v37 = vor.u32 %v5261_v4, %v5260_v55  ;;  %v5278_v16 = vrot.slane %v19783_v23, 7  ;;  %v5281_v52 = vrot.slane %v19784_v30, 6  ;;  %v19788_v55 = vld [vmem:[#allocation124_spill] sm:$0xff] }
 0x3c2   : > { %12735 = vmatprep.mubr.msk.bf16.mxu0 %vm524_vm3, %v17804_v41  ;;  %v5253_v24 = vor.u32 %v5252_v54, %v5251_v56  ;;  %v19780_v7 = vshrl.u32 %v19779_v15, 16  ;;  %v5274_v54 = vrot.slane %v19781_v44, 7  ;;  %v5245_v5 = vsel %vm17301_vm4, %v5241_v57, %v5244_v40  ;;  %v14396_v40 = vld [vmem:[%s18818_s3 + $0x1a8] sm:$0xff]  }
 0x3c3   : > { %v5250_v3 = vsel %vm17301_vm4, %v5246_v39, %v5249_v63  ;;  %v5267_v57 = vrot.slane %v5266_v32, 4  ;;  %v5272_v39 = vrot.slane %v5270_v62, 4  ;;  %v5290_v19 = vrot.slane %v19787_v60, 6  ;;  %v19789_v4 = vld [vmem:[#allocation125_spill] sm:$0xff] }
 0x3c4   : > { %v5273_v56 = vrot.slane %v19780_v7, 6  ;;  %v5254_v14 = vrot.slane %v5253_v24, 4  ;;  %v17884_v12 = vcombine.low %v5245_v5, %v5250_v3  ;;  %v19786_v24 = vld [vmem:[#allocation80_spill] sm:$0xff]  ;;  %v5291_v27 = vrot.slane %v19788_v55, 7  ;;  %v19791_v7 = vld [vmem:[#allocation87_spill] sm:$0xff] }
 0x3c5   : > { %v5263_v32 = vsel %vm17301_vm4, %v5259_v25, %v5262_v37  ;;  %v19792_v5 = vld [vmem:[#allocation127_spill] sm:$0xff]  ;;  %v5287_v23 = vrot.slane %v19710_v46, 7  ;;  %v19794_v37 = vld [vmem:[#allocation130_spill] sm:$0xff]  ;;  %v5300_v30 = vrot.slane %v19711_v35, 7 }
 0x3c6   : > { %v5275_v63 = vor.u32 %v5274_v54, %v5273_v56  ;;  %v5258_v44 = vsel %vm17301_vm4, %v5254_v14, %v5257_v33  ;;  %v5283_v54 = vor.u32 %v5282_v49, %v5281_v52  ;;  %v19793_v3 = vshrl.u32 %v19792_v5, 16 }
 0x3c7   : > { %13260 = vmatmul.mubr.msk.bf16.gmra.mrb[60].mxu1 %vm524_vm3, %v11502_v59  ;;  %v5237_v59 = vsel %vm17301_vm4, %v5233_v36, %v5236_v42  ;;  %v19782_v36 = vld [vmem:[#allocation119_spill] sm:$0xff]  ;;  %v5271_v33 = vsel %vm17301_vm4, %v5267_v57, %v5270_v62  ;;  %v5292_v14 = vor.u32 %v5291_v27, %v5290_v19  ;;  %v17913_v52 = vcombine.low %v5258_v44, %v5263_v32  ;;  %v19796_v19 = vld [vmem:[#allocation89_spill] sm:$0xff] }
 0x3c8   : > { %13267 = vmatprep.mubr.msk.bf16.mxu1 %vm524_vm3, %v19775_v29  ;;  %v17875_v20 = vcombine.low %v5232_v50, %v5237_v59  ;;  %v5277_v42 = vrot.slane %v19782_v36, 6  ;;  %v5294_v50 = vrot.slane %v19789_v4, 6  ;;  %v19790_v59 = vld [vmem:[#allocation126_spill] sm:$0xff]  ;;  %v5286_v36 = vrot.slane %v19793_v3, 6  ;;  %v19798_v4 = vld [vmem:[#allocation8_spill] sm:$0xff] }
 0x3c9   : > { %12736 = vmatmul.mubr.msk.bf16.gmra.mrb[108].mxu0 %vm524_vm3, %v17835_v45  ;;  %v5295_v15 = vrot.slane %v19790_v59, 7  ;;  %v5285_v49 = vrot.slane %v5283_v54, 4  ;;  %v5303_v62 = vrot.slane %v19705_v1, 6  ;;  %v5304_v57 = vrot.slane %v19706_v22, 7 }
 0x3ca   : > { %12739 = vmatprep.mubr.msk.bf16.mxu0 %vm524_vm3, %v17848_v8  ;;  %v5279_v56 = vor.u32 %v5278_v16, %v5277_v42  ;;  %v19795_v42 = vshrl.u32 %v19794_v37, 16  ;;  %v5288_v60 = vor.u32 %v5287_v23, %v5286_v36  ;;  %v5293_v35 = vrot.slane %v5292_v14, 4  ;;  %v19802_v23 = vld [vmem:[#allocation133_spill] sm:$0xff] }
 0x3cb   : > { %v5296_v25 = vor.u32 %v5295_v15, %v5294_v50  ;;  %v19799_v50 = vshrl.u32 %v19798_v4, 16  ;;  %v5313_v15 = vrot.slane %v19715_v58, 7  ;;  %v17961_v37 = vshrl.u32 %v17778_v34, 16 }
 0x3cc   : > { %v5299_v16 = vrot.slane %v19795_v42, 6  ;;  %v5280_v21 = vrot.slane %v5279_v56, 4  ;;  %v19807_v42 = vld [vmem:[#allocation147_spill] sm:$0xff]  ;;  %v9304_v4 = vshrl.u32 %v17819_v48, 16 }
 0x3cd   : > { %v5298_v55 = vrot.slane %v5296_v25, 4  ;;  %v5312_v59 = vrot.slane %v19799_v50, 6  ;;  %v5297_v44 = vsel %vm17301_vm4, %v5293_v35, %v5296_v25  ;;  %v19805_v25 = vld [vmem:[#allocation142_spill] sm:$0xff]  ;;  %19806 = vst [vmem:[#allocation182_spill] sm:$0xff] %v17961_v37  ;;  %v9307_v50 = vshll.u32 %v17819_v48, 16 }
 0x3ce   : > { %v5301_v27 = vor.u32 %v5300_v30, %v5299_v16  ;;  %v5284_v1 = vsel %vm17301_vm4, %v5280_v21, %v5283_v54  ;;  %v17966_v16 = vshll.u32 %v17778_v34, 16  ;;  %v17969_v30 = vshll.u32 %v17781_v10, 16 }
 0x3cf   : > { %13268 = vmatmul.mubr.msk.bf16.vlgmr.msra.gmra.mrb[32].mxu1 %vm524_vm3, %v19786_v24  ;;  %v5314_v36 = vor.u32 %v5313_v15, %v5312_v59  ;;  %v17972_v21 = vshrl.u32 %v17781_v10, 16  ;;  %v19815_v59 = vld [vmem:[#allocation176_spill] sm:$0xff] }
 0x3d0   : > { %13271 = vmatprep.mubr.msk.bf16.mxu1 %vm524_vm3, %v19791_v7  ;;  %13300 = vmatpush3.bf16.msra.mxu1 %v17611_v61  ;;  %v5276_v61 = vsel %vm17301_vm4, %v5272_v39, %v5275_v63  ;;  %v5307_v39 = vrot.slane %v19708_v51, 6  ;;  %v5308_v63 = vrot.slane %v19707_v31, 7  ;;  %v5289_v51 = vsel %vm17301_vm4, %v5285_v49, %v5288_v60  ;;  %19808 = vst [vmem:[#allocation110_spill] sm:$0xff] %v17966_v16  ;;  %v17977_v49 = vld [vmem:[%s14749_s25 + $0xf8] sm:$0x7]  ;;  %v19811_v60 = vld [vmem:[#allocation170_spill] sm:$0xff] }
 0x3d1   : > { %12740 = vmatmul.mubr.msk.bf16.gmra.mrb[112].mxu0 %vm524_vm3, %v17875_v20  ;;  %13301 = vmatprep.subr.bf16.mxu1 %v14396_v40  ;;  %v17915_v46 = vcombine.low %v5271_v33, %v5276_v61  ;;  %v5305_v31 = vor.u32 %v5304_v57, %v5303_v62  ;;  %v5302_v32 = vsel %vm17301_vm4, %v5298_v55, %v5301_v27  ;;  %v19803_v33 = vld [vmem:[#allocation139_spill] sm:$0xff]  ;;  %v17982_v62 = vshll.u32 %v17977_v49, 16 }
 0x3d2   : > { %12743 = vmatprep.mubr.msk.bf16.mxu0 %vm524_vm3, %v17884_v12  ;;  %v5309_v22 = vor.u32 %v5308_v63, %v5307_v39  ;;  %v17940_v56 = vcombine.low %v5284_v1, %v5289_v51  ;;  %v17942_v54 = vcombine.low %v5297_v44, %v5302_v32  ;;  %19809 = vst [vmem:[#allocation17_spill] sm:$0xff] %v17969_v30  ;;  %19810 = vst [vmem:[#allocation113_spill] sm:$0xff] %v17972_v21  ;;  %v19813_v51 = vld [vmem:[#allocation148_spill] sm:$0xff] }
 0x3d3   : > { %v5306_v5 = vrot.slane %v5305_v31, 4  ;;  %19812 = vst [vmem:[#allocation15_spill] sm:$0xff] %v17982_v62  ;;  %v6581_v57 = vrot.slane %v17961_v37, 5  ;;  %v6582_v39 = vrot.slane %v17966_v16, 6  ;;  %v6585_v63 = vrot.slane %v17972_v21, 5  ;;  %v14397_v31 = vld [vmem:[%s18818_s3 + $0xd8] sm:$0xff]  }
 0x3d4   : > { %13302 = vmatpush3.bf16.msra.mxu1 %v14396_v40  ;;  %v19797_v40 = vld [vmem:[#allocation101_spill] sm:$0xff]  ;;  %19800 = vst [vmem:[#allocation107_spill] sm:$0xff] %v17940_v56  ;;  %19801 = vst [vmem:[#allocation108_spill] sm:$0xff] %v17942_v54  ;;  %v5311_v3 = vrot.slane %v5309_v22, 4  ;;  %v6586_v35 = vrot.slane %v17969_v30, 6  ;;  %v19204_v55 = vshrl.u32 %v17977_v49, 16 }
 0x3d5   : > { %v5310_v58 = vsel %vm17301_vm4, %v5306_v5, %v5309_v22  ;;  %v9295_v27 = vshrl.u32 %v17813_v28, 16  ;;  %v9298_v1 = vshll.u32 %v17813_v28, 16  ;;  %v19814_v22 = vld [vmem:[#allocation150_spill] sm:$0xff]  ;;  %v6583_v15 = vor.u32 %v6582_v39, %v6581_v57  ;;  %v19819_v30 = vld [vmem:[#allocation172_spill] sm:$0xff]  ;;  %v19830_v16 = vld [vmem:[#allocation135_spill] sm:$0xff] }
 0x3d6   : > { %v5315_v61 = vsel %vm17301_vm4, %v5311_v3, %v5314_v36  ;;  %v6587_v44 = vor.u32 %v6586_v35, %v6585_v63  ;;  %v6592_v32 = vrot.slane %v19204_v55, 5  ;;  %v6593_v5 = vrot.slane %v17982_v62, 6  ;;  %v18006_v3 = vld [vmem:[%s14749_s25 + $0x104] sm:$0x7]  ;;  %v19816_v36 = vld [vmem:[#allocation177_spill] sm:$0xff]  ;;  %v19817_v62 = vld [vmem:[#allocation151_spill] sm:$0xff] }
 0x3d7   : > { %13272 = vmatmul.mubr.msk.bf16.gmra.mrb[36].mxu1 %vm524_vm3, %v19796_v19  ;;  %v17956_v14 = vcombine.low %v5310_v58, %v5315_v61  ;;  %v9297_v58 = vrot.slane %v9295_v27, 5  ;;  %v9300_v61 = vrot.slane %v9298_v1, 6  ;;  %v9306_v57 = vrot.slane %v9304_v4, 5  ;;  %v19818_v27 = vld [vmem:[#allocation152_spill] sm:$0xff] }
 0x3d8   : > { %13275 = vmatprep.mubr.msk.bf16.mxu1 %vm524_vm3, %v19797_v40  ;;  %v9309_v39 = vrot.slane %v9307_v50, 6  ;;  %v9314_v63 = vshrl.u32 %v18006_v3, 16  ;;  %v9317_v35 = vshll.u32 %v18006_v3, 16  ;;  %v6589_v55 = vrot.slane %v6587_v44, 4 }
 0x3d9   : > { %12744 = vmatmul.mubr.msk.bf16.gmra.mrb[116].mxu0 %vm524_vm3, %v17913_v52  ;;  %19804 = vst [vmem:[#allocation109_spill] sm:$0xff] %v17956_v14  ;;  %v9301_v1 = vor.u32 %v9300_v61, %v9297_v58  ;;  %v19823_v61 = vld [vmem:[#allocation77_spill] sm:$0xff] }
 0x3da   : > { %12747 = vmatprep.mubr.msk.bf16.mxu0 %vm524_vm3, %v17915_v46  ;;  %v9310_v21 = vor.u32 %v9309_v39, %v9306_v57  ;;  %v9316_v4 = vrot.slane %v9314_v63, 5  ;;  %v9319_v50 = vrot.slane %v9317_v35, 6  ;;  %v19824_v57 = vld [vmem:[#allocation179_spill] sm:$0xff]  ;;  %v19825_v39 = vld [vmem:[#allocation153_spill] sm:$0xff] }
 0x3db   : > { %v9302_v37 = vrot.slane %v9301_v1, 4  ;;  %v19826_v35 = vld [vmem:[#allocation189_spill] sm:$0xff] }
 0x3dc   : > { %v9320_v58 = vor.u32 %v9319_v50, %v9316_v4  ;;  %v19832_v4 = vld [vmem:[#allocation138_spill] sm:$0xff] }
 0x3dd   : > { %v5626_v50 = vrot.slane %v19832_v4, 5 }
 0x3df   : > { %13276 = vmatmul.mubr.msk.bf16.gmra.mrb[40].mxu1 %vm524_vm3, %v19802_v23 }
 0x3e0   : > { %13279 = vmatprep.mubr.msk.bf16.mxu1 %vm524_vm3, %v19803_v33 }
 0x3e1   : > { %12748 = vmatmul.mubr.msk.bf16.gmra.mrb[120].mxu0 %vm524_vm3, %v17940_v56  ;;  %v19844_v56 = vld [vmem:[#allocation194_spill] sm:$0xff] }
 0x3e2   : > { %12751 = vmatprep.mubr.msk.bf16.mxu0 %vm524_vm3, %v17942_v54  ;;  %v19843_v54 = vld [vmem:[#allocation149_spill] sm:$0xff] }
 0x3e7   : > { %13280 = vmatmul.mubr.msk.bf16.gmra.mrb[44].mxu1 %vm524_vm3, %v19805_v25 }
 0x3e8   : > { %13283 = vmatprep.mubr.msk.bf16.mxu1 %vm524_vm3, %v19807_v42 }
 0x3e9   : > { %12752 = vmatmul.mubr.msk.bf16.gmra.mrb[124].mxu0 %vm524_vm3, %v17956_v14  ;;  %v19841_v14 = vld [vmem:[#allocation193_spill] sm:$0xff] }
 0x3ea   : > { %12759 = vmatprep.mubr.msk.bf16.mxu0 %vm524_vm3, %v19811_v60  ;;  %v18014_v60 = vld [vmem:[%s18818_s3 + $0xe0] sm:$0xff]  }
 0x3ef   : > { %13284 = vmatmul.mubr.msk.bf16.gmra.mrb[48].mxu1 %vm524_vm3, %v19813_v51 }
 0x3f0   : > { %13287 = vmatprep.mubr.msk.bf16.mxu1 %vm524_vm3, %v19814_v22 }
 0x3f1   : > { %12760 = vmatmul.mubr.msk.bf16.vlgmr.msra.gmra.mrb[96].mxu0 %vm524_vm3, %v19815_v59  ;;  %v6584_v59 = vrot.slane %v6583_v15, 4 }
 0x3f2   : > { %12792 = vmatpush3.bf16.msra.mxu0 %v17757_v17  ;;  %12763 = vmatprep.mubr.msk.bf16.mxu0 %vm524_vm3, %v19816_v36  ;;  %v6594_v17 = vor.u32 %v6593_v5, %v6592_v32  ;;  %v19821_v32 = vld [vmem:[#allocation174_spill] sm:$0xff]  ;;  %v9312_v36 = vrot.slane %v9310_v21, 4 }
 0x3f3   : > { %12793 = vmatprep.subr.bf16.mxu0 %v14397_v31  ;;  %v6588_v15 = vsel %vm15407_vm9, %v6584_v59, %v6587_v44  ;;  %v9311_v44 = vsel %vm15407_vm9, %v9302_v37, %v9310_v21  ;;  %v19827_v59 = vld [vmem:[#allocation158_spill] sm:$0xff]  ;;  %v5622_v21 = vrot.slane %v19830_v16, 4 }
 0x3f4   : > { %v19829_v37 = vld [vmem:[#allocation190_spill] sm:$0xff] }
 0x3f6   : > { %12794 = vmatpush3.bf16.msra.mxu0 %v14397_v31  ;;  %v6595_v31 = vsel %vm15407_vm9, %v6589_v55, %v6594_v17  ;;  %v9321_v55 = vsel %vm15407_vm9, %v9312_v36, %v9320_v58  ;;  %v19828_v17 = vld [vmem:[#allocation159_spill] sm:$0xff]  ;;  %v19831_v36 = vld [vmem:[#allocation136_spill] sm:$0xff] }
 0x3f7   : > { %13288 = vmatmul.mubr.msk.bf16.gmra.mrb[52].mxu1 %vm524_vm3, %v19817_v62  ;;  %12827 = vmatprep.subr.bf16.mxu0 %v18014_v60  ;;  %v18031_v5 = vcombine.low %v6588_v15, %v6595_v31  ;;  %v11525_v63 = vcombine.low %v9311_v44, %v9321_v55  ;;  %v5623_v1 = vrot.slane %v19831_v36, 5  ;;  %v19833_v15 = vld [vmem:[#allocation137_spill] sm:$0xff]  ;;  %v19834_v58 = vld [vmem:[#allocation191_spill] sm:$0xff] }
 0x3f8   : > { %13291 = vmatprep.mubr.msk.bf16.mxu1 %vm524_vm3, %v19818_v27  ;;  %v5628_v31 = vrot.slane %v19833_v15, 4 }
 0x3f9   : > { %12764 = vmatmul.mubr.msk.bf16.gmra.mrb[100].mxu0 %vm524_vm3, %v19819_v30  ;;  %19822 = vst [vmem:[#allocation28_spill] sm:$0xff] %v18031_v5  ;;  %v5624_v44 = vor.u32 %v5623_v1, %v5622_v21  ;;  %v19840_v30 = vld [vmem:[#allocation141_spill] sm:$0xff] }
 0x3fa   : > { %12767 = vmatprep.mubr.msk.bf16.mxu0 %vm524_vm3, %v19821_v32  ;;  %v5629_v55 = vor.u32 %v5628_v31, %v5626_v50 }
 0x3fc   : > { %v5630_v32 = vrot.slane %v5629_v55, 4 }
 0x3ff   : > { %13292 = vmatmul.mubr.msk.bf16.gmra.mrb[56].mxu1 %vm524_vm3, %v19823_v61  ;;  %v19837_v61 = vld [vmem:[#allocation146_spill] sm:$0xff] }
 0x400   : > { %13295 = vmatprep.mubr.msk.bf16.mxu1 %vm524_vm3, %v18031_v5 }
 0x401   : > { %12768 = vmatmul.mubr.msk.bf16.gmra.mrb[104].mxu0 %vm524_vm3, %v19824_v57  ;;  %v19839_v57 = vld [vmem:[#allocation192_spill] sm:$0xff] }
 0x402   : > { %12771 = vmatprep.mubr.msk.bf16.mxu0 %vm524_vm3, %v19825_v39 }
 0x407   : > { %13296 = vmatmul.mubr.msk.bf16.gmra.mrb[60].mxu1 %vm524_vm3, %v11525_v63  ;;  %v19835_v63 = vld [vmem:[#allocation143_spill] sm:$0xff] }
 0x408   : > { %13303 = vmatprep.mubr.msk.bf16.mxu1 %vm524_vm3, %v19826_v35  ;;  %v5633_v35 = vrot.slane %v19835_v63, 4 }
 0x409   : > { %12772 = vmatmul.mubr.msk.bf16.gmra.mrb[108].mxu0 %vm524_vm3, %v19827_v59  ;;  %v19838_v59 = vld [vmem:[#allocation145_spill] sm:$0xff] }
 0x40a   : > { %12775 = vmatprep.mubr.msk.bf16.mxu0 %vm524_vm3, %v19828_v17  ;;  %v5637_v17 = vrot.slane %v19837_v61, 5  ;;  %v5639_v39 = vrot.slane %v19838_v59, 4 }
 0x40c   : > { %v5640_v1 = vor.u32 %v5639_v39, %v5637_v17  ;;  %v19849_v39 = vld [vmem:[#allocation163_spill] sm:$0xff] }
 0x40e   : > { %v5641_v53 = vrot.slane %v5640_v1, 4  ;;  %v14400_v1 = vld [vmem:[%s18818_s3 + $0xf0] sm:$0xff]  }
 0x40f   : > { %13304 = vmatmul.mubr.msk.bf16.vlgmr.msra.gmra.mrb[32].mxu1 %vm524_vm3, %v19829_v37  ;;  %v19836_v37 = vld [vmem:[#allocation144_spill] sm:$0xff] }
 0x410   : > { %13307 = vmatprep.mubr.msk.bf16.mxu1 %vm524_vm3, %v19834_v58  ;;  %v5634_v5 = vrot.slane %v19836_v37, 5  ;;  %v5625_v58 = vrot.slane %v5624_v44, 4 }
 0x411   : > { %12776 = vmatmul.mubr.msk.bf16.gmra.mrb[112].mxu0 %vm524_vm3, %v17619_v43  ;;  %v5631_v43 = vrot.slane %v19840_v30, 5 }
 0x412   : > { %12779 = vmatprep.mubr.msk.bf16.mxu0 %vm524_vm3, %v17625_v18  ;;  %v5635_v21 = vor.u32 %v5634_v5, %v5633_v35  ;;  %v5627_v18 = vsel %vm17168_vm0, %v5625_v58, %v5626_v50  ;;  %v19846_v5 = vld [vmem:[#allocation196_spill] sm:$0xff]  ;;  %v9542_v50 = vrot.slane %v17793_v13, 7  ;;  %v19851_v35 = vld [vmem:[#allocation105_spill] sm:$0xff]  ;;  %v9549_v58 = vrot.slane %v17781_v10, 7 }
 0x413   : > { %v9552_v10 = vrot.slane %v17977_v49, 7 }
 0x414   : > { %v5636_v55 = vrot.slane %v5635_v21, 4  ;;  %v19852_v21 = vld [vmem:[#allocation106_spill] sm:$0xff] }
 0x417   : > { %13308 = vmatmul.mubr.msk.bf16.gmra.mrb[36].mxu1 %vm524_vm3, %v19839_v57  ;;  %v5632_v57 = vsel %vm17168_vm0, %v5630_v32, %v5631_v43 }
 0x418   : > { %13311 = vmatprep.mubr.msk.bf16.mxu1 %vm524_vm3, %v19841_v14  ;;  %v18081_v44 = vcombine.low %v5627_v18, %v5632_v57  ;;  %v5642_v14 = vrot.slane %v19843_v54, 5  ;;  %v5638_v18 = vsel %vm17168_vm0, %v5636_v55, %v5637_v17  ;;  %v19850_v17 = vld [vmem:[#allocation171_spill] sm:$0xff]  ;;  %v11544_v57 = vrot.slane %v17796_v9, 11 }
 0x419   : > { %12780 = vmatmul.mubr.msk.bf16.gmra.mrb[116].mxu0 %vm524_vm3, %v17653_v38  ;;  %v19845_v38 = vld [vmem:[#allocation195_spill] sm:$0xff]  ;;  %v9544_v55 = vrot.slane %v9542_v50, 4 }
 0x41a   : > { %12783 = vmatprep.mubr.msk.bf16.mxu0 %vm524_vm3, %v17660_v2  ;;  %v5643_v43 = vsel %vm17168_vm0, %v5641_v53, %v5642_v14  ;;  %v14399_v53 = vld [vmem:[%s18818_s3 + $0xe8] sm:$0xff]  }
 0x41b   : > { %v18096_v32 = vcombine.low %v5638_v18, %v5643_v43  ;;  %v14498_v14 = vld [vmem:[%s14749_s25 + $0xec] sm:$0x7]  ;;  %v11545_v18 = vrot.slane %v17778_v34, 11  ;;  %v9551_v43 = vrot.slane %v9549_v58, 4  ;;  %s11614_s25 = sshll.u32 %s14679_s17, 12 }
 0x41c   : > { %v9545_v13 = vrot.slane %v14498_v14, 7  ;;  %v14402_v14 = vld [vmem:[%s18818_s3 + $0x100] sm:$0xff]   ;;  %s18740_s29 = scalar_lea.hbm %s18825_s10, %s11614_s25 }
 0x41d   : > { %v9550_v34 = vsel %vm16811_vm12, %v11545_v18, %v9549_v58 }
 0x41e   : > { %v9546_v9 = vsel %vm16811_vm12, %v9544_v55, %v9545_v13  ;;  %v9559_v55 = vrot.slane %v18006_v3, 7  ;;  %v14401_v3 = vld [vmem:[%s18818_s3 + $0xf8] sm:$0xff]   ;;  %v6081_v13 = vrot.slane %v19832_v4, 7  ;;  %v6094_v4 = vrot.slane %v19837_v61, 7 }
 0x41f   : > { %13312 = vmatmul.mubr.msk.bf16.gmra.mrb[40].mxu1 %vm524_vm3, %v19844_v56  ;;  %v19847_v56 = vld [vmem:[#allocation197_spill] sm:$0xff] }
 0x420   : > { %13315 = vmatprep.mubr.msk.bf16.mxu1 %vm524_vm3, %v19845_v38  ;;  %v19848_v38 = vld [vmem:[#allocation38_spill] sm:$0xff] }
 0x421   : > { %12784 = vmatmul.mubr.msk.bf16.gmra.mrb[120].mxu0 %vm524_vm3, %v17689_v47 }
 0x422   : > { %12787 = vmatprep.mubr.msk.bf16.mxu0 %vm524_vm3, %v18081_v44 }
 0x427   : > { %13316 = vmatmul.mubr.msk.bf16.gmra.mrb[44].mxu1 %vm524_vm3, %v19846_v5  ;;  %v19854_v5 = vld [vmem:[#allocation178_spill] sm:$0xff] }
 0x428   : > { %13319 = vmatprep.mubr.msk.bf16.mxu1 %vm524_vm3, %v19847_v56  ;;  %v6086_v56 = vrot.slane %v19840_v30, 7  ;;  %v19860_v30 = vld [vmem:[#allocation94_spill] sm:$0xff] }
 0x429   : > { %12788 = vmatmul.mubr.msk.bf16.gmra.mrb[124].mxu0 %vm524_vm3, %v18096_v32 }
 0x42a   : > { %12795 = vmatprep.mubr.msk.bf16.mxu0 %vm524_vm3, %v19848_v38  ;;  %v9543_v38 = vsel %vm16811_vm12, %v11544_v57, %v9542_v50  ;;  %v11546_v50 = vrot.slane %v17813_v28, 11 }
 0x42f   : > { %13320 = vmatmul.mubr.msk.bf16.gmra.mrb[48].mxu1 %vm524_vm3, %v19849_v39  ;;  %v9556_v39 = vrot.slane %v17819_v48, 7 }
 0x430   : > { %13323 = vmatprep.mubr.msk.bf16.mxu1 %vm524_vm3, %v19850_v17  ;;  %v11551_v17 = vcombine.low %v9543_v38, %v9546_v9 }
 0x431   : > { %12796 = vmatmul.mubr.msk.bf16.vlgmr.msra.gmra.mrb[96].mxu0 %vm524_vm3, %v19851_v35  ;;  %v9558_v57 = vrot.slane %v9556_v39, 4  ;;  %v9557_v48 = vsel %vm16811_vm12, %v11546_v50, %v9556_v39  ;;  %v19861_v50 = vshrl.u32 %v19860_v30, 16 }
 0x432   : > { %12828 = vmatpush3.bf16.msra.mxu0 %v18014_v60  ;;  %12799 = vmatprep.mubr.msk.bf16.mxu0 %vm524_vm3, %v19852_v21  ;;  %v19853_v60 = vld [vmem:[#allocation173_spill] sm:$0xff] }
 0x433   : > { %12829 = vmatprep.subr.bf16.mxu0 %v14399_v53  ;;  %v9560_v58 = vsel %vm16811_vm12, %v9558_v57, %v9559_v55 }
 0x434   : > { %v11553_v28 = vcombine.low %v9557_v48, %v9560_v58 }
 0x436   : > { %12830 = vmatpush3.bf16.msra.mxu0 %v14399_v53  ;;  %v9553_v53 = vsel %vm16811_vm12, %v9551_v43, %v9552_v10  ;;  %v19856_v10 = vld [vmem:[#allocation140_spill] sm:$0xff] }
 0x437   : > { %13324 = vmatmul.mubr.msk.bf16.gmra.mrb[52].mxu1 %vm524_vm3, %v19853_v60  ;;  %12863 = vmatprep.subr.bf16.mxu0 %v14400_v1  ;;  %v11552_v35 = vcombine.low %v9550_v34, %v9553_v53  ;;  %v19857_v60 = vshrl.u32 %v19856_v10, 16  ;;  %v19858_v34 = vld [vmem:[#allocation107_spill] sm:$0xff]  ;;  %v19859_v53 = vld [vmem:[#allocation108_spill] sm:$0xff]  ;;  %v18251_v10 = vld [vmem:[%s18818_s3 + $0x110] sm:$0xff]  }
 0x438   : > { %13327 = vmatprep.mubr.msk.bf16.mxu1 %vm524_vm3, %v19854_v5 }
 0x439   : > { %12800 = vmatmul.mubr.msk.bf16.gmra.mrb[100].mxu0 %vm524_vm3, %v19775_v29  ;;  %v6085_v5 = vrot.slane %v19857_v60, 6  ;;  %v19867_v60 = vld [vmem:[#allocation179_spill] sm:$0xff] }
 0x43a   : > { %12803 = vmatprep.mubr.msk.bf16.mxu0 %vm524_vm3, %v19786_v24 }
 0x43b   : > { %v6087_v39 = vor.u32 %v6086_v56, %v6085_v5  ;;  %v19868_v5 = vld [vmem:[#allocation153_spill] sm:$0xff]  ;;  %v19869_v56 = vld [vmem:[#allocation158_spill] sm:$0xff] }
 0x43f   : > { %13328 = vmatmul.mubr.msk.bf16.gmra.mrb[56].mxu1 %vm524_vm3, %v11551_v17 }
 0x440   : > { %13331 = vmatprep.mubr.msk.bf16.mxu1 %vm524_vm3, %v11552_v35 }
 0x441   : > { %12804 = vmatmul.mubr.msk.bf16.gmra.mrb[104].mxu0 %vm524_vm3, %v19791_v7 }
 0x442   : > { %12807 = vmatprep.mubr.msk.bf16.mxu0 %vm524_vm3, %v19796_v19 }
 0x447   : > { %13332 = vmatmul.mubr.msk.bf16.gmra.mrb[60].mxu1 %vm524_vm3, %v11553_v28 }
 0x449   : > { %12808 = vmatmul.mubr.msk.bf16.gmra.mrb[108].mxu0 %vm524_vm3, %v19797_v40 }
 0x44a   : > { %12811 = vmatprep.mubr.msk.bf16.mxu0 %vm524_vm3, %v19802_v23 }
 0x451   : > { %12812 = vmatmul.mubr.msk.bf16.gmra.mrb[112].mxu0 %vm524_vm3, %v19803_v33 }
 0x452   : > { %12815 = vmatprep.mubr.msk.bf16.mxu0 %vm524_vm3, %v19805_v25 }
 0x459   : > { %12816 = vmatmul.mubr.msk.bf16.gmra.mrb[116].mxu0 %vm524_vm3, %v19807_v42 }
 0x45a   : > { %12819 = vmatprep.mubr.msk.bf16.mxu0 %vm524_vm3, %v19813_v51 }
 0x461   : > { %12820 = vmatmul.mubr.msk.bf16.gmra.mrb[120].mxu0 %vm524_vm3, %v19814_v22 }
 0x462   : > { %12823 = vmatprep.mubr.msk.bf16.mxu0 %vm524_vm3, %v19817_v62 }
 0x469   : > { %12824 = vmatmul.mubr.msk.bf16.gmra.mrb[124].mxu0 %vm524_vm3, %v19818_v27 }
 0x46a   : > { %12831 = vmatprep.mubr.msk.bf16.mxu0 %vm524_vm3, %v17718_v6  ;;  %v6076_v6 = vrot.slane %v19830_v16, 6  ;;  %v6089_v16 = vrot.slane %v19835_v63, 6  ;;  %v6098_v63 = vrot.slane %v19861_v50, 6  ;;  %v19877_v50 = vld [vmem:[#allocation181_spill] sm:$0xff] }
 0x471   : > { %12832 = vmatmul.mubr.msk.bf16.vlgmr.msra.gmra.mrb[96].mxu0 %vm524_vm3, %v17750_v26  ;;  %v6077_v26 = vrot.slane %v19831_v36, 7  ;;  %v6090_v36 = vrot.slane %v19836_v37, 7  ;;  %v6099_v37 = vrot.slane %v19843_v54, 7 }
 0x472   : > { %12864 = vmatpush3.bf16.msra.mxu0 %v14400_v1  ;;  %12835 = vmatprep.mubr.msk.bf16.mxu0 %vm524_vm3, %v17752_v11  ;;  %v6080_v1 = vrot.slane %v19833_v15, 6  ;;  %v6093_v15 = vrot.slane %v19838_v59, 6 }
 0x473   : > { %12865 = vmatprep.subr.bf16.mxu0 %v14401_v3  ;;  %v6078_v18 = vor.u32 %v6077_v26, %v6076_v6  ;;  %v6091_v17 = vor.u32 %v6090_v36, %v6089_v16  ;;  %v6100_v28 = vor.u32 %v6099_v37, %v6098_v63  ;;  %v19871_v16 = vld [vmem:[#allocation160_spill] sm:$0xff] }
 0x474   : > { %v6082_v43 = vor.u32 %v6081_v13, %v6080_v1  ;;  %v6095_v35 = vor.u32 %v6094_v4, %v6093_v15  ;;  %v19864_v1 = vld [vmem:[#allocation177_spill] sm:$0xff]  ;;  %v19872_v36 = vld [vmem:[#allocation180_spill] sm:$0xff]  ;;  %v19873_v15 = vld [vmem:[#allocation19_spill] sm:$0xff] }
 0x475   : > { %v6079_v38 = vrot.slane %v6078_v18, 4  ;;  %v6092_v48 = vrot.slane %v6091_v17, 4  ;;  %v14403_v13 = vld [vmem:[%s18818_s3 + $0x108] sm:$0xff]   ;;  %v19865_v18 = vld [vmem:[#allocation172_spill] sm:$0xff]  ;;  %v6324_v4 = vrot.slane %v19873_v15, 4 }
 0x476   : > { %12866 = vmatpush3.bf16.msra.mxu0 %v14401_v3  ;;  %v6084_v9 = vrot.slane %v6082_v43, 4  ;;  %v6097_v58 = vrot.slane %v6095_v35, 4  ;;  %v19863_v3 = vld [vmem:[#allocation109_spill] sm:$0xff] }
 0x477   : > { %12899 = vmatprep.subr.bf16.mxu0 %v14402_v14  ;;  %v6083_v59 = vsel %vm17301_vm4, %v6079_v38, %v6082_v43  ;;  %v6096_v54 = vsel %vm17301_vm4, %v6092_v48, %v6095_v35  ;;  %v19866_v43 = vld [vmem:[#allocation174_spill] sm:$0xff]  ;;  %v19874_v38 = vld [vmem:[#allocation21_spill] sm:$0xff]  ;;  %v19876_v35 = vld [vmem:[#allocation23_spill] sm:$0xff] }
 0x478   : > { %v6088_v61 = vsel %vm17301_vm4, %v6084_v9, %v6087_v39  ;;  %v6101_v6 = vsel %vm17301_vm4, %v6097_v58, %v6100_v28  ;;  %v6325_v9 = vrot.slane %v19874_v38, 5  ;;  %v19875_v39 = vld [vmem:[#allocation24_spill] sm:$0xff]  ;;  %v6330_v30 = vrot.slane %v19876_v35, 4  ;;  %v19879_v48 = vld [vmem:[#allocation110_spill] sm:$0xff]  ;;  %v19880_v28 = vld [vmem:[#allocation17_spill] sm:$0xff] }
 0x479   : > { %12836 = vmatmul.mubr.msk.bf16.gmra.mrb[100].mxu0 %vm524_vm3, %v17800_v0  ;;  %v18225_v55 = vcombine.low %v6083_v59, %v6088_v61  ;;  %v18235_v26 = vcombine.low %v6096_v54, %v6101_v6  ;;  %v6328_v17 = vrot.slane %v19875_v39, 5  ;;  %v19878_v59 = vld [vmem:[#allocation182_spill] sm:$0xff]  ;;  %v6341_v58 = vrot.slane %v19879_v48, 5  ;;  %v19881_v6 = vld [vmem:[#allocation113_spill] sm:$0xff] }
 0x47a   : > { %12839 = vmatprep.mubr.msk.bf16.mxu0 %vm524_vm3, %v17804_v41  ;;  %v6326_v63 = vor.u32 %v6325_v9, %v6324_v4  ;;  %v6338_v61 = vrot.slane %v19878_v59, 4  ;;  %v6347_v54 = vrot.slane %v19880_v28, 5  ;;  %v19883_v9 = vld [vmem:[#allocation15_spill] sm:$0xff] }
 0x47b   : > { %v6331_v37 = vor.u32 %v6330_v30, %v6328_v17  ;;  %v6357_v30 = vrot.slane %v19883_v9, 5 }
 0x481   : > { %12840 = vmatmul.mubr.msk.bf16.gmra.mrb[104].mxu0 %vm524_vm3, %v17835_v45 }
 0x482   : > { %12843 = vmatprep.mubr.msk.bf16.mxu0 %vm524_vm3, %v17848_v8 }
 0x489   : > { %12844 = vmatmul.mubr.msk.bf16.gmra.mrb[108].mxu0 %vm524_vm3, %v17875_v20 }
 0x48a   : > { %12847 = vmatprep.mubr.msk.bf16.mxu0 %vm524_vm3, %v17884_v12 }
 0x491   : > { %12848 = vmatmul.mubr.msk.bf16.gmra.mrb[112].mxu0 %vm524_vm3, %v17913_v52 }
 0x492   : > { %12851 = vmatprep.mubr.msk.bf16.mxu0 %vm524_vm3, %v17915_v46 }
 0x499   : > { %12852 = vmatmul.mubr.msk.bf16.gmra.mrb[116].mxu0 %vm524_vm3, %v19858_v34 }
 0x49a   : > { %12855 = vmatprep.mubr.msk.bf16.mxu0 %vm524_vm3, %v19859_v53 }
 0x4a1   : > { %12856 = vmatmul.mubr.msk.bf16.gmra.mrb[120].mxu0 %vm524_vm3, %v19863_v3 }
 0x4a2   : > { %12859 = vmatprep.mubr.msk.bf16.mxu0 %vm524_vm3, %v18225_v55 }
 0x4a9   : > { %12860 = vmatmul.mubr.msk.bf16.gmra.mrb[124].mxu0 %vm524_vm3, %v18235_v26 }
 0x4aa   : > { %12867 = vmatprep.mubr.msk.bf16.mxu0 %vm524_vm3, %v19864_v1  ;;  %v6351_v1 = vrot.slane %v19881_v6, 4 }
 0x4b1   : > { %12868 = vmatmul.mubr.msk.bf16.vlgmr.msra.gmra.mrb[96].mxu0 %vm524_vm3, %v19865_v18  ;;  %v6332_v18 = vrot.slane %v6331_v37, 4 }
 0x4b2   : > { %12900 = vmatpush3.bf16.msra.mxu0 %v14402_v14  ;;  %12871 = vmatprep.mubr.msk.bf16.mxu0 %vm524_vm3, %v19866_v43  ;;  %v19870_v14 = vld [vmem:[#allocation159_spill] sm:$0xff]  ;;  %v19882_v43 = vld [vmem:[#allocation36_spill] sm:$0xff] }
 0x4b3   : > { %12901 = vmatprep.subr.bf16.mxu0 %v14403_v13 }
 0x4b6   : > { %12902 = vmatpush3.bf16.msra.mxu0 %v14403_v13  ;;  %v6327_v13 = vrot.slane %v6326_v63, 4 }
 0x4b7   : > { %12935 = vmatprep.subr.bf16.mxu0 %v18251_v10 }
 0x4b9   : > { %12872 = vmatmul.mubr.msk.bf16.gmra.mrb[100].mxu0 %vm524_vm3, %v19867_v60  ;;  %v6333_v60 = vrot.slane %v19882_v43, 5 }
 0x4ba   : > { %12875 = vmatprep.mubr.msk.bf16.mxu0 %vm524_vm3, %v19868_v5  ;;  %v6352_v5 = vor.u32 %v6351_v1, %v6347_v54 }
 0x4bc   : > { %v6353_v4 = vrot.slane %v6352_v5, 4 }
 0x4be   : > { %v6358_v63 = vsel %vm17168_vm0, %v6353_v4, %v6357_v30 }
 0x4c1   : > { %12876 = vmatmul.mubr.msk.bf16.gmra.mrb[104].mxu0 %vm524_vm3, %v19869_v56  ;;  %v6329_v56 = vsel %vm17168_vm0, %v6327_v13, %v6328_v17  ;;  %v18298_v17 = vld [vmem:[%s18822_s7 + $0x3] ss:$0 sm:$0xff] }
 0x4c2   : > { %12879 = vmatprep.mubr.msk.bf16.mxu0 %vm524_vm3, %v19870_v14  ;;  %v6334_v14 = vsel %vm17168_vm0, %v6332_v18, %v6333_v60 }
 0x4c9   : > { %12880 = vmatmul.mubr.msk.bf16.gmra.mrb[108].mxu0 %vm524_vm3, %v19871_v16  ;;  %v11215_v16 = vcombine.low %v6329_v56, %v6334_v14 }
 0x4ca   : > { %12883 = vmatprep.mubr.msk.bf16.mxu0 %vm524_vm3, %v19872_v36 }
 0x4d1   : > { %12884 = vmatmul.mubr.msk.bf16.gmra.mrb[112].mxu0 %vm524_vm3, %v19877_v50 }
 0x4d2   : > { %12887 = vmatprep.mubr.msk.bf16.mxu0 %vm524_vm3, %v17660_v2  ;;  %v6342_v2 = vor.u32 %v6341_v58, %v6338_v61 }
 0x4d4   : > { %v6343_v36 = vrot.slane %v6342_v2, 4 }
 0x4d6   : > { %v6348_v50 = vsel %vm17168_vm0, %v6343_v36, %v6347_v54 }
 0x4d7   : > { %v11216_v60 = vcombine.low %v6348_v50, %v6358_v63 }
 0x4d9   : > { %12888 = vmatmul.mubr.msk.bf16.gmra.mrb[116].mxu0 %vm524_vm3, %v17689_v47  ;;  %v18291_v47 = vld [vmem:[%s18821_s6 + $0x3] ss:$0 sm:$0xff] }
 0x4da   : > { %12891 = vmatprep.mubr.msk.bf16.mxu0 %vm524_vm3, %v18081_v44 }
 0x4e1   : > { %12892 = vmatmul.mubr.msk.bf16.gmra.mrb[120].mxu0 %vm524_vm3, %v18096_v32 }
 0x4e2   : > { %v13305_v44 = vpop.f32.mrb[32].mxu1  ;;  %12895 = vmatprep.mubr.msk.bf16.mxu0 %vm524_vm3, %v11215_v16 }
 0x4e3   : > { %v9799_v37 = vmul.f32 %v13305_v44, %v18291_v47  ;;  %v9630_v61 = vpop.f32.mrb[33].mxu1 }
 0x4e4   : > { %v9797_v58 = vmul.f32 %v18291_v47, %v9630_v61  ;;  %v13306_v32 = vpop.f32.mrb[34].mxu1 }
 0x4e5   : > { %v9839_v1 = vadd.f32 %v18298_v17, %v9799_v37  ;;  %v9800_v13 = vmul.f32 %v13306_v32, %v18291_v47  ;;  %v9633_v18 = vpop.f32.mrb[35].mxu1 }
 0x4e6   : > { %v9837_v2 = vadd.f32 %v18298_v17, %v9797_v58  ;;  %v9798_v5 = vmul.f32 %v18291_v47, %v9633_v18 }
 0x4e7   : > { %v9840_v54 = vadd.f32 %v18298_v17, %v9800_v13  ;;  %v9871_v56 = vmax.f32 %v9839_v1, 0.0 }
 0x4e8   : > { %v9838_v31 = vadd.f32 %v18298_v17, %v9798_v5  ;;  %v9869_v16 = vmax.f32 %v9837_v2, 0.0 }
 0x4e9   : > { %v9872_v14 = vmax.f32 %v9840_v54, 0.0  ;;  %12896 = vmatmul.mubr.msk.bf16.gmra.mrb[124].mxu0 %vm524_vm3, %v11216_v60  ;;  %v14405_v60 = vld [vmem:[%s18818_s3 + $0x118] sm:$0xff]  }
 0x4ea   : > { %v9870_v36 = vmax.f32 %v9838_v31, 0.0  ;;  %v13309_v4 = vpop.f32.mrb[36].mxu1  ;;  %12903 = vmatprep.mubr.msk.bf16.mxu0 %vm524_vm3, %v19852_v21 }
 0x4eb   : > { %v18316_v30 = vpack.c.bf16 %v9872_v14, %v9871_v56  ;;  %v9803_v44 = vmul.f32 %v13309_v4, %v18291_v47  ;;  %v9646_v50 = vpop.f32.mrb[37].mxu1 }
 0x4ec   : > { %v18319_v63 = vpack.c.bf16 %v9870_v36, %v9869_v16  ;;  %v9801_v37 = vmul.f32 %v18291_v47, %v9646_v50  ;;  %v13310_v61 = vpop.f32.mrb[38].mxu1 }
 0x4ed   : > { %v9843_v58 = vadd.f32 %v18298_v17, %v9803_v44  ;;  %v9804_v32 = vmul.f32 %v13310_v61, %v18291_v47  ;;  %v9649_v1 = vpop.f32.mrb[39].mxu1  ;;  %v18339_v44 = vld [vmem:[#allocation2 + $0x40] sm:$0xff]  }
 0x4ee   : > { %v9841_v13 = vadd.f32 %v18298_v17, %v9801_v37  ;;  %v9802_v18 = vmul.f32 %v18291_v47, %v9649_v1 }
 0x4ef   : > { %v9844_v21 = vadd.f32 %v18298_v17, %v9804_v32  ;;  %v9875_v5 = vmax.f32 %v9843_v58, 0.0 }
 0x4f0   : > { %v9842_v2 = vadd.f32 %v18298_v17, %v9802_v18  ;;  %v9873_v31 = vmax.f32 %v9841_v13, 0.0 }
 0x4f1   : > { %v9876_v54 = vmax.f32 %v9844_v21, 0.0  ;;  %12904 = vmatmul.mubr.msk.bf16.vlgmr.msra.gmra.mrb[96].mxu0 %vm524_vm3, %v19775_v29 }
 0x4f2   : > { %v9874_v56 = vmax.f32 %v9842_v2, 0.0  ;;  %12936 = vmatpush3.bf16.msra.mxu0 %v18251_v10  ;;  %v13313_v14 = vpop.f32.mrb[40].mxu1  ;;  %12907 = vmatprep.mubr.msk.bf16.mxu0 %vm524_vm3, %v19786_v24 }
 0x4f3   : > { %v18336_v16 = vpack.c.bf16 %v9876_v54, %v9875_v5  ;;  %v9807_v36 = vmul.f32 %v13313_v14, %v18291_v47  ;;  %v9662_v4 = vpop.f32.mrb[41].mxu1  ;;  %12937 = vmatprep.subr.bf16.mxu0 %v14405_v60 }
 0x4f4   : > { %v18341_v50 = vpack.c.bf16 %v9874_v56, %v9873_v31  ;;  %v9805_v29 = vmul.f32 %v18291_v47, %v9662_v4  ;;  %v13314_v37 = vpop.f32.mrb[42].mxu1 }
 0x4f5   : > { %v9847_v61 = vadd.f32 %v18298_v17, %v9807_v36  ;;  %v9808_v10 = vmul.f32 %v13314_v37, %v18291_v47  ;;  %v9665_v58 = vpop.f32.mrb[43].mxu1 }
 0x4f6   : > { %v9845_v24 = vadd.f32 %v18298_v17, %v9805_v29  ;;  %v9806_v32 = vmul.f32 %v18291_v47, %v9665_v58  ;;  %12938 = vmatpush3.bf16.msra.mxu0 %v14405_v60 }
 0x4f7   : > { %v9848_v1 = vadd.f32 %v18298_v17, %v9808_v10  ;;  %12971 = vmatprep.subr.bf16.mxu0 %v18339_v44  ;;  %v9879_v18 = vmax.f32 %v9847_v61, 0.0 }
 0x4f8   : > { %v9846_v13 = vadd.f32 %v18298_v17, %v9806_v32  ;;  %v9877_v2 = vmax.f32 %v9845_v24, 0.0 }
 0x4f9   : > { %v9880_v21 = vmax.f32 %v9848_v1, 0.0  ;;  %12908 = vmatmul.mubr.msk.bf16.gmra.mrb[100].mxu0 %vm524_vm3, %v19791_v7 }
 0x4fa   : > { %v9878_v5 = vmax.f32 %v9846_v13, 0.0  ;;  %v13317_v54 = vpop.f32.mrb[44].mxu1  ;;  %12911 = vmatprep.mubr.msk.bf16.mxu0 %vm524_vm3, %v19796_v19 }
 0x4fb   : > { %v18355_v31 = vpack.c.bf16 %v9880_v21, %v9879_v18  ;;  %v9811_v60 = vmul.f32 %v13317_v54, %v18291_v47  ;;  %v9678_v56 = vpop.f32.mrb[45].mxu1 }
 0x4fc   : > { %v18358_v14 = vpack.c.bf16 %v9878_v5, %v9877_v2  ;;  %v9809_v36 = vmul.f32 %v18291_v47, %v9678_v56  ;;  %v13318_v4 = vpop.f32.mrb[46].mxu1 }
 0x4fd   : > { %v9851_v29 = vadd.f32 %v18298_v17, %v9811_v60  ;;  %v9812_v7 = vmul.f32 %v13318_v4, %v18291_v47  ;;  %v9681_v37 = vpop.f32.mrb[47].mxu1 }
 0x4fe   : > { %v9849_v61 = vadd.f32 %v18298_v17, %v9809_v36  ;;  %v9810_v10 = vmul.f32 %v18291_v47, %v9681_v37 }
 0x4ff   : > { %v9852_v19 = vadd.f32 %v18298_v17, %v9812_v7  ;;  %v9883_v24 = vmax.f32 %v9851_v29, 0.0 }
 0x500   : > { %v9850_v58 = vadd.f32 %v18298_v17, %v9810_v10  ;;  %v9881_v1 = vmax.f32 %v9849_v61, 0.0 }
 0x501   : > { %v9884_v32 = vmax.f32 %v9852_v19, 0.0  ;;  %12912 = vmatmul.mubr.msk.bf16.gmra.mrb[104].mxu0 %vm524_vm3, %v19797_v40 }
 0x502   : > { %v9882_v13 = vmax.f32 %v9850_v58, 0.0  ;;  %v13321_v18 = vpop.f32.mrb[48].mxu1  ;;  %12915 = vmatprep.mubr.msk.bf16.mxu0 %vm524_vm3, %v19802_v23 }
 0x503   : > { %v18371_v21 = vpack.c.bf16 %v9884_v32, %v9883_v24  ;;  %v9815_v2 = vmul.f32 %v13321_v18, %v18291_v47  ;;  %v9694_v5 = vpop.f32.mrb[49].mxu1 }
 0x504   : > { %v18374_v54 = vpack.c.bf16 %v9882_v13, %v9881_v1  ;;  %v9813_v60 = vmul.f32 %v18291_v47, %v9694_v5  ;;  %v13322_v56 = vpop.f32.mrb[50].mxu1 }
 0x505   : > { %v9855_v36 = vadd.f32 %v18298_v17, %v9815_v2  ;;  %v9816_v40 = vmul.f32 %v13322_v56, %v18291_v47  ;;  %v9697_v4 = vpop.f32.mrb[51].mxu1 }
 0x506   : > { %v9853_v29 = vadd.f32 %v18298_v17, %v9813_v60  ;;  %v9814_v7 = vmul.f32 %v18291_v47, %v9697_v4 }
 0x507   : > { %v9856_v23 = vadd.f32 %v18298_v17, %v9816_v40  ;;  %v9887_v61 = vmax.f32 %v9855_v36, 0.0 }
 0x508   : > { %v9854_v37 = vadd.f32 %v18298_v17, %v9814_v7  ;;  %v9885_v19 = vmax.f32 %v9853_v29, 0.0 }
 0x509   : > { %v9888_v10 = vmax.f32 %v9856_v23, 0.0  ;;  %12916 = vmatmul.mubr.msk.bf16.gmra.mrb[108].mxu0 %vm524_vm3, %v19803_v33 }
 0x50a   : > { %v9886_v58 = vmax.f32 %v9854_v37, 0.0  ;;  %v13325_v24 = vpop.f32.mrb[52].mxu1  ;;  %12919 = vmatprep.mubr.msk.bf16.mxu0 %vm524_vm3, %v19805_v25 }
 0x50b   : > { %v18387_v32 = vpack.c.bf16 %v9888_v10, %v9887_v61  ;;  %v9819_v1 = vmul.f32 %v13325_v24, %v18291_v47  ;;  %v9710_v13 = vpop.f32.mrb[53].mxu1 }
 0x50c   : > { %v18390_v18 = vpack.c.bf16 %v9886_v58, %v9885_v19  ;;  %v9817_v2 = vmul.f32 %v18291_v47, %v9710_v13  ;;  %v13326_v5 = vpop.f32.mrb[54].mxu1 }
 0x50d   : > { %v9859_v60 = vadd.f32 %v18298_v17, %v9819_v1  ;;  %v9820_v33 = vmul.f32 %v13326_v5, %v18291_v47  ;;  %v9713_v56 = vpop.f32.mrb[55].mxu1 }
 0x50e   : > { %v9857_v36 = vadd.f32 %v18298_v17, %v9817_v2  ;;  %v9818_v40 = vmul.f32 %v18291_v47, %v9713_v56 }
 0x50f   : > { %v9860_v25 = vadd.f32 %v18298_v17, %v9820_v33  ;;  %v9891_v29 = vmax.f32 %v9859_v60, 0.0 }
 0x510   : > { %v9858_v4 = vadd.f32 %v18298_v17, %v9818_v40  ;;  %v9889_v23 = vmax.f32 %v9857_v36, 0.0 }
 0x511   : > { %v9892_v7 = vmax.f32 %v9860_v25, 0.0  ;;  %12920 = vmatmul.mubr.msk.bf16.gmra.mrb[112].mxu0 %vm524_vm3, %v19807_v42 }
 0x512   : > { %v9890_v37 = vmax.f32 %v9858_v4, 0.0  ;;  %v13329_v61 = vpop.f32.mrb[56].mxu1  ;;  %12923 = vmatprep.mubr.msk.bf16.mxu0 %vm524_vm3, %v19813_v51 }
 0x513   : > { %v18403_v10 = vpack.c.bf16 %v9892_v7, %v9891_v29  ;;  %v9823_v19 = vmul.f32 %v13329_v61, %v18291_v47  ;;  %v9726_v58 = vpop.f32.mrb[57].mxu1 }
 0x514   : > { %v18406_v24 = vpack.c.bf16 %v9890_v37, %v9889_v23  ;;  %v9821_v1 = vmul.f32 %v18291_v47, %v9726_v58  ;;  %v13330_v13 = vpop.f32.mrb[58].mxu1 }
 0x515   : > { %v9863_v2 = vadd.f32 %v18298_v17, %v9823_v19  ;;  %v9824_v42 = vmul.f32 %v13330_v13, %v18291_v47  ;;  %v9729_v5 = vpop.f32.mrb[59].mxu1 }
 0x516   : > { %v9861_v60 = vadd.f32 %v18298_v17, %v9821_v1  ;;  %v9822_v33 = vmul.f32 %v18291_v47, %v9729_v5 }
 0x517   : > { %v9864_v51 = vadd.f32 %v18298_v17, %v9824_v42  ;;  %v9895_v36 = vmax.f32 %v9863_v2, 0.0 }
 0x518   : > { %v9862_v56 = vadd.f32 %v18298_v17, %v9822_v33  ;;  %v9893_v25 = vmax.f32 %v9861_v60, 0.0 }
 0x519   : > { %v9896_v40 = vmax.f32 %v9864_v51, 0.0  ;;  %12924 = vmatmul.mubr.msk.bf16.gmra.mrb[116].mxu0 %vm524_vm3, %v19814_v22 }
 0x51a   : > { %v9894_v4 = vmax.f32 %v9862_v56, 0.0  ;;  %v13333_v29 = vpop.f32.mrb[60].mxu1  ;;  %12927 = vmatprep.mubr.msk.bf16.mxu0 %vm524_vm3, %v19817_v62 }
 0x51b   : > { %v18419_v7 = vpack.c.bf16 %v9896_v40, %v9895_v36  ;;  %v9827_v23 = vmul.f32 %v13333_v29, %v18291_v47  ;;  %v9742_v37 = vpop.f32.mrb[61].mxu1  ;;  %v19884_v36 = vld [vmem:[#allocation77_spill] sm:$0xff] }
 0x51c   : > { %v18422_v61 = vpack.c.bf16 %v9894_v4, %v9893_v25  ;;  %v9825_v19 = vmul.f32 %v18291_v47, %v9742_v37  ;;  %v13334_v58 = vpop.f32.mrb[62].mxu1  ;;  %v19885_v4 = vld [vmem:[#allocation28_spill] sm:$0xff] }
 0x51d   : > { %v9867_v1 = vadd.f32 %v18298_v17, %v9827_v23  ;;  %v9828_v22 = vmul.f32 %v13334_v58, %v18291_v47  ;;  %v9745_v13 = vpop.f32.mrb[63].mxu1 }
 0x51e   : > { %v9865_v2 = vadd.f32 %v18298_v17, %v9825_v19  ;;  %v9826_v42 = vmul.f32 %v18291_v47, %v9745_v13  ;;  %v14407_v47 = vld [vmem:[#allocation2 + $0x48] sm:$0xff]   ;;  %v18497_v13 = vld [vmem:[%s18821_s6 + $0x2] ss:$0 sm:$0xff] }
 0x51f   : > { %v9868_v62 = vadd.f32 %v18298_v17, %v9828_v22  ;;  %v9899_v60 = vmax.f32 %v9867_v1, 0.0  ;;  %v14410_v22 = vld [vmem:[#allocation2 + $0x60] sm:$0xff]  }
 0x520   : > { %v9866_v5 = vadd.f32 %v18298_v17, %v9826_v42  ;;  %v9897_v51 = vmax.f32 %v9865_v2, 0.0  ;;  %v14409_v17 = vld [vmem:[#allocation2 + $0x58] sm:$0xff]  }
 0x521   : > { %v9900_v33 = vmax.f32 %v9868_v62, 0.0  ;;  %12928 = vmatmul.mubr.msk.bf16.gmra.mrb[120].mxu0 %vm524_vm3, %v19818_v27  ;;  %v14408_v27 = vld [vmem:[#allocation2 + $0x50] sm:$0xff]  }
 0x522   : > { %v9898_v56 = vmax.f32 %v9866_v5, 0.0  ;;  %12931 = vmatprep.mubr.msk.bf16.mxu0 %vm524_vm3, %v19884_v36 }
 0x523   : > { %v18435_v40 = vpack.c.bf16 %v9900_v33, %v9899_v60 }
 0x524   : > { %v18437_v25 = vpack.c.bf16 %v9898_v56, %v9897_v51 }
 0x529   : > { %12932 = vmatmul.mubr.msk.bf16.gmra.mrb[124].mxu0 %vm524_vm3, %v19885_v4 }
 0x52a   : > { %12939 = vmatprep.mubr.msk.bf16.mxu0 %vm524_vm3, %v17752_v11  ;;  %v6812_v11 = vrot.slane %v19873_v15, 6  ;;  %v6825_v15 = vrot.slane %v19878_v59, 6 }
 0x531   : > { %12940 = vmatmul.mubr.msk.bf16.vlgmr.msra.gmra.mrb[96].mxu0 %vm524_vm3, %v17800_v0  ;;  %v6813_v0 = vrot.slane %v19874_v38, 7  ;;  %v6826_v38 = vrot.slane %v19879_v48, 7  ;;  %v6835_v48 = vrot.slane %v19883_v9, 7 }
 0x532   : > { %12943 = vmatprep.mubr.msk.bf16.mxu0 %vm524_vm3, %v17804_v41  ;;  %12972 = vmatpush3.bf16.msra.mxu0 %v18339_v44  ;;  %v6816_v41 = vrot.slane %v19876_v35, 6  ;;  %v6829_v35 = vrot.slane %v19881_v6, 6 }
 0x533   : > { %12973 = vmatprep.subr.bf16.mxu0 %v14407_v47 }
 0x536   : > { %12974 = vmatpush3.bf16.msra.mxu0 %v14407_v47 }
 0x537   : > { %12975 = vmatprep.subr.bf16.mxu0 %v14408_v27 }
 0x539   : > { %12944 = vmatmul.mubr.msk.bf16.gmra.mrb[100].mxu0 %vm524_vm3, %v17835_v45  ;;  %v6817_v45 = vrot.slane %v19875_v39, 7  ;;  %v6830_v39 = vrot.slane %v19880_v28, 7 }
 0x53a   : > { %12947 = vmatprep.mubr.msk.bf16.mxu0 %vm524_vm3, %v17848_v8  ;;  %12976 = vmatpush3.bf16.msra.mxu0 %v14408_v27  ;;  %v6814_v8 = vor.u32 %v6813_v0, %v6812_v11 }
 0x53b   : > { %12977 = vmatprep.subr.bf16.mxu0 %v14409_v17  ;;  %v6831_v37 = vor.u32 %v6830_v39, %v6829_v35  ;;  %v14411_v35 = vld [vmem:[#allocation2 + $0x68] sm:$0xff]  }
 0x53c   : > { %v6815_v29 = vrot.slane %v6814_v8, 4 }
 0x53d   : > { %v6833_v1 = vrot.slane %v6831_v37, 4 }
 0x53e   : > { %12978 = vmatpush3.bf16.msra.mxu0 %v14409_v17 }
 0x53f   : > { %13335 = vmatprep.subr.bf16.mxu0 %v14410_v22 }
 0x541   : > { %12948 = vmatmul.mubr.msk.bf16.gmra.mrb[104].mxu0 %vm524_vm3, %v17875_v20  ;;  %v6818_v20 = vor.u32 %v6817_v45, %v6816_v41 }
 0x542   : > { %12951 = vmatprep.mubr.msk.bf16.mxu0 %vm524_vm3, %v17884_v12  ;;  %v19886_v12 = vld [vmem:[#allocation13_spill] sm:$0xff] }
 0x543   : > { %v6819_v6 = vsel %vm17301_vm4, %v6815_v29, %v6818_v20 }
 0x549   : > { %12952 = vmatmul.mubr.msk.bf16.gmra.mrb[108].mxu0 %vm524_vm3, %v17913_v52  ;;  %v19887_v52 = vshrl.u32 %v19886_v12, 16 }
 0x54a   : > { %12955 = vmatprep.mubr.msk.bf16.mxu0 %vm524_vm3, %v17915_v46  ;;  %v6822_v46 = vrot.slane %v19882_v43, 7  ;;  %v19888_v43 = vshrl.u32 %v17977_v49, 16 }
 0x54b   : > { %v6821_v44 = vrot.slane %v19887_v52, 6 }
 0x54c   : > { %v6834_v59 = vrot.slane %v19888_v43, 6  ;;  %v14412_v43 = vld [vmem:[#allocation2 + $0x70] sm:$0xff]  }
 0x54d   : > { %v6823_v23 = vor.u32 %v6822_v46, %v6821_v44 }
 0x551   : > { %12956 = vmatmul.mubr.msk.bf16.gmra.mrb[112].mxu0 %vm524_vm3, %v19858_v34  ;;  %v6820_v34 = vrot.slane %v6818_v20, 4 }
 0x552   : > { %12959 = vmatprep.mubr.msk.bf16.mxu0 %vm524_vm3, %v19859_v53  ;;  %v6827_v53 = vor.u32 %v6826_v38, %v6825_v15 }
 0x553   : > { %v6824_v28 = vsel %vm17301_vm4, %v6820_v34, %v6823_v23 }
 0x554   : > { %v11262_v19 = vcombine.low %v6819_v6, %v6824_v28  ;;  %v6828_v58 = vrot.slane %v6827_v53, 4 }
 0x556   : > { %v6832_v49 = vsel %vm17301_vm4, %v6828_v58, %v6831_v37 }
 0x559   : > { %12960 = vmatmul.mubr.msk.bf16.gmra.mrb[116].mxu0 %vm524_vm3, %v19863_v3  ;;  %v6836_v3 = vor.u32 %v6835_v48, %v6834_v59 }
 0x55a   : > { %12963 = vmatprep.mubr.msk.bf16.mxu0 %vm524_vm3, %v18225_v55 }
 0x55b   : > { %v6837_v55 = vsel %vm17301_vm4, %v6833_v1, %v6836_v3 }
 0x55c   : > { %v11263_v9 = vcombine.low %v6832_v49, %v6837_v55 }
 0x561   : > { %12964 = vmatmul.mubr.msk.bf16.gmra.mrb[120].mxu0 %vm524_vm3, %v18235_v26  ;;  %v18502_v26 = vld [vmem:[%s18822_s7 + $0x2] ss:$0 sm:$0xff] }
 0x562   : > { %12967 = vmatprep.mubr.msk.bf16.mxu0 %vm524_vm3, %v11262_v19 }
 0x569   : > { %12968 = vmatmul.mubr.msk.bf16.gmra.mrb[124].mxu0 %vm524_vm3, %v11263_v9 }
 0x604   : > { %v12941_v2 = vpop.f32.mrb[96].mxu0 }
 0x605   : > { %v7070_v42 = vmul.f32 %v12941_v2, %v18497_v13  ;;  %v6901_v57 = vpop.f32.mrb[97].mxu0  ;;  %v14413_v2 = vld [vmem:[#allocation2 + $0x78] sm:$0xff]  }
 0x606   : > { %v7068_v62 = vmul.f32 %v18497_v13, %v6901_v57  ;;  %v12942_v5 = vpop.f32.mrb[98].mxu0 }
 0x607   : > { %v7110_v60 = vadd.f32 %v18502_v26, %v7070_v42  ;;  %v7071_v33 = vmul.f32 %v12942_v5, %v18497_v13  ;;  %v6904_v51 = vpop.f32.mrb[99].mxu0 }
 0x608   : > { %v7108_v56 = vadd.f32 %v18502_v26, %v7068_v62  ;;  %v7069_v36 = vmul.f32 %v18497_v13, %v6904_v51 }
 0x609   : > { %v7111_v4 = vadd.f32 %v18502_v26, %v7071_v33  ;;  %v7142_v27 = vmax.f32 %v7110_v60, 0.0 }
 0x60a   : > { %v7109_v47 = vadd.f32 %v18502_v26, %v7069_v36  ;;  %v7140_v11 = vmax.f32 %v7108_v56, 0.0 }
 0x60b   : > { %v7143_v17 = vmax.f32 %v7111_v4, 0.0 }
 0x60c   : > { %v7141_v0 = vmax.f32 %v7109_v47, 0.0  ;;  %v12945_v41 = vpop.f32.mrb[100].mxu0 }
 0x60d   : > { %v7173_v45 = vpack.c.bf16 %v7143_v17, %v7142_v27  ;;  %v7074_v8 = vmul.f32 %v12945_v41, %v18497_v13  ;;  %v6917_v20 = vpop.f32.mrb[101].mxu0 }
 0x60e   : > { %v7172_v12 = vpack.c.bf16 %v7141_v0, %v7140_v11  ;;  %v7072_v52 = vmul.f32 %v18497_v13, %v6917_v20  ;;  %v12946_v44 = vpop.f32.mrb[102].mxu0  ;;  %v14598_v20 = vmov 0.0  }
 0x60f   : > { %v7114_v46 = vadd.f32 %v18502_v26, %v7074_v8  ;;  %v7075_v15 = vmul.f32 %v12946_v44, %v18497_v13  ;;  %v6920_v38 = vpop.f32.mrb[103].mxu0 }
 0x610   : > { %v7112_v39 = vadd.f32 %v18502_v26, %v7072_v52  ;;  %v7073_v29 = vmul.f32 %v18497_v13, %v6920_v38  ;;  %12979 = vmatprep.mubr.msk.bf16.mxu0 %vm3997_vm13, %v7172_v12 }
 0x611   : > { %v7115_v34 = vadd.f32 %v18502_v26, %v7075_v15  ;;  %12980 = vmatmul.mubr.msk.bf16.vlgmr.msra.gmra.mrb[64].mxu0 %vm3997_vm13, %v7173_v45  ;;  %v7146_v53 = vmax.f32 %v7114_v46, 0.0 }
 0x612   : > { %v7113_v23 = vadd.f32 %v18502_v26, %v7073_v29  ;;  %13336 = vmatpush3.bf16.msra.mxu0 %v14410_v22  ;;  %v7144_v59 = vmax.f32 %v7112_v39, 0.0 }
 0x613   : > { %v7147_v37 = vmax.f32 %v7115_v34, 0.0  ;;  %13337 = vmatprep.subr.bf16.mxu0 %v14411_v35 }
 0x614   : > { %v7145_v48 = vmax.f32 %v7113_v23, 0.0  ;;  %v12949_v6 = vpop.f32.mrb[104].mxu0 }
 0x615   : > { %v7175_v28 = vpack.c.bf16 %v7147_v37, %v7146_v53  ;;  %v7078_v19 = vmul.f32 %v12949_v6, %v18497_v13  ;;  %v6933_v58 = vpop.f32.mrb[105].mxu0 }
 0x616   : > { %v7174_v1 = vpack.c.bf16 %v7145_v48, %v7144_v59  ;;  %v7076_v3 = vmul.f32 %v18497_v13, %v6933_v58  ;;  %v12950_v49 = vpop.f32.mrb[106].mxu0  ;;  %13338 = vmatpush3.bf16.msra.mxu0 %v14411_v35 }
 0x617   : > { %v7118_v55 = vadd.f32 %v18502_v26, %v7078_v19  ;;  %v7079_v9 = vmul.f32 %v12950_v49, %v18497_v13  ;;  %v6936_v22 = vpop.f32.mrb[107].mxu0  ;;  %13339 = vmatprep.subr.bf16.mxu0 %v14412_v43 }
 0x618   : > { %v7116_v42 = vadd.f32 %v18502_v26, %v7076_v3  ;;  %v7077_v57 = vmul.f32 %v18497_v13, %v6936_v22  ;;  %12983 = vmatprep.mubr.msk.bf16.mxu0 %vm3997_vm13, %v7174_v1 }
 0x619   : > { %v7119_v62 = vadd.f32 %v18502_v26, %v7079_v9  ;;  %12984 = vmatmul.mubr.msk.bf16.gmra.mrb[68].mxu0 %vm3997_vm13, %v7175_v28  ;;  %v7150_v60 = vmax.f32 %v7118_v55, 0.0 }
 0x61a   : > { %v7117_v5 = vadd.f32 %v18502_v26, %v7077_v57  ;;  %13340 = vmatpush3.bf16.msra.mxu0 %v14412_v43  ;;  %v7148_v51 = vmax.f32 %v7116_v42, 0.0 }
 0x61b   : > { %v7151_v33 = vmax.f32 %v7119_v62, 0.0  ;;  %13341 = vmatprep.subr.bf16.mxu0 %v14413_v2 }
 0x61c   : > { %v7149_v56 = vmax.f32 %v7117_v5, 0.0  ;;  %v12953_v36 = vpop.f32.mrb[108].mxu0 }
 0x61d   : > { %v7177_v4 = vpack.c.bf16 %v7151_v33, %v7150_v60  ;;  %v7082_v47 = vmul.f32 %v12953_v36, %v18497_v13  ;;  %v6949_v27 = vpop.f32.mrb[109].mxu0 }
 0x61e   : > { %v7176_v17 = vpack.c.bf16 %v7149_v56, %v7148_v51  ;;  %v7080_v11 = vmul.f32 %v18497_v13, %v6949_v27  ;;  %v12954_v0 = vpop.f32.mrb[110].mxu0  ;;  %13342 = vmatpush3.bf16.msra.mxu0 %v14413_v2 }
 0x61f   : > { %v7122_v41 = vadd.f32 %v18502_v26, %v7082_v47  ;;  %v7083_v45 = vmul.f32 %v12954_v0, %v18497_v13  ;;  %v6952_v8 = vpop.f32.mrb[111].mxu0  ;;  %13375 = vmatprep.subr.bf16.mxu0 %v14598_v20 }
 0x620   : > { %v7120_v12 = vadd.f32 %v18502_v26, %v7080_v11  ;;  %v7081_v52 = vmul.f32 %v18497_v13, %v6952_v8  ;;  %12987 = vmatprep.mubr.msk.bf16.mxu0 %vm3997_vm13, %v7176_v17 }
 0x621   : > { %v7123_v44 = vadd.f32 %v18502_v26, %v7083_v45  ;;  %12988 = vmatmul.mubr.msk.bf16.gmra.mrb[72].mxu0 %vm3997_vm13, %v7177_v4  ;;  %v7154_v15 = vmax.f32 %v7122_v41, 0.0 }
 0x622   : > { %v7121_v46 = vadd.f32 %v18502_v26, %v7081_v52  ;;  %v7152_v35 = vmax.f32 %v7120_v12, 0.0 }
 0x623   : > { %v7155_v38 = vmax.f32 %v7123_v44, 0.0 }
 0x624   : > { %v7153_v39 = vmax.f32 %v7121_v46, 0.0  ;;  %v12957_v29 = vpop.f32.mrb[112].mxu0 }
 0x625   : > { %v7179_v34 = vpack.c.bf16 %v7155_v38, %v7154_v15  ;;  %v7086_v23 = vmul.f32 %v12957_v29, %v18497_v13  ;;  %v6965_v53 = vpop.f32.mrb[113].mxu0 }
 0x626   : > { %v7178_v37 = vpack.c.bf16 %v7153_v39, %v7152_v35  ;;  %v7084_v43 = vmul.f32 %v18497_v13, %v6965_v53  ;;  %v12958_v59 = vpop.f32.mrb[114].mxu0 }
 0x627   : > { %v7126_v48 = vadd.f32 %v18502_v26, %v7086_v23  ;;  %v7087_v6 = vmul.f32 %v12958_v59, %v18497_v13  ;;  %v6968_v28 = vpop.f32.mrb[115].mxu0 }
 0x628   : > { %v7124_v19 = vadd.f32 %v18502_v26, %v7084_v43  ;;  %v7085_v58 = vmul.f32 %v18497_v13, %v6968_v28  ;;  %12991 = vmatprep.mubr.msk.bf16.mxu0 %vm3997_vm13, %v7178_v37 }
 0x629   : > { %v7127_v1 = vadd.f32 %v18502_v26, %v7087_v6  ;;  %12992 = vmatmul.mubr.msk.bf16.gmra.mrb[76].mxu0 %vm3997_vm13, %v7179_v34  ;;  %v7158_v49 = vmax.f32 %v7126_v48, 0.0 }
 0x62a   : > { %v7125_v3 = vadd.f32 %v18502_v26, %v7085_v58  ;;  %v7156_v9 = vmax.f32 %v7124_v19, 0.0 }
 0x62b   : > { %v7159_v55 = vmax.f32 %v7127_v1, 0.0 }
 0x62c   : > { %v7157_v22 = vmax.f32 %v7125_v3, 0.0  ;;  %v12961_v2 = vpop.f32.mrb[116].mxu0 }
 0x62d   : > { %v7181_v42 = vpack.c.bf16 %v7159_v55, %v7158_v49  ;;  %v7090_v57 = vmul.f32 %v12961_v2, %v18497_v13  ;;  %v6981_v62 = vpop.f32.mrb[117].mxu0 }
 0x62e   : > { %v7180_v5 = vpack.c.bf16 %v7157_v22, %v7156_v9  ;;  %v7088_v60 = vmul.f32 %v18497_v13, %v6981_v62  ;;  %v12962_v33 = vpop.f32.mrb[118].mxu0 }
 0x62f   : > { %v7130_v51 = vadd.f32 %v18502_v26, %v7090_v57  ;;  %v7091_v56 = vmul.f32 %v12962_v33, %v18497_v13  ;;  %v6984_v36 = vpop.f32.mrb[119].mxu0 }
 0x630   : > { %v7128_v4 = vadd.f32 %v18502_v26, %v7088_v60  ;;  %v7089_v47 = vmul.f32 %v18497_v13, %v6984_v36  ;;  %12995 = vmatprep.mubr.msk.bf16.mxu0 %vm3997_vm13, %v7180_v5 }
 0x631   : > { %v7131_v27 = vadd.f32 %v18502_v26, %v7091_v56  ;;  %12996 = vmatmul.mubr.msk.bf16.gmra.mrb[80].mxu0 %vm3997_vm13, %v7181_v42  ;;  %v7162_v11 = vmax.f32 %v7130_v51, 0.0 }
 0x632   : > { %v7129_v17 = vadd.f32 %v18502_v26, %v7089_v47  ;;  %v7160_v41 = vmax.f32 %v7128_v4, 0.0 }
 0x633   : > { %v7163_v0 = vmax.f32 %v7131_v27, 0.0 }
 0x634   : > { %v7161_v45 = vmax.f32 %v7129_v17, 0.0  ;;  %v12965_v8 = vpop.f32.mrb[120].mxu0 }
 0x635   : > { %v7183_v12 = vpack.c.bf16 %v7163_v0, %v7162_v11  ;;  %v7094_v52 = vmul.f32 %v12965_v8, %v18497_v13  ;;  %v6997_v44 = vpop.f32.mrb[121].mxu0 }
 0x636   : > { %v7182_v46 = vpack.c.bf16 %v7161_v45, %v7160_v41  ;;  %v7092_v15 = vmul.f32 %v18497_v13, %v6997_v44  ;;  %v12966_v38 = vpop.f32.mrb[122].mxu0 }
 0x637   : > { %v7134_v35 = vadd.f32 %v18502_v26, %v7094_v52  ;;  %v7095_v39 = vmul.f32 %v12966_v38, %v18497_v13  ;;  %v7000_v29 = vpop.f32.mrb[123].mxu0 }
 0x638   : > { %v7132_v34 = vadd.f32 %v18502_v26, %v7092_v15  ;;  %v7093_v23 = vmul.f32 %v18497_v13, %v7000_v29  ;;  %12999 = vmatprep.mubr.msk.bf16.mxu0 %vm3997_vm13, %v7182_v46 }
 0x639   : > { %v7135_v53 = vadd.f32 %v18502_v26, %v7095_v39  ;;  %13000 = vmatmul.mubr.msk.bf16.gmra.mrb[84].mxu0 %vm3997_vm13, %v7183_v12  ;;  %v7166_v43 = vmax.f32 %v7134_v35, 0.0 }
 0x63a   : > { %v7133_v37 = vadd.f32 %v18502_v26, %v7093_v23  ;;  %v7164_v48 = vmax.f32 %v7132_v34, 0.0 }
 0x63b   : > { %v7167_v59 = vmax.f32 %v7135_v53, 0.0 }
 0x63c   : > { %v7165_v6 = vmax.f32 %v7133_v37, 0.0  ;;  %v12969_v28 = vpop.f32.mrb[124].mxu0 }
 0x63d   : > { %v7185_v19 = vpack.c.bf16 %v7167_v59, %v7166_v43  ;;  %v7098_v58 = vmul.f32 %v12969_v28, %v18497_v13  ;;  %v7013_v1 = vpop.f32.mrb[125].mxu0 }
 0x63e   : > { %v7184_v3 = vpack.c.bf16 %v7165_v6, %v7164_v48  ;;  %v7096_v49 = vmul.f32 %v18497_v13, %v7013_v1  ;;  %v12970_v55 = vpop.f32.mrb[126].mxu0  ;;  %v11599_v1 = vld [vmem:[%s18821_s6 + $0x4] sm:$0x1] }
 0x63f   : > { %v7138_v9 = vadd.f32 %v18502_v26, %v7098_v58  ;;  %v7099_v22 = vmul.f32 %v12970_v55, %v18497_v13  ;;  %v7016_v2 = vpop.f32.mrb[127].mxu0 }
 0x640   : > { %v7136_v42 = vadd.f32 %v18502_v26, %v7096_v49  ;;  %v7097_v57 = vmul.f32 %v18497_v13, %v7016_v2  ;;  %13003 = vmatprep.mubr.msk.bf16.mxu0 %vm3997_vm13, %v7184_v3  ;;  %v14414_v13 = vld [vmem:[%s18819_s4] sm:$0xff]  }
 0x641   : > { %v7139_v62 = vadd.f32 %v18502_v26, %v7099_v22  ;;  %13004 = vmatmul.mubr.msk.bf16.gmra.mrb[88].mxu0 %vm3997_vm13, %v7185_v19  ;;  %v7170_v60 = vmax.f32 %v7138_v9, 0.0  ;;  %v11600_v49 = vld [vmem:[%s18822_s7 + $0x4] sm:$0x1] }
 0x642   : > { %v7137_v5 = vadd.f32 %v18502_v26, %v7097_v57  ;;  %v7168_v51 = vmax.f32 %v7136_v42, 0.0  ;;  %v14415_v26 = vld [vmem:[%s18819_s4 + $0x8] sm:$0xff]  }
 0x643   : > { %v7171_v33 = vmax.f32 %v7139_v62, 0.0 }
 0x644   : > { %v7169_v56 = vmax.f32 %v7137_v5, 0.0  ;;  %v10406_v5 = vlaneseq }
 0x645   : > { %v7187_v36 = vpack.c.bf16 %v7171_v33, %v7170_v60 }
 0x646   : > { %v7186_v4 = vpack.c.bf16 %v7169_v56, %v7168_v51  ;;  %v10407_v60 = vshrl.u32 %v10406_v5, 7 }
 0x648   : > { %13007 = vmatprep.mubr.msk.bf16.mxu0 %vm3997_vm13, %v7186_v4  ;;  %v10408_v33 = vsub.s32 0, %v10407_v60 }
 0x649   : > { %13008 = vmatmul.mubr.msk.bf16.gmra.mrb[92].mxu0 %vm3997_vm13, %v7187_v36 }
 0x64a   : > { %13343 = vmatprep.mubr.msk.bf16.mxu0 %vm3997_vm13, %v18319_v63 }
 0x651   : > { %13344 = vmatmul.mubr.msk.bf16.vlgmr.msra.gmra.mrb[64].mxu0 %vm3997_vm13, %v18316_v30  ;;  %v19889_v30 = vld [vmem:[#allocation134_spill] sm:$0xff] }
 0x652   : > { %13347 = vmatprep.mubr.msk.bf16.mxu0 %vm3997_vm13, %v18341_v50  ;;  %13376 = vmatpush3.bf16.msra.mxu0 %v14414_v13  ;;  %v10254_v63 = vrot.slane %v19889_v30, 4 }
 0x653   : > { %13377 = vmatprep.subr.bf16.mxu0 %v14598_v20 }
 0x656   : > { %13378 = vmatpush3.bf16.msra.mxu0 %v14415_v26 }
 0x657   : > { %13383 = vmatprep.subr.bf16.mxu0 %v14598_v20 }
 0x659   : > { %13348 = vmatmul.mubr.msk.bf16.gmra.mrb[68].mxu0 %vm3997_vm13, %v18336_v16  ;;  %v10255_v16 = vadd.f32 %v10254_v63, %v19889_v30 }
 0x65a   : > { %13351 = vmatprep.mubr.msk.bf16.mxu0 %vm3997_vm13, %v18358_v14 }
 0x65b   : > { %v10256_v50 = vrot.slane %v10255_v16, 2 }
 0x661   : > { %13352 = vmatmul.mubr.msk.bf16.gmra.mrb[72].mxu0 %vm3997_vm13, %v18355_v31  ;;  %v10257_v31 = vadd.f32 %v10256_v50, %v10255_v16 }
 0x662   : > { %13355 = vmatprep.mubr.msk.bf16.mxu0 %vm3997_vm13, %v18374_v54 }
 0x663   : > { %v10258_v14 = vrot.slane %v10257_v31, 1 }
 0x669   : > { %13356 = vmatmul.mubr.msk.bf16.gmra.mrb[76].mxu0 %vm3997_vm13, %v18371_v21  ;;  %v10259_v21 = vadd.f32 %v10258_v14, %v10257_v31 }
 0x66a   : > { %13359 = vmatprep.mubr.msk.bf16.mxu0 %vm3997_vm13, %v18390_v18  ;;  %v14416_v18 = vld [vmem:[#allocation2 + $0x80] sm:$0xff]  }
 0x66b   : > { %v10261_v54 = vmul.f32 0.00390625, %v10259_v21 }
 0x671   : > { %13360 = vmatmul.mubr.msk.bf16.gmra.mrb[80].mxu0 %vm3997_vm13, %v18387_v32  ;;  %v10262_v32 = vpack.c.bf16 %v10261_v54, %v10261_v54 }
 0x672   : > { %13363 = vmatprep.mubr.msk.bf16.mxu0 %vm3997_vm13, %v18406_v24  ;;  %v14418_v24 = vld [vmem:[#allocation2 + $0x90] sm:$0xff]  }
 0x679   : > { %13364 = vmatmul.mubr.msk.bf16.gmra.mrb[84].mxu0 %vm3997_vm13, %v18403_v10  ;;  %v14417_v10 = vld [vmem:[#allocation2 + $0x88] sm:$0xff]  }
 0x67a   : > { %13367 = vmatprep.mubr.msk.bf16.mxu0 %vm3997_vm13, %v18422_v61 }
 0x681   : > { %13368 = vmatmul.mubr.msk.bf16.gmra.mrb[88].mxu0 %vm3997_vm13, %v18419_v7  ;;  %v14419_v7 = vld [vmem:[#allocation2 + $0x98] sm:$0xff]  }
 0x682   : > { %13371 = vmatprep.mubr.msk.bf16.mxu0 %vm3997_vm13, %v18437_v25 }
 0x689   : > { %13372 = vmatmul.mubr.msk.bf16.gmra.mrb[92].mxu0 %vm3997_vm13, %v18435_v40 }
 0x68a   : > { %13379 = vmatprep.mubr.msk.bf16.mxu0 %vm14599_vm5, %v14598_v20 }
 0x691   : > { %13380 = vmatmul.mubr.msk.bf16.vlgmr.msra.gmra.mrb[128].mxu0 %vm524_vm3, %v10262_v32 }
 0x692   : > { %13391 = vmatprep.mubr.msk.bf16.mxu0 %vm14599_vm5, %v14598_v20  ;;  %13384 = vmatpush3.bf16.msra.mxu0 %v14416_v18 }
 0x693   : > { %13385 = vmatprep.subr.bf16.mxu0 %v14598_v20 }
 0x696   : > { %13386 = vmatpush3.bf16.msra.mxu0 %v14417_v10 }
 0x697   : > { %13387 = vmatprep.subr.bf16.mxu0 %v14598_v20 }
 0x69a   : > { %13388 = vmatpush3.bf16.msra.mxu0 %v14418_v24 }
 0x69b   : > { %13389 = vmatprep.subr.bf16.mxu0 %v14598_v20 }
 0x69e   : > { %13390 = vmatpush3.bf16.msra.mxu0 %v14419_v7 }
 0x724   : > { %v13345_v61 = vpop.f32.mrb[64].mxu0 }
 0x725   : > { %v10032_v40 = vpop.f32.mrb[65].mxu0 }
 0x726   : > { %v13346_v25 = vpop.f32.mrb[66].mxu0 }
 0x727   : > { %v10035_v47 = vpop.f32.mrb[67].mxu0 }
 0x72c   : > { %v13349_v27 = vpop.f32.mrb[68].mxu0 }
 0x72d   : > { %v10048_v17 = vpop.f32.mrb[69].mxu0 }
 0x72e   : > { %v13350_v11 = vpop.f32.mrb[70].mxu0 }
 0x72f   : > { %v10051_v0 = vpop.f32.mrb[71].mxu0 }
 0x734   : > { %v13353_v41 = vpop.f32.mrb[72].mxu0 }
 0x735   : > { %v10064_v45 = vpop.f32.mrb[73].mxu0 }
 0x736   : > { %v13354_v8 = vpop.f32.mrb[74].mxu0 }
 0x737   : > { %v10067_v12 = vpop.f32.mrb[75].mxu0 }
 0x73c   : > { %v13357_v52 = vpop.f32.mrb[76].mxu0 }
 0x73d   : > { %v10080_v44 = vpop.f32.mrb[77].mxu0 }
 0x73e   : > { %v13358_v46 = vpop.f32.mrb[78].mxu0 }
 0x73f   : > { %v10083_v15 = vpop.f32.mrb[79].mxu0 }
 0x744   : > { %v13361_v38 = vpop.f32.mrb[80].mxu0 }
 0x745   : > { %v10096_v20 = vpop.f32.mrb[81].mxu0 }
 0x746   : > { %v13362_v35 = vpop.f32.mrb[82].mxu0 }
 0x747   : > { %v10099_v39 = vpop.f32.mrb[83].mxu0 }
 0x74c   : > { %v13365_v29 = vpop.f32.mrb[84].mxu0 }
 0x74d   : > { %v10112_v34 = vpop.f32.mrb[85].mxu0 }
 0x74e   : > { %v13366_v23 = vpop.f32.mrb[86].mxu0 }
 0x74f   : > { %v10115_v53 = vpop.f32.mrb[87].mxu0 }
 0x754   : > { %v13369_v37 = vpop.f32.mrb[88].mxu0 }
 0x755   : > { %v10128_v43 = vpop.f32.mrb[89].mxu0 }
 0x756   : > { %v13370_v59 = vpop.f32.mrb[90].mxu0 }
 0x757   : > { %v10131_v48 = vpop.f32.mrb[91].mxu0 }
 0x75c   : > { %v13373_v6 = vpop.f32.mrb[92].mxu0 }
 0x75d   : > { %v10144_v28 = vpop.f32.mrb[93].mxu0 }
 0x75e   : > { %v13374_v19 = vpop.f32.mrb[94].mxu0 }
 0x75f   : > { %v10147_v58 = vpop.f32.mrb[95].mxu0 }
 0x764   : > { %v10316_v3 = vpop.f32.mrb[128].mxu0 }
 0x765   : > { %v10324_v55 = vmul.f32 %v11599_v1, %v10316_v3  ;;  %v13381_v9 = vpop.f32.mrb[129].mxu0 }
 0x766   : > { %v10319_v22 = vpop.f32.mrb[130].mxu0 }
 0x767   : > { %v10327_v2 = vadd.f32 %v11600_v49, %v10324_v55  ;;  %v13382_v42 = vpop.f32.mrb[131].mxu0 }
 0x768   : > { %v11607_v42 = vld [vmem:[%s18824_s9] ss:$0 sm:$0xff] }
 0x769   : > { %v10328_v57 = vmax.f32 %v10327_v2, 0.0 }
 0x76b   : > { %v10329_v62 = vpack.c.bf16 %v10328_v57, %v10328_v57 }
 0x76d   : > { %13392 = vmatmul.mubr.msk.bf16.vlgmr.msra.gmra.mrb[132].mxu0 %vm3997_vm13, %v10329_v62 }
 0x840   : > { %v10400_v51 = vpop.f32.mrb[132].mxu0 }
 0x841   : > { %v10409_v56 = vrot.slane %v10400_v51, %v10408_v33  ;;  %v13393_v36 = vpop.f32.mrb[133].mxu0 }
 0x842   : > { %v10403_v4 = vpop.f32.mrb[134].mxu0 }
 0x843   : > { %v10410_v13 = vadd.f32 %v10409_v56, %v10032_v40  ;;  %v10411_v26 = vadd.f32 %v10409_v56, %v10035_v47  ;;  %v10412_v30 = vadd.f32 %v13345_v61, %v10409_v56  ;;  %v10413_v63 = vadd.f32 %v13346_v25, %v10409_v56  ;;  %v13394_v16 = vpop.f32.mrb[135].mxu0  ;;  %v11606_v61 = vld [vmem:[%s18823_s8] ss:$0 sm:$0xff] }
 0x844   : > { %v10414_v50 = vadd.f32 %v10409_v56, %v10048_v17  ;;  %v10415_v31 = vadd.f32 %v10409_v56, %v10051_v0  ;;  %v10416_v14 = vadd.f32 %v13349_v27, %v10409_v56  ;;  %v10417_v21 = vadd.f32 %v13350_v11, %v10409_v56 }
 0x845   : > { %v10418_v54 = vadd.f32 %v10409_v56, %v10064_v45  ;;  %v10419_v32 = vadd.f32 %v10409_v56, %v10067_v12  ;;  %v10420_v18 = vadd.f32 %v13353_v41, %v10409_v56  ;;  %v10421_v10 = vadd.f32 %v13354_v8, %v10409_v56 }
 0x846   : > { %v10422_v24 = vadd.f32 %v10409_v56, %v10080_v44  ;;  %v10423_v7 = vadd.f32 %v10409_v56, %v10083_v15  ;;  %v10424_v1 = vadd.f32 %v13357_v52, %v10409_v56  ;;  %v10425_v3 = vadd.f32 %v13358_v46, %v10409_v56 }
 0x847   : > { %v10426_v49 = vadd.f32 %v10409_v56, %v10096_v20  ;;  %v10427_v55 = vadd.f32 %v10409_v56, %v10099_v39  ;;  %v10428_v9 = vadd.f32 %v13361_v38, %v10409_v56  ;;  %v10429_v40 = vadd.f32 %v13362_v35, %v10409_v56 }
 0x848   : > { %v10430_v25 = vadd.f32 %v10409_v56, %v10112_v34  ;;  %v10431_v47 = vadd.f32 %v10409_v56, %v10115_v53  ;;  %v10432_v27 = vadd.f32 %v13365_v29, %v10409_v56  ;;  %v10433_v17 = vadd.f32 %v13366_v23, %v10409_v56 }
 0x849   : > { %v10434_v11 = vadd.f32 %v10409_v56, %v10128_v43  ;;  %v10435_v0 = vadd.f32 %v10409_v56, %v10131_v48  ;;  %v10436_v41 = vadd.f32 %v13369_v37, %v10409_v56  ;;  %v10437_v45 = vadd.f32 %v13370_v59, %v10409_v56 }
 0x84a   : > { %v10438_v8 = vadd.f32 %v10409_v56, %v10144_v28  ;;  %v10439_v12 = vadd.f32 %v10409_v56, %v10147_v58  ;;  %v10440_v52 = vadd.f32 %v13373_v6, %v10409_v56  ;;  %v10441_v44 = vadd.f32 %v13374_v19, %v10409_v56 }
 0x84b   : > { %v10449_v46 = vmul.f32 %v11606_v61, %v10410_v13  ;;  %v10450_v15 = vmul.f32 %v11606_v61, %v10411_v26  ;;  %v10451_v38 = vmul.f32 %v11606_v61, %v10412_v30  ;;  %v10452_v20 = vmul.f32 %v11606_v61, %v10413_v63 }
 0x84c   : > { %v10453_v35 = vmul.f32 %v11606_v61, %v10414_v50  ;;  %v10454_v39 = vmul.f32 %v11606_v61, %v10415_v31  ;;  %v10455_v22 = vmul.f32 %v11606_v61, %v10416_v14  ;;  %v10456_v2 = vmul.f32 %v11606_v61, %v10417_v21 }
 0x84d   : > { %v10457_v34 = vmul.f32 %v11606_v61, %v10418_v54  ;;  %v10458_v53 = vmul.f32 %v11606_v61, %v10419_v32  ;;  %v10459_v29 = vmul.f32 %v11606_v61, %v10420_v18  ;;  %v10460_v23 = vmul.f32 %v11606_v61, %v10421_v10 }
 0x84e   : > { %v10461_v43 = vmul.f32 %v11606_v61, %v10422_v24  ;;  %v10462_v48 = vmul.f32 %v11606_v61, %v10423_v7  ;;  %v10463_v37 = vmul.f32 %v11606_v61, %v10424_v1  ;;  %v10464_v59 = vmul.f32 %v11606_v61, %v10425_v3 }
 0x84f   : > { %v10465_v28 = vmul.f32 %v11606_v61, %v10426_v49  ;;  %v10466_v58 = vmul.f32 %v11606_v61, %v10427_v55  ;;  %v10467_v6 = vmul.f32 %v11606_v61, %v10428_v9  ;;  %v10468_v19 = vmul.f32 %v11606_v61, %v10429_v40 }
 0x850   : > { %v10469_v57 = vmul.f32 %v11606_v61, %v10430_v25  ;;  %v10470_v62 = vmul.f32 %v11606_v61, %v10431_v47  ;;  %v10471_v5 = vmul.f32 %v11606_v61, %v10432_v27  ;;  %v10472_v60 = vmul.f32 %v11606_v61, %v10433_v17 }
 0x851   : > { %v10473_v33 = vmul.f32 %v11606_v61, %v10434_v11  ;;  %v10474_v51 = vmul.f32 %v11606_v61, %v10435_v0  ;;  %v10475_v56 = vmul.f32 %v11606_v61, %v10436_v41  ;;  %v10476_v36 = vmul.f32 %v11606_v61, %v10437_v45 }
 0x852   : > { %v10477_v4 = vmul.f32 %v11606_v61, %v10438_v8  ;;  %v10478_v13 = vmul.f32 %v11606_v61, %v10439_v12  ;;  %v10479_v26 = vmul.f32 %v11606_v61, %v10440_v52  ;;  %v10480_v30 = vmul.f32 %v11606_v61, %v10441_v44 }
 0x853   : > { %v10488_v63 = vadd.f32 %v11607_v42, %v10449_v46  ;;  %v10489_v16 = vadd.f32 %v11607_v42, %v10450_v15  ;;  %v10490_v50 = vadd.f32 %v11607_v42, %v10451_v38  ;;  %v10491_v31 = vadd.f32 %v11607_v42, %v10452_v20 }
 0x854   : > { %v10492_v14 = vadd.f32 %v11607_v42, %v10453_v35  ;;  %v10493_v21 = vadd.f32 %v11607_v42, %v10454_v39  ;;  %v10494_v54 = vadd.f32 %v11607_v42, %v10455_v22  ;;  %v10495_v32 = vadd.f32 %v11607_v42, %v10456_v2 }
 0x855   : > { %v10496_v18 = vadd.f32 %v11607_v42, %v10457_v34  ;;  %v10497_v10 = vadd.f32 %v11607_v42, %v10458_v53  ;;  %v10498_v24 = vadd.f32 %v11607_v42, %v10459_v29  ;;  %v10499_v7 = vadd.f32 %v11607_v42, %v10460_v23 }
 0x856   : > { %v10500_v1 = vadd.f32 %v11607_v42, %v10461_v43  ;;  %v10501_v3 = vadd.f32 %v11607_v42, %v10462_v48  ;;  %v10502_v49 = vadd.f32 %v11607_v42, %v10463_v37  ;;  %v10503_v55 = vadd.f32 %v11607_v42, %v10464_v59 }
 0x857   : > { %v18649_v9 = vadd.f32 %v11607_v42, %v10465_v28  ;;  %v18651_v40 = vadd.f32 %v11607_v42, %v10466_v58  ;;  %v18653_v61 = vadd.f32 %v11607_v42, %v10467_v6  ;;  %v18655_v25 = vadd.f32 %v11607_v42, %v10468_v19 }
 0x858   : > { %v18657_v47 = vadd.f32 %v11607_v42, %v10469_v57  ;;  %v18659_v27 = vadd.f32 %v11607_v42, %v10470_v62  ;;  %v18661_v17 = vadd.f32 %v11607_v42, %v10471_v5  ;;  %v18663_v11 = vadd.f32 %v11607_v42, %v10472_v60 }
 0x859   : > { %v18665_v0 = vadd.f32 %v11607_v42, %v10473_v33  ;;  %v18667_v41 = vadd.f32 %v11607_v42, %v10474_v51  ;;  %v18669_v45 = vadd.f32 %v11607_v42, %v10475_v56  ;;  %v18671_v8 = vadd.f32 %v11607_v42, %v10476_v36 }
 0x85a   : > { %v18673_v12 = vadd.f32 %v11607_v42, %v10477_v4  ;;  %v18675_v52 = vadd.f32 %v11607_v42, %v10478_v13  ;;  %v18677_v44 = vadd.f32 %v11607_v42, %v10479_v26  ;;  %v18679_v46 = vadd.f32 %v11607_v42, %v10480_v30 }
 0x85b   : > { %v10520_v15 = vmax.f32 %v10488_v63, 0.0  ;;  %v10521_v38 = vmax.f32 %v10489_v16, 0.0  ;;  %v10522_v20 = vmax.f32 %v10490_v50, 0.0  ;;  %v10523_v35 = vmax.f32 %v10491_v31, 0.0 }
 0x85c   : > { %v10524_v39 = vmax.f32 %v10492_v14, 0.0  ;;  %v10525_v22 = vmax.f32 %v10493_v21, 0.0  ;;  %v10526_v2 = vmax.f32 %v10494_v54, 0.0  ;;  %v10527_v34 = vmax.f32 %v10495_v32, 0.0 }
 0x85d   : > { %v10528_v53 = vmax.f32 %v10496_v18, 0.0  ;;  %v10529_v29 = vmax.f32 %v10497_v10, 0.0  ;;  %v10530_v23 = vmax.f32 %v10498_v24, 0.0  ;;  %v10531_v43 = vmax.f32 %v10499_v7, 0.0  ;;  %10552 = vst.msk [vmem:[%s18681_s27] sm:$0xff] %vm3997_vm13, %v10520_v15  ;;  %10553 = vst.msk [vmem:[%s18681_s27 + $0x8] sm:$0xff] %vm3997_vm13, %v10521_v38 }
 0x85e   : > { %10554 = vst.msk [vmem:[%s18681_s27 + $0x10] sm:$0xff] %vm3997_vm13, %v10522_v20  ;;  %10555 = vst.msk [vmem:[%s18681_s27 + $0x18] sm:$0xff] %vm3997_vm13, %v10523_v35  ;;  %v10532_v48 = vmax.f32 %v10500_v1, 0.0  ;;  %v10533_v37 = vmax.f32 %v10501_v3, 0.0  ;;  %v10534_v59 = vmax.f32 %v10502_v49, 0.0  ;;  %v10535_v28 = vmax.f32 %v10503_v55, 0.0 }
 0x85f   : > { %10556 = vst.msk [vmem:[%s18681_s27 + $0x20] sm:$0xff] %vm3997_vm13, %v10524_v39  ;;  %10557 = vst.msk [vmem:[%s18681_s27 + $0x28] sm:$0xff] %vm3997_vm13, %v10525_v22  ;;  %v10536_v58 = vmax.f32 %v18649_v9, 0.0  ;;  %v10537_v6 = vmax.f32 %v18651_v40, 0.0  ;;  %v10538_v19 = vmax.f32 %v18653_v61, 0.0  ;;  %v10539_v42 = vmax.f32 %v18655_v25, 0.0 }
 0x860   : > { %10558 = vst.msk [vmem:[%s18681_s27 + $0x30] sm:$0xff] %vm3997_vm13, %v10526_v2  ;;  %10559 = vst.msk [vmem:[%s18681_s27 + $0x38] sm:$0xff] %vm3997_vm13, %v10527_v34  ;;  %v10540_v57 = vmax.f32 %v18657_v47, 0.0  ;;  %v10541_v62 = vmax.f32 %v18659_v27, 0.0  ;;  %v10542_v5 = vmax.f32 %v18661_v17, 0.0  ;;  %v10543_v60 = vmax.f32 %v18663_v11, 0.0 }
 0x861   : > { %10560 = vst.msk [vmem:[%s18681_s27 + $0x40] sm:$0xff] %vm3997_vm13, %v10528_v53  ;;  %10561 = vst.msk [vmem:[%s18681_s27 + $0x48] sm:$0xff] %vm3997_vm13, %v10529_v29  ;;  %v10544_v33 = vmax.f32 %v18665_v0, 0.0  ;;  %v10545_v51 = vmax.f32 %v18667_v41, 0.0  ;;  %v10546_v56 = vmax.f32 %v18669_v45, 0.0  ;;  %v10547_v36 = vmax.f32 %v18671_v8, 0.0 }
 0x862   : > { %10562 = vst.msk [vmem:[%s18681_s27 + $0x50] sm:$0xff] %vm3997_vm13, %v10530_v23  ;;  %10563 = vst.msk [vmem:[%s18681_s27 + $0x58] sm:$0xff] %vm3997_vm13, %v10531_v43  ;;  %v10548_v4 = vmax.f32 %v18673_v12, 0.0  ;;  %v10549_v13 = vmax.f32 %v18675_v52, 0.0  ;;  %v10550_v26 = vmax.f32 %v18677_v44, 0.0  ;;  %v10551_v30 = vmax.f32 %v18679_v46, 0.0 }
 0x863   : > { %10564 = vst.msk [vmem:[%s18681_s27 + $0x60] sm:$0xff] %vm3997_vm13, %v10532_v48  ;;  %10565 = vst.msk [vmem:[%s18681_s27 + $0x68] sm:$0xff] %vm3997_vm13, %v10533_v37 }
 0x864   : > { %10566 = vst.msk [vmem:[%s18681_s27 + $0x70] sm:$0xff] %vm3997_vm13, %v10534_v59  ;;  %10567 = vst.msk [vmem:[%s18681_s27 + $0x78] sm:$0xff] %vm3997_vm13, %v10535_v28 }
 0x865   : > { %10568 = vst.msk [vmem:[%s18681_s27 + $0x80] sm:$0xff] %vm3997_vm13, %v10536_v58  ;;  %10569 = vst.msk [vmem:[%s18681_s27 + $0x88] sm:$0xff] %vm3997_vm13, %v10537_v6 }
 0x866   : > { %10570 = vst.msk [vmem:[%s18681_s27 + $0x90] sm:$0xff] %vm3997_vm13, %v10538_v19  ;;  %10571 = vst.msk [vmem:[%s18681_s27 + $0x98] sm:$0xff] %vm3997_vm13, %v10539_v42 }
 0x867   : > { %10572 = vst.msk [vmem:[%s18681_s27 + $0xa0] sm:$0xff] %vm3997_vm13, %v10540_v57  ;;  %10573 = vst.msk [vmem:[%s18681_s27 + $0xa8] sm:$0xff] %vm3997_vm13, %v10541_v62 }
 0x868   : > { %10574 = vst.msk [vmem:[%s18681_s27 + $0xb0] sm:$0xff] %vm3997_vm13, %v10542_v5  ;;  %10575 = vst.msk [vmem:[%s18681_s27 + $0xb8] sm:$0xff] %vm3997_vm13, %v10543_v60 }
 0x869   : > { %10576 = vst.msk [vmem:[%s18681_s27 + $0xc0] sm:$0xff] %vm3997_vm13, %v10544_v33  ;;  %10577 = vst.msk [vmem:[%s18681_s27 + $0xc8] sm:$0xff] %vm3997_vm13, %v10545_v51 }
 0x86a   : > { %10578 = vst.msk [vmem:[%s18681_s27 + $0xd0] sm:$0xff] %vm3997_vm13, %v10546_v56  ;;  %10579 = vst.msk [vmem:[%s18681_s27 + $0xd8] sm:$0xff] %vm3997_vm13, %v10547_v36 }
 0x86b   : > { %10580 = vst.msk [vmem:[%s18681_s27 + $0xe0] sm:$0xff] %vm3997_vm13, %v10548_v4  ;;  %10581 = vst.msk [vmem:[%s18681_s27 + $0xe8] sm:$0xff] %vm3997_vm13, %v10549_v13 }
 0x86c   : > { %10582 = vst.msk [vmem:[%s18681_s27 + $0xf0] sm:$0xff] %vm3997_vm13, %v10550_v26  ;;  %10583 = vst.msk [vmem:[%s18681_s27 + $0xf8] sm:$0xff] %vm3997_vm13, %v10551_v30 }
 0x86d   : > { %14540 = shalt.err (!%p14537_p7)
}
 0x86e   : > { %s14541_s20 = scalar_lea.hbm %s18740_s29, 4096  ;;  %s14545_s17 = scalar_lea.hbm %s18825_s10, 8192 }
 0x86f   : > { %p14542_p8 = scmp.ne.s32.totalorder %s18740_s29, %s14541_s20  ;;  %p14546_p1 = scmp.lt.u32.totalorder %s18740_s29, %s18825_s10 }
 0x870   : > { %p14547_p0 = scmp.lt.u32.totalorder %s14545_s17, %s14541_s20  ;;  %p14549_p6 = scmp.lt.u32.totalorder %s14541_s20, %s18740_s29 }
 0x871   : > { %p14543_p11 = pnand %p14542_p8, %p19890_p9 }
 0x872   : > { %p14548_p5 = por %p14547_p0, %p14546_p1 }
 0x873   : > { %p14544_p13 = pneg %p14543_p11 }
 0x874   : > { %p14550_p10 = por %p14549_p6, %p14548_p5 }
 0x876   : > { %p14551_p12 = pnand %p14550_p10, %p14544_p13 }
 0x878   : > { %14554 = shalt.err (!%p14551_p12)
}
 0x879   : > { %s14601_s12 = smov 128   ;;  %s14602_s18 = smov 8  }
 0x87a   : > { %14268 = dma.vmem_to_hbm [thread:$0]  (%p19890_p9), %s18742_s21, 4096, %s18740_s29, %s18774_s30, %s14601_s12, %s14601_s12, %s14602_s18  }
 0x87b PF: > { %p14280_p2 = scmp.ge.s32.totalorder %s14593_s16, 2  ;;  %s10613_s28 = sand.u32 1, %s14581_s13  }
 0x87c   : > { %p19891_p3 = scmp.ne.s32.totalorder %s19227_s24, 0  ;;  %s10614_s20 = scalar_lea.sflag [#allocation4], %s10613_s28 }
 0x87e   : > { %p14275_p4 = pnand %p14280_p2, %p19891_p3 }
 0x880   : > { %14576 = dma.done.wait (!%p14275_p4), %s10614_s20, 4096  }
 0x881   : > { %14578 = vsyncadd (!%p14275_p4), %s10614_s20, 4294963200  ;;  %p21_p7 = scmp.ge.s32.totalorder %s14683_s19, 4   ;;  %s19892_s13 = smov %s14585_s14 }
 0x882   : > { %s19893_s14 = smov %s14589_s15  ;;  %s19894_s15 = smov %s14694_s22 }
 0x883   : > { %s19895_s16 = smov %s14683_s19  ;;  %23 = sbr.rel (!%p21_p7) target bundleno = 4 (0x4), region = 141 }
 0x88a   :  { %10619 = vsyncpa [#allocation3], 1 }
 0x88b   :  { %10621 = vsyncpa [#allocation3 + $0x1], 1 }
 0x88c   :  { %10622 = vsyncpa [#allocation4], 1 }
 0x88d   :  { %10624 = vsyncpa [#allocation4 + $0x1], 1 }

</bundles_post_ra>
